<compile_context>
chip_gen: v7x
topology: tpu7x:2x2x1
jax: 0.10.0
libtpu: 0.0.40
codegen_flags: <defaults>
</compile_context>

<pallas_src>
import jax
import jax.numpy as jnp
from jax.experimental import pallas as pl
from jax.experimental.pallas import tpu as pltpu


def _round_up(a, b):
    return ((a + b - 1) // b) * b


def _pick_bb(B, per_image_bytes, budget=2 << 20, cap=8):
    """Largest divisor of B (<= cap) whose working set fits a rough VMEM budget."""
    limit = max(1, min(cap, budget // max(int(per_image_bytes), 1)))
    for d in range(min(B, limit), 0, -1):
        if B % d == 0:
            return d
    return 1


# ---------------------------------------------------------------------------
# Fused Conv3x3(pad=1) + BN(eval) + ReLU + MaxPool2d(2)
# ---------------------------------------------------------------------------
def _conv_bn_relu_pool_kernel(xp_ref, w_ref, scale_ref, shift_ref, o_ref):
    BB, Hp, Wp, Cin = xp_ref.shape
    H, W = Hp - 2, Wp - 2
    Cout = w_ref.shape[1]
    _, H2, WC = o_ref.shape
    W2 = WC // Cout

    scale = scale_ref[...]
    shift = shift_ref[...]

    for b in range(BB):
        xp = xp_ref[b]                                   # (Hp, Wp, Cin)
        if Cin == 1:
            # K=1 matmuls waste the MXU: 9 VPU broadcast FMAs instead.
            # TODO(synk): for realistic widths, lay conv1 out time-in-lanes
            # (shifted-FMA formulation) for full 128-lane utilization.
            acc = jnp.zeros((H * W, Cout), jnp.float32)
            for k in range(9):
                dy, dx = k // 3, k % 3
                patch = xp[dy:dy + H, dx:dx + W, :].reshape(H * W, 1).astype(jnp.float32)
                acc = acc + patch * w_ref[k:k + 1, :].astype(jnp.float32)
        else:
            # Local im2col: one deep (H*W, 9*Cin) x (9*Cin, Cout) MXU matmul.
            cols = []
            for k in range(9):
                dy, dx = k // 3, k % 3
                cols.append(xp[dy:dy + H, dx:dx + W, :].reshape(H * W, Cin))
            patch = jnp.concatenate(cols, axis=-1).astype(jnp.bfloat16)
            acc = jnp.dot(patch, w_ref[...], preferred_element_type=jnp.float32)

        # folded BatchNorm (eval) + ReLU (f32 math, bf16 only at the store)
        y = jnp.maximum(acc * scale + shift, 0.0).reshape(H, W, Cout)
        if (2 * H2, 2 * W2) != (H, W):                   # MaxPool2d(2) floors odd dims
            y = y[:2 * H2, :2 * W2, :]
        yr = y.reshape(H2, 2, 2 * W2, Cout)
        y = jnp.maximum(yr[:, 0], yr[:, 1])              # pool rows
        yc = y.reshape(H2, W2, 2, Cout)
        y = jnp.maximum(yc[:, :, 0], yc[:, :, 1])        # pool cols -> (H2, W2, Cout)
        # lane-dense bf16 store
        o_ref[b] = y.reshape(H2, W2 * Cout).astype(o_ref.dtype)


def conv_bn_relu_pool(x_nhwc, w_flat, scale, shift):
    B, H, W, Cin = x_nhwc.shape
    Cout = w_flat.shape[-1]
    H2, W2 = H // 2, W // 2
    xp = jnp.pad(x_nhwc, ((0, 0), (1, 1), (1, 1), (0, 0)))
    per_img = (H * W * (4 * Cout + 2 * 9 * Cin)
               + (H + 2) * (W + 2) * Cin * xp.dtype.itemsize)
    bb = _pick_bb(B, per_img)
    # TODO(synk): for long spectrograms also tile the time (W) axis to bound the
    # f32 accumulator / im2col patch per grid step.
    out = pl.pallas_call(
        _conv_bn_relu_pool_kernel,
        out_shape=jax.ShapeDtypeStruct((B, H2, W2 * Cout), jnp.bfloat16),
        grid_spec=pltpu.PrefetchScalarGridSpec(
            num_scalar_prefetch=0,
            grid=(B // bb,),
            in_specs=[
                pl.BlockSpec((bb, H + 2, W + 2, Cin), lambda b: (b, 0, 0, 0)),
                pl.BlockSpec((9 * Cin, Cout), lambda b: (0, 0)),
                pl.BlockSpec((1, Cout), lambda b: (0, 0)),
                pl.BlockSpec((1, Cout), lambda b: (0, 0)),
            ],
            out_specs=pl.BlockSpec((bb, H2, W2 * Cout), lambda b: (b, 0, 0)),
        ),
        compiler_params=pltpu.CompilerParams(dimension_semantics=("parallel",)),
    )(xp, w_flat, scale, shift)
    return out.reshape(B, H2, W2, Cout)


# ---------------------------------------------------------------------------
# Batched matmul + bias (bf16 operands, f32 acc) — GRU input projection
# ---------------------------------------------------------------------------
def _matmul_bias_kernel(x_ref, w_ref, b_ref, o_ref):
    o_ref[...] = (jnp.dot(x_ref[...].astype(jnp.bfloat16), w_ref[...],
                          preferred_element_type=jnp.float32) + b_ref[...])


def matmul_bias(x, w_bf16, b, tm=128):
    M, K = x.shape
    N = w_bf16.shape[1]
    Mp8 = _round_up(M, 8)
    if Mp8 >= 2 * tm:
        tm_eff = tm
    elif Mp8 >= 16:
        tm_eff = _round_up(Mp8 // 2, 8)      # >= 2 grid steps => both v7x cores busy
    else:
        tm_eff = Mp8
    Mp = _round_up(Mp8, tm_eff)
    xpad = jnp.pad(x, ((0, Mp - M), (0, 0))) if Mp != M else x
    out = pl.pallas_call(
        _matmul_bias_kernel,
        out_shape=jax.ShapeDtypeStruct((Mp, N), jnp.float32),
        grid_spec=pltpu.PrefetchScalarGridSpec(
            num_scalar_prefetch=0,
            grid=(Mp // tm_eff,),
            in_specs=[
                pl.BlockSpec((tm_eff, K), lambda i: (i, 0)),
                pl.BlockSpec((K, N), lambda i: (0, 0)),
                pl.BlockSpec((1, N), lambda i: (0, 0)),
            ],
            out_specs=pl.BlockSpec((tm_eff, N), lambda i: (i, 0)),
        ),
        compiler_params=pltpu.CompilerParams(dimension_semantics=("parallel",)),
    )(xpad, w_bf16, b)
    return out[:M] if Mp != M else out


# ---------------------------------------------------------------------------
# Bidirectional GRU layer: both directions fused via a block-diagonal recurrent
# GEMM, hidden state carried in registers, outputs written as (T, B, 2H) bf16.
# PyTorch gate order (per direction): r, z, n; columns here interleaved
# [r_f, r_b, z_f, z_b, n_f, n_b].
# ---------------------------------------------------------------------------
def _bigru_layer_kernel(gi_ref, whh_ref, bhh_ref, o_ref):
    # gi_ref : (T, B, 6H) f32 — x @ W_ih + b_ih (+ folded r/z b_hh)
    # whh_ref: (2H, 6H) bf16 block-diagonal
    # bhh_ref: (1, 6H) f32 — only the n-gate b_hh (must stay inside r*(.))
    # o_ref  : (T, B, 2H) bf16 — [:, :, :H] forward, [:, :, H:] backward
    T, B, H6 = gi_ref.shape
    H = H6 // 6
    H2 = 2 * H
    col = jax.lax.broadcasted_iota(jnp.int32, (1, H6), 1)
    fwd_cols = (col % H2) < H
    whh = whh_ref[...]
    bhh = bhh_ref[...]

    def step(t, h):
        tb = T - 1 - t
        # forward gates read time t, backward gates read time T-1-t
        gd = jnp.where(fwd_cols, gi_ref[t], gi_ref[tb])                    # (B, 6H)
        gh = jnp.dot(h, whh, preferred_element_type=jnp.float32) + bhh     # (B, 6H)
        rz = jax.nn.sigmoid(gd[:, :2 * H2] + gh[:, :2 * H2])               # (B, 4H)
        r, z = rz[:, :H2], rz[:, H2:]
        n = jnp.tanh(gd[:, 2 * H2:] + r * gh[:, 2 * H2:])
        h_new = ((1.0 - z) * n + z * h.astype(jnp.float32)).astype(o_ref.dtype)
        o_ref[pl.ds(t, 1), :, pl.ds(0, H)] = h_new[None, :, :H]
        o_ref[pl.ds(tb, 1), :, pl.ds(H, H)] = h_new[None, :, H:]
        return h_new

    jax.lax.fori_loop(0, T, step, jnp.zeros((B, H2), o_ref.dtype), unroll=2)


def bigru_layer(gi, whh_bd, bhh):
    T, B, H6 = gi.shape
    H = H6 // 6
    # TODO(synk): chunk the time axis (grid over T/Tc, carry h in VMEM scratch,
    # double-buffer the gi chunk) for long sequences / v7x 64MiB VMEM.
    return pl.pallas_call(
        _bigru_layer_kernel,
        out_shape=jax.ShapeDtypeStruct((T, B, 2 * H), jnp.bfloat16),
    )(gi, whh_bd, bhh)


# ---------------------------------------------------------------------------
# Head: fc1 -> (dropout=identity) -> fc2, fused
# ---------------------------------------------------------------------------
def _head_kernel(x_ref, w1_ref, b1_ref, w2_ref, b2_ref, o_ref):
    h = (jnp.dot(x_ref[...].astype(jnp.bfloat16), w1_ref[...],
                 preferred_element_type=jnp.float32) + b1_ref[...])
    o_ref[...] = (jnp.dot(h.astype(jnp.bfloat16), w2_ref[...],
                          preferred_element_type=jnp.float32) + b2_ref[...])


def head_forward(x, w1, b1, w2, b2):
    B = x.shape[0]
    n_out = w2.shape[1]
    return pl.pallas_call(
        _head_kernel,
        out_shape=jax.ShapeDtypeStruct((B, n_out), jnp.float32),
    )(x, w1, b1, w2, b2)


# ---------------------------------------------------------------------------
# One-time parameter preparation (BN folding, transposes, gate interleaving, bf16)
# ---------------------------------------------------------------------------
def prepare_params(p, eps=1e-5):
    q = {}
    for i in ("1", "2", "3"):
        w = p[f"conv{i}_w"]                                   # (Cout, Cin, 3, 3)
        cout, cin = w.shape[0], w.shape[1]
        q[f"conv{i}_w"] = (jnp.transpose(w, (2, 3, 1, 0))
                           .reshape(9 * cin, cout).astype(jnp.bfloat16))
        s = p[f"bn{i}_gamma"] / jnp.sqrt(p[f"bn{i}_var"] + eps)
        q[f"conv{i}_scale"] = s.reshape(1, -1).astype(jnp.float32)
        q[f"conv{i}_shift"] = ((p[f"conv{i}_b"] - p[f"bn{i}_mean"]) * s
                               + p[f"bn{i}_beta"]).reshape(1, -1).astype(jnp.float32)

    def interleave(a, b, H):
        # per-direction [r,z,n] -> [r_f, r_b, z_f, z_b, n_f, n_b]
        return jnp.concatenate([a[..., 0:H], b[..., 0:H],
                                a[..., H:2 * H], b[..., H:2 * H],
                                a[..., 2 * H:3 * H], b[..., 2 * H:3 * H]], axis=-1)

    q["gru"] = []
    for layer in range(2):
        pf, pb = p["gru"][layer]
        H = pf["w_hh"].shape[1]
        Z = jnp.zeros((H, H), jnp.float32)
        WfT, WbT = pf["w_hh"].T, pb["w_hh"].T                 # (H, 3H)
        row_f = jnp.concatenate([WfT[:, 0:H], Z, WfT[:, H:2 * H], Z, WfT[:, 2 * H:], Z], axis=1)
        row_b = jnp.concatenate([Z, WbT[:, 0:H], Z, WbT[:, H:2 * H], Z, WbT[:, 2 * H:]], axis=1)
        whh_bd = jnp.concatenate([row_f, row_b], axis=0).astype(jnp.bfloat16)    # (2H, 6H)

        zH = jnp.zeros((H,), jnp.float32)
        z2H = jnp.zeros((2 * H,), jnp.float32)
        bih_f = pf["b_ih"] + jnp.concatenate([pf["b_hh"][:2 * H], zH])   # fold r/z b_hh
        bih_b = pb["b_ih"] + jnp.concatenate([pb["b_hh"][:2 * H], zH])
        bhh_f = jnp.concatenate([z2H, pf["b_hh"][2 * H:]])               # only n-gate b_hh
        bhh_b = jnp.concatenate([z2H, pb["b_hh"][2 * H:]])

        q["gru"].append(dict(
            wih=interleave(pf["w_ih"].T, pb["w_ih"].T, H).astype(jnp.bfloat16),     # (In, 6H)
            bih=interleave(bih_f, bih_b, H).reshape(1, -1).astype(jnp.float32),     # (1, 6H)
            whh=whh_bd,                                                              # (2H, 6H)
            bhh=interleave(bhh_f, bhh_b, H).reshape(1, -1).astype(jnp.float32),     # (1, 6H)
        ))

    q["fc1_w"] = p["fc1_w"].T.astype(jnp.bfloat16)
    q["fc1_b"] = p["fc1_b"].reshape(1, -1).astype(jnp.float32)
    q["fc2_w"] = p["fc2_w"].T.astype(jnp.bfloat16)
    q["fc2_b"] = p["fc2_b"].reshape(1, -1).astype(jnp.float32)
    return q


# ---------------------------------------------------------------------------
# Full CRNN forward (eval mode)
# ---------------------------------------------------------------------------
def crnn_forward(x_nchw, q):
    # NCHW -> NHWC (H = freq / n_mels, W = time)
    x = jnp.transpose(x_nchw, (0, 2, 3, 1)).astype(jnp.float32)

    for i in ("1", "2", "3"):
        x = conv_bn_relu_pool(x, q[f"conv{i}_w"], q[f"conv{i}_scale"], q[f"conv{i}_shift"])
        # drop1/2/3: identity (eval mode)

    B, Fq, T, C = x.shape
    # PyTorch: permute(0,3,1,2).reshape(B, time, C*freq)  => feature index = c*Fq + f
    # TODO(synk): fold this permute into the conv-3 store (in-kernel transpose).
    seq = jnp.transpose(x, (2, 0, 3, 1)).reshape(T, B, C * Fq)        # (T, B, In) bf16

    H = q["gru"][0]["whh"].shape[0] // 2
    layer_in = seq
    for layer in range(2):
        g = q["gru"][layer]
        Tt, Bb, In = layer_in.shape
        # Input projection for both directions, hoisted out of the serial recurrence.
        gi = matmul_bias(layer_in.reshape(Tt * Bb, In), g["wih"], g["bih"])
        gi = gi.reshape(Tt, Bb, 6 * H)
        layer_in = bigru_layer(gi, g["whh"], g["bhh"])                # (T, B, 2H) bf16
        # inter-layer GRU dropout: identity (eval mode)

    last = layer_in[-1]                                               # == gru_output[:, -1, :]
    return head_forward(last, q["fc1_w"], q["fc1_b"], q["fc2_w"], q["fc2_b"])


# ---------------------------------------------------------------------------
# Deterministic parameter init (shapes per CRNN.__init__)
# ---------------------------------------------------------------------------
def init_params(key, n_mels=16, n_classes=10, hidden=128):
    keys = iter(jax.random.split(key, 64))

    def nrm(shape, scale=0.05):
        return scale * jax.random.normal(next(keys), shape, dtype=jnp.float32)

    p = {}
    for name, cin, cout in [("1", 1, 32), ("2", 32, 64), ("3", 64, 128)]:
        p[f"conv{name}_w"] = nrm((cout, cin, 3, 3))
        p[f"conv{name}_b"] = nrm((cout,))
        p[f"bn{name}_gamma"] = 1.0 + nrm((cout,))
        p[f"bn{name}_beta"] = nrm((cout,))
        p[f"bn{name}_mean"] = nrm((cout,))
        p[f"bn{name}_var"] = 1.0 + 0.1 * jnp.abs(
            jax.random.normal(next(keys), (cout,), dtype=jnp.float32))

    gru_in = [128 * (n_mels // 8), 2 * hidden]
    p["gru"] = []
    for layer in range(2):
        dirs = []
        for _direction in range(2):
            In = gru_in[layer]
            dirs.append(dict(
                w_ih=nrm((3 * hidden, In)),
                w_hh=nrm((3 * hidden, hidden)),
                b_ih=nrm((3 * hidden,)),
                b_hh=nrm((3 * hidden,)),
            ))
        p["gru"].append(dirs)

    p["fc1_w"] = nrm((64, 2 * hidden))
    p["fc1_b"] = nrm((64,))
    p["fc2_w"] = nrm((n_classes, 64))
    p["fc2_b"] = nrm((n_classes,))
    return p


if __name__ == "__main__":
    n_mels, time_steps, batch, n_classes = 16, 16, 2, 10
    x = jax.random.normal(jax.random.PRNGKey(0), (batch, 1, n_mels, time_steps),
                          dtype=jnp.float32)
    params = init_params(jax.random.PRNGKey(1), n_mels=n_mels, n_classes=n_classes)
    prep = prepare_params(params)   # BN folding / transposes / gate interleave: once

    fwd = jax.jit(crnn_forward)
    out = jax.block_until_ready(fwd(x, prep))
    assert out.shape == (batch, n_classes), out.shape
    assert jnp.all(jnp.isfinite(out))
    print("KERNEL_OK")
</pallas_src>

<mosaic_0001>
module attributes {stable_mosaic.version = 11 : i64} {
  func.func @_conv_bn_relu_pool_kernel(%arg0: i32, %arg1: memref<2x18x18x1xf32, #tpu.memory_space<vmem>>, %arg2: memref<9x32xbf16, #tpu.memory_space<vmem>>, %arg3: memref<1x32xf32, #tpu.memory_space<vmem>>, %arg4: memref<1x32xf32, #tpu.memory_space<vmem>>, %arg5: memref<2x8x256xbf16, #tpu.memory_space<vmem>>) attributes {dimension_semantics = [#tpu.dimension_semantics<parallel>], iteration_bounds = array<i64: 1>, scalar_prefetch = 0 : i64, scratch_operands = 0 : i64, tpu.core_type = #tpu.core_type<tc>, window_params = [{transform_indices = @transform_0, window_bounds = array<i64: 2, 18, 18, 1>}, {pipeline_mode = #tpu.pipeline_mode<synchronous>, transform_indices = @transform_1, window_bounds = array<i64: 9, 32>}, {pipeline_mode = #tpu.pipeline_mode<synchronous>, transform_indices = @transform_2, window_bounds = array<i64: 1, 32>}, {pipeline_mode = #tpu.pipeline_mode<synchronous>, transform_indices = @transform_3, window_bounds = array<i64: 1, 32>}, {transform_indices = @transform_4, window_bounds = array<i64: 2, 8, 256>}]} {
    %c0 = arith.constant 0 : index
    %c0_0 = arith.constant 0 : index
    %0 = vector.load %arg3[%c0, %c0_0] : memref<1x32xf32, #tpu.memory_space<vmem>>, vector<1x32xf32>
    %c0_1 = arith.constant 0 : index
    %c0_2 = arith.constant 0 : index
    %1 = vector.load %arg4[%c0_1, %c0_2] : memref<1x32xf32, #tpu.memory_space<vmem>>, vector<1x32xf32>
    %c0_3 = arith.constant 0 : index
    %c0_4 = arith.constant 0 : index
    %c0_5 = arith.constant 0 : index
    %c0_6 = arith.constant 0 : index
    %2 = vector.load %arg1[%c0_3, %c0_4, %c0_5, %c0_6] : memref<2x18x18x1xf32, #tpu.memory_space<vmem>>, vector<1x18x18x1xf32>
    %3 = vector.shape_cast %2 : vector<1x18x18x1xf32> to vector<18x18x1xf32>
    %cst = arith.constant 0.000000e+00 : f32
    %4 = vector.broadcast %cst : f32 to vector<256x32xf32>
    %5 = vector.extract_strided_slice %3 {offsets = [0, 0, 0], sizes = [16, 16, 1], strides = [1, 1, 1]} : vector<18x18x1xf32> to vector<16x16x1xf32>
    %6 = vector.shape_cast %5 : vector<16x16x1xf32> to vector<256x1xf32>
    %c0_7 = arith.constant 0 : index
    %c0_8 = arith.constant 0 : index
    %7 = vector.load %arg2[%c0_7, %c0_8] : memref<9x32xbf16, #tpu.memory_space<vmem>>, vector<1x32xbf16>
    %8 = arith.extf %7 : vector<1x32xbf16> to vector<1x32xf32>
    %9 = vector.broadcast %6 : vector<256x1xf32> to vector<256x32xf32>
    %10 = vector.broadcast %8 : vector<1x32xf32> to vector<256x32xf32>
    %11 = arith.mulf %9, %10 : vector<256x32xf32>
    %12 = arith.addf %4, %11 : vector<256x32xf32>
    %13 = vector.extract_strided_slice %3 {offsets = [0, 1, 0], sizes = [16, 16, 1], strides = [1, 1, 1]} : vector<18x18x1xf32> to vector<16x16x1xf32>
    %14 = vector.shape_cast %13 : vector<16x16x1xf32> to vector<256x1xf32>
    %c1 = arith.constant 1 : index
    %c0_9 = arith.constant 0 : index
    %15 = vector.load %arg2[%c1, %c0_9] : memref<9x32xbf16, #tpu.memory_space<vmem>>, vector<1x32xbf16>
    %16 = arith.extf %15 : vector<1x32xbf16> to vector<1x32xf32>
    %17 = vector.broadcast %14 : vector<256x1xf32> to vector<256x32xf32>
    %18 = vector.broadcast %16 : vector<1x32xf32> to vector<256x32xf32>
    %19 = arith.mulf %17, %18 : vector<256x32xf32>
    %20 = arith.addf %12, %19 : vector<256x32xf32>
    %21 = vector.extract_strided_slice %3 {offsets = [0, 2, 0], sizes = [16, 16, 1], strides = [1, 1, 1]} : vector<18x18x1xf32> to vector<16x16x1xf32>
    %22 = vector.shape_cast %21 : vector<16x16x1xf32> to vector<256x1xf32>
    %c2 = arith.constant 2 : index
    %c0_10 = arith.constant 0 : index
    %23 = vector.load %arg2[%c2, %c0_10] : memref<9x32xbf16, #tpu.memory_space<vmem>>, vector<1x32xbf16>
    %24 = arith.extf %23 : vector<1x32xbf16> to vector<1x32xf32>
    %25 = vector.broadcast %22 : vector<256x1xf32> to vector<256x32xf32>
    %26 = vector.broadcast %24 : vector<1x32xf32> to vector<256x32xf32>
    %27 = arith.mulf %25, %26 : vector<256x32xf32>
    %28 = arith.addf %20, %27 : vector<256x32xf32>
    %29 = vector.extract_strided_slice %3 {offsets = [1, 0, 0], sizes = [16, 16, 1], strides = [1, 1, 1]} : vector<18x18x1xf32> to vector<16x16x1xf32>
    %30 = vector.shape_cast %29 : vector<16x16x1xf32> to vector<256x1xf32>
    %c3 = arith.constant 3 : index
    %c0_11 = arith.constant 0 : index
    %31 = vector.load %arg2[%c3, %c0_11] : memref<9x32xbf16, #tpu.memory_space<vmem>>, vector<1x32xbf16>
    %32 = arith.extf %31 : vector<1x32xbf16> to vector<1x32xf32>
    %33 = vector.broadcast %30 : vector<256x1xf32> to vector<256x32xf32>
    %34 = vector.broadcast %32 : vector<1x32xf32> to vector<256x32xf32>
    %35 = arith.mulf %33, %34 : vector<256x32xf32>
    %36 = arith.addf %28, %35 : vector<256x32xf32>
    %37 = vector.extract_strided_slice %3 {offsets = [1, 1, 0], sizes = [16, 16, 1], strides = [1, 1, 1]} : vector<18x18x1xf32> to vector<16x16x1xf32>
    %38 = vector.shape_cast %37 : vector<16x16x1xf32> to vector<256x1xf32>
    %c4 = arith.constant 4 : index
    %c0_12 = arith.constant 0 : index
    %39 = vector.load %arg2[%c4, %c0_12] : memref<9x32xbf16, #tpu.memory_space<vmem>>, vector<1x32xbf16>
    %40 = arith.extf %39 : vector<1x32xbf16> to vector<1x32xf32>
    %41 = vector.broadcast %38 : vector<256x1xf32> to vector<256x32xf32>
    %42 = vector.broadcast %40 : vector<1x32xf32> to vector<256x32xf32>
    %43 = arith.mulf %41, %42 : vector<256x32xf32>
    %44 = arith.addf %36, %43 : vector<256x32xf32>
    %45 = vector.extract_strided_slice %3 {offsets = [1, 2, 0], sizes = [16, 16, 1], strides = [1, 1, 1]} : vector<18x18x1xf32> to vector<16x16x1xf32>
    %46 = vector.shape_cast %45 : vector<16x16x1xf32> to vector<256x1xf32>
    %c5 = arith.constant 5 : index
    %c0_13 = arith.constant 0 : index
    %47 = vector.load %arg2[%c5, %c0_13] : memref<9x32xbf16, #tpu.memory_space<vmem>>, vector<1x32xbf16>
    %48 = arith.extf %47 : vector<1x32xbf16> to vector<1x32xf32>
    %49 = vector.broadcast %46 : vector<256x1xf32> to vector<256x32xf32>
    %50 = vector.broadcast %48 : vector<1x32xf32> to vector<256x32xf32>
    %51 = arith.mulf %49, %50 : vector<256x32xf32>
    %52 = arith.addf %44, %51 : vector<256x32xf32>
    %53 = vector.extract_strided_slice %3 {offsets = [2, 0, 0], sizes = [16, 16, 1], strides = [1, 1, 1]} : vector<18x18x1xf32> to vector<16x16x1xf32>
    %54 = vector.shape_cast %53 : vector<16x16x1xf32> to vector<256x1xf32>
    %c6 = arith.constant 6 : index
    %c0_14 = arith.constant 0 : index
    %55 = vector.load %arg2[%c6, %c0_14] : memref<9x32xbf16, #tpu.memory_space<vmem>>, vector<1x32xbf16>
    %56 = arith.extf %55 : vector<1x32xbf16> to vector<1x32xf32>
    %57 = vector.broadcast %54 : vector<256x1xf32> to vector<256x32xf32>
    %58 = vector.broadcast %56 : vector<1x32xf32> to vector<256x32xf32>
    %59 = arith.mulf %57, %58 : vector<256x32xf32>
    %60 = arith.addf %52, %59 : vector<256x32xf32>
    %61 = vector.extract_strided_slice %3 {offsets = [2, 1, 0], sizes = [16, 16, 1], strides = [1, 1, 1]} : vector<18x18x1xf32> to vector<16x16x1xf32>
    %62 = vector.shape_cast %61 : vector<16x16x1xf32> to vector<256x1xf32>
    %c7 = arith.constant 7 : index
    %c0_15 = arith.constant 0 : index
    %63 = vector.load %arg2[%c7, %c0_15] : memref<9x32xbf16, #tpu.memory_space<vmem>>, vector<1x32xbf16>
    %64 = arith.extf %63 : vector<1x32xbf16> to vector<1x32xf32>
    %65 = vector.broadcast %62 : vector<256x1xf32> to vector<256x32xf32>
    %66 = vector.broadcast %64 : vector<1x32xf32> to vector<256x32xf32>
    %67 = arith.mulf %65, %66 : vector<256x32xf32>
    %68 = arith.addf %60, %67 : vector<256x32xf32>
    %69 = vector.extract_strided_slice %3 {offsets = [2, 2, 0], sizes = [16, 16, 1], strides = [1, 1, 1]} : vector<18x18x1xf32> to vector<16x16x1xf32>
    %70 = vector.shape_cast %69 : vector<16x16x1xf32> to vector<256x1xf32>
    %c8 = arith.constant 8 : index
    %c0_16 = arith.constant 0 : index
    %71 = vector.load %arg2[%c8, %c0_16] : memref<9x32xbf16, #tpu.memory_space<vmem>>, vector<1x32xbf16>
    %72 = arith.extf %71 : vector<1x32xbf16> to vector<1x32xf32>
    %73 = vector.broadcast %70 : vector<256x1xf32> to vector<256x32xf32>
    %74 = vector.broadcast %72 : vector<1x32xf32> to vector<256x32xf32>
    %75 = arith.mulf %73, %74 : vector<256x32xf32>
    %76 = arith.addf %68, %75 : vector<256x32xf32>
    %77 = vector.broadcast %0 : vector<1x32xf32> to vector<256x32xf32>
    %78 = arith.mulf %76, %77 : vector<256x32xf32>
    %79 = vector.broadcast %1 : vector<1x32xf32> to vector<256x32xf32>
    %80 = arith.addf %78, %79 : vector<256x32xf32>
    %cst_17 = arith.constant 0.000000e+00 : f32
    %81 = vector.broadcast %cst_17 : f32 to vector<256x32xf32>
    %82 = arith.maximumf %80, %81 : vector<256x32xf32>
    %83 = vector.shape_cast %82 : vector<256x32xf32> to vector<16x16x32xf32>
    %84 = vector.shape_cast %83 : vector<16x16x32xf32> to vector<8x2x16x32xf32>
    %85 = vector.extract_strided_slice %84 {offsets = [0, 0, 0, 0], sizes = [8, 1, 16, 32], strides = [1, 1, 1, 1]} : vector<8x2x16x32xf32> to vector<8x1x16x32xf32>
    %86 = vector.shape_cast %85 : vector<8x1x16x32xf32> to vector<8x16x32xf32>
    %87 = vector.extract_strided_slice %84 {offsets = [0, 1, 0, 0], sizes = [8, 1, 16, 32], strides = [1, 1, 1, 1]} : vector<8x2x16x32xf32> to vector<8x1x16x32xf32>
    %88 = vector.shape_cast %87 : vector<8x1x16x32xf32> to vector<8x16x32xf32>
    %89 = arith.maximumf %86, %88 : vector<8x16x32xf32>
    %90 = vector.shape_cast %89 : vector<8x16x32xf32> to vector<8x8x2x32xf32>
    %91 = vector.extract_strided_slice %90 {offsets = [0, 0, 0, 0], sizes = [8, 8, 1, 32], strides = [1, 1, 1, 1]} : vector<8x8x2x32xf32> to vector<8x8x1x32xf32>
    %92 = vector.shape_cast %91 : vector<8x8x1x32xf32> to vector<8x8x32xf32>
    %93 = vector.extract_strided_slice %90 {offsets = [0, 0, 1, 0], sizes = [8, 8, 1, 32], strides = [1, 1, 1, 1]} : vector<8x8x2x32xf32> to vector<8x8x1x32xf32>
    %94 = vector.shape_cast %93 : vector<8x8x1x32xf32> to vector<8x8x32xf32>
    %95 = arith.maximumf %92, %94 : vector<8x8x32xf32>
    %96 = vector.shape_cast %95 : vector<8x8x32xf32> to vector<8x256xf32>
    %97 = arith.truncf %96 : vector<8x256xf32> to vector<8x256xbf16>
    %c0_18 = arith.constant 0 : index
    %c0_19 = arith.constant 0 : index
    %c0_20 = arith.constant 0 : index
    %98 = vector.load %arg5[%c0_18, %c0_19, %c0_20] : memref<2x8x256xbf16, #tpu.memory_space<vmem>>, vector<1x8x256xbf16>
    %99 = vector.shape_cast %98 : vector<1x8x256xbf16> to vector<8x256xbf16>
    %100 = vector.shape_cast %97 : vector<8x256xbf16> to vector<1x8x256xbf16>
    tpu.vector_store %arg5[%c0_18, %c0_19, %c0_20], %100 {strides = array<i32>} : memref<2x8x256xbf16, #tpu.memory_space<vmem>>, vector<1x8x256xbf16>,
    %c1_21 = arith.constant 1 : index
    %c0_22 = arith.constant 0 : index
    %c0_23 = arith.constant 0 : index
    %c0_24 = arith.constant 0 : index
    %101 = vector.load %arg1[%c1_21, %c0_22, %c0_23, %c0_24] : memref<2x18x18x1xf32, #tpu.memory_space<vmem>>, vector<1x18x18x1xf32>
    %102 = vector.shape_cast %101 : vector<1x18x18x1xf32> to vector<18x18x1xf32>
    %cst_25 = arith.constant 0.000000e+00 : f32
    %103 = vector.broadcast %cst_25 : f32 to vector<256x32xf32>
    %104 = vector.extract_strided_slice %102 {offsets = [0, 0, 0], sizes = [16, 16, 1], strides = [1, 1, 1]} : vector<18x18x1xf32> to vector<16x16x1xf32>
    %105 = vector.shape_cast %104 : vector<16x16x1xf32> to vector<256x1xf32>
    %c0_26 = arith.constant 0 : index
    %c0_27 = arith.constant 0 : index
    %106 = vector.load %arg2[%c0_26, %c0_27] : memref<9x32xbf16, #tpu.memory_space<vmem>>, vector<1x32xbf16>
    %107 = arith.extf %106 : vector<1x32xbf16> to vector<1x32xf32>
    %108 = vector.broadcast %105 : vector<256x1xf32> to vector<256x32xf32>
    %109 = vector.broadcast %107 : vector<1x32xf32> to vector<256x32xf32>
    %110 = arith.mulf %108, %109 : vector<256x32xf32>
    %111 = arith.addf %103, %110 : vector<256x32xf32>
    %112 = vector.extract_strided_slice %102 {offsets = [0, 1, 0], sizes = [16, 16, 1], strides = [1, 1, 1]} : vector<18x18x1xf32> to vector<16x16x1xf32>
    %113 = vector.shape_cast %112 : vector<16x16x1xf32> to vector<256x1xf32>
    %c1_28 = arith.constant 1 : index
    %c0_29 = arith.constant 0 : index
    %114 = vector.load %arg2[%c1_28, %c0_29] : memref<9x32xbf16, #tpu.memory_space<vmem>>, vector<1x32xbf16>
    %115 = arith.extf %114 : vector<1x32xbf16> to vector<1x32xf32>
    %116 = vector.broadcast %113 : vector<256x1xf32> to vector<256x32xf32>
    %117 = vector.broadcast %115 : vector<1x32xf32> to vector<256x32xf32>
    %118 = arith.mulf %116, %117 : vector<256x32xf32>
    %119 = arith.addf %111, %118 : vector<256x32xf32>
    %120 = vector.extract_strided_slice %102 {offsets = [0, 2, 0], sizes = [16, 16, 1], strides = [1, 1, 1]} : vector<18x18x1xf32> to vector<16x16x1xf32>
    %121 = vector.shape_cast %120 : vector<16x16x1xf32> to vector<256x1xf32>
    %c2_30 = arith.constant 2 : index
    %c0_31 = arith.constant 0 : index
    %122 = vector.load %arg2[%c2_30, %c0_31] : memref<9x32xbf16, #tpu.memory_space<vmem>>, vector<1x32xbf16>
    %123 = arith.extf %122 : vector<1x32xbf16> to vector<1x32xf32>
    %124 = vector.broadcast %121 : vector<256x1xf32> to vector<256x32xf32>
    %125 = vector.broadcast %123 : vector<1x32xf32> to vector<256x32xf32>
    %126 = arith.mulf %124, %125 : vector<256x32xf32>
    %127 = arith.addf %119, %126 : vector<256x32xf32>
    %128 = vector.extract_strided_slice %102 {offsets = [1, 0, 0], sizes = [16, 16, 1], strides = [1, 1, 1]} : vector<18x18x1xf32> to vector<16x16x1xf32>
    %129 = vector.shape_cast %128 : vector<16x16x1xf32> to vector<256x1xf32>
    %c3_32 = arith.constant 3 : index
    %c0_33 = arith.constant 0 : index
    %130 = vector.load %arg2[%c3_32, %c0_33] : memref<9x32xbf16, #tpu.memory_space<vmem>>, vector<1x32xbf16>
    %131 = arith.extf %130 : vector<1x32xbf16> to vector<1x32xf32>
    %132 = vector.broadcast %129 : vector<256x1xf32> to vector<256x32xf32>
    %133 = vector.broadcast %131 : vector<1x32xf32> to vector<256x32xf32>
    %134 = arith.mulf %132, %133 : vector<256x32xf32>
    %135 = arith.addf %127, %134 : vector<256x32xf32>
    %136 = vector.extract_strided_slice %102 {offsets = [1, 1, 0], sizes = [16, 16, 1], strides = [1, 1, 1]} : vector<18x18x1xf32> to vector<16x16x1xf32>
    %137 = vector.shape_cast %136 : vector<16x16x1xf32> to vector<256x1xf32>
    %c4_34 = arith.constant 4 : index
    %c0_35 = arith.constant 0 : index
    %138 = vector.load %arg2[%c4_34, %c0_35] : memref<9x32xbf16, #tpu.memory_space<vmem>>, vector<1x32xbf16>
    %139 = arith.extf %138 : vector<1x32xbf16> to vector<1x32xf32>
    %140 = vector.broadcast %137 : vector<256x1xf32> to vector<256x32xf32>
    %141 = vector.broadcast %139 : vector<1x32xf32> to vector<256x32xf32>
    %142 = arith.mulf %140, %141 : vector<256x32xf32>
    %143 = arith.addf %135, %142 : vector<256x32xf32>
    %144 = vector.extract_strided_slice %102 {offsets = [1, 2, 0], sizes = [16, 16, 1], strides = [1, 1, 1]} : vector<18x18x1xf32> to vector<16x16x1xf32>
    %145 = vector.shape_cast %144 : vector<16x16x1xf32> to vector<256x1xf32>
    %c5_36 = arith.constant 5 : index
    %c0_37 = arith.constant 0 : index
    %146 = vector.load %arg2[%c5_36, %c0_37] : memref<9x32xbf16, #tpu.memory_space<vmem>>, vector<1x32xbf16>
    %147 = arith.extf %146 : vector<1x32xbf16> to vector<1x32xf32>
    %148 = vector.broadcast %145 : vector<256x1xf32> to vector<256x32xf32>
    %149 = vector.broadcast %147 : vector<1x32xf32> to vector<256x32xf32>
    %150 = arith.mulf %148, %149 : vector<256x32xf32>
    %151 = arith.addf %143, %150 : vector<256x32xf32>
    %152 = vector.extract_strided_slice %102 {offsets = [2, 0, 0], sizes = [16, 16, 1], strides = [1, 1, 1]} : vector<18x18x1xf32> to vector<16x16x1xf32>
    %153 = vector.shape_cast %152 : vector<16x16x1xf32> to vector<256x1xf32>
    %c6_38 = arith.constant 6 : index
    %c0_39 = arith.constant 0 : index
    %154 = vector.load %arg2[%c6_38, %c0_39] : memref<9x32xbf16, #tpu.memory_space<vmem>>, vector<1x32xbf16>
    %155 = arith.extf %154 : vector<1x32xbf16> to vector<1x32xf32>
    %156 = vector.broadcast %153 : vector<256x1xf32> to vector<256x32xf32>
    %157 = vector.broadcast %155 : vector<1x32xf32> to vector<256x32xf32>
    %158 = arith.mulf %156, %157 : vector<256x32xf32>
    %159 = arith.addf %151, %158 : vector<256x32xf32>
    %160 = vector.extract_strided_slice %102 {offsets = [2, 1, 0], sizes = [16, 16, 1], strides = [1, 1, 1]} : vector<18x18x1xf32> to vector<16x16x1xf32>
    %161 = vector.shape_cast %160 : vector<16x16x1xf32> to vector<256x1xf32>
    %c7_40 = arith.constant 7 : index
    %c0_41 = arith.constant 0 : index
    %162 = vector.load %arg2[%c7_40, %c0_41] : memref<9x32xbf16, #tpu.memory_space<vmem>>, vector<1x32xbf16>
    %163 = arith.extf %162 : vector<1x32xbf16> to vector<1x32xf32>
    %164 = vector.broadcast %161 : vector<256x1xf32> to vector<256x32xf32>
    %165 = vector.broadcast %163 : vector<1x32xf32> to vector<256x32xf32>
    %166 = arith.mulf %164, %165 : vector<256x32xf32>
    %167 = arith.addf %159, %166 : vector<256x32xf32>
    %168 = vector.extract_strided_slice %102 {offsets = [2, 2, 0], sizes = [16, 16, 1], strides = [1, 1, 1]} : vector<18x18x1xf32> to vector<16x16x1xf32>
    %169 = vector.shape_cast %168 : vector<16x16x1xf32> to vector<256x1xf32>
    %c8_42 = arith.constant 8 : index
    %c0_43 = arith.constant 0 : index
    %170 = vector.load %arg2[%c8_42, %c0_43] : memref<9x32xbf16, #tpu.memory_space<vmem>>, vector<1x32xbf16>
    %171 = arith.extf %170 : vector<1x32xbf16> to vector<1x32xf32>
    %172 = vector.broadcast %169 : vector<256x1xf32> to vector<256x32xf32>
    %173 = vector.broadcast %171 : vector<1x32xf32> to vector<256x32xf32>
    %174 = arith.mulf %172, %173 : vector<256x32xf32>
    %175 = arith.addf %167, %174 : vector<256x32xf32>
    %176 = vector.broadcast %0 : vector<1x32xf32> to vector<256x32xf32>
    %177 = arith.mulf %175, %176 : vector<256x32xf32>
    %178 = vector.broadcast %1 : vector<1x32xf32> to vector<256x32xf32>
    %179 = arith.addf %177, %178 : vector<256x32xf32>
    %cst_44 = arith.constant 0.000000e+00 : f32
    %180 = vector.broadcast %cst_44 : f32 to vector<256x32xf32>
    %181 = arith.maximumf %179, %180 : vector<256x32xf32>
    %182 = vector.shape_cast %181 : vector<256x32xf32> to vector<16x16x32xf32>
    %183 = vector.shape_cast %182 : vector<16x16x32xf32> to vector<8x2x16x32xf32>
    %184 = vector.extract_strided_slice %183 {offsets = [0, 0, 0, 0], sizes = [8, 1, 16, 32], strides = [1, 1, 1, 1]} : vector<8x2x16x32xf32> to vector<8x1x16x32xf32>
    %185 = vector.shape_cast %184 : vector<8x1x16x32xf32> to vector<8x16x32xf32>
    %186 = vector.extract_strided_slice %183 {offsets = [0, 1, 0, 0], sizes = [8, 1, 16, 32], strides = [1, 1, 1, 1]} : vector<8x2x16x32xf32> to vector<8x1x16x32xf32>
    %187 = vector.shape_cast %186 : vector<8x1x16x32xf32> to vector<8x16x32xf32>
    %188 = arith.maximumf %185, %187 : vector<8x16x32xf32>
    %189 = vector.shape_cast %188 : vector<8x16x32xf32> to vector<8x8x2x32xf32>
    %190 = vector.extract_strided_slice %189 {offsets = [0, 0, 0, 0], sizes = [8, 8, 1, 32], strides = [1, 1, 1, 1]} : vector<8x8x2x32xf32> to vector<8x8x1x32xf32>
    %191 = vector.shape_cast %190 : vector<8x8x1x32xf32> to vector<8x8x32xf32>
    %192 = vector.extract_strided_slice %189 {offsets = [0, 0, 1, 0], sizes = [8, 8, 1, 32], strides = [1, 1, 1, 1]} : vector<8x8x2x32xf32> to vector<8x8x1x32xf32>
    %193 = vector.shape_cast %192 : vector<8x8x1x32xf32> to vector<8x8x32xf32>
    %194 = arith.maximumf %191, %193 : vector<8x8x32xf32>
    %195 = vector.shape_cast %194 : vector<8x8x32xf32> to vector<8x256xf32>
    %196 = arith.truncf %195 : vector<8x256xf32> to vector<8x256xbf16>
    %c1_45 = arith.constant 1 : index
    %c0_46 = arith.constant 0 : index
    %c0_47 = arith.constant 0 : index
    %197 = vector.load %arg5[%c1_45, %c0_46, %c0_47] : memref<2x8x256xbf16, #tpu.memory_space<vmem>>, vector<1x8x256xbf16>
    %198 = vector.shape_cast %197 : vector<1x8x256xbf16> to vector<8x256xbf16>
    %199 = vector.shape_cast %196 : vector<8x256xbf16> to vector<1x8x256xbf16>
    tpu.vector_store %arg5[%c1_45, %c0_46, %c0_47], %199 {strides = array<i32>} : memref<2x8x256xbf16, #tpu.memory_space<vmem>>, vector<1x8x256xbf16>,
    return
  }
  func.func @transform_0(%arg0: i32) -> (i32, i32, i32, i32) {
    %c0_i32 = arith.constant 0 : i32
    %c0_i32_0 = arith.constant 0 : i32
    %c0_i32_1 = arith.constant 0 : i32
    %c0_i32_2 = arith.constant 0 : i32
    return %arg0, %c0_i32, %c0_i32_0, %c0_i32_1 : i32, i32, i32, i32
  }
  func.func @transform_1(%arg0: i32) -> (i32, i32) {
    %c0_i32 = arith.constant 0 : i32
    %c0_i32_0 = arith.constant 0 : i32
    %c0_i32_1 = arith.constant 0 : i32
    return %c0_i32, %c0_i32_0 : i32, i32
  }
  func.func @transform_2(%arg0: i32) -> (i32, i32) {
    %c0_i32 = arith.constant 0 : i32
    %c0_i32_0 = arith.constant 0 : i32
    %c0_i32_1 = arith.constant 0 : i32
    return %c0_i32, %c0_i32_0 : i32, i32
  }
  func.func @transform_3(%arg0: i32) -> (i32, i32) {
    %c0_i32 = arith.constant 0 : i32
    %c0_i32_0 = arith.constant 0 : i32
    %c0_i32_1 = arith.constant 0 : i32
    return %c0_i32, %c0_i32_0 : i32, i32
  }
  func.func @transform_4(%arg0: i32) -> (i32, i32, i32) {
    %c0_i32 = arith.constant 0 : i32
    %c0_i32_0 = arith.constant 0 : i32
    %c0_i32_1 = arith.constant 0 : i32
    return %arg0, %c0_i32, %c0_i32_0 : i32, i32, i32
  }
}

module attributes {stable_mosaic.version = 11 : i64} {
  func.func @_conv_bn_relu_pool_kernel(%arg0: i32, %arg1: memref<2x10x10x32xbf16, #tpu.memory_space<vmem>>, %arg2: memref<288x64xbf16, #tpu.memory_space<vmem>>, %arg3: memref<1x64xf32, #tpu.memory_space<vmem>>, %arg4: memref<1x64xf32, #tpu.memory_space<vmem>>, %arg5: memref<2x4x256xbf16, #tpu.memory_space<vmem>>) attributes {dimension_semantics = [#tpu.dimension_semantics<parallel>], iteration_bounds = array<i64: 1>, scalar_prefetch = 0 : i64, scratch_operands = 0 : i64, tpu.core_type = #tpu.core_type<tc>, window_params = [{transform_indices = @transform_0, window_bounds = array<i64: 2, 10, 10, 32>}, {pipeline_mode = #tpu.pipeline_mode<synchronous>, transform_indices = @transform_1, window_bounds = array<i64: 288, 64>}, {pipeline_mode = #tpu.pipeline_mode<synchronous>, transform_indices = @transform_2, window_bounds = array<i64: 1, 64>}, {pipeline_mode = #tpu.pipeline_mode<synchronous>, transform_indices = @transform_3, window_bounds = array<i64: 1, 64>}, {transform_indices = @transform_4, window_bounds = array<i64: 2, 4, 256>}]} {
    %c0 = arith.constant 0 : index
    %c0_0 = arith.constant 0 : index
    %0 = vector.load %arg3[%c0, %c0_0] : memref<1x64xf32, #tpu.memory_space<vmem>>, vector<1x64xf32>
    %c0_1 = arith.constant 0 : index
    %c0_2 = arith.constant 0 : index
    %1 = vector.load %arg4[%c0_1, %c0_2] : memref<1x64xf32, #tpu.memory_space<vmem>>, vector<1x64xf32>
    %c0_3 = arith.constant 0 : index
    %c0_4 = arith.constant 0 : index
    %c0_5 = arith.constant 0 : index
    %c0_6 = arith.constant 0 : index
    %2 = vector.load %arg1[%c0_3, %c0_4, %c0_5, %c0_6] : memref<2x10x10x32xbf16, #tpu.memory_space<vmem>>, vector<1x10x10x32xbf16>
    %3 = vector.shape_cast %2 : vector<1x10x10x32xbf16> to vector<10x10x32xbf16>
    %4 = vector.extract_strided_slice %3 {offsets = [0, 0, 0], sizes = [8, 8, 32], strides = [1, 1, 1]} : vector<10x10x32xbf16> to vector<8x8x32xbf16>
    %5 = vector.shape_cast %4 : vector<8x8x32xbf16> to vector<64x32xbf16>
    %6 = vector.extract_strided_slice %3 {offsets = [0, 1, 0], sizes = [8, 8, 32], strides = [1, 1, 1]} : vector<10x10x32xbf16> to vector<8x8x32xbf16>
    %7 = vector.shape_cast %6 : vector<8x8x32xbf16> to vector<64x32xbf16>
    %8 = vector.extract_strided_slice %3 {offsets = [0, 2, 0], sizes = [8, 8, 32], strides = [1, 1, 1]} : vector<10x10x32xbf16> to vector<8x8x32xbf16>
    %9 = vector.shape_cast %8 : vector<8x8x32xbf16> to vector<64x32xbf16>
    %10 = vector.extract_strided_slice %3 {offsets = [1, 0, 0], sizes = [8, 8, 32], strides = [1, 1, 1]} : vector<10x10x32xbf16> to vector<8x8x32xbf16>
    %11 = vector.shape_cast %10 : vector<8x8x32xbf16> to vector<64x32xbf16>
    %12 = vector.extract_strided_slice %3 {offsets = [1, 1, 0], sizes = [8, 8, 32], strides = [1, 1, 1]} : vector<10x10x32xbf16> to vector<8x8x32xbf16>
    %13 = vector.shape_cast %12 : vector<8x8x32xbf16> to vector<64x32xbf16>
    %14 = vector.extract_strided_slice %3 {offsets = [1, 2, 0], sizes = [8, 8, 32], strides = [1, 1, 1]} : vector<10x10x32xbf16> to vector<8x8x32xbf16>
    %15 = vector.shape_cast %14 : vector<8x8x32xbf16> to vector<64x32xbf16>
    %16 = vector.extract_strided_slice %3 {offsets = [2, 0, 0], sizes = [8, 8, 32], strides = [1, 1, 1]} : vector<10x10x32xbf16> to vector<8x8x32xbf16>
    %17 = vector.shape_cast %16 : vector<8x8x32xbf16> to vector<64x32xbf16>
    %18 = vector.extract_strided_slice %3 {offsets = [2, 1, 0], sizes = [8, 8, 32], strides = [1, 1, 1]} : vector<10x10x32xbf16> to vector<8x8x32xbf16>
    %19 = vector.shape_cast %18 : vector<8x8x32xbf16> to vector<64x32xbf16>
    %20 = vector.extract_strided_slice %3 {offsets = [2, 2, 0], sizes = [8, 8, 32], strides = [1, 1, 1]} : vector<10x10x32xbf16> to vector<8x8x32xbf16>
    %21 = vector.shape_cast %20 : vector<8x8x32xbf16> to vector<64x32xbf16>
    %22 = tpu.concatenate %5, %7, %9, %11, %13, %15, %17, %19, %21 in 1 : vector<64x32xbf16>, vector<64x32xbf16>, vector<64x32xbf16>, vector<64x32xbf16>, vector<64x32xbf16>, vector<64x32xbf16>, vector<64x32xbf16>, vector<64x32xbf16>, vector<64x32xbf16> -> vector<64x288xbf16>
    %c0_7 = arith.constant 0 : index
    %c0_8 = arith.constant 0 : index
    %23 = vector.load %arg2[%c0_7, %c0_8] : memref<288x64xbf16, #tpu.memory_space<vmem>>, vector<288x64xbf16>
    %cst = arith.constant dense<0.000000e+00> : vector<64x64xf32>
    %24 = tpu.matmul %22, %23, %cst {dimension_numbers = #tpu.dot_dimension_numbers<[1], [0], [0], [1], [0, 0, 1, 1], [], []>} : vector<64x288xbf16>, vector<288x64xbf16>, vector<64x64xf32> -> vector<64x64xf32>
    %25 = vector.broadcast %0 : vector<1x64xf32> to vector<64x64xf32>
    %26 = arith.mulf %24, %25 : vector<64x64xf32>
    %27 = vector.broadcast %1 : vector<1x64xf32> to vector<64x64xf32>
    %28 = arith.addf %26, %27 : vector<64x64xf32>
    %cst_9 = arith.constant 0.000000e+00 : f32
    %29 = vector.broadcast %cst_9 : f32 to vector<64x64xf32>
    %30 = arith.maximumf %28, %29 : vector<64x64xf32>
    %31 = vector.shape_cast %30 : vector<64x64xf32> to vector<8x8x64xf32>
    %32 = vector.shape_cast %31 : vector<8x8x64xf32> to vector<4x2x8x64xf32>
    %33 = vector.extract_strided_slice %32 {offsets = [0, 0, 0, 0], sizes = [4, 1, 8, 64], strides = [1, 1, 1, 1]} : vector<4x2x8x64xf32> to vector<4x1x8x64xf32>
    %34 = vector.shape_cast %33 : vector<4x1x8x64xf32> to vector<4x8x64xf32>
    %35 = vector.extract_strided_slice %32 {offsets = [0, 1, 0, 0], sizes = [4, 1, 8, 64], strides = [1, 1, 1, 1]} : vector<4x2x8x64xf32> to vector<4x1x8x64xf32>
    %36 = vector.shape_cast %35 : vector<4x1x8x64xf32> to vector<4x8x64xf32>
    %37 = arith.maximumf %34, %36 : vector<4x8x64xf32>
    %38 = vector.shape_cast %37 : vector<4x8x64xf32> to vector<4x4x2x64xf32>
    %39 = vector.extract_strided_slice %38 {offsets = [0, 0, 0, 0], sizes = [4, 4, 1, 64], strides = [1, 1, 1, 1]} : vector<4x4x2x64xf32> to vector<4x4x1x64xf32>
    %40 = vector.shape_cast %39 : vector<4x4x1x64xf32> to vector<4x4x64xf32>
    %41 = vector.extract_strided_slice %38 {offsets = [0, 0, 1, 0], sizes = [4, 4, 1, 64], strides = [1, 1, 1, 1]} : vector<4x4x2x64xf32> to vector<4x4x1x64xf32>
    %42 = vector.shape_cast %41 : vector<4x4x1x64xf32> to vector<4x4x64xf32>
    %43 = arith.maximumf %40, %42 : vector<4x4x64xf32>
    %44 = vector.shape_cast %43 : vector<4x4x64xf32> to vector<4x256xf32>
    %45 = arith.truncf %44 : vector<4x256xf32> to vector<4x256xbf16>
    %c0_10 = arith.constant 0 : index
    %c0_11 = arith.constant 0 : index
    %c0_12 = arith.constant 0 : index
    %46 = vector.load %arg5[%c0_10, %c0_11, %c0_12] : memref<2x4x256xbf16, #tpu.memory_space<vmem>>, vector<1x4x256xbf16>
    %47 = vector.shape_cast %46 : vector<1x4x256xbf16> to vector<4x256xbf16>
    %48 = vector.shape_cast %45 : vector<4x256xbf16> to vector<1x4x256xbf16>
    tpu.vector_store %arg5[%c0_10, %c0_11, %c0_12], %48 {strides = array<i32>} : memref<2x4x256xbf16, #tpu.memory_space<vmem>>, vector<1x4x256xbf16>,
    %c1 = arith.constant 1 : index
    %c0_13 = arith.constant 0 : index
    %c0_14 = arith.constant 0 : index
    %c0_15 = arith.constant 0 : index
    %49 = vector.load %arg1[%c1, %c0_13, %c0_14, %c0_15] : memref<2x10x10x32xbf16, #tpu.memory_space<vmem>>, vector<1x10x10x32xbf16>
    %50 = vector.shape_cast %49 : vector<1x10x10x32xbf16> to vector<10x10x32xbf16>
    %51 = vector.extract_strided_slice %50 {offsets = [0, 0, 0], sizes = [8, 8, 32], strides = [1, 1, 1]} : vector<10x10x32xbf16> to vector<8x8x32xbf16>
    %52 = vector.shape_cast %51 : vector<8x8x32xbf16> to vector<64x32xbf16>
    %53 = vector.extract_strided_slice %50 {offsets = [0, 1, 0], sizes = [8, 8, 32], strides = [1, 1, 1]} : vector<10x10x32xbf16> to vector<8x8x32xbf16>
    %54 = vector.shape_cast %53 : vector<8x8x32xbf16> to vector<64x32xbf16>
    %55 = vector.extract_strided_slice %50 {offsets = [0, 2, 0], sizes = [8, 8, 32], strides = [1, 1, 1]} : vector<10x10x32xbf16> to vector<8x8x32xbf16>
    %56 = vector.shape_cast %55 : vector<8x8x32xbf16> to vector<64x32xbf16>
    %57 = vector.extract_strided_slice %50 {offsets = [1, 0, 0], sizes = [8, 8, 32], strides = [1, 1, 1]} : vector<10x10x32xbf16> to vector<8x8x32xbf16>
    %58 = vector.shape_cast %57 : vector<8x8x32xbf16> to vector<64x32xbf16>
    %59 = vector.extract_strided_slice %50 {offsets = [1, 1, 0], sizes = [8, 8, 32], strides = [1, 1, 1]} : vector<10x10x32xbf16> to vector<8x8x32xbf16>
    %60 = vector.shape_cast %59 : vector<8x8x32xbf16> to vector<64x32xbf16>
    %61 = vector.extract_strided_slice %50 {offsets = [1, 2, 0], sizes = [8, 8, 32], strides = [1, 1, 1]} : vector<10x10x32xbf16> to vector<8x8x32xbf16>
    %62 = vector.shape_cast %61 : vector<8x8x32xbf16> to vector<64x32xbf16>
    %63 = vector.extract_strided_slice %50 {offsets = [2, 0, 0], sizes = [8, 8, 32], strides = [1, 1, 1]} : vector<10x10x32xbf16> to vector<8x8x32xbf16>
    %64 = vector.shape_cast %63 : vector<8x8x32xbf16> to vector<64x32xbf16>
    %65 = vector.extract_strided_slice %50 {offsets = [2, 1, 0], sizes = [8, 8, 32], strides = [1, 1, 1]} : vector<10x10x32xbf16> to vector<8x8x32xbf16>
    %66 = vector.shape_cast %65 : vector<8x8x32xbf16> to vector<64x32xbf16>
    %67 = vector.extract_strided_slice %50 {offsets = [2, 2, 0], sizes = [8, 8, 32], strides = [1, 1, 1]} : vector<10x10x32xbf16> to vector<8x8x32xbf16>
    %68 = vector.shape_cast %67 : vector<8x8x32xbf16> to vector<64x32xbf16>
    %69 = tpu.concatenate %52, %54, %56, %58, %60, %62, %64, %66, %68 in 1 : vector<64x32xbf16>, vector<64x32xbf16>, vector<64x32xbf16>, vector<64x32xbf16>, vector<64x32xbf16>, vector<64x32xbf16>, vector<64x32xbf16>, vector<64x32xbf16>, vector<64x32xbf16> -> vector<64x288xbf16>
    %c0_16 = arith.constant 0 : index
    %c0_17 = arith.constant 0 : index
    %70 = vector.load %arg2[%c0_16, %c0_17] : memref<288x64xbf16, #tpu.memory_space<vmem>>, vector<288x64xbf16>
    %cst_18 = arith.constant dense<0.000000e+00> : vector<64x64xf32>
    %71 = tpu.matmul %69, %70, %cst_18 {dimension_numbers = #tpu.dot_dimension_numbers<[1], [0], [0], [1], [0, 0, 1, 1], [], []>} : vector<64x288xbf16>, vector<288x64xbf16>, vector<64x64xf32> -> vector<64x64xf32>
    %72 = vector.broadcast %0 : vector<1x64xf32> to vector<64x64xf32>
    %73 = arith.mulf %71, %72 : vector<64x64xf32>
    %74 = vector.broadcast %1 : vector<1x64xf32> to vector<64x64xf32>
    %75 = arith.addf %73, %74 : vector<64x64xf32>
    %cst_19 = arith.constant 0.000000e+00 : f32
    %76 = vector.broadcast %cst_19 : f32 to vector<64x64xf32>
    %77 = arith.maximumf %75, %76 : vector<64x64xf32>
    %78 = vector.shape_cast %77 : vector<64x64xf32> to vector<8x8x64xf32>
    %79 = vector.shape_cast %78 : vector<8x8x64xf32> to vector<4x2x8x64xf32>
    %80 = vector.extract_strided_slice %79 {offsets = [0, 0, 0, 0], sizes = [4, 1, 8, 64], strides = [1, 1, 1, 1]} : vector<4x2x8x64xf32> to vector<4x1x8x64xf32>
    %81 = vector.shape_cast %80 : vector<4x1x8x64xf32> to vector<4x8x64xf32>
    %82 = vector.extract_strided_slice %79 {offsets = [0, 1, 0, 0], sizes = [4, 1, 8, 64], strides = [1, 1, 1, 1]} : vector<4x2x8x64xf32> to vector<4x1x8x64xf32>
    %83 = vector.shape_cast %82 : vector<4x1x8x64xf32> to vector<4x8x64xf32>
    %84 = arith.maximumf %81, %83 : vector<4x8x64xf32>
    %85 = vector.shape_cast %84 : vector<4x8x64xf32> to vector<4x4x2x64xf32>
    %86 = vector.extract_strided_slice %85 {offsets = [0, 0, 0, 0], sizes = [4, 4, 1, 64], strides = [1, 1, 1, 1]} : vector<4x4x2x64xf32> to vector<4x4x1x64xf32>
    %87 = vector.shape_cast %86 : vector<4x4x1x64xf32> to vector<4x4x64xf32>
    %88 = vector.extract_strided_slice %85 {offsets = [0, 0, 1, 0], sizes = [4, 4, 1, 64], strides = [1, 1, 1, 1]} : vector<4x4x2x64xf32> to vector<4x4x1x64xf32>
    %89 = vector.shape_cast %88 : vector<4x4x1x64xf32> to vector<4x4x64xf32>
    %90 = arith.maximumf %87, %89 : vector<4x4x64xf32>
    %91 = vector.shape_cast %90 : vector<4x4x64xf32> to vector<4x256xf32>
    %92 = arith.truncf %91 : vector<4x256xf32> to vector<4x256xbf16>
    %c1_20 = arith.constant 1 : index
    %c0_21 = arith.constant 0 : index
    %c0_22 = arith.constant 0 : index
    %93 = vector.load %arg5[%c1_20, %c0_21, %c0_22] : memref<2x4x256xbf16, #tpu.memory_space<vmem>>, vector<1x4x256xbf16>
    %94 = vector.shape_cast %93 : vector<1x4x256xbf16> to vector<4x256xbf16>
    %95 = vector.shape_cast %92 : vector<4x256xbf16> to vector<1x4x256xbf16>
    tpu.vector_store %arg5[%c1_20, %c0_21, %c0_22], %95 {strides = array<i32>} : memref<2x4x256xbf16, #tpu.memory_space<vmem>>, vector<1x4x256xbf16>,
    return
  }
  func.func @transform_0(%arg0: i32) -> (i32, i32, i32, i32) {
    %c0_i32 = arith.constant 0 : i32
    %c0_i32_0 = arith.constant 0 : i32
    %c0_i32_1 = arith.constant 0 : i32
    %c0_i32_2 = arith.constant 0 : i32
    return %arg0, %c0_i32, %c0_i32_0, %c0_i32_1 : i32, i32, i32, i32
  }
  func.func @transform_1(%arg0: i32) -> (i32, i32) {
    %c0_i32 = arith.constant 0 : i32
    %c0_i32_0 = arith.constant 0 : i32
    %c0_i32_1 = arith.constant 0 : i32
    return %c0_i32, %c0_i32_0 : i32, i32
  }
  func.func @transform_2(%arg0: i32) -> (i32, i32) {
    %c0_i32 = arith.constant 0 : i32
    %c0_i32_0 = arith.constant 0 : i32
    %c0_i32_1 = arith.constant 0 : i32
    return %c0_i32, %c0_i32_0 : i32, i32
  }
  func.func @transform_3(%arg0: i32) -> (i32, i32) {
    %c0_i32 = arith.constant 0 : i32
    %c0_i32_0 = arith.constant 0 : i32
    %c0_i32_1 = arith.constant 0 : i32
    return %c0_i32, %c0_i32_0 : i32, i32
  }
  func.func @transform_4(%arg0: i32) -> (i32, i32, i32) {
    %c0_i32 = arith.constant 0 : i32
    %c0_i32_0 = arith.constant 0 : i32
    %c0_i32_1 = arith.constant 0 : i32
    return %arg0, %c0_i32, %c0_i32_0 : i32, i32, i32
  }
}

module attributes {stable_mosaic.version = 11 : i64} {
  func.func @_conv_bn_relu_pool_kernel(%arg0: i32, %arg1: memref<2x6x6x64xbf16, #tpu.memory_space<vmem>>, %arg2: memref<576x128xbf16, #tpu.memory_space<vmem>>, %arg3: memref<1x128xf32, #tpu.memory_space<vmem>>, %arg4: memref<1x128xf32, #tpu.memory_space<vmem>>, %arg5: memref<2x2x256xbf16, #tpu.memory_space<vmem>>) attributes {dimension_semantics = [#tpu.dimension_semantics<parallel>], iteration_bounds = array<i64: 1>, scalar_prefetch = 0 : i64, scratch_operands = 0 : i64, tpu.core_type = #tpu.core_type<tc>, window_params = [{transform_indices = @transform_0, window_bounds = array<i64: 2, 6, 6, 64>}, {pipeline_mode = #tpu.pipeline_mode<synchronous>, transform_indices = @transform_1, window_bounds = array<i64: 576, 128>}, {pipeline_mode = #tpu.pipeline_mode<synchronous>, transform_indices = @transform_2, window_bounds = array<i64: 1, 128>}, {pipeline_mode = #tpu.pipeline_mode<synchronous>, transform_indices = @transform_3, window_bounds = array<i64: 1, 128>}, {transform_indices = @transform_4, window_bounds = array<i64: 2, 2, 256>}]} {
    %c0 = arith.constant 0 : index
    %c0_0 = arith.constant 0 : index
    %0 = vector.load %arg3[%c0, %c0_0] : memref<1x128xf32, #tpu.memory_space<vmem>>, vector<1x128xf32>
    %c0_1 = arith.constant 0 : index
    %c0_2 = arith.constant 0 : index
    %1 = vector.load %arg4[%c0_1, %c0_2] : memref<1x128xf32, #tpu.memory_space<vmem>>, vector<1x128xf32>
    %c0_3 = arith.constant 0 : index
    %c0_4 = arith.constant 0 : index
    %c0_5 = arith.constant 0 : index
    %c0_6 = arith.constant 0 : index
    %2 = vector.load %arg1[%c0_3, %c0_4, %c0_5, %c0_6] : memref<2x6x6x64xbf16, #tpu.memory_space<vmem>>, vector<1x6x6x64xbf16>
    %3 = vector.shape_cast %2 : vector<1x6x6x64xbf16> to vector<6x6x64xbf16>
    %4 = vector.extract_strided_slice %3 {offsets = [0, 0, 0], sizes = [4, 4, 64], strides = [1, 1, 1]} : vector<6x6x64xbf16> to vector<4x4x64xbf16>
    %5 = vector.shape_cast %4 : vector<4x4x64xbf16> to vector<16x64xbf16>
    %6 = vector.extract_strided_slice %3 {offsets = [0, 1, 0], sizes = [4, 4, 64], strides = [1, 1, 1]} : vector<6x6x64xbf16> to vector<4x4x64xbf16>
    %7 = vector.shape_cast %6 : vector<4x4x64xbf16> to vector<16x64xbf16>
    %8 = vector.extract_strided_slice %3 {offsets = [0, 2, 0], sizes = [4, 4, 64], strides = [1, 1, 1]} : vector<6x6x64xbf16> to vector<4x4x64xbf16>
    %9 = vector.shape_cast %8 : vector<4x4x64xbf16> to vector<16x64xbf16>
    %10 = vector.extract_strided_slice %3 {offsets = [1, 0, 0], sizes = [4, 4, 64], strides = [1, 1, 1]} : vector<6x6x64xbf16> to vector<4x4x64xbf16>
    %11 = vector.shape_cast %10 : vector<4x4x64xbf16> to vector<16x64xbf16>
    %12 = vector.extract_strided_slice %3 {offsets = [1, 1, 0], sizes = [4, 4, 64], strides = [1, 1, 1]} : vector<6x6x64xbf16> to vector<4x4x64xbf16>
    %13 = vector.shape_cast %12 : vector<4x4x64xbf16> to vector<16x64xbf16>
    %14 = vector.extract_strided_slice %3 {offsets = [1, 2, 0], sizes = [4, 4, 64], strides = [1, 1, 1]} : vector<6x6x64xbf16> to vector<4x4x64xbf16>
    %15 = vector.shape_cast %14 : vector<4x4x64xbf16> to vector<16x64xbf16>
    %16 = vector.extract_strided_slice %3 {offsets = [2, 0, 0], sizes = [4, 4, 64], strides = [1, 1, 1]} : vector<6x6x64xbf16> to vector<4x4x64xbf16>
    %17 = vector.shape_cast %16 : vector<4x4x64xbf16> to vector<16x64xbf16>
    %18 = vector.extract_strided_slice %3 {offsets = [2, 1, 0], sizes = [4, 4, 64], strides = [1, 1, 1]} : vector<6x6x64xbf16> to vector<4x4x64xbf16>
    %19 = vector.shape_cast %18 : vector<4x4x64xbf16> to vector<16x64xbf16>
    %20 = vector.extract_strided_slice %3 {offsets = [2, 2, 0], sizes = [4, 4, 64], strides = [1, 1, 1]} : vector<6x6x64xbf16> to vector<4x4x64xbf16>
    %21 = vector.shape_cast %20 : vector<4x4x64xbf16> to vector<16x64xbf16>
    %22 = tpu.concatenate %5, %7, %9, %11, %13, %15, %17, %19, %21 in 1 : vector<16x64xbf16>, vector<16x64xbf16>, vector<16x64xbf16>, vector<16x64xbf16>, vector<16x64xbf16>, vector<16x64xbf16>, vector<16x64xbf16>, vector<16x64xbf16>, vector<16x64xbf16> -> vector<16x576xbf16>
    %c0_7 = arith.constant 0 : index
    %c0_8 = arith.constant 0 : index
    %23 = vector.load %arg2[%c0_7, %c0_8] : memref<576x128xbf16, #tpu.memory_space<vmem>>, vector<576x128xbf16>
    %cst = arith.constant dense<0.000000e+00> : vector<16x128xf32>
    %24 = tpu.matmul %22, %23, %cst {dimension_numbers = #tpu.dot_dimension_numbers<[1], [0], [0], [1], [0, 0, 1, 1], [], []>} : vector<16x576xbf16>, vector<576x128xbf16>, vector<16x128xf32> -> vector<16x128xf32>
    %25 = vector.broadcast %0 : vector<1x128xf32> to vector<16x128xf32>
    %26 = arith.mulf %24, %25 : vector<16x128xf32>
    %27 = vector.broadcast %1 : vector<1x128xf32> to vector<16x128xf32>
    %28 = arith.addf %26, %27 : vector<16x128xf32>
    %cst_9 = arith.constant 0.000000e+00 : f32
    %29 = vector.broadcast %cst_9 : f32 to vector<16x128xf32>
    %30 = arith.maximumf %28, %29 : vector<16x128xf32>
    %31 = vector.shape_cast %30 : vector<16x128xf32> to vector<4x4x128xf32>
    %32 = vector.shape_cast %31 : vector<4x4x128xf32> to vector<2x2x4x128xf32>
    %33 = vector.extract_strided_slice %32 {offsets = [0, 0, 0, 0], sizes = [2, 1, 4, 128], strides = [1, 1, 1, 1]} : vector<2x2x4x128xf32> to vector<2x1x4x128xf32>
    %34 = vector.shape_cast %33 : vector<2x1x4x128xf32> to vector<2x4x128xf32>
    %35 = vector.extract_strided_slice %32 {offsets = [0, 1, 0, 0], sizes = [2, 1, 4, 128], strides = [1, 1, 1, 1]} : vector<2x2x4x128xf32> to vector<2x1x4x128xf32>
    %36 = vector.shape_cast %35 : vector<2x1x4x128xf32> to vector<2x4x128xf32>
    %37 = arith.maximumf %34, %36 : vector<2x4x128xf32>
    %38 = vector.shape_cast %37 : vector<2x4x128xf32> to vector<2x2x2x128xf32>
    %39 = vector.extract_strided_slice %38 {offsets = [0, 0, 0, 0], sizes = [2, 2, 1, 128], strides = [1, 1, 1, 1]} : vector<2x2x2x128xf32> to vector<2x2x1x128xf32>
    %40 = vector.shape_cast %39 : vector<2x2x1x128xf32> to vector<2x2x128xf32>
    %41 = vector.extract_strided_slice %38 {offsets = [0, 0, 1, 0], sizes = [2, 2, 1, 128], strides = [1, 1, 1, 1]} : vector<2x2x2x128xf32> to vector<2x2x1x128xf32>
    %42 = vector.shape_cast %41 : vector<2x2x1x128xf32> to vector<2x2x128xf32>
    %43 = arith.maximumf %40, %42 : vector<2x2x128xf32>
    %44 = vector.shape_cast %43 : vector<2x2x128xf32> to vector<2x256xf32>
    %45 = arith.truncf %44 : vector<2x256xf32> to vector<2x256xbf16>
    %c0_10 = arith.constant 0 : index
    %c0_11 = arith.constant 0 : index
    %c0_12 = arith.constant 0 : index
    %46 = vector.load %arg5[%c0_10, %c0_11, %c0_12] : memref<2x2x256xbf16, #tpu.memory_space<vmem>>, vector<1x2x256xbf16>
    %47 = vector.shape_cast %46 : vector<1x2x256xbf16> to vector<2x256xbf16>
    %48 = vector.shape_cast %45 : vector<2x256xbf16> to vector<1x2x256xbf16>
    tpu.vector_store %arg5[%c0_10, %c0_11, %c0_12], %48 {strides = array<i32>} : memref<2x2x256xbf16, #tpu.memory_space<vmem>>, vector<1x2x256xbf16>,
    %c1 = arith.constant 1 : index
    %c0_13 = arith.constant 0 : index
    %c0_14 = arith.constant 0 : index
    %c0_15 = arith.constant 0 : index
    %49 = vector.load %arg1[%c1, %c0_13, %c0_14, %c0_15] : memref<2x6x6x64xbf16, #tpu.memory_space<vmem>>, vector<1x6x6x64xbf16>
    %50 = vector.shape_cast %49 : vector<1x6x6x64xbf16> to vector<6x6x64xbf16>
    %51 = vector.extract_strided_slice %50 {offsets = [0, 0, 0], sizes = [4, 4, 64], strides = [1, 1, 1]} : vector<6x6x64xbf16> to vector<4x4x64xbf16>
    %52 = vector.shape_cast %51 : vector<4x4x64xbf16> to vector<16x64xbf16>
    %53 = vector.extract_strided_slice %50 {offsets = [0, 1, 0], sizes = [4, 4, 64], strides = [1, 1, 1]} : vector<6x6x64xbf16> to vector<4x4x64xbf16>
    %54 = vector.shape_cast %53 : vector<4x4x64xbf16> to vector<16x64xbf16>
    %55 = vector.extract_strided_slice %50 {offsets = [0, 2, 0], sizes = [4, 4, 64], strides = [1, 1, 1]} : vector<6x6x64xbf16> to vector<4x4x64xbf16>
    %56 = vector.shape_cast %55 : vector<4x4x64xbf16> to vector<16x64xbf16>
    %57 = vector.extract_strided_slice %50 {offsets = [1, 0, 0], sizes = [4, 4, 64], strides = [1, 1, 1]} : vector<6x6x64xbf16> to vector<4x4x64xbf16>
    %58 = vector.shape_cast %57 : vector<4x4x64xbf16> to vector<16x64xbf16>
    %59 = vector.extract_strided_slice %50 {offsets = [1, 1, 0], sizes = [4, 4, 64], strides = [1, 1, 1]} : vector<6x6x64xbf16> to vector<4x4x64xbf16>
    %60 = vector.shape_cast %59 : vector<4x4x64xbf16> to vector<16x64xbf16>
    %61 = vector.extract_strided_slice %50 {offsets = [1, 2, 0], sizes = [4, 4, 64], strides = [1, 1, 1]} : vector<6x6x64xbf16> to vector<4x4x64xbf16>
    %62 = vector.shape_cast %61 : vector<4x4x64xbf16> to vector<16x64xbf16>
    %63 = vector.extract_strided_slice %50 {offsets = [2, 0, 0], sizes = [4, 4, 64], strides = [1, 1, 1]} : vector<6x6x64xbf16> to vector<4x4x64xbf16>
    %64 = vector.shape_cast %63 : vector<4x4x64xbf16> to vector<16x64xbf16>
    %65 = vector.extract_strided_slice %50 {offsets = [2, 1, 0], sizes = [4, 4, 64], strides = [1, 1, 1]} : vector<6x6x64xbf16> to vector<4x4x64xbf16>
    %66 = vector.shape_cast %65 : vector<4x4x64xbf16> to vector<16x64xbf16>
    %67 = vector.extract_strided_slice %50 {offsets = [2, 2, 0], sizes = [4, 4, 64], strides = [1, 1, 1]} : vector<6x6x64xbf16> to vector<4x4x64xbf16>
    %68 = vector.shape_cast %67 : vector<4x4x64xbf16> to vector<16x64xbf16>
    %69 = tpu.concatenate %52, %54, %56, %58, %60, %62, %64, %66, %68 in 1 : vector<16x64xbf16>, vector<16x64xbf16>, vector<16x64xbf16>, vector<16x64xbf16>, vector<16x64xbf16>, vector<16x64xbf16>, vector<16x64xbf16>, vector<16x64xbf16>, vector<16x64xbf16> -> vector<16x576xbf16>
    %c0_16 = arith.constant 0 : index
    %c0_17 = arith.constant 0 : index
    %70 = vector.load %arg2[%c0_16, %c0_17] : memref<576x128xbf16, #tpu.memory_space<vmem>>, vector<576x128xbf16>
    %cst_18 = arith.constant dense<0.000000e+00> : vector<16x128xf32>
    %71 = tpu.matmul %69, %70, %cst_18 {dimension_numbers = #tpu.dot_dimension_numbers<[1], [0], [0], [1], [0, 0, 1, 1], [], []>} : vector<16x576xbf16>, vector<576x128xbf16>, vector<16x128xf32> -> vector<16x128xf32>
    %72 = vector.broadcast %0 : vector<1x128xf32> to vector<16x128xf32>
    %73 = arith.mulf %71, %72 : vector<16x128xf32>
    %74 = vector.broadcast %1 : vector<1x128xf32> to vector<16x128xf32>
    %75 = arith.addf %73, %74 : vector<16x128xf32>
    %cst_19 = arith.constant 0.000000e+00 : f32
    %76 = vector.broadcast %cst_19 : f32 to vector<16x128xf32>
    %77 = arith.maximumf %75, %76 : vector<16x128xf32>
    %78 = vector.shape_cast %77 : vector<16x128xf32> to vector<4x4x128xf32>
    %79 = vector.shape_cast %78 : vector<4x4x128xf32> to vector<2x2x4x128xf32>
    %80 = vector.extract_strided_slice %79 {offsets = [0, 0, 0, 0], sizes = [2, 1, 4, 128], strides = [1, 1, 1, 1]} : vector<2x2x4x128xf32> to vector<2x1x4x128xf32>
    %81 = vector.shape_cast %80 : vector<2x1x4x128xf32> to vector<2x4x128xf32>
    %82 = vector.extract_strided_slice %79 {offsets = [0, 1, 0, 0], sizes = [2, 1, 4, 128], strides = [1, 1, 1, 1]} : vector<2x2x4x128xf32> to vector<2x1x4x128xf32>
    %83 = vector.shape_cast %82 : vector<2x1x4x128xf32> to vector<2x4x128xf32>
    %84 = arith.maximumf %81, %83 : vector<2x4x128xf32>
    %85 = vector.shape_cast %84 : vector<2x4x128xf32> to vector<2x2x2x128xf32>
    %86 = vector.extract_strided_slice %85 {offsets = [0, 0, 0, 0], sizes = [2, 2, 1, 128], strides = [1, 1, 1, 1]} : vector<2x2x2x128xf32> to vector<2x2x1x128xf32>
    %87 = vector.shape_cast %86 : vector<2x2x1x128xf32> to vector<2x2x128xf32>
    %88 = vector.extract_strided_slice %85 {offsets = [0, 0, 1, 0], sizes = [2, 2, 1, 128], strides = [1, 1, 1, 1]} : vector<2x2x2x128xf32> to vector<2x2x1x128xf32>
    %89 = vector.shape_cast %88 : vector<2x2x1x128xf32> to vector<2x2x128xf32>
    %90 = arith.maximumf %87, %89 : vector<2x2x128xf32>
    %91 = vector.shape_cast %90 : vector<2x2x128xf32> to vector<2x256xf32>
    %92 = arith.truncf %91 : vector<2x256xf32> to vector<2x256xbf16>
    %c1_20 = arith.constant 1 : index
    %c0_21 = arith.constant 0 : index
    %c0_22 = arith.constant 0 : index
    %93 = vector.load %arg5[%c1_20, %c0_21, %c0_22] : memref<2x2x256xbf16, #tpu.memory_space<vmem>>, vector<1x2x256xbf16>
    %94 = vector.shape_cast %93 : vector<1x2x256xbf16> to vector<2x256xbf16>
    %95 = vector.shape_cast %92 : vector<2x256xbf16> to vector<1x2x256xbf16>
    tpu.vector_store %arg5[%c1_20, %c0_21, %c0_22], %95 {strides = array<i32>} : memref<2x2x256xbf16, #tpu.memory_space<vmem>>, vector<1x2x256xbf16>,
    return
  }
  func.func @transform_0(%arg0: i32) -> (i32, i32, i32, i32) {
    %c0_i32 = arith.constant 0 : i32
    %c0_i32_0 = arith.constant 0 : i32
    %c0_i32_1 = arith.constant 0 : i32
    %c0_i32_2 = arith.constant 0 : i32
    return %arg0, %c0_i32, %c0_i32_0, %c0_i32_1 : i32, i32, i32, i32
  }
  func.func @transform_1(%arg0: i32) -> (i32, i32) {
    %c0_i32 = arith.constant 0 : i32
    %c0_i32_0 = arith.constant 0 : i32
    %c0_i32_1 = arith.constant 0 : i32
    return %c0_i32, %c0_i32_0 : i32, i32
  }
  func.func @transform_2(%arg0: i32) -> (i32, i32) {
    %c0_i32 = arith.constant 0 : i32
    %c0_i32_0 = arith.constant 0 : i32
    %c0_i32_1 = arith.constant 0 : i32
    return %c0_i32, %c0_i32_0 : i32, i32
  }
  func.func @transform_3(%arg0: i32) -> (i32, i32) {
    %c0_i32 = arith.constant 0 : i32
    %c0_i32_0 = arith.constant 0 : i32
    %c0_i32_1 = arith.constant 0 : i32
    return %c0_i32, %c0_i32_0 : i32, i32
  }
  func.func @transform_4(%arg0: i32) -> (i32, i32, i32) {
    %c0_i32 = arith.constant 0 : i32
    %c0_i32_0 = arith.constant 0 : i32
    %c0_i32_1 = arith.constant 0 : i32
    return %arg0, %c0_i32, %c0_i32_0 : i32, i32, i32
  }
}

module attributes {stable_mosaic.version = 11 : i64} {
  func.func @_matmul_bias_kernel(%arg0: i32, %arg1: memref<8x256xbf16, #tpu.memory_space<vmem>>, %arg2: memref<256x768xbf16, #tpu.memory_space<vmem>>, %arg3: memref<1x768xf32, #tpu.memory_space<vmem>>, %arg4: memref<8x768xf32, #tpu.memory_space<vmem>>) attributes {dimension_semantics = [#tpu.dimension_semantics<parallel>], iteration_bounds = array<i64: 1>, scalar_prefetch = 0 : i64, scratch_operands = 0 : i64, tpu.core_type = #tpu.core_type<tc>, window_params = [{transform_indices = @transform_0, window_bounds = array<i64: 8, 256>}, {pipeline_mode = #tpu.pipeline_mode<synchronous>, transform_indices = @transform_1, window_bounds = array<i64: 256, 768>}, {pipeline_mode = #tpu.pipeline_mode<synchronous>, transform_indices = @transform_2, window_bounds = array<i64: 1, 768>}, {transform_indices = @transform_3, window_bounds = array<i64: 8, 768>}]} {
    %c0 = arith.constant 0 : index
    %c0_0 = arith.constant 0 : index
    %0 = vector.load %arg1[%c0, %c0_0] : memref<8x256xbf16, #tpu.memory_space<vmem>>, vector<8x256xbf16>
    %c0_1 = arith.constant 0 : index
    %c0_2 = arith.constant 0 : index
    %1 = vector.load %arg2[%c0_1, %c0_2] : memref<256x768xbf16, #tpu.memory_space<vmem>>, vector<256x768xbf16>
    %cst = arith.constant dense<0.000000e+00> : vector<8x768xf32>
    %2 = tpu.matmul %0, %1, %cst {dimension_numbers = #tpu.dot_dimension_numbers<[1], [0], [0], [1], [0, 0, 1, 1], [], []>} : vector<8x256xbf16>, vector<256x768xbf16>, vector<8x768xf32> -> vector<8x768xf32>
    %c0_3 = arith.constant 0 : index
    %c0_4 = arith.constant 0 : index
    %3 = vector.load %arg3[%c0_3, %c0_4] : memref<1x768xf32, #tpu.memory_space<vmem>>, vector<1x768xf32>
    %4 = vector.broadcast %3 : vector<1x768xf32> to vector<8x768xf32>
    %5 = arith.addf %2, %4 : vector<8x768xf32>
    %c0_5 = arith.constant 0 : index
    %c0_6 = arith.constant 0 : index
    %6 = vector.load %arg4[%c0_5, %c0_6] : memref<8x768xf32, #tpu.memory_space<vmem>>, vector<8x768xf32>
    tpu.vector_store %arg4[%c0_5, %c0_6], %5 {strides = array<i32>} : memref<8x768xf32, #tpu.memory_space<vmem>>, vector<8x768xf32>,
    return
  }
  func.func @transform_0(%arg0: i32) -> (i32, i32) {
    %c0_i32 = arith.constant 0 : i32
    %c0_i32_0 = arith.constant 0 : i32
    return %arg0, %c0_i32 : i32, i32
  }
  func.func @transform_1(%arg0: i32) -> (i32, i32) {
    %c0_i32 = arith.constant 0 : i32
    %c0_i32_0 = arith.constant 0 : i32
    %c0_i32_1 = arith.constant 0 : i32
    return %c0_i32, %c0_i32_0 : i32, i32
  }
  func.func @transform_2(%arg0: i32) -> (i32, i32) {
    %c0_i32 = arith.constant 0 : i32
    %c0_i32_0 = arith.constant 0 : i32
    %c0_i32_1 = arith.constant 0 : i32
    return %c0_i32, %c0_i32_0 : i32, i32
  }
  func.func @transform_3(%arg0: i32) -> (i32, i32) {
    %c0_i32 = arith.constant 0 : i32
    %c0_i32_0 = arith.constant 0 : i32
    return %arg0, %c0_i32 : i32, i32
  }
}

module attributes {stable_mosaic.version = 11 : i64} {
  func.func @_bigru_layer_kernel(%arg0: memref<2x2x768xf32, #tpu.memory_space<vmem>>, %arg1: memref<256x768xbf16, #tpu.memory_space<vmem>>, %arg2: memref<1x768xf32, #tpu.memory_space<vmem>>, %arg3: memref<2x2x256xbf16, #tpu.memory_space<vmem>>) attributes {dimension_semantics = [], scalar_prefetch = 0 : i64, scratch_operands = 0 : i64, tpu.core_type = #tpu.core_type<tc>} {
    %0 = tpu.iota {dimensions = array<i32: 1>} : vector<1x768xi32>
    %c256_i32 = arith.constant 256 : i32
    %c0_i32 = arith.constant 0 : i32
    %1 = arith.cmpi eq, %c256_i32, %c0_i32 : i32
    %c1_i32 = arith.constant 1 : i32
    %2 = arith.select %1, %c1_i32, %c256_i32 : i32
    %3 = vector.broadcast %2 : i32 to vector<1x768xi32>
    %4 = arith.remsi %0, %3 : vector<1x768xi32>
    %c0_i32_0 = arith.constant 0 : i32
    %5 = vector.broadcast %c0_i32_0 : i32 to vector<1x768xi32>
    %6 = arith.cmpi ne, %4, %5 : vector<1x768xi32>
    %c0_i32_1 = arith.constant 0 : i32
    %7 = vector.broadcast %c0_i32_1 : i32 to vector<1x768xi32>
    %8 = arith.cmpi slt, %4, %7 : vector<1x768xi32>
    %c0_i32_2 = arith.constant 0 : i32
    %9 = arith.cmpi slt, %2, %c0_i32_2 : i32
    %10 = vector.broadcast %9 : i1 to vector<1x768xi1>
    %11 = vector.broadcast %10 : vector<1x768xi1> to vector<1x768xi1>
    %12 = arith.xori %8, %11 : vector<1x768xi1>
    %13 = arith.andi %12, %6 : vector<1x768xi1>
    %14 = vector.broadcast %2 : i32 to vector<1x768xi32>
    %15 = arith.addi %4, %14 : vector<1x768xi32>
    %16 = arith.select %13, %15, %4 : vector<1x768xi1>, vector<1x768xi32>
    %c128_i32 = arith.constant 128 : i32
    %17 = vector.broadcast %c128_i32 : i32 to vector<1x768xi32>
    %18 = arith.cmpi slt, %16, %17 : vector<1x768xi32>
    %c0 = arith.constant 0 : index
    %c0_3 = arith.constant 0 : index
    %19 = vector.load %arg1[%c0, %c0_3] : memref<256x768xbf16, #tpu.memory_space<vmem>>, vector<256x768xbf16>
    %c0_4 = arith.constant 0 : index
    %c0_5 = arith.constant 0 : index
    %20 = vector.load %arg2[%c0_4, %c0_5] : memref<1x768xf32, #tpu.memory_space<vmem>>, vector<1x768xf32>
    %cst = arith.constant 0.000000e+00 : bf16
    %21 = vector.broadcast %cst : bf16 to vector<2x256xbf16>
    %c0_i32_6 = arith.constant 0 : i32
    %c1_i32_7 = arith.constant 1 : i32
    %22 = arith.subi %c1_i32_7, %c0_i32_6 : i32
    %23 = arith.index_cast %c0_i32_6 : i32 to index
    %c0_8 = arith.constant 0 : index
    %c0_9 = arith.constant 0 : index
    %24 = vector.load %arg0[%23, %c0_8, %c0_9] : memref<2x2x768xf32, #tpu.memory_space<vmem>>, vector<1x2x768xf32>
    %25 = vector.shape_cast %24 : vector<1x2x768xf32> to vector<2x768xf32>
    %26 = arith.index_cast %22 : i32 to index
    %c0_10 = arith.constant 0 : index
    %c0_11 = arith.constant 0 : index
    %27 = vector.load %arg0[%26, %c0_10, %c0_11] : memref<2x2x768xf32, #tpu.memory_space<vmem>>, vector<1x2x768xf32>
    %28 = vector.shape_cast %27 : vector<1x2x768xf32> to vector<2x768xf32>
    %29 = vector.shape_cast %18 : vector<1x768xi1> to vector<1x768xi1>
    %30 = vector.broadcast %29 : vector<1x768xi1> to vector<2x768xi1>
    %31 = arith.select %30, %25, %28 : vector<2x768xi1>, vector<2x768xf32>
    %cst_12 = arith.constant dense<0.000000e+00> : vector<2x768xf32>
    %32 = tpu.matmul %21, %19, %cst_12 {dimension_numbers = #tpu.dot_dimension_numbers<[1], [0], [0], [1], [0, 0, 1, 1], [], []>} : vector<2x256xbf16>, vector<256x768xbf16>, vector<2x768xf32> -> vector<2x768xf32>
    %33 = vector.broadcast %20 : vector<1x768xf32> to vector<2x768xf32>
    %34 = arith.addf %32, %33 : vector<2x768xf32>
    %35 = vector.extract_strided_slice %31 {offsets = [0, 0], sizes = [2, 512], strides = [1, 1]} : vector<2x768xf32> to vector<2x512xf32>
    %36 = vector.extract_strided_slice %34 {offsets = [0, 0], sizes = [2, 512], strides = [1, 1]} : vector<2x768xf32> to vector<2x512xf32>
    %37 = arith.addf %35, %36 : vector<2x512xf32>
    %38 = arith.negf %37 : vector<2x512xf32>
    %39 = math.exp %38 : vector<2x512xf32>
    %cst_13 = arith.constant 1.000000e+00 : f32
    %40 = vector.broadcast %cst_13 : f32 to vector<2x512xf32>
    %41 = arith.addf %40, %39 : vector<2x512xf32>
    %42 = arith.divf %40, %41 : vector<2x512xf32>
    %43 = vector.extract_strided_slice %42 {offsets = [0, 0], sizes = [2, 256], strides = [1, 1]} : vector<2x512xf32> to vector<2x256xf32>
    %44 = vector.extract_strided_slice %42 {offsets = [0, 256], sizes = [2, 256], strides = [1, 1]} : vector<2x512xf32> to vector<2x256xf32>
    %45 = vector.extract_strided_slice %31 {offsets = [0, 512], sizes = [2, 256], strides = [1, 1]} : vector<2x768xf32> to vector<2x256xf32>
    %46 = vector.extract_strided_slice %34 {offsets = [0, 512], sizes = [2, 256], strides = [1, 1]} : vector<2x768xf32> to vector<2x256xf32>
    %47 = arith.mulf %43, %46 : vector<2x256xf32>
    %48 = arith.addf %45, %47 : vector<2x256xf32>
    %49 = math.tanh %48 : vector<2x256xf32>
    %cst_14 = arith.constant 1.000000e+00 : f32
    %50 = vector.broadcast %cst_14 : f32 to vector<2x256xf32>
    %51 = arith.subf %50, %44 : vector<2x256xf32>
    %52 = arith.mulf %51, %49 : vector<2x256xf32>
    %53 = arith.extf %21 : vector<2x256xbf16> to vector<2x256xf32>
    %54 = arith.mulf %44, %53 : vector<2x256xf32>
    %55 = arith.addf %52, %54 : vector<2x256xf32>
    %56 = arith.truncf %55 : vector<2x256xf32> to vector<2x256xbf16>
    %57 = vector.extract_strided_slice %56 {offsets = [0, 0], sizes = [2, 128], strides = [1, 1]} : vector<2x256xbf16> to vector<2x128xbf16>
    %58 = vector.shape_cast %57 : vector<2x128xbf16> to vector<1x2x128xbf16>
    %59 = arith.index_cast %c0_i32_6 : i32 to index
    %c0_15 = arith.constant 0 : index
    %c0_16 = arith.constant 0 : index
    %60 = vector.load %arg3[%59, %c0_15, %c0_16] : memref<2x2x256xbf16, #tpu.memory_space<vmem>>, vector<1x2x128xbf16>
    tpu.vector_store %arg3[%59, %c0_15, %c0_16], %58 {strides = array<i32>} : memref<2x2x256xbf16, #tpu.memory_space<vmem>>, vector<1x2x128xbf16>,
    %61 = vector.extract_strided_slice %56 {offsets = [0, 128], sizes = [2, 128], strides = [1, 1]} : vector<2x256xbf16> to vector<2x128xbf16>
    %62 = vector.shape_cast %61 : vector<2x128xbf16> to vector<1x2x128xbf16>
    %63 = arith.index_cast %22 : i32 to index
    %c0_17 = arith.constant 0 : index
    %c128 = arith.constant 128 : index
    %64 = vector.load %arg3[%63, %c0_17, %c128] : memref<2x2x256xbf16, #tpu.memory_space<vmem>>, vector<1x2x128xbf16>
    tpu.vector_store %arg3[%63, %c0_17, %c128], %62 {strides = array<i32>} : memref<2x2x256xbf16, #tpu.memory_space<vmem>>, vector<1x2x128xbf16>,
    %c1_i32_18 = arith.constant 1 : i32
    %c1_i32_19 = arith.constant 1 : i32
    %65 = arith.subi %c1_i32_19, %c1_i32_18 : i32
    %66 = arith.index_cast %c1_i32_18 : i32 to index
    %c0_20 = arith.constant 0 : index
    %c0_21 = arith.constant 0 : index
    %67 = vector.load %arg0[%66, %c0_20, %c0_21] : memref<2x2x768xf32, #tpu.memory_space<vmem>>, vector<1x2x768xf32>
    %68 = vector.shape_cast %67 : vector<1x2x768xf32> to vector<2x768xf32>
    %69 = arith.index_cast %65 : i32 to index
    %c0_22 = arith.constant 0 : index
    %c0_23 = arith.constant 0 : index
    %70 = vector.load %arg0[%69, %c0_22, %c0_23] : memref<2x2x768xf32, #tpu.memory_space<vmem>>, vector<1x2x768xf32>
    %71 = vector.shape_cast %70 : vector<1x2x768xf32> to vector<2x768xf32>
    %72 = vector.shape_cast %18 : vector<1x768xi1> to vector<1x768xi1>
    %73 = vector.broadcast %72 : vector<1x768xi1> to vector<2x768xi1>
    %74 = arith.select %73, %68, %71 : vector<2x768xi1>, vector<2x768xf32>
    %cst_24 = arith.constant dense<0.000000e+00> : vector<2x768xf32>
    %75 = tpu.matmul %56, %19, %cst_24 {dimension_numbers = #tpu.dot_dimension_numbers<[1], [0], [0], [1], [0, 0, 1, 1], [], []>} : vector<2x256xbf16>, vector<256x768xbf16>, vector<2x768xf32> -> vector<2x768xf32>
    %76 = vector.broadcast %20 : vector<1x768xf32> to vector<2x768xf32>
    %77 = arith.addf %75, %76 : vector<2x768xf32>
    %78 = vector.extract_strided_slice %74 {offsets = [0, 0], sizes = [2, 512], strides = [1, 1]} : vector<2x768xf32> to vector<2x512xf32>
    %79 = vector.extract_strided_slice %77 {offsets = [0, 0], sizes = [2, 512], strides = [1, 1]} : vector<2x768xf32> to vector<2x512xf32>
    %80 = arith.addf %78, %79 : vector<2x512xf32>
    %81 = arith.negf %80 : vector<2x512xf32>
    %82 = math.exp %81 : vector<2x512xf32>
    %cst_25 = arith.constant 1.000000e+00 : f32
    %83 = vector.broadcast %cst_25 : f32 to vector<2x512xf32>
    %84 = arith.addf %83, %82 : vector<2x512xf32>
    %85 = arith.divf %83, %84 : vector<2x512xf32>
    %86 = vector.extract_strided_slice %85 {offsets = [0, 0], sizes = [2, 256], strides = [1, 1]} : vector<2x512xf32> to vector<2x256xf32>
    %87 = vector.extract_strided_slice %85 {offsets = [0, 256], sizes = [2, 256], strides = [1, 1]} : vector<2x512xf32> to vector<2x256xf32>
    %88 = vector.extract_strided_slice %74 {offsets = [0, 512], sizes = [2, 256], strides = [1, 1]} : vector<2x768xf32> to vector<2x256xf32>
    %89 = vector.extract_strided_slice %77 {offsets = [0, 512], sizes = [2, 256], strides = [1, 1]} : vector<2x768xf32> to vector<2x256xf32>
    %90 = arith.mulf %86, %89 : vector<2x256xf32>
    %91 = arith.addf %88, %90 : vector<2x256xf32>
    %92 = math.tanh %91 : vector<2x256xf32>
    %cst_26 = arith.constant 1.000000e+00 : f32
    %93 = vector.broadcast %cst_26 : f32 to vector<2x256xf32>
    %94 = arith.subf %93, %87 : vector<2x256xf32>
    %95 = arith.mulf %94, %92 : vector<2x256xf32>
    %96 = arith.extf %56 : vector<2x256xbf16> to vector<2x256xf32>
    %97 = arith.mulf %87, %96 : vector<2x256xf32>
    %98 = arith.addf %95, %97 : vector<2x256xf32>
    %99 = arith.truncf %98 : vector<2x256xf32> to vector<2x256xbf16>
    %100 = vector.extract_strided_slice %99 {offsets = [0, 0], sizes = [2, 128], strides = [1, 1]} : vector<2x256xbf16> to vector<2x128xbf16>
    %101 = vector.shape_cast %100 : vector<2x128xbf16> to vector<1x2x128xbf16>
    %102 = arith.index_cast %c1_i32_18 : i32 to index
    %c0_27 = arith.constant 0 : index
    %c0_28 = arith.constant 0 : index
    %103 = vector.load %arg3[%102, %c0_27, %c0_28] : memref<2x2x256xbf16, #tpu.memory_space<vmem>>, vector<1x2x128xbf16>
    tpu.vector_store %arg3[%102, %c0_27, %c0_28], %101 {strides = array<i32>} : memref<2x2x256xbf16, #tpu.memory_space<vmem>>, vector<1x2x128xbf16>,
    %104 = vector.extract_strided_slice %99 {offsets = [0, 128], sizes = [2, 128], strides = [1, 1]} : vector<2x256xbf16> to vector<2x128xbf16>
    %105 = vector.shape_cast %104 : vector<2x128xbf16> to vector<1x2x128xbf16>
    %106 = arith.index_cast %65 : i32 to index
    %c0_29 = arith.constant 0 : index
    %c128_30 = arith.constant 128 : index
    %107 = vector.load %arg3[%106, %c0_29, %c128_30] : memref<2x2x256xbf16, #tpu.memory_space<vmem>>, vector<1x2x128xbf16>
    tpu.vector_store %arg3[%106, %c0_29, %c128_30], %105 {strides = array<i32>} : memref<2x2x256xbf16, #tpu.memory_space<vmem>>, vector<1x2x128xbf16>,
    %c2_i32 = arith.constant 2 : i32
    return
  }
}

module attributes {stable_mosaic.version = 11 : i64} {
  func.func @_head_kernel(%arg0: memref<2x256xbf16, #tpu.memory_space<vmem>>, %arg1: memref<256x64xbf16, #tpu.memory_space<vmem>>, %arg2: memref<1x64xf32, #tpu.memory_space<vmem>>, %arg3: memref<64x10xbf16, #tpu.memory_space<vmem>>, %arg4: memref<1x10xf32, #tpu.memory_space<vmem>>, %arg5: memref<2x10xf32, #tpu.memory_space<vmem>>) attributes {dimension_semantics = [], scalar_prefetch = 0 : i64, scratch_operands = 0 : i64, tpu.core_type = #tpu.core_type<tc>} {
    %c0 = arith.constant 0 : index
    %c0_0 = arith.constant 0 : index
    %0 = vector.load %arg0[%c0, %c0_0] : memref<2x256xbf16, #tpu.memory_space<vmem>>, vector<2x256xbf16>
    %c0_1 = arith.constant 0 : index
    %c0_2 = arith.constant 0 : index
    %1 = vector.load %arg1[%c0_1, %c0_2] : memref<256x64xbf16, #tpu.memory_space<vmem>>, vector<256x64xbf16>
    %cst = arith.constant dense<0.000000e+00> : vector<2x64xf32>
    %2 = tpu.matmul %0, %1, %cst {dimension_numbers = #tpu.dot_dimension_numbers<[1], [0], [0], [1], [0, 0, 1, 1], [], []>} : vector<2x256xbf16>, vector<256x64xbf16>, vector<2x64xf32> -> vector<2x64xf32>
    %c0_3 = arith.constant 0 : index
    %c0_4 = arith.constant 0 : index
    %3 = vector.load %arg2[%c0_3, %c0_4] : memref<1x64xf32, #tpu.memory_space<vmem>>, vector<1x64xf32>
    %4 = vector.broadcast %3 : vector<1x64xf32> to vector<2x64xf32>
    %5 = arith.addf %2, %4 : vector<2x64xf32>
    %6 = arith.truncf %5 : vector<2x64xf32> to vector<2x64xbf16>
    %c0_5 = arith.constant 0 : index
    %c0_6 = arith.constant 0 : index
    %7 = vector.load %arg3[%c0_5, %c0_6] : memref<64x10xbf16, #tpu.memory_space<vmem>>, vector<64x10xbf16>
    %cst_7 = arith.constant dense<0.000000e+00> : vector<2x10xf32>
    %8 = tpu.matmul %6, %7, %cst_7 {dimension_numbers = #tpu.dot_dimension_numbers<[1], [0], [0], [1], [0, 0, 1, 1], [], []>} : vector<2x64xbf16>, vector<64x10xbf16>, vector<2x10xf32> -> vector<2x10xf32>
    %c0_8 = arith.constant 0 : index
    %c0_9 = arith.constant 0 : index
    %9 = vector.load %arg4[%c0_8, %c0_9] : memref<1x10xf32, #tpu.memory_space<vmem>>, vector<1x10xf32>
    %10 = vector.broadcast %9 : vector<1x10xf32> to vector<2x10xf32>
    %11 = arith.addf %8, %10 : vector<2x10xf32>
    %c0_10 = arith.constant 0 : index
    %c0_11 = arith.constant 0 : index
    %12 = vector.load %arg5[%c0_10, %c0_11] : memref<2x10xf32, #tpu.memory_space<vmem>>, vector<2x10xf32>
    tpu.vector_store %arg5[%c0_10, %c0_11], %11 {strides = array<i32>} : memref<2x10xf32, #tpu.memory_space<vmem>>, vector<2x10xf32>,
    return
  }
}

</mosaic_0001>

<bundles_post_ra>
// kernel: crnn_forward.9
= control target key start
LH: loop header
LB: loop body
LE: loop exit
PB: predicated region body
PF: predicated region fallthrough
CT: control target
= control target key end

     0   :  { %vm171_vm0 = vcmask 1042432   ;;  %vm172_vm1 = vcmask 1046532   ;;  %vm40_vm2 = vsmask.f32 3328  ;;  %s2489_s29 = smov 64   ;;  %s2490_s12 = smov 32   ;;  %s3585_s0 = inlined_call_operand.vmem [shape: bf16[2,10,10,32], index: 0, kind: input, shape index: {}]   ;;  %s3586_s1 = inlined_call_operand.vmem [shape: bf16[288,64], index: 1, kind: input, shape index: {}]   ;;  %s3587_s2 = inlined_call_operand.vmem [shape: f32[1,64], index: 2, kind: input, shape index: {}]   ;;  %s3588_s3 = inlined_call_operand.vmem [shape: f32[1,64], index: 3, kind: input, shape index: {}]   ;;  %s3589_s4 = inlined_call_operand.vmem [shape: bf16[2,4,256], index: 4, kind: output, shape index: {}]  }
   0x1   :  { %v2522_v0 = vld [vmem:[%s3585_s0 + $0x10] sm:$0xf]  ;;  %v2527_v1 = vld [vmem:[%s3585_s0 + $0x18] sm:$0xf]  ;;  %v2532_v2 = vld [vmem:[%s3585_s0 + $0x8] sm:$0xf] }
   0x2   :  { %v2536_v3 = vcombine.low %v2522_v0, %v2527_v1  ;;  %v23_v4 = vld [vmem:[%s3585_s0 + $0xc] sm:$0x1]  ;;  %v25_v5 = vld [vmem:[%s3585_s0 + $0x14] sm:$0x1]  ;;  %v2547_v6 = vld [vmem:[%s3585_s0 + $0x1c] sm:$0x1]  ;;  %v2145_v7 = vcombine.low %v2532_v2, %v2522_v0 }
   0x3   :  { %v67_v8 = vshll.u32 %v23_v4, 16  ;;  %v81_v9 = vshll.u32 %v25_v5, 16  ;;  %vm2551_vm3 = vmor %vm171_vm0, %vm172_vm1  ;;  %v2124_v11 = vrot.slane %v2532_v2, 9  ;;  %v180_v12 = vrot.slane %v23_v4, 5  ;;  %v2559_v13 = vld [vmem:[%s3585_s0] sm:$0xf] }
   0x4   :  { %331 = vrot.lane.b32.xlu1 %v2536_v3, %s2489_s29  ;;  %v2125_v14 = vrot.slane %v2522_v0, 9  ;;  %v184_v15 = vrot.slane %v25_v5, 5  ;;  %v2126_v16 = vrot.slane %v2527_v1, 9  ;;  %v188_v17 = vrot.slane %v2547_v6, 5  ;;  %v21_v18 = vld [vmem:[%s3585_s0 + $0x4] sm:$0x1] }
   0x5   :  { %v181_v19 = vsel %vm2551_vm3, %v2124_v11, %v180_v12  ;;  %v2123_v20 = vrot.slane %v2559_v13, 9  ;;  %v176_v21 = vrot.slane %v21_v18, 5  ;;  %v2575_v22 = vld [vmem:[%s3585_s0 + $0x20] sm:$0xf]  ;;  %v2580_v23 = vld [vmem:[%s3585_s0 + $0x24] sm:$0x1] }
   0x6   :  { %v185_v25 = vsel %vm2551_vm3, %v2125_v14, %v184_v15  ;;  %v189_v26 = vsel %vm2551_vm3, %v2126_v16, %v188_v17  ;;  %v2127_v27 = vrot.slane %v2575_v22, 9  ;;  %v192_v28 = vrot.slane %v2580_v23, 5  ;;  %v2451_v29 = vld [vmem:[%s3586_s1 + $0x40] sm:$0xff]   ;;  %v2453_v54 = vld [vmem:[%s3586_s1 + $0x48] sm:$0xff]   ;;  %s2491_s21 = smov 96   ;;  %v2456_v16 = vld [vmem:[%s3586_s1 + $0x10] sm:$0xff]  }
   0x7   :  { %v2593_v30 = vcombine.low %v185_v25, %v189_v26  ;;  %v2153_v31 = vcombine.low %v181_v19, %v185_v25  ;;  %v177_v32 = vsel %vm2551_vm3, %v2123_v20, %v176_v21  ;;  %vm41_vm4 = vsmask.f32 7440  ;;  %2304 = vmatprep.subr.bf16.mxu0 %v2451_v29  ;;  %v2452_v41 = vld [vmem:[%s3586_s1] sm:$0xff]   ;;  %v2629_v60 = vld [vmem:[%s3585_s0 + $0x28] sm:$0xf] }
   0x8   :  { %v2141_v33 = vcombine.low %v177_v32, %v181_v19  ;;  %v2599_v34 = vsel %vm2551_vm3, %v2127_v27, %v192_v28  ;;  %v44_v35 = vshrl.u32 %v2559_v13, 16  ;;  %v47_v36 = vshll.u32 %v2559_v13, 16  ;;  %2305 = vmatpush3.bf16.msra.mxu0 %v2452_v41  ;;  %vm2620_vm5 = vmor %vm40_vm2, %vm41_vm4  ;;  %v2454_v61 = vld [vmem:[%s3586_s1 + $0x8] sm:$0xff]   ;;  %v2674_v29 = vld [vmem:[%s3585_s0 + $0x54] sm:$0x1] }
   0x9   :  { %321 = vrot.lane.b32.xlu0 %v2153_v31, %s2490_s12  ;;  %v2154_v37 = vcombine.low %v189_v26, %v2599_v34  ;;  %v53_v38 = vshll.u32 %v21_v18, 16  ;;  %v58_v39 = vshrl.u32 %v2532_v2, 16  ;;  %v61_v40 = vshll.u32 %v2532_v2, 16  ;;  %2306 = vmatprep.subr.bf16.mxu0 %v2453_v54  ;;  %v2662_v20 = vld [vmem:[%s3585_s0 + $0x2c] sm:$0x1]  ;;  %v2457_v31 = vld [vmem:[%s3586_s1 + $0x58] sm:$0xff]  }
   0xa   :  { %290 = vrot.lane.b32.xlu1 %v2141_v33, %s2489_s29  ;;  %v46_v42 = vrot.slane %v44_v35, 4  ;;  %v49_v43 = vrot.slane %v47_v36, 5  ;;  %v69_v44 = vrot.slane %v67_v8, 5  ;;  %v72_v45 = vshrl.u32 %v2522_v0, 16  ;;  %v2694_v41 = vld [vmem:[%s3585_s0 + $0x58] sm:$0xf] }
   0xb   :  { %v55_v46 = vrot.slane %v53_v38, 5  ;;  %v60_v47 = vrot.slane %v58_v39, 4  ;;  %v63_v48 = vrot.slane %v61_v40, 5  ;;  %v75_v49 = vshll.u32 %v2522_v0, 16  ;;  %v2455_v0 = vld [vmem:[%s3586_s1 + $0x50] sm:$0xff]  }
   0xc   :  { %v50_v50 = vor.u32 %v49_v43, %v46_v42  ;;  %v74_v51 = vrot.slane %v72_v45, 4  ;;  %v83_v52 = vrot.slane %v81_v9, 5  ;;  %v86_v53 = vshrl.u32 %v2527_v1, 16  ;;  %2307 = vmatpush3.bf16.msra.mxu0 %v2454_v61  ;;  %v2207_v45 = vld [vmem:[%s3585_s0 + $0x5c] sm:$0x1]  ;;  %v2461_v61 = vld [vmem:[%s3586_s1 + $0x80] sm:$0xff]  }
   0xd   :  { %323 = vrot.lane.b32.xlu0 %v2154_v37, %s2490_s12  ;;  %v64_v56 = vor.u32 %v63_v48, %v60_v47  ;;  %v77_v57 = vrot.slane %v75_v49, 5  ;;  %v89_v58 = vshll.u32 %v2527_v1, 16  ;;  %v95_v59 = vshll.u32 %v2547_v6, 16  ;;  %2308 = vmatprep.subr.bf16.mxu0 %v2455_v0  ;;  %v2458_v37 = vld [vmem:[%s3586_s1 + $0x18] sm:$0xff]   ;;  %v2459_v48 = vld [vmem:[%s3586_s1 + $0x60] sm:$0xff]  }
   0xe   :  { %303 = vrot.lane.b32.xlu1 %v2145_v7, %s2491_s21  ;;  %v51_v62 = vrot.slane %v50_v50, 4  ;;  %v88_v63 = vrot.slane %v86_v53, 4  ;;  %v2640_v4 = vcombine.low %v2575_v22, %v2629_v60  ;;  %v2146_v5 = vcombine.low %v2527_v1, %v2575_v22  ;;  %v2714_v53 = vld [vmem:[%s3585_s0 + $0x60] sm:$0xf]  ;;  %2396 = vmatprep.subr.bf16.mxu1 %v2461_v61 }
   0xf   :  { %v65_v6 = vrot.slane %v64_v56, 4  ;;  %v78_v8 = vor.u32 %v77_v57, %v74_v51  ;;  %v91_v9 = vrot.slane %v89_v58, 5  ;;  %v97_v11 = vrot.slane %v95_v59, 5  ;;  %v2460_v59 = vld [vmem:[%s3586_s1 + $0x20] sm:$0xff]   ;;  %2397 = vmatpush3.bf16.msra.mxu1 %v2461_v61 }
  0x10   :  { %v56_v7 = vsel %vm2620_vm5, %v51_v62, %v55_v46  ;;  %v100_v12 = vshrl.u32 %v2575_v22, 16  ;;  %v103_v14 = vshll.u32 %v2575_v22, 16  ;;  %v109_v15 = vshll.u32 %v2580_v23, 16  ;;  %v2668_v23 = vld [vmem:[%s3585_s0 + $0x50] sm:$0xf]  ;;  %2309 = vmatpush3.bf16.msra.mxu0 %v2456_v16 }
  0x11   :  { %v2657_v17 = vsel %vm2620_vm5, %v65_v6, %v69_v44  ;;  %v79_v18 = vrot.slane %v78_v8, 4  ;;  %v92_v19 = vor.u32 %v91_v9, %v88_v63  ;;  %v114_v21 = vshrl.u32 %v2629_v60, 16  ;;  %2310 = vmatprep.subr.bf16.mxu0 %v2457_v31  ;;  %v2209_v8 = vld [vmem:[%s3585_s0 + $0x64] sm:$0x1] }
  0x12   :  { %v2137_v25 = vcombine.low %v56_v7, %v2657_v17  ;;  %v102_v26 = vrot.slane %v100_v12, 4  ;;  %v105_v27 = vrot.slane %v103_v14, 5  ;;  %v111_v28 = vrot.slane %v109_v15, 5  ;;  %v2739_v14 = vld [vmem:[%s3585_s0 + $0x30] sm:$0xf]  ;;  %v2462_v15 = vld [vmem:[%s3586_s1 + $0x68] sm:$0xff]  }
  0x13   :  { %v2681_v32 = vsel %vm2620_vm5, %v79_v18, %v83_v52  ;;  %v93_v33 = vrot.slane %v92_v19, 4  ;;  %v116_v35 = vrot.slane %v114_v21, 4  ;;  %v117_v36 = vshll.u32 %v2629_v60, 16 }
  0x14   :  { %270 = vrot.lane.b32.xlu0 %v2137_v25, %s2490_s12  ;;  %v106_v39 = vor.u32 %v105_v27, %v102_v26  ;;  %v123_v40 = vshll.u32 %v2662_v20, 16  ;;  %v1104_v42 = vshrl.u32 %v2668_v23, 16  ;;  %v1107_v46 = vshll.u32 %v2668_v23, 16  ;;  %2311 = vmatpush3.bf16.msra.mxu0 %v2458_v37  ;;  %v2748_v25 = vld [vmem:[%s3585_s0 + $0x34] sm:$0x1] }
  0x15   :  { %v2699_v43 = vsel %vm2620_vm5, %v93_v33, %v97_v11  ;;  %v119_v44 = vrot.slane %v117_v36, 5  ;;  %v1113_v47 = vshll.u32 %v2674_v29, 16  ;;  %v1118_v58 = vshrl.u32 %v2694_v41, 16  ;;  %2312 = vmatprep.subr.bf16.mxu0 %v2459_v48  ;;  %v2463_v33 = vld [vmem:[%s3586_s1 + $0x28] sm:$0xff]  }
  0x16   :  { %v2138_v49 = vcombine.low %v2681_v32, %v2699_v43  ;;  %v107_v50 = vrot.slane %v106_v39, 4  ;;  %v125_v51 = vrot.slane %v123_v40, 5  ;;  %v1106_v52 = vrot.slane %v1104_v42, 4  ;;  %v2774_v40 = vld [vmem:[%s3585_s0 + $0x68] sm:$0xf] }
  0x17   :  { %v120_v54 = vor.u32 %v119_v44, %v116_v35  ;;  %v1109_v56 = vrot.slane %v1107_v46, 5  ;;  %v1115_v57 = vrot.slane %v1113_v47, 5  ;;  %v1121_v63 = vshll.u32 %v2694_v41, 16  ;;  %v2785_v46 = vld [vmem:[%s3585_s0 + $0x6c] sm:$0x1] }
  0x18   :  { %272 = vrot.lane.b32.xlu1 %v2138_v49, %s2490_s12  ;;  %341 = vrot.lane.b32.xlu0 %v2138_v49, %s2491_s21  ;;  %v2727_v62 = vsel %vm2620_vm5, %v107_v50, %v111_v28  ;;  %v1127_v6 = vshll.u32 %v2207_v45, 16  ;;  %v2225_v9 = vrot.slane %v2694_v41, 9  ;;  %v1120_v12 = vrot.slane %v1118_v58, 4  ;;  %v2464_v49 = vld [vmem:[%s3586_s1 + $0x88] sm:$0xff]  }
  0x19   :  { %v121_v11 = vrot.slane %v120_v54, 4  ;;  %v1110_v7 = vor.u32 %v1109_v56, %v1106_v52  ;;  %v1123_v16 = vrot.slane %v1121_v63, 5  ;;  %v1237_v19 = vrot.slane %v2207_v45, 5  ;;  %2313 = vmatpush3.bf16.msra.mxu0 %v2460_v59  ;;  %v2465_v56 = vld [vmem:[%s3586_s1 + $0x70] sm:$0xff]   ;;  %2398 = vmatprep.subr.bf16.mxu1 %v2464_v49 }
  0x1a   :  { %v1129_v18 = vrot.slane %v1127_v6, 5  ;;  %v2226_v21 = vrot.slane %v2714_v53, 9  ;;  %v1241_v28 = vrot.slane %v2209_v8, 5  ;;  %v2128_v31 = vrot.slane %v2629_v60, 9  ;;  %2314 = vmatprep.subr.bf16.mxu0 %v2462_v15  ;;  %2399 = vmatpush3.bf16.msra.mxu1 %v2464_v49  ;;  %v2860_v49 = vld [vmem:[%s3585_s0 + $0x70] sm:$0xf] }
  0x1b   :  { %v2752_v26 = vsel %vm2620_vm5, %v121_v11, %v125_v51  ;;  %v1111_v27 = vrot.slane %v1110_v7, 4  ;;  %v1124_v36 = vor.u32 %v1123_v16, %v1120_v12  ;;  %v2768_v37 = vsel %vm2551_vm3, %v2225_v9, %v1237_v19  ;;  %v2829_v16 = vld [vmem:[%s3585_s0 + $0x38] sm:$0xf] }
  0x1c   :  { %292 = vrot.lane.b32.xlu1 %v2593_v30, %s2489_s29  ;;  %333 = vrot.lane.b32.xlu0 %v2640_v4, %s2489_s29  ;;  %v2764_v35 = vcombine.low %v2727_v62, %v2752_v26  ;;  %v196_v39 = vrot.slane %v2662_v20, 5  ;;  %v2778_v42 = vsel %vm2551_vm3, %v2226_v21, %v1241_v28  ;;  %v2129_v44 = vrot.slane %v2739_v14, 9  ;;  %v2845_v28 = vld [vmem:[%s3585_s0 + $0x3c] sm:$0x1] }
  0x1d   :  { %v200_v45 = vrot.slane %v2748_v25, 5  ;;  %v1116_v20 = vsel %vm2620_vm5, %v1111_v27, %v1115_v57  ;;  %v1125_v47 = vrot.slane %v1124_v36, 4  ;;  %v2254_v48 = vcombine.low %v2768_v37, %v2778_v42  ;;  %2315 = vmatpush3.bf16.msra.mxu0 %v2463_v33 }
  0x1e   :  { %v2796_v50 = vsel %vm2551_vm3, %v2128_v31, %v196_v39  ;;  %v1132_v51 = vshrl.u32 %v2714_v53, 16  ;;  %v1135_v52 = vshll.u32 %v2714_v53, 16  ;;  %v1141_v54 = vshll.u32 %v2209_v8, 16  ;;  %2316 = vmatprep.subr.bf16.mxu0 %v2465_v56  ;;  %v2471_v56 = vld [vmem:[%s3586_s1 + $0x38] sm:$0xff]  }
  0x1f   :  { %v2811_v57 = vsel %vm2620_vm5, %v1125_v47, %v1129_v18  ;;  %v2815_v58 = vsel %vm2551_vm3, %v2129_v44, %v200_v45  ;;  %v1146_v59 = vshrl.u32 %v2774_v40, 16  ;;  %v1149_v61 = vshll.u32 %v2774_v40, 16  ;;  %v2468_v18 = vld [vmem:[%s3586_s1 + $0x40] sm:$0xff]   ;;  %v2469_v44 = vld [vmem:[%s3586_s1 + $0x78] sm:$0xff]  }
  0x20   :  { %305 = vrot.lane.b32.xlu1 %v2146_v5, %s2491_s21  ;;  %343 = vrot.lane.b32.xlu0 %v2764_v35, %s2491_s21  ;;  %v2238_v63 = vcombine.low %v1116_v20, %v2811_v57  ;;  %v1134_v6 = vrot.slane %v1132_v51, 4  ;;  %v1137_v1 = vrot.slane %v1135_v52, 5  ;;  %v1143_v22 = vrot.slane %v1141_v54, 5  ;;  %v2466_v5 = vld [vmem:[%s3586_s1 + $0x30] sm:$0xff]  }
  0x21   :  { %v1148_v8 = vrot.slane %v1146_v59, 4  ;;  %v1151_v9 = vrot.slane %v1149_v61, 5  ;;  %v1155_v11 = vshll.u32 %v2785_v46, 16  ;;  %v2224_v7 = vrot.slane %v2668_v23, 9  ;;  %2317 = vmatpush3.bf16.msra.mxu0 %v2466_v5  ;;  %2350 = vmatprep.subr.bf16.mxu1 %v2468_v18  ;;  %v2865_v51 = vld [vmem:[%s3585_s0 + $0x74] sm:$0x1] }
  0x22   :  { %v1138_v12 = vor.u32 %v1137_v1, %v1134_v6  ;;  %v1233_v15 = vrot.slane %v2674_v29, 5  ;;  %v2155_v19 = vcombine.low %v2796_v50, %v2815_v58  ;;  %v2840_v29 = vcombine.low %v2714_v53, %v2774_v40  ;;  %2318 = vmatprep.subr.bf16.mxu0 %v2469_v44 }
  0x23   :  { %v1152_v21 = vor.u32 %v1151_v9, %v1148_v8  ;;  %v1157_v27 = vrot.slane %v1155_v11, 5  ;;  %v128_v36 = vshrl.u32 %v2739_v14, 16  ;;  %v131_v39 = vshll.u32 %v2739_v14, 16 }
  0x24   :  { %1327 = vrot.lane.b32.xlu1 %v2238_v63, %s2490_s12  ;;  %1378 = vrot.lane.b32.xlu0 %v2254_v48, %s2490_s12  ;;  %3600 = vst [vmem:[#allocation2_spill] sm:$0xff] %v2840_v29  ;;  %v1139_v31 = vrot.slane %v1138_v12, 4  ;;  %v1234_v33 = vsel %vm2551_vm3, %v2224_v7, %v1233_v15  ;;  %v137_v47 = vshll.u32 %v2748_v25, 16  ;;  %v142_v48 = vshrl.u32 %v2829_v16, 16  ;;  %v2894_v7 = vld [vmem:[%s3585_s0 + $0x40] sm:$0xf] }
  0x25   :  { %v1153_v45 = vrot.slane %v1152_v21, 4  ;;  %v2242_v20 = vcombine.low %v1234_v33, %v2768_v37  ;;  %v130_v54 = vrot.slane %v128_v36, 4  ;;  %v133_v37 = vrot.slane %v131_v39, 5  ;;  %2319 = vmatpush3.bf16.msra.mxu0 %v2471_v56  ;;  %v37_v21 = vld [vmem:[%s3585_s0 + $0x44] sm:$0x1] }
  0x26   :  { %v2869_v52 = vsel %vm2620_vm5, %v1139_v31, %v1143_v22  ;;  %v145_v25 = vshll.u32 %v2829_v16, 16  ;;  %v139_v63 = vrot.slane %v137_v47, 5  ;;  %v144_v6 = vrot.slane %v142_v48, 4  ;;  %v2922_v39 = vld [vmem:[%s3585_s0 + $0x78] sm:$0xf] }
  0x27   :  { %v2880_v59 = vsel %vm2620_vm5, %v1153_v45, %v1157_v27  ;;  %v134_v22 = vor.u32 %v133_v37, %v130_v54  ;;  %v151_v8 = vshll.u32 %v2845_v28, 16  ;;  %v2227_v9 = vrot.slane %v2774_v40, 9  ;;  %v2904_v27 = vld [vmem:[%s3585_s0 + $0x48] sm:$0xf] }
  0x28   :  { %325 = vrot.lane.b32.xlu1 %v2155_v19, %s2490_s12  ;;  %1388 = vrot.lane.b32.xlu0 %v2840_v29, %s2489_s29  ;;  %3601 = vst [vmem:[#allocation3_spill] sm:$0xff] %v2880_v59  ;;  %v2886_v1 = vcombine.low %v2869_v52, %v2880_v59  ;;  %v147_v5 = vrot.slane %v145_v25, 5  ;;  %v1245_v11 = vrot.slane %v2785_v46, 5  ;;  %v2228_v18 = vrot.slane %v2860_v49, 9  ;;  %v2909_v46 = vld [vmem:[%s3585_s0 + $0x4c] sm:$0x1] }
  0x29   :  { %v135_v12 = vrot.slane %v134_v22, 4  ;;  %v1249_v19 = vrot.slane %v2865_v51, 5  ;;  %v2916_v31 = vcombine.low %v2739_v14, %v2829_v16  ;;  %v153_v33 = vrot.slane %v151_v8, 5  ;;  %v2940_v25 = vld [vmem:[%s3585_s0 + $0x7c] sm:$0x1] }
  0x2a   :  { %v148_v15 = vor.u32 %v147_v5, %v144_v6  ;;  %v2130_v36 = vrot.slane %v2829_v16, 9  ;;  %v204_v47 = vrot.slane %v2845_v28, 5  ;;  %v2132_v54 = vrot.slane %v2904_v27, 9 }
  0x2b   :  { %3602 = vst [vmem:[#allocation4_spill] sm:$0xff] %v2916_v31  ;;  %v2926_v44 = vsel %vm2620_vm5, %v135_v12, %v139_v63  ;;  %v244_v37 = vrot.slane %v2909_v46, 5  ;;  %v2246_v56 = vcombine.low %v2694_v41, %v2714_v53  ;;  %v1246_v28 = vsel %vm2551_vm3, %v2227_v9, %v1245_v11 }
  0x2c   :  { %1398 = vrot.lane.b32.xlu1 %v2886_v1, %s2491_s21  ;;  %1347 = vrot.lane.b32.xlu0 %v2242_v20, %s2489_s29  ;;  %v149_v45 = vrot.slane %v148_v15, 4  ;;  %v2931_v20 = vcombine.low %v2599_v34, %v2796_v50  ;;  %v2131_v34 = vrot.slane %v2894_v7, 9  ;;  %v1160_v50 = vshrl.u32 %v2860_v49, 16 }
  0x2d   :  { %v2954_v63 = vsel %vm2551_vm3, %v2228_v18, %v1249_v19  ;;  %v224_v6 = vrot.slane %v37_v21, 5  ;;  %v2958_v53 = vsel %vm2551_vm3, %v2132_v54, %v244_v37  ;;  %v1163_v22 = vshll.u32 %v2860_v49, 16 }
  0x2e   :  { %v2963_v5 = vsel %vm2620_vm5, %v149_v45, %v153_v33  ;;  %v1162_v8 = vrot.slane %v1160_v50, 4  ;;  %v1169_v9 = vshll.u32 %v2865_v51, 16  ;;  %v2147_v11 = vcombine.low %v2629_v60, %v2739_v14 }
  0x2f   :  { %3603 = vst [vmem:[#allocation5_spill] sm:$0xff] %v2963_v5  ;;  %v1165_v12 = vrot.slane %v1163_v22, 5  ;;  %v1177_v15 = vshll.u32 %v2922_v39, 16  ;;  %v2255_v18 = vcombine.low %v1246_v28, %v2954_v63  ;;  %v2973_v19 = vsel %vm2551_vm3, %v2130_v36, %v204_v47 }
  0x30   :  { %335 = vrot.lane.b32.xlu1 %v2916_v31, %s2489_s29  ;;  %274 = vrot.lane.b32.xlu0 %v2764_v35, %s2490_s12  ;;  %v1174_v35 = vshrl.u32 %v2922_v39, 16  ;;  %v1183_v33 = vshll.u32 %v2940_v25, 16  ;;  %v2981_v60 = vcombine.low %v2926_v44, %v2963_v5  ;;  %v1171_v51 = vrot.slane %v1169_v9, 5 }
  0x31   :  { %v1166_v14 = vor.u32 %v1165_v12, %v1162_v8  ;;  %v1179_v45 = vrot.slane %v1177_v15, 5  ;;  %v2985_v37 = vsel %vm2551_vm3, %v2131_v34, %v224_v6  ;;  %v207_v36 = vshrl.u32 %v2894_v7, 16  ;;  %v2217_v34 = vld [vmem:[%s3585_s0 + $0x84] sm:$0x1] }
  0x32   :  { %v1176_v54 = vrot.slane %v1174_v35, 4  ;;  %v210_v47 = vshll.u32 %v2894_v7, 16  ;;  %v216_v50 = vshll.u32 %v37_v21, 16  ;;  %v227_v8 = vshrl.u32 %v2904_v27, 16 }
  0x33   :  { %v1167_v22 = vrot.slane %v1166_v14, 4  ;;  %v230_v9 = vshll.u32 %v2904_v27, 16  ;;  %v1185_v6 = vrot.slane %v1183_v33, 5  ;;  %v209_v12 = vrot.slane %v207_v36, 4 }
  0x34   :  { %294 = vrot.lane.b32.xlu1 %v2931_v20, %s2489_s29  ;;  %1360 = vrot.lane.b32.xlu0 %v2246_v56, %s2491_s21  ;;  %v2992_v56 = vld [vmem:[%s3585_s0 + $0x80] sm:$0xf]  ;;  %v1180_v35 = vor.u32 %v1179_v45, %v1176_v54  ;;  %v212_v15 = vrot.slane %v210_v47, 5  ;;  %v218_v48 = vrot.slane %v216_v50, 5  ;;  %v229_v14 = vrot.slane %v227_v8, 4 }
  0x35   :  { %v3004_v21 = vsel %vm2620_vm5, %v1167_v22, %v1171_v51  ;;  %v236_v45 = vshll.u32 %v2909_v46, 16  ;;  %v232_v36 = vrot.slane %v230_v9, 5  ;;  %v2229_v47 = vrot.slane %v2922_v39, 9  ;;  %v3019_v22 = vld [vmem:[%s3585_s0 + $0x88] sm:$0xf] }
  0x36   :  { %3604 = vst [vmem:[#allocation6_spill] sm:$0xff] %v3004_v21  ;;  %v1181_v54 = vrot.slane %v1180_v35, 4  ;;  %v213_v33 = vor.u32 %v212_v15, %v209_v12  ;;  %v1253_v50 = vrot.slane %v2940_v25, 5  ;;  %v2230_v51 = vrot.slane %v2992_v56, 9  ;;  %v2219_v12 = vld [vmem:[%s3585_s0 + $0x8c] sm:$0x1] }
  0x37   :  { %v2156_v46 = vcombine.low %v2973_v19, %v2985_v37  ;;  %v3024_v35 = vcombine.low %v2778_v42, %v1246_v28  ;;  %v1257_v9 = vrot.slane %v2217_v34, 5  ;;  %v2157_v15 = vcombine.low %v2894_v7, %v2904_v27 }
  0x38   :  { %307 = vrot.lane.b32.xlu1 %v2147_v11, %s2491_s21  ;;  %345 = vrot.lane.b32.xlu0 %v2981_v60, %s2491_s21  ;;  %v3012_v11 = vcombine.low %v2860_v49, %v2922_v39  ;;  %v214_v8 = vrot.slane %v213_v33, 4  ;;  %v3034_v25 = vsel %vm2620_vm5, %v1181_v54, %v1185_v6  ;;  %v3040_v42 = vsel %vm2551_vm3, %v2229_v47, %v1253_v50  ;;  %v3046_v33 = vld [vmem:[%s3585_s0 + $0x90] sm:$0xf]  ;;  %v3062_v54 = vld [vmem:[%s3585_s0 + $0x94] sm:$0x1] }
  0x39   :  { %v1188_v28 = vshrl.u32 %v2992_v56, 16  ;;  %v3056_v27 = vsel %vm2551_vm3, %v2230_v51, %v1257_v9  ;;  %v1191_v6 = vshll.u32 %v2992_v56, 16  ;;  %v233_v47 = vor.u32 %v232_v36, %v229_v14 }
  0x3a   :  { %3605 = vst [vmem:[#allocation7_spill] sm:$0xff] %v3012_v11  ;;  %v1197_v9 = vshll.u32 %v2217_v34, 16  ;;  %v1202_v61 = vshrl.u32 %v3019_v22, 16  ;;  %v1205_v14 = vshll.u32 %v3019_v22, 16  ;;  %v1211_v36 = vshll.u32 %v2219_v12, 16 }
  0x3b   :  { %v1193_v51 = vrot.slane %v1191_v6, 5  ;;  %v2223_v6 = vld [vmem:[%s3585_s0 + $0x9c] sm:$0x1]  ;;  %v2231_v34 = vrot.slane %v3019_v22, 9  ;;  %v1261_v50 = vrot.slane %v2219_v12, 5  ;;  %v2232_v38 = vrot.slane %v3046_v33, 9 }
  0x3c   :  { %1329 = vrot.lane.b32.xlu1 %v2886_v1, %s2490_s12  ;;  %1380 = vrot.lane.b32.xlu0 %v2255_v18, %s2490_s12  ;;  %v3050_v1 = vsel %vm2620_vm5, %v214_v8, %v218_v48  ;;  %v3052_v18 = vrot.slane %v236_v45, 5  ;;  %v1190_v45 = vrot.slane %v1188_v28, 4  ;;  %v3070_v8 = vcombine.low %v3004_v21, %v3034_v25  ;;  %v3080_v28 = vld [vmem:[%s3585_s0 + $0x98] sm:$0xf] }
  0x3d   :  { %v1204_v24 = vrot.slane %v1202_v61, 4  ;;  %v234_v48 = vrot.slane %v233_v47, 4  ;;  %v3089_v5 = vsel %vm2551_vm3, %v2231_v34, %v1261_v50  ;;  %v1281_v31 = vrot.slane %v3062_v54, 5 }
  0x3e   :  { %v1194_v0 = vor.u32 %v1193_v51, %v1190_v45  ;;  %v2233_v21 = vrot.slane %v3080_v28, 9  ;;  %v1301_v59 = vrot.slane %v2223_v6, 5  ;;  %v3095_v12 = vcombine.low %v3056_v27, %v3089_v5 }
  0x3f   :  { %v1213_v47 = vrot.slane %v1211_v36, 5  ;;  %v3103_v50 = vsel %vm2551_vm3, %v2232_v38, %v1281_v31  ;;  %v2144_v45 = vcombine.low %v2815_v58, %v2973_v19  ;;  %v2470_v38 = vld [vmem:[%s3586_s1] sm:$0xff]   ;;  %v1267_v19 = vshll.u32 %v3046_v33, 16 }
  0x40   :  { %327 = vrot.lane.b32.xlu1 %v2156_v46, %s2490_s12  ;;  %1390 = vrot.lane.b32.xlu0 %v3012_v11, %s2489_s29  ;;  %v1199_v46 = vrot.slane %v1197_v9, 5  ;;  %v1207_v11 = vrot.slane %v1205_v14, 5  ;;  %v1195_v29 = vrot.slane %v1194_v0, 4  ;;  %v1264_v0 = vshrl.u32 %v3046_v33, 16 }
  0x41   :  { %v3114_v9 = vsel %vm2551_vm3, %v2233_v21, %v1301_v59  ;;  %v1273_v10 = vshll.u32 %v3062_v54, 16  ;;  %v1284_v59 = vshrl.u32 %v3080_v28, 16  ;;  %v1287_v21 = vshll.u32 %v3080_v28, 16 }
  0x42   :  { %v1208_v61 = vor.u32 %v1207_v11, %v1204_v24  ;;  %v3110_v51 = vsel %vm2620_vm5, %v1195_v29, %v1199_v46  ;;  %v2257_v24 = vcombine.low %v3089_v5, %v3103_v50  ;;  %v2260_v58 = vcombine.low %v3103_v50, %v3114_v9 }
  0x43   :  { %v2252_v11 = vcombine.low %v3034_v25, %v3110_v51  ;;  %v1266_v29 = vrot.slane %v1264_v0, 4  ;;  %v2247_v14 = vcombine.low %v2774_v40, %v2860_v49  ;;  %v1293_v34 = vshll.u32 %v2223_v6, 16  ;;  %v2472_v40 = vld [vmem:[%s3586_s1 + $0x48] sm:$0xff]   ;;  %v3151_v49 = vld [vmem:[%s3586_s1 + $0x80] sm:$0xff]  }
  0x44   :  { %1400 = vrot.lane.b32.xlu1 %v3070_v8, %s2491_s21  ;;  %1349 = vrot.lane.b32.xlu0 %v3024_v35, %s2489_s29  ;;  %v1209_v31 = vrot.slane %v1208_v61, 4  ;;  %vm351_vm6 = vcmask 261120   ;;  %v239_v54 = vsel %vm2620_vm5, %v234_v48, %v3052_v18  ;;  %v1286_v61 = vrot.slane %v1284_v59, 4  ;;  %v2477_v59 = vld [vmem:[%s3586_s1 + $0x58] sm:$0xff]  }
  0x45   :  { %2400 = vmatprep.mubr.msk.bf16.mxu1 %vm351_vm6, %v2593_v30  ;;  %v2234_v18 = vcombine.low %v2668_v23, %v2694_v41  ;;  %v1275_v6 = vrot.slane %v1273_v10, 5  ;;  %v2473_v30 = vld [vmem:[%s3586_s1 + $0x8] sm:$0xff]   ;;  %2408 = vmatprep.subr.bf16.mxu0 %v3151_v49  ;;  %v3606_v55 = vcombine.low %v3040_v42, %v3056_v27  ;;  %v2249_v5 = vcombine.low %v3019_v22, %v3046_v33 }
  0x46   :  { %v3136_v36 = vsel %vm2620_vm5, %v1209_v31, %v1213_v47  ;;  %2401 = vmatmul.mubr.msk.bf16.vlgmr.msra.gmra.mrb[0].mxu1 %vm351_vm6, %v2931_v20  ;;  %v2148_v47 = vcombine.low %v2829_v16, %v2894_v7  ;;  %v2158_v20 = vcombine.low %v3050_v1, %v239_v54  ;;  %v1295_v31 = vrot.slane %v1293_v34, 5  ;;  %v2475_v16 = vld [vmem:[%s3586_s1 + $0x10] sm:$0xff]   ;;  %v2479_v54 = vld [vmem:[%s3586_s1 + $0x60] sm:$0xff]   ;;  %v2482_v27 = vld [vmem:[%s3586_s1 + $0x28] sm:$0xff]  }
  0x47   :  { %v2241_v46 = vcombine.low %v3110_v51, %v3136_v36  ;;  %2351 = vmatpush3.bf16.msra.mxu1 %v2470_v38  ;;  %2404 = vmatprep.mubr.msk.bf16.mxu1 %vm351_vm6, %v2144_v45  ;;  %v2474_v38 = vld [vmem:[%s3586_s1 + $0x50] sm:$0xff]   ;;  %v3205_v34 = vcombine.low %v2992_v56, %v3019_v22  ;;  %v3608_v22 = vcombine.low %v2559_v13, %v2532_v2  ;;  %vm364_vm7 = vcmask 523264  }
  0x48   :  { %337 = vrot.lane.b32.xlu1 %v2157_v15, %s2489_s29  ;;  %276 = vrot.lane.b32.xlu0 %v2981_v60, %s2490_s12  ;;  %v1269_v15 = vrot.slane %v1267_v19, 5  ;;  %v1289_v60 = vrot.slane %v1287_v21, 5  ;;  %v2478_v21 = vld [vmem:[%s3586_s1 + $0x18] sm:$0xff]   ;;  %vm373_vm8 = vcmask 785408   ;;  %vm917_vm9 = vcmask 1041409  }
  0x49   :  { %2352 = vmatprep.subr.bf16.mxu1 %v2472_v40  ;;  %v2486_v40 = vld [vmem:[%s3586_s1 + $0x38] sm:$0xff]   ;;  %vm919_vm10 = vcmask 1043459   ;;  %vm921_vm11 = vcmask 1045509   ;;  %vm923_vm12 = vcmask 1047559  }
  0x4a   :  { %v1270_v48 = vor.u32 %v1269_v15, %v1266_v29  ;;  %v1290_v0 = vor.u32 %v1289_v60, %v1286_v61  ;;  %v2483_v15 = vld [vmem:[%s3586_s1 + $0x70] sm:$0xff]   ;;  %v2485_v61 = vld [vmem:[%s3586_s1 + $0x78] sm:$0xff]  }
  0x4b   :  { %2353 = vmatpush3.bf16.msra.mxu1 %v2473_v30  ;;  %v3607_v30 = vcombine.low %v2657_v17, %v2681_v32  ;;  %v2488_v17 = vld [vmem:[%s3586_s1 + $0x88] sm:$0xff]  }
  0x4c   :  { %296 = vrot.lane.b32.xlu1 %v2144_v45, %s2489_s29  ;;  %1362 = vrot.lane.b32.xlu0 %v2247_v14, %s2491_s21  ;;  %v1271_v29 = vrot.slane %v1270_v48, 4  ;;  %v2159_v45 = vcombine.low %v2985_v37, %v2958_v53  ;;  %v1291_v19 = vrot.slane %v1290_v0, 4  ;;  %v3201_v14 = vcombine.low %v2954_v63, %v3040_v42  ;;  %v2481_v42 = vld [vmem:[%s3586_s1 + $0x68] sm:$0xff]  }
  0x4d   :  { %2354 = vmatprep.subr.bf16.mxu1 %v2474_v38  ;;  %v2248_v63 = vcombine.low %v2922_v39, %v2992_v56  ;;  %v2484_v39 = vld [vmem:[%s3586_s1 + $0x30] sm:$0xff]   ;;  %v2258_v56 = vcombine.low %v3046_v33, %v3080_v28 }
  0x4e   :  { %v3174_v10 = vsel %vm2620_vm5, %v1271_v29, %v1275_v6  ;;  %v1296_v7 = vsel %vm2620_vm5, %v1291_v19, %v1295_v31  ;;  %2405 = vmatmul.mubr.msk.bf16.gmra.mrb[4].mxu1 %vm351_vm6, %v2159_v45  ;;  %v3609_v19 = vcombine.low %v2699_v43, %v2727_v62  ;;  %v3610_v43 = vcombine.low %v2811_v57, %v2869_v52 }
  0x4f   :  { %v2253_v53 = vcombine.low %v3136_v36, %v3174_v10  ;;  %v2259_v37 = vcombine.low %v3174_v10, %v1296_v7  ;;  %2355 = vmatpush3.bf16.msra.mxu1 %v2475_v16 }
  0x50   :  { %309 = vrot.lane.b32.xlu1 %v2148_v47, %s2491_s21  ;;  %347 = vrot.lane.b32.xlu0 %v2158_v20, %s2491_s21 }
  0x51   :  { %2356 = vmatprep.subr.bf16.mxu1 %v2477_v59 }
  0x53   :  { %2357 = vmatpush3.bf16.msra.mxu1 %v2478_v21 }
  0x54   :  { %1331 = vrot.lane.b32.xlu1 %v3070_v8, %s2490_s12  ;;  %1382 = vrot.lane.b32.xlu0 %v3606_v55, %s2490_s12  ;;  %v2480_v8 = vld [vmem:[%s3586_s1 + $0x20] sm:$0xff]  }
  0x55   :  { %2358 = vmatprep.subr.bf16.mxu1 %v2479_v54 }
  0x57   :  { %2359 = vmatpush3.bf16.msra.mxu1 %v2480_v8 }
  0x58   :  { %1351 = vrot.lane.b32.xlu1 %v3201_v14, %s2489_s29  ;;  %1392 = vrot.lane.b32.xlu0 %v3205_v34, %s2489_s29 }
  0x59   :  { %2360 = vmatprep.subr.bf16.mxu1 %v2481_v42 }
  0x5b   :  { %2361 = vmatpush3.bf16.msra.mxu1 %v2482_v27 }
  0x5c   :  { %1364 = vrot.lane.b32.xlu1 %v2248_v63, %s2491_s21  ;;  %1402 = vrot.lane.b32.xlu0 %v2241_v46, %s2491_s21 }
  0x5d   :  { %2362 = vmatprep.subr.bf16.mxu1 %v2483_v15 }
  0x5f   :  { %2363 = vmatpush3.bf16.msra.mxu1 %v2484_v39 }
  0x60   :  { %1333 = vrot.lane.b32.xlu1 %v2241_v46, %s2490_s12  ;;  %1384 = vrot.lane.b32.xlu0 %v2257_v24, %s2490_s12 }
  0x61   :  { %2364 = vmatprep.subr.bf16.mxu1 %v2485_v61 }
  0x63   :  { %2365 = vmatpush3.bf16.msra.mxu1 %v2486_v40 }
  0x64   :  { %1353 = vrot.lane.b32.xlu1 %v3095_v12, %s2489_s29  ;;  %1394 = vrot.lane.b32.xlu0 %v2258_v56, %s2489_s29 }
  0x68   :  { %1366 = vrot.lane.b32.xlu1 %v2249_v5, %s2491_s21  ;;  %1404 = vrot.lane.b32.xlu0 %v2259_v37, %s2491_s21 }
  0x76   :  { %v332_v28 = vpop.permute.xlu1 %331 }
  0x7b   :  { %v322_v24 = vpop.permute.xlu0 %321 }
  0x7c   :  { %v291_v46 = vpop.permute.xlu1 %290  ;;  %v388_v47 = vsel %vm351_vm6, %v3607_v30, %v322_v24 }
  0x7d   :  { %v399_v29 = vsel %vm364_vm7, %v388_v47, %v332_v28 }
  0x7f   :  { %v324_v60 = vpop.permute.xlu0 %323 }
  0x80   :  { %v304_v48 = vpop.permute.xlu1 %303  ;;  %v391_v16 = vsel %vm351_vm6, %v3609_v19, %v324_v60 }
  0x86   :  { %v271_v6 = vpop.permute.xlu0 %270 }
  0x87   :  { %v354_v33 = vsel %vm351_vm6, %v3608_v22, %v271_v6 }
  0x88   :  { %v366_v20 = vsel %vm364_vm7, %v354_v33, %v291_v46  ;;  %v3611_v46 = vcombine.low %v2752_v26, %v2926_v44  ;;  %v3613_v26 = vld [vmem:[#allocation6_spill] sm:$0xff] }
  0x89   :  { %v375_v32 = vsel %vm373_vm8, %v366_v20, %v304_v48  ;;  %v3612_v20 = vld [vmem:[#allocation3_spill] sm:$0xff] }
  0x8a   :  { %v273_v0 = vpop.permute.xlu1 %272  ;;  %v342_v31 = vpop.permute.xlu0 %341  ;;  %v3614_v44 = vcombine.low %v3612_v20, %v3613_v26  ;;  %v3362_v26 = vld [vmem:[%s3587_s2] ss:$0 sm:$0xff] }
  0x8b   :  { %v407_v38 = vsel %vm373_vm8, %v399_v29, %v342_v31  ;;  %v357_v45 = vsel %vm351_vm6, %v2536_v3, %v273_v0 }
  0x8c   :  { %606 = vmatprep.mubr.bf16.mxu0 %v407_v38 }
  0x8d   :  { %607 = vmatmul.mubr.bf16.vlgmr.msra.gmra.mrb[0].mxu0 %v375_v32 }
  0x8e   :  { %v293_v2 = vpop.permute.xlu1 %292  ;;  %v334_v13 = vpop.permute.xlu0 %333  ;;  %2409 = vmatpush3.bf16.msra.mxu0 %v3151_v49 }
  0x8f   :  { %2410 = vmatprep.subr.bf16.mxu0 %v2488_v17  ;;  %v401_v7 = vsel %vm364_vm7, %v391_v16, %v334_v13  ;;  %v368_v21 = vsel %vm364_vm7, %v357_v45, %v293_v2  ;;  %v3615_v13 = vld [vmem:[#allocation2_spill] sm:$0xff] }
  0x92   :  { %v306_v37 = vpop.permute.xlu1 %305  ;;  %v344_v59 = vpop.permute.xlu0 %343  ;;  %2411 = vmatpush3.bf16.msra.mxu0 %v2488_v17 }
  0x93   :  { %v410_v55 = vsel %vm373_vm8, %v401_v7, %v344_v59  ;;  %v378_v49 = vsel %vm373_vm8, %v368_v21, %v306_v37  ;;  %v3616_v59 = vld [vmem:[#allocation4_spill] sm:$0xff] }
  0x94   :  { %614 = vmatprep.mubr.bf16.mxu0 %v410_v55  ;;  %v3617_v55 = vld [vmem:[#allocation5_spill] sm:$0xff] }
  0x95   :  { %615 = vmatmul.mubr.bf16.gmra.mrb[4].mxu0 %v378_v49  ;;  %v3618_v49 = vcombine.low %v3617_v55, %v3050_v1 }
  0x96   :  { %v1328_v54 = vpop.permute.xlu1 %1327  ;;  %v1379_v3 = vpop.permute.xlu0 %1378 }
  0x97   :  { %v1442_v62 = vsel %vm351_vm6, %v3610_v43, %v1379_v3  ;;  %v1410_v40 = vsel %vm351_vm6, %v2234_v18, %v1328_v54 }
  0x9a   :  { %v326_v8 = vpop.permute.xlu1 %325  ;;  %v1389_v63 = vpop.permute.xlu0 %1388 }
  0x9b   :  { %v1453_v42 = vsel %vm364_vm7, %v1442_v62, %v1389_v63  ;;  %v394_v60 = vsel %vm351_vm6, %v3611_v46, %v326_v8 }
  0x9e   :  { %v1399_v27 = vpop.permute.xlu1 %1398  ;;  %v1348_v15 = vpop.permute.xlu0 %1347 }
  0x9f   :  { %v1461_v39 = vsel %vm373_vm8, %v1453_v42, %v1399_v27  ;;  %v1421_v5 = vsel %vm364_vm7, %v1410_v40, %v1348_v15 }
  0xa0   :  { %1660 = vmatprep.mubr.bf16.mxu1 %v1461_v39 }
  0xa2   :  { %v336_v56 = vpop.permute.xlu1 %335  ;;  %v275_v61 = vpop.permute.xlu0 %274 }
  0xa3   :  { %v360_v24 = vsel %vm351_vm6, %v2640_v4, %v275_v61  ;;  %v403_v48 = vsel %vm364_vm7, %v394_v60, %v336_v56  ;;  %v3619_v56 = vld [vmem:[#allocation7_spill] sm:$0xff] }
  0xa6   :  { %v295_v28 = vpop.permute.xlu1 %294  ;;  %v1361_v57 = vpop.permute.xlu0 %1360 }
  0xa7   :  { %v1429_v52 = vsel %vm373_vm8, %v1421_v5, %v1361_v57  ;;  %v370_v18 = vsel %vm364_vm7, %v360_v24, %v295_v28 }
  0xa8   :  { %1661 = vmatmul.mubr.bf16.vlgmr.msra.gmra.mrb[8].mxu1 %v1429_v52 }
  0xaa   :  { %v308_v23 = vpop.permute.xlu1 %307  ;;  %v346_v41 = vpop.permute.xlu0 %345 }
  0xab   :  { %v413_v6 = vsel %vm373_vm8, %v403_v48, %v346_v41  ;;  %v381_v30 = vsel %vm373_vm8, %v370_v18, %v308_v23 }
  0xac   :  { %622 = vmatprep.mubr.bf16.mxu0 %v413_v6 }
  0xad   :  { %623 = vmatmul.mubr.bf16.gmra.mrb[8].mxu0 %v381_v30 }
  0xae   :  { %v1330_v47 = vpop.permute.xlu1 %1329  ;;  %v1381_v4 = vpop.permute.xlu0 %1380 }
  0xaf   :  { %v1445_v0 = vsel %vm351_vm6, %v3614_v44, %v1381_v4  ;;  %v1413_v45 = vsel %vm351_vm6, %v3615_v13, %v1330_v47  ;;  %v2492_v44 = vmov 1983009808  }
  0xb2   :  { %v328_v22 = vpop.permute.xlu1 %327  ;;  %v1391_v33 = vpop.permute.xlu0 %1390 }
  0xb3   :  { %v1455_v31 = vsel %vm364_vm7, %v1445_v0, %v1391_v33  ;;  %v397_v54 = vsel %vm351_vm6, %v3618_v49, %v328_v22  ;;  %v750_v0 = vunpack.c.l.s4 %v2492_v44 }
  0xb5   :  { %v751_v13 = vunpack.c.0.s8 %v750_v0 }
  0xb6   :  { %v1401_v29 = vpop.permute.xlu1 %1400  ;;  %v1350_v38 = vpop.permute.xlu0 %1349 }
  0xb7   :  { %v1464_v17 = vsel %vm373_vm8, %v1455_v31, %v1401_v29  ;;  %v1423_v19 = vsel %vm364_vm7, %v1413_v45, %v1350_v38  ;;  %v752_v31 = vlaneseq }
  0xb8   :  { %1668 = vmatprep.mubr.bf16.mxu1 %v1464_v17  ;;  %v3367_v17 = vld [vmem:[%s3588_s3] ss:$0 sm:$0xff] }
  0xb9   :  { %v3370_v45 = vshrl.u32 %v752_v31, 7 }
  0xba   :  { %v338_v32 = vpop.permute.xlu1 %337  ;;  %v277_v2 = vpop.permute.xlu0 %276 }
  0xbb   :  { %v363_v21 = vsel %vm351_vm6, %v3616_v59, %v277_v2  ;;  %v405_v3 = vsel %vm364_vm7, %v397_v54, %v338_v32  ;;  %v3376_v49 = vsub.s32 %v751_v13, %v3370_v45 }
  0xbe   :  { %v297_v16 = vpop.permute.xlu1 %296  ;;  %v1363_v7 = vpop.permute.xlu0 %1362 }
  0xbf   :  { %v1432_v37 = vsel %vm373_vm8, %v1423_v19, %v1363_v7  ;;  %v372_v43 = vsel %vm364_vm7, %v363_v21, %v297_v16 }
  0xc0   :  { %1669 = vmatmul.mubr.bf16.gmra.mrb[12].mxu1 %v1432_v37 }
  0xc2   :  { %v310_v8 = vpop.permute.xlu1 %309  ;;  %v348_v63 = vpop.permute.xlu0 %347 }
  0xc3   :  { %v416_v62 = vsel %vm373_vm8, %v405_v3, %v348_v63  ;;  %v384_v42 = vsel %vm373_vm8, %v372_v43, %v310_v8 }
  0xc4   :  { %630 = vmatprep.mubr.bf16.mxu0 %v416_v62 }
  0xc5   :  { %631 = vmatmul.mubr.bf16.gmra.mrb[12].mxu0 %v384_v42 }
  0xc6   :  { %v1332_v27 = vpop.permute.xlu1 %1331  ;;  %v1383_v15 = vpop.permute.xlu0 %1382  ;;  %2412 = vmatprep.mubr.msk.bf16.mxu0 %vm351_vm6, %v3024_v35 }
  0xc7   :  { %v1416_v61 = vsel %vm351_vm6, %v3619_v56, %v1332_v27  ;;  %v1448_v40 = vsel %vm351_vm6, %v2252_v11, %v1383_v15 }
  0xca   :  { %v1352_v1 = vpop.permute.xlu1 %1351  ;;  %v1393_v39 = vpop.permute.xlu0 %1392 }
  0xcb   :  { %v1457_v5 = vsel %vm364_vm7, %v1448_v40, %v1393_v39  ;;  %v1425_v35 = vsel %vm364_vm7, %v1416_v61, %v1352_v1 }
  0xcd   :  { %2413 = vmatmul.mubr.msk.bf16.vlgmr.msra.gmra.mrb[16].mxu0 %vm351_vm6, %v3201_v14 }
  0xce   :  { %v1365_v28 = vpop.permute.xlu1 %1364  ;;  %v1403_v57 = vpop.permute.xlu0 %1402  ;;  %2416 = vmatprep.mubr.msk.bf16.mxu0 %vm351_vm6, %v3095_v12 }
  0xcf   :  { %v1467_v52 = vsel %vm373_vm8, %v1457_v5, %v1403_v57  ;;  %v1435_v24 = vsel %vm373_vm8, %v1425_v35, %v1365_v28 }
  0xd0   :  { %1676 = vmatprep.mubr.bf16.mxu1 %v1467_v52 }
  0xd1   :  { %1677 = vmatmul.mubr.bf16.gmra.mrb[16].mxu1 %v1435_v24 }
  0xd2   :  { %v1334_v25 = vpop.permute.xlu1 %1333  ;;  %v1385_v51 = vpop.permute.xlu0 %1384 }
  0xd3   :  { %v1419_v12 = vsel %vm351_vm6, %v3205_v34, %v1334_v25  ;;  %v1451_v46 = vsel %vm351_vm6, %v2253_v53, %v1385_v51 }
  0xd5   :  { %2417 = vmatmul.mubr.msk.bf16.gmra.mrb[20].mxu0 %vm351_vm6, %v2260_v58 }
  0xd6   :  { %v1354_v11 = vpop.permute.xlu1 %1353  ;;  %v1395_v14 = vpop.permute.xlu0 %1394 }
  0xd7   :  { %v1459_v60 = vsel %vm364_vm7, %v1451_v46, %v1395_v14  ;;  %v1427_v41 = vsel %vm364_vm7, %v1419_v12, %v1354_v11 }
  0xda   :  { %v1367_v48 = vpop.permute.xlu1 %1366  ;;  %v1405_v23 = vpop.permute.xlu0 %1404 }
  0xdb   :  { %v1470_v50 = vsel %vm373_vm8, %v1459_v60, %v1405_v23  ;;  %v1438_v9 = vsel %vm373_vm8, %v1427_v41, %v1367_v48 }
  0xdc   :  { %1684 = vmatprep.mubr.bf16.mxu1 %v1470_v50 }
  0xdd   :  { %1685 = vmatmul.mubr.bf16.gmra.mrb[20].mxu1 %v1438_v9 }
 0x119   :  { %v2402_v58 = vpop.f32.mrb[0].mxu1 }
 0x11a   :  { %v673_v18 = vpop.f32.mrb[1].mxu1 }
 0x11b   :  { %v2403_v34 = vpop.f32.mrb[2].mxu1 }
 0x11c   :  { %v676_v6 = vpop.f32.mrb[3].mxu1 }
 0x121   :  { %v3351_v30 = vpop.f32.mrb[4].mxu1 }
 0x122   :  { %v3353_v36 = vpop.f32.mrb[5].mxu1 }
 0x123   :  { %v3355_v10 = vpop.f32.mrb[6].mxu1 }
 0x124   :  { %v3357_v53 = vpop.f32.mrb[7].mxu1 }
 0x160   :  { %v2320_v47 = vpop.f32.mrb[0].mxu0 }
 0x161   :  { %v2321_v4 = vpop.f32.mrb[1].mxu0 }
 0x162   :  { %v2322_v22 = vadd.f32 %v2321_v4, %v2320_v47  ;;  %v2323_v33 = vpop.f32.mrb[2].mxu0 }
 0x163   :  { %v2324_v20 = vpop.f32.mrb[3].mxu0 }
 0x164   :  { %v2325_v29 = vadd.f32 %v2324_v20, %v2323_v33  ;;  %v674_v38 = vadd.f32 %v2322_v22, %v673_v18 }
 0x166   :  { %v710_v32 = vmul.f32 %v3362_v26, %v674_v38  ;;  %v677_v2 = vadd.f32 %v2325_v29, %v676_v6 }
 0x168   :  { %v724_v19 = vadd.f32 %v3367_v17, %v710_v32  ;;  %v711_v16 = vmul.f32 %v3362_v26, %v677_v2  ;;  %v2326_v7 = vpop.f32.mrb[4].mxu0 }
 0x169   :  { %v2327_v37 = vpop.f32.mrb[5].mxu0 }
 0x16a   :  { %v725_v59 = vadd.f32 %v3367_v17, %v711_v16  ;;  %v2328_v21 = vadd.f32 %v2327_v37, %v2326_v7  ;;  %v2329_v55 = vpop.f32.mrb[6].mxu0  ;;  %v732_v3 = vmax.f32 %v724_v19, 0.0 }
 0x16b   :  { %v2330_v54 = vpop.f32.mrb[7].mxu0 }
 0x16c   :  { %v733_v8 = vmax.f32 %v725_v59, 0.0  ;;  %v682_v63 = vadd.f32 %v2402_v58, %v2328_v21  ;;  %v2331_v43 = vadd.f32 %v2330_v54, %v2329_v55 }
 0x16e   :  { %v740_v62 = vmax.f32 %v732_v3, %v733_v8  ;;  %v712_v42 = vmul.f32 %v3362_v26, %v682_v63  ;;  %v685_v27 = vadd.f32 %v2403_v34, %v2331_v43 }
 0x170   :  { %v748_v15 = vcombine.high %v740_v62, %v740_v62  ;;  %v755_v1 = vrot.slane %v740_v62, %v3376_v49  ;;  %v713_v39 = vmul.f32 %v3362_v26, %v685_v27  ;;  %v726_v56 = vadd.f32 %v3367_v17, %v712_v42 }
 0x172   :  { %v762_v61 = vrot.slane %v748_v15, %v3376_v49  ;;  %v763_v40 = vcombine.high %v755_v1, %v755_v1  ;;  %v727_v5 = vadd.f32 %v3367_v17, %v713_v39  ;;  %v2184_v35 = vrot.slane %v755_v1, 9 }
 0x173   :  { %v734_v52 = vmax.f32 %v726_v56, 0.0 }
 0x174   :  { %v764_v28 = vcombine.high %v762_v61, %v762_v61  ;;  %v2185_v57 = vrot.slane %v763_v40, 9  ;;  %v735_v24 = vmax.f32 %v727_v5, 0.0  ;;  %v2186_v14 = vrot.slane %v762_v61, 9 }
 0x175   :  { %v880_v60 = vmax.f32 %v755_v1, %v2184_v35 }
 0x176   :  { %v2187_v25 = vrot.slane %v764_v28, 9  ;;  %v881_v51 = vmax.f32 %v763_v40, %v2185_v57  ;;  %v741_v11 = vmax.f32 %v734_v52, %v735_v24  ;;  %v882_v34 = vmax.f32 %v762_v61, %v2186_v14 }
 0x178   :  { %v883_v12 = vmax.f32 %v764_v28, %v2187_v25  ;;  %v916_v46 = vrot.slane %v881_v51, 7  ;;  %v765_v48 = vcombine.high %v741_v11, %v741_v11  ;;  %v772_v23 = vrot.slane %v741_v11, %v3376_v49 }
 0x17a   :  { %v927_v41 = vrot.slane %v883_v12, 7  ;;  %v918_v50 = vsel %vm917_vm9, %v916_v46, %v880_v60  ;;  %v779_v9 = vrot.slane %v765_v48, %v3376_v49  ;;  %v780_v58 = vcombine.high %v772_v23, %v772_v23 }
 0x17b   :  { %v2366_v18 = vpop.f32.mrb[8].mxu1  ;;  %v2188_v4 = vrot.slane %v772_v23, 9  ;;  %v920_v0 = vsel %vm919_vm10, %v916_v46, %v918_v50 }
 0x17c   :  { %v2367_v6 = vpop.f32.mrb[9].mxu1  ;;  %v781_v47 = vcombine.high %v779_v9, %v779_v9  ;;  %v2189_v22 = vrot.slane %v780_v58, 9  ;;  %v928_v31 = vsel %vm917_vm9, %v927_v41, %v882_v34  ;;  %v2190_v29 = vrot.slane %v779_v9, 9 }
 0x17d   :  { %v2369_v33 = vpop.f32.mrb[10].mxu1  ;;  %v3387_v20 = vadd.f32 %v2367_v6, %v2366_v18  ;;  %v884_v19 = vmax.f32 %v772_v23, %v2188_v4  ;;  %v922_v55 = vsel %vm921_vm11, %v916_v46, %v920_v0  ;;  %v929_v54 = vsel %vm919_vm10, %v927_v41, %v928_v31 }
 0x17e   :  { %v2370_v44 = vpop.f32.mrb[11].mxu1  ;;  %v2191_v38 = vrot.slane %v781_v47, 9  ;;  %v885_v32 = vmax.f32 %v780_v58, %v2189_v22  ;;  %v886_v3 = vmax.f32 %v779_v9, %v2190_v29  ;;  %v3399_v15 = vsel %vm923_vm12, %v916_v46, %v922_v55 }
 0x17f   :  { %v3391_v2 = vadd.f32 %v2370_v44, %v2369_v33  ;;  %v930_v1 = vsel %vm921_vm11, %v927_v41, %v929_v54 }
 0x180   :  { %v2332_v13 = vpop.f32.mrb[8].mxu0  ;;  %v887_v16 = vmax.f32 %v781_v47, %v2191_v38  ;;  %v934_v7 = vrot.slane %v885_v32, 7  ;;  %v3416_v24 = vsel %vm923_vm12, %v927_v41, %v930_v1  ;;  %v2493_v38 = vmov 1934713408  }
 0x181   :  { %v2333_v37 = vpop.f32.mrb[9].mxu0  ;;  %v984_v32 = vunpack.c.l.s4 %v2493_v38 }
 0x182   :  { %v2334_v59 = vadd.f32 %v2333_v37, %v2332_v13  ;;  %v2335_v21 = vpop.f32.mrb[10].mxu0  ;;  %v941_v8 = vrot.slane %v887_v16, 7  ;;  %v935_v43 = vsel %vm917_vm9, %v934_v7, %v884_v19 }
 0x183   :  { %v2336_v63 = vpop.f32.mrb[11].mxu0  ;;  %v936_v27 = vsel %vm919_vm10, %v934_v7, %v935_v43  ;;  %v985_v54 = vunpack.c.0.s8 %v984_v32 }
 0x184   :  { %v690_v62 = vadd.f32 %v2334_v59, %v3353_v36  ;;  %v2337_v42 = vadd.f32 %v2336_v63, %v2335_v21  ;;  %v937_v39 = vsel %vm921_vm11, %v934_v7, %v936_v27  ;;  %v942_v56 = vsel %vm917_vm9, %v941_v8, %v886_v3 }
 0x185   :  { %v3407_v5 = vsel %vm923_vm12, %v934_v7, %v937_v39  ;;  %v943_v36 = vsel %vm919_vm10, %v941_v8, %v942_v56 }
 0x186   :  { %v714_v61 = vmul.f32 %v3362_v26, %v690_v62  ;;  %v693_v40 = vadd.f32 %v2337_v42, %v3357_v53  ;;  %v944_v28 = vsel %vm921_vm11, %v941_v8, %v943_v36  ;;  %v982_v57 = vcombine.low %v3399_v15, %v3407_v5 }
 0x187   :  { %v3419_v25 = vsel %vm923_vm12, %v941_v8, %v944_v28 }
 0x188   :  { %v728_v35 = vadd.f32 %v3367_v17, %v714_v61  ;;  %v715_v52 = vmul.f32 %v3362_v26, %v693_v40  ;;  %v1000_v53 = vcombine.low %v3416_v24, %v3419_v25  ;;  %v3435_v61 = vsub.s32 %v985_v54, %v3370_v45 }
 0x18a   :  { %v729_v51 = vadd.f32 %v3367_v17, %v715_v52  ;;  %v736_v11 = vmax.f32 %v728_v35, 0.0  ;;  %v3463_v15 = vrot.slane %v1000_v53, %v3435_v61 }
 0x18c   :  { %v737_v14 = vmax.f32 %v729_v51, 0.0 }
 0x18e   :  { %v742_v12 = vmax.f32 %v736_v11, %v737_v14 }
 0x190   :  { %v782_v46 = vcombine.high %v742_v12, %v742_v12  ;;  %v789_v60 = vrot.slane %v742_v12, %v3376_v49 }
 0x192   :  { %v796_v48 = vrot.slane %v782_v46, %v3376_v49  ;;  %v797_v23 = vcombine.high %v789_v60, %v789_v60  ;;  %v2192_v0 = vrot.slane %v789_v60, 9 }
 0x193   :  { %v2372_v50 = vpop.f32.mrb[12].mxu1 }
 0x194   :  { %v2193_v41 = vrot.slane %v797_v23, 9  ;;  %v2373_v9 = vpop.f32.mrb[13].mxu1  ;;  %v798_v58 = vcombine.high %v796_v48, %v796_v48  ;;  %v888_v59 = vmax.f32 %v789_v60, %v2192_v0  ;;  %v2194_v3 = vrot.slane %v796_v48, 9 }
 0x195   :  { %v2374_v18 = vadd.f32 %v2373_v9, %v2372_v50  ;;  %v2375_v34 = vpop.f32.mrb[14].mxu1 }
 0x196   :  { %v2376_v6 = vpop.f32.mrb[15].mxu1  ;;  %v889_v4 = vmax.f32 %v797_v23, %v2193_v41  ;;  %v2195_v33 = vrot.slane %v798_v58, 9 }
 0x197   :  { %v2377_v47 = vadd.f32 %v2376_v6, %v2375_v34  ;;  %v3452_v34 = vrot.slane %v982_v57, %v3435_v61 }
 0x198   :  { %v2338_v22 = vpop.f32.mrb[12].mxu0  ;;  %v948_v19 = vrot.slane %v889_v4, 7  ;;  %v891_v37 = vmax.f32 %v798_v58, %v2195_v33 }
 0x199   :  { %v2339_v44 = vpop.f32.mrb[13].mxu0 }
 0x19a   :  { %v2340_v31 = vadd.f32 %v2339_v44, %v2338_v22  ;;  %v2341_v29 = vpop.f32.mrb[14].mxu0  ;;  %v949_v62 = vsel %vm917_vm9, %v948_v19, %v888_v59  ;;  %v955_v42 = vrot.slane %v891_v37, 7 }
 0x19b   :  { %v2342_v13 = vpop.f32.mrb[15].mxu0  ;;  %v950_v35 = vsel %vm919_vm10, %v948_v19, %v949_v62 }
 0x19c   :  { %v698_v16 = vadd.f32 %v3351_v30, %v2340_v31  ;;  %v2343_v7 = vadd.f32 %v2342_v13, %v2341_v29 }
 0x19e   :  { %v716_v21 = vmul.f32 %v3362_v26, %v698_v16  ;;  %v701_v55 = vadd.f32 %v3355_v10, %v2343_v7  ;;  %v890_v10 = vmax.f32 %v796_v48, %v2194_v3 }
 0x1a0   :  { %v730_v8 = vadd.f32 %v3367_v17, %v716_v21  ;;  %v717_v63 = vmul.f32 %v3362_v26, %v701_v55  ;;  %v2414_v43 = vpop.f32.mrb[16].mxu0  ;;  %v956_v60 = vsel %vm917_vm9, %v955_v42, %v890_v10 }
 0x1a1   :  { %v1736_v27 = vadd.f32 %v2414_v43, %v2374_v18  ;;  %v1727_v1 = vpop.f32.mrb[17].mxu0  ;;  %v957_v33 = vsel %vm919_vm10, %v955_v42, %v956_v60 }
 0x1a2   :  { %v731_v30 = vadd.f32 %v3367_v17, %v717_v63  ;;  %v1728_v39 = vadd.f32 %v3387_v20, %v1727_v1  ;;  %v2415_v56 = vpop.f32.mrb[18].mxu0  ;;  %v738_v52 = vmax.f32 %v730_v8, 0.0  ;;  %v958_v21 = vsel %vm921_vm11, %v955_v42, %v957_v33 }
 0x1a3   :  { %v1760_v40 = vmul.f32 %v3362_v26, %v1736_v27  ;;  %v1739_v36 = vadd.f32 %v2415_v56, %v2377_v47  ;;  %v1730_v28 = vpop.f32.mrb[19].mxu0  ;;  %v3473_v27 = vsel %vm923_vm12, %v955_v42, %v958_v21 }
 0x1a4   :  { %v739_v51 = vmax.f32 %v731_v30, 0.0  ;;  %v1758_v11 = vmul.f32 %v3362_v26, %v1728_v39  ;;  %v1731_v14 = vadd.f32 %v3391_v2, %v1730_v28  ;;  %v2378_v12 = vpop.f32.mrb[16].mxu1  ;;  %v951_v2 = vsel %vm921_vm11, %v948_v19, %v950_v35 }
 0x1a5   :  { %v1768_v20 = vadd.f32 %v3367_v17, %v1760_v40  ;;  %v1761_v46 = vmul.f32 %v3362_v26, %v1739_v36  ;;  %v2379_v45 = vpop.f32.mrb[17].mxu1  ;;  %v3467_v13 = vsel %vm923_vm12, %v948_v19, %v951_v2 }
 0x1a6   :  { %v743_v48 = vmax.f32 %v738_v52, %v739_v51  ;;  %v1759_v23 = vmul.f32 %v3362_v26, %v1731_v14  ;;  %v2380_v50 = vadd.f32 %v2379_v45, %v2378_v12  ;;  %v2381_v41 = vpop.f32.mrb[18].mxu1  ;;  %v1766_v9 = vadd.f32 %v3367_v17, %v1758_v11 }
 0x1a7   :  { %v1769_v58 = vadd.f32 %v3367_v17, %v1761_v46  ;;  %v2382_v18 = vpop.f32.mrb[19].mxu1  ;;  %v1776_v44 = vmax.f32 %v1768_v20, 0.0 }
 0x1a8   :  { %v799_v6 = vcombine.high %v743_v48, %v743_v48  ;;  %v806_v47 = vrot.slane %v743_v48, %v3376_v49  ;;  %v1767_v4 = vadd.f32 %v3367_v17, %v1759_v23  ;;  %v3456_v22 = vpop.f32.mrb[20].mxu0  ;;  %v2383_v31 = vadd.f32 %v2382_v18, %v2381_v41 }
 0x1a9   :  { %v1777_v0 = vmax.f32 %v1769_v58, 0.0  ;;  %v1743_v29 = vpop.f32.mrb[21].mxu0  ;;  %v1774_v16 = vmax.f32 %v1766_v9, 0.0 }
 0x1aa   :  { %v813_v5 = vrot.slane %v799_v6, %v3376_v49  ;;  %v814_v57 = vcombine.high %v806_v47, %v806_v47  ;;  %v1775_v38 = vmax.f32 %v1767_v4, 0.0  ;;  %v2419_v32 = vpop.f32.mrb[22].mxu0  ;;  %v1744_v37 = vadd.f32 %v2380_v50, %v1743_v29 }
 0x1ab   :  { %v1783_v7 = vmax.f32 %v1776_v44, %v1777_v0  ;;  %v1746_v59 = vpop.f32.mrb[23].mxu0  ;;  %v2196_v54 = vrot.slane %v806_v47, 9 }
 0x1ac   :  { %v815_v55 = vcombine.high %v813_v5, %v813_v5  ;;  %v2197_v3 = vrot.slane %v814_v57, 9  ;;  %v2198_v24 = vrot.slane %v813_v5, 9  ;;  %v1782_v8 = vmax.f32 %v1774_v16, %v1775_v38 }
 0x1ad   :  { %v1807_v25 = vcombine.high %v1783_v7, %v1783_v7  ;;  %v1814_v53 = vrot.slane %v1783_v7, %v3376_v49  ;;  %v1762_v63 = vmul.f32 %v3362_v26, %v1744_v37  ;;  %v1747_v19 = vadd.f32 %v2383_v31, %v1746_v59 }
 0x1ae   :  { %v2199_v43 = vrot.slane %v815_v55, 9  ;;  %v893_v62 = vmax.f32 %v814_v57, %v2197_v3  ;;  %v1790_v56 = vcombine.high %v1782_v8, %v1782_v8  ;;  %v892_v10 = vmax.f32 %v806_v47, %v2196_v54 }
 0x1af   :  { %v1821_v1 = vrot.slane %v1807_v25, %v3376_v49  ;;  %v1822_v30 = vcombine.high %v1814_v53, %v1814_v53  ;;  %v2287_v39 = vrot.slane %v1814_v53, 9  ;;  %v894_v40 = vmax.f32 %v813_v5, %v2198_v24 }
 0x1b0   :  { %v895_v36 = vmax.f32 %v815_v55, %v2199_v43  ;;  %v1797_v28 = vrot.slane %v1782_v8, %v3376_v49  ;;  %v2384_v35 = vpop.f32.mrb[20].mxu1  ;;  %v1770_v14 = vadd.f32 %v3367_v17, %v1762_v63  ;;  %v962_v20 = vrot.slane %v893_v62, 7 }
 0x1b1   :  { %v1823_v52 = vcombine.high %v1821_v1, %v1821_v1  ;;  %v2288_v51 = vrot.slane %v1822_v30, 9  ;;  %v2289_v11 = vrot.slane %v1821_v1, 9  ;;  %v2385_v12 = vpop.f32.mrb[21].mxu1  ;;  %v1804_v42 = vrot.slane %v1790_v56, %v3376_v49 }
 0x1b2   :  { %v1805_v46 = vcombine.high %v1797_v28, %v1797_v28  ;;  %v2283_v45 = vrot.slane %v1797_v28, 9  ;;  %v2387_v60 = vpop.f32.mrb[22].mxu1  ;;  %v969_v48 = vrot.slane %v895_v36, 7  ;;  %v1926_v50 = vmax.f32 %v1814_v53, %v2287_v39 }
 0x1b3   :  { %v2290_v23 = vrot.slane %v1823_v52, 9  ;;  %v1927_v41 = vmax.f32 %v1822_v30, %v2288_v51  ;;  %v2388_v9 = vpop.f32.mrb[23].mxu1  ;;  %v3479_v58 = vmax.f32 %v1821_v1, %v2289_v11  ;;  %v1806_v18 = vcombine.high %v1804_v42, %v1804_v42 }
 0x1b4   :  { %v2284_v2 = vrot.slane %v1805_v46, 9  ;;  %v2285_v6 = vrot.slane %v1804_v42, 9  ;;  %v1922_v47 = vmax.f32 %v1797_v28, %v2283_v45  ;;  %v1778_v4 = vmax.f32 %v1770_v14, 0.0 }
 0x1b5   :  { %v1763_v33 = vmul.f32 %v3362_v26, %v1747_v19  ;;  %v2386_v44 = vadd.f32 %v2385_v12, %v2384_v35  ;;  %v1929_v0 = vmax.f32 %v1823_v52, %v2290_v23  ;;  %v2286_v31 = vrot.slane %v1806_v18, 9 }
 0x1b6   :  { %v1923_v29 = vmax.f32 %v1805_v46, %v2284_v2  ;;  %v2389_v5 = vadd.f32 %v2388_v9, %v2387_v60  ;;  %v3482_v57 = vrot.slane %v1927_v41, 7  ;;  %v1924_v38 = vmax.f32 %v1804_v42, %v2285_v6 }
 0x1b7   :  { %v1771_v16 = vadd.f32 %v3367_v17, %v1763_v33  ;;  %v1752_v7 = vadd.f32 %v3456_v22, %v2386_v44  ;;  %v1925_v37 = vmax.f32 %v1806_v18, %v2286_v31  ;;  %v963_v55 = vsel %vm917_vm9, %v962_v20, %v892_v10 }
 0x1b8   :  { %v1956_v59 = vrot.slane %v1923_v29, 7  ;;  %v1755_v21 = vadd.f32 %v2419_v32, %v2389_v5  ;;  %v964_v24 = vsel %vm919_vm10, %v962_v20, %v963_v55  ;;  %v970_v25 = vsel %vm917_vm9, %v969_v48, %v894_v40 }
 0x1b9   :  { %v1779_v54 = vmax.f32 %v1771_v16, 0.0  ;;  %v1764_v3 = vmul.f32 %v3362_v26, %v1752_v7  ;;  %v3491_v8 = vrot.slane %v1925_v37, 7  ;;  %v965_v22 = vsel %vm921_vm11, %v962_v20, %v964_v24 }
 0x1ba   :  { %v1957_v53 = vsel %vm917_vm9, %v1956_v59, %v1922_v47  ;;  %v1765_v63 = vmul.f32 %v3362_v26, %v1755_v21  ;;  %v966_v62 = vsel %vm923_vm12, %v962_v20, %v965_v22  ;;  %v971_v19 = vsel %vm919_vm10, %v969_v48, %v970_v25 }
 0x1bb   :  { %v1784_v43 = vmax.f32 %v1778_v4, %v1779_v54  ;;  %v1772_v32 = vadd.f32 %v3367_v17, %v1764_v3  ;;  %v972_v30 = vsel %vm921_vm11, %v969_v48, %v971_v19  ;;  %v991_v39 = vcombine.low %v3467_v13, %v966_v62 }
 0x1bc   :  { %v1773_v1 = vadd.f32 %v3367_v17, %v1765_v63  ;;  %v1958_v56 = vsel %vm919_vm10, %v1956_v59, %v1957_v53  ;;  %v973_v36 = vsel %vm923_vm12, %v969_v48, %v972_v30  ;;  %v1971_v51 = vsel %vm917_vm9, %v3482_v57, %v1926_v50 }
 0x1bd   :  { %v1824_v10 = vcombine.high %v1784_v43, %v1784_v43  ;;  %v1831_v26 = vrot.slane %v1784_v43, %v3376_v49  ;;  %v1780_v40 = vmax.f32 %v1772_v32, 0.0  ;;  %v3505_v35 = vrot.slane %v991_v39, %v3435_v61 }
 0x1be   :  { %v1781_v28 = vmax.f32 %v1773_v1, 0.0  ;;  %v1009_v52 = vcombine.low %v3473_v27, %v973_v36  ;;  %v1959_v17 = vsel %vm921_vm11, %v1956_v59, %v1958_v56  ;;  %v1964_v46 = vsel %vm917_vm9, %v3491_v8, %v1924_v38 }
 0x1bf   :  { %v1838_v13 = vrot.slane %v1824_v10, %v3376_v49  ;;  %v1839_v11 = vcombine.high %v1831_v26, %v1831_v26  ;;  %v2291_v14 = vrot.slane %v1831_v26, 9  ;;  %v2200_v42 = vcombine.high %v3452_v34, %v3505_v35 }
 0x1c0   :  { %v1785_v12 = vmax.f32 %v1780_v40, %v1781_v28  ;;  %v3513_v20 = vrot.slane %v1009_v52, %v3435_v61  ;;  %v1977_v27 = vrot.slane %v1929_v0, 7  ;;  %v1960_v48 = vsel %vm923_vm12, %v1956_v59, %v1959_v17 }
 0x1c1   :  { %v1840_v45 = vcombine.high %v1838_v13, %v1838_v13  ;;  %v2292_v60 = vrot.slane %v1839_v11, 9  ;;  %v2293_v23 = vrot.slane %v1838_v13, 9  ;;  %v1930_v2 = vmax.f32 %v1831_v26, %v2291_v14 }
 0x1c2   :  { %v1841_v50 = vcombine.high %v1785_v12, %v1785_v12  ;;  %v1848_v41 = vrot.slane %v1785_v12, %v3376_v49  ;;  %v2201_v9 = vcombine.high %v3463_v15, %v3513_v20  ;;  %v1965_v47 = vsel %vm919_vm10, %v3491_v8, %v1964_v46 }
 0x1c3   :  { %v2294_v18 = vrot.slane %v1840_v45, 9  ;;  %v1931_v6 = vmax.f32 %v1839_v11, %v2292_v60  ;;  %v1038_v5 = vrot.slane %v2200_v42, %v3376_v49  ;;  %v1972_v38 = vsel %vm919_vm10, %v3482_v57, %v1971_v51 }
 0x1c4   :  { %v1855_v4 = vrot.slane %v1841_v50, %v3376_v49  ;;  %v1856_v33 = vcombine.high %v1848_v41, %v1848_v41  ;;  %v2295_v44 = vrot.slane %v1848_v41, 9  ;;  %v1062_v0 = vrot.slane %v2201_v9, %v3376_v49 }
 0x1c5   :  { %v1933_v31 = vmax.f32 %v1840_v45, %v2294_v18  ;;  %v1984_v29 = vrot.slane %v1931_v6, 7  ;;  %v1932_v16 = vmax.f32 %v1838_v13, %v2293_v23  ;;  %v1966_v59 = vsel %vm921_vm11, %v3491_v8, %v1965_v47 }
 0x1c6   :  { %v1857_v7 = vcombine.high %v1855_v4, %v1855_v4  ;;  %v2296_v37 = vrot.slane %v1856_v33, 9  ;;  %v2297_v54 = vrot.slane %v1855_v4, 9  ;;  %v2425_v3 = vpack.i.bf16 %v1062_v0, %v1038_v5 }
 0x1c7   :  { %v1985_v21 = vsel %vm917_vm9, %v1984_v29, %v1930_v2  ;;  %v1991_v55 = vrot.slane %v1933_v31, 7  ;;  %v1934_v25 = vmax.f32 %v1848_v41, %v2295_v44  ;;  %v1973_v63 = vsel %vm921_vm11, %v3482_v57, %v1972_v38 }
 0x1c8   :  { %v2298_v24 = vrot.slane %v1857_v7, 9  ;;  %v1935_v53 = vmax.f32 %v1856_v33, %v2296_v37  ;;  %2426 = vrot.lane.b32.xlu0 %v2425_v3, %s2489_s29  ;;  %v1974_v22 = vsel %vm923_vm12, %v3482_v57, %v1973_v63  ;;  %v1978_v43 = vsel %vm917_vm9, %v1977_v27, %v3479_v58 }
 0x1c9   :  { %v1986_v32 = vsel %vm919_vm10, %v1984_v29, %v1985_v21  ;;  %v1992_v62 = vsel %vm917_vm9, %v1991_v55, %v1932_v16  ;;  %v1967_v30 = vsel %vm923_vm12, %v3491_v8, %v1966_v59  ;;  %v1979_v39 = vsel %vm919_vm10, %v1977_v27, %v1978_v43 }
 0x1ca   :  { %v1937_v19 = vmax.f32 %v1857_v7, %v2298_v24  ;;  %v1998_v1 = vrot.slane %v1935_v53, 7  ;;  %v1936_v56 = vmax.f32 %v1855_v4, %v2297_v54  ;;  %v1980_v10 = vsel %vm921_vm11, %v1977_v27, %v1979_v39 }
 0x1cb   :  { %v1993_v26 = vsel %vm919_vm10, %v1991_v55, %v1992_v62  ;;  %v2018_v57 = vcombine.low %v1960_v48, %v1974_v22  ;;  %v1981_v58 = vsel %vm923_vm12, %v1977_v27, %v1980_v10  ;;  %v1987_v36 = vsel %vm921_vm11, %v1984_v29, %v1986_v32 }
 0x1cc   :  { %v2005_v40 = vrot.slane %v1937_v19, 7  ;;  %v1999_v28 = vsel %vm917_vm9, %v1998_v1, %v1934_v25  ;;  %v1994_v52 = vsel %vm921_vm11, %v1991_v55, %v1993_v26  ;;  %v2036_v8 = vcombine.low %v1967_v30, %v1981_v58 }
 0x1cd   :  { %v2000_v17 = vsel %vm919_vm10, %v1998_v1, %v1999_v28  ;;  %v1020_v11 = vcombine.low %v3452_v34, %v3505_v35  ;;  %v1044_v14 = vcombine.low %v3463_v15, %v3513_v20  ;;  %v1988_v12 = vsel %vm923_vm12, %v1984_v29, %v1987_v36 }
 0x1ce   :  { %v2001_v51 = vsel %vm921_vm11, %v1998_v1, %v2000_v17  ;;  %v2006_v13 = vsel %vm917_vm9, %v2005_v40, %v1936_v56  ;;  %v1995_v60 = vsel %vm923_vm12, %v1991_v55, %v1994_v52  ;;  %v2025_v23 = vrot.slane %v2018_v57, %v3435_v61 }
 0x1cf   :  { %v2002_v42 = vsel %vm923_vm12, %v1998_v1, %v2001_v51  ;;  %v2007_v46 = vsel %vm919_vm10, %v2005_v40, %v2006_v13  ;;  %v2043_v15 = vrot.slane %v2036_v8, %v3435_v61  ;;  %v1027_v33 = vrot.slane %v1020_v11, %v3376_v49 }
 0x1d0   :  { %v2008_v27 = vsel %vm921_vm11, %v2005_v40, %v2007_v46  ;;  %v2027_v45 = vcombine.low %v1988_v12, %v2002_v42  ;;  %v1051_v44 = vrot.slane %v1044_v14, %v3376_v49 }
 0x1d1   :  { %v2009_v48 = vsel %vm923_vm12, %v2005_v40, %v2008_v27 }
 0x1d2   :  { %v2034_v34 = vrot.slane %v2027_v45, %v3435_v61  ;;  %v2045_v35 = vcombine.low %v1995_v60, %v2009_v48 }
 0x1d4   :  { %v2052_v20 = vrot.slane %v2045_v35, %v3435_v61  ;;  %v2299_v50 = vcombine.high %v2025_v23, %v2034_v34  ;;  %v2056_v41 = vcombine.low %v2025_v23, %v2034_v34 }
 0x1d6   :  { %v2300_v9 = vcombine.high %v2043_v15, %v2052_v20  ;;  %v2080_v18 = vcombine.low %v2043_v15, %v2052_v20  ;;  %v2074_v2 = vrot.slane %v2299_v50, %v3376_v49  ;;  %v2063_v16 = vrot.slane %v2056_v41, %v3376_v49 }
 0x1d8   :  { %v2098_v6 = vrot.slane %v2300_v9, %v3376_v49  ;;  %v2087_v59 = vrot.slane %v2080_v18, %v3376_v49 }
 0x1da   :  { %v2430_v47 = vpack.i.bf16 %v2098_v6, %v2074_v2 }
 0x1dc   :  { %2431 = vrot.lane.b32.xlu1 %v2430_v47, %s2489_s29 }
 0x23a   :  { %v2427_v4 = vpop.permute.xlu0 %2426 }
 0x23b   :  { %v2429_v0 = vunpack.i.h.bf16 %v2427_v4  ;;  %v2428_v31 = vunpack.i.l.bf16 %v2427_v4 }
 0x23d   :  { %v1067_v61 = vsel %vm364_vm7, %v1051_v44, %v2429_v0  ;;  %v1066_v29 = vsel %vm364_vm7, %v1027_v33, %v2428_v31 }
 0x23e   :  { %v2202_v5 = vpack.c.bf16 %v1067_v61, %v1066_v29 }
 0x240   :  { %2203 = vst.sshfl [vmem:[%s3589_s4] sm:$0x33 pattern:$0x76325410] %v2202_v5 }
 0x24e   :  { %v2432_v38 = vpop.permute.xlu1 %2431 }
 0x24f   :  { %v2434_v7 = vunpack.i.h.bf16 %v2432_v38  ;;  %v2433_v37 = vunpack.i.l.bf16 %v2432_v38 }
 0x251   :  { %v2102_v21 = vsel %vm364_vm7, %v2063_v16, %v2433_v37  ;;  %v2103_v55 = vsel %vm364_vm7, %v2087_v59, %v2434_v7 }
 0x252   :  { %v2301_v54 = vpack.c.bf16 %v2103_v55, %v2102_v21 }
 0x254   :  { %2303 = vst.sshfl [vmem:[%s3589_s4 + $0x4] sm:$0x33 pattern:$0x76325410] %v2301_v54 }

// kernel: crnn_forward.10
= control target key start
LH: loop header
LB: loop body
LE: loop exit
PB: predicated region body
PF: predicated region fallthrough
CT: control target
= control target key end

     0   :  { %v33_v0 = vlaneseq  ;;  %v2050_v3 = vmov 1983009808   ;;  %vm62_vm0 = vsmask.f32 1280  ;;  %vm63_vm1 = vsmask.f32 3336  ;;  %s2846_s0 = inlined_call_operand.vmem [shape: bf16[2,6,6,64], index: 0, kind: input, shape index: {}]   ;;  %s2847_s1 = inlined_call_operand.vmem [shape: bf16[576,128], index: 1, kind: input, shape index: {}]   ;;  %s2848_s2 = inlined_call_operand.vmem [shape: f32[1,128], index: 2, kind: input, shape index: {}]   ;;  %s2849_s3 = inlined_call_operand.vmem [shape: f32[1,128], index: 3, kind: input, shape index: {}]   ;;  %s2850_s4 = inlined_call_operand.vmem [shape: bf16[2,2,256], index: 4, kind: output, shape index: {}]  }
   0x1   :  { %v2084_v1 = vld [vmem:[%s2846_s0 + $0x8] sm:$0x7]  ;;  %v2089_v2 = vld [vmem:[%s2846_s0 + $0xc] sm:$0x7]  ;;  %v31_v4 = vunpack.c.l.s4 %v2050_v3  ;;  %v2094_v5 = vld [vmem:[%s2846_s0 + $0x4] sm:$0x7] }
   0x2   :  { %v2096_v6 = vshrl.u32 %v33_v0, 7  ;;  %v203_v7 = vcombine.low %v2084_v1, %v2089_v2  ;;  %v2103_v8 = vld [vmem:[%s2846_s0] sm:$0x7]  ;;  %v2108_v9 = vld [vmem:[%s2846_s0 + $0x10] sm:$0x7]  ;;  %v255_v11 = vcombine.low %v2094_v5, %v2084_v1  ;;  %vm125_vm2 = vcmask 1040384   ;;  %vm2160_vm6 = vmor %vm62_vm0, %vm63_vm1 }
   0x3   :  { %v32_v10 = vunpack.c.0.s8 %v31_v4  ;;  %v202_v12 = vcombine.low %v2103_v8, %v2094_v5  ;;  %v256_v13 = vcombine.low %v2089_v2, %v2108_v9  ;;  %v2119_v14 = vld [vmem:[%s2846_s0 + $0x14] sm:$0x7]  ;;  %v2127_v16 = vld [vmem:[%s2846_s0 + $0x1c] sm:$0x7]  ;;  %v2132_v17 = vld [vmem:[%s2846_s0 + $0x20] sm:$0x7] }
   0x4   :  { %vm65_vm3 = vsmask.f32 5392  ;;  %vm67_vm4 = vsmask.f32 7448  ;;  %vm126_vm5 = vcmask 1042434   ;;  %v1112_v18 = vcombine.low %v2127_v16, %v2132_v17  ;;  %v1974_v28 = vld [vmem:[%s2847_s1 + $0x40] sm:$0xff]  }
   0x5   :  { %v2122_v15 = vsub.s32 %v32_v10, %v2096_v6  ;;  %vm128_vm7 = vcmask 1044484   ;;  %1840 = vmatprep.subr.bf16.mxu0 %v1974_v28  ;;  %v1975_v37 = vld [vmem:[%s2847_s1] sm:$0xff]   ;;  %v1976_v38 = vld [vmem:[%s2847_s1 + $0x48] sm:$0xff]   ;;  %vm2196_vm8 = vmor %vm2160_vm6, %vm65_vm3  ;;  %vm130_vm9 = vcmask 1046534   ;;  %s2051_s11 = smov 64   ;;  %vm339_vm14 = vcmask 523264  }
   0x6   :  { %1841 = vmatpush3.bf16.msra.mxu0 %v1975_v37  ;;  %v1977_v52 = vld [vmem:[%s2847_s1 + $0xc0] sm:$0xff]   ;;  %vm2212_vm10 = vmor %vm2196_vm8, %vm67_vm4  ;;  %v1978_v62 = vld [vmem:[%s2847_s1 + $0x8] sm:$0xff]   ;;  %vm2053_vm15 = vmmov 0   ;;  %vm843_vm0 = vcmask 1041409   ;;  %vm845_vm1 = vcmask 1043459   ;;  %vm849_vm3 = vcmask 1047559  }
   0x7   :  { %v2138_v19 = vrot.slane %v2084_v1, %v2122_v15  ;;  %v2142_v20 = vrot.slane %v2089_v2, %v2122_v15  ;;  %v2146_v21 = vrot.slane %v2108_v9, %v2122_v15  ;;  %v263_v22 = vrot.slane %v255_v11, %v2122_v15  ;;  %1842 = vmatprep.subr.bf16.mxu0 %v1976_v38  ;;  %v1979_v63 = vld [vmem:[%s2847_s1 + $0x80] sm:$0xff]   ;;  %vm2233_vm11 = vmor %vm125_vm2, %vm126_vm5  ;;  %v1980_v28 = vld [vmem:[%s2847_s1 + $0x50] sm:$0xff]  }
   0x8   :  { %v270_v23 = vrot.slane %v256_v13, %v2122_v15  ;;  %v2152_v24 = vrot.slane %v2103_v8, %v2122_v15  ;;  %v2156_v25 = vrot.slane %v2094_v5, %v2122_v15  ;;  %v2166_v27 = vrot.slane %v2119_v14, %v2122_v15  ;;  %1862 = vmatprep.subr.bf16.mxu1 %v1977_v52  ;;  %vm2258_vm12 = vmor %vm2233_vm11, %vm128_vm7 }
   0x9   :  { %v2173_v29 = vcombine.high %v2138_v19, %v2138_v19  ;;  %v2177_v30 = vcombine.high %v2142_v20, %v2142_v20  ;;  %v98_v31 = vshrl.u32 %v2138_v19, 16  ;;  %v101_v32 = vshll.u32 %v2138_v19, 16  ;;  %1863 = vmatpush3.bf16.msra.mxu1 %v1979_v63  ;;  %vm2287_vm13 = vmor %vm2258_vm12, %vm130_vm9 }
   0xa   :  { %v271_v33 = vcombine.low %v263_v22, %v270_v23  ;;  %v112_v34 = vshrl.u32 %v2142_v20, 16  ;;  %v115_v35 = vshll.u32 %v2142_v20, 16  ;;  %v2185_v36 = vcombine.high %v2146_v21, %v2146_v21  ;;  %1843 = vmatpush3.bf16.msra.mxu0 %v1978_v62 }
   0xb   :  { %v100_v40 = vrot.slane %v98_v31, 6  ;;  %v103_v41 = vrot.slane %v101_v32, 7  ;;  %v107_v42 = vshll.u32 %v2173_v29, 16  ;;  %v121_v43 = vshll.u32 %v2177_v30, 16  ;;  %1844 = vmatprep.subr.bf16.mxu0 %v1980_v28  ;;  %v2315_v28 = vld [vmem:[%s2846_s0 + $0x24] sm:$0x7] }
   0xc   :  { %272 = vrot.lane.b32.xlu0 %v271_v33, %s2051_s11  ;;  %v114_v44 = vrot.slane %v112_v34, 6  ;;  %v117_v45 = vrot.slane %v115_v35, 7  ;;  %v158_v46 = vshrl.u32 %v2146_v21, 16  ;;  %v161_v47 = vshll.u32 %v2146_v21, 16  ;;  %v1981_v35 = vld [vmem:[%s2847_s1 + $0xc8] sm:$0xff]  }
   0xd   :  { %v104_v48 = vor.u32 %v103_v41, %v100_v40  ;;  %v109_v49 = vrot.slane %v107_v42, 7  ;;  %v123_v50 = vrot.slane %v121_v43, 7  ;;  %v167_v51 = vshll.u32 %v2185_v36, 16  ;;  %1864 = vmatprep.subr.bf16.mxu1 %v1981_v35  ;;  %v1988_v35 = vld [vmem:[%s2847_s1 + $0x60] sm:$0xff]   ;;  %v1989_v41 = vld [vmem:[%s2847_s1 + $0xd8] sm:$0xff]  }
   0xe   :  { %v118_v54 = vor.u32 %v117_v45, %v114_v44  ;;  %v160_v55 = vrot.slane %v158_v46, 6  ;;  %v163_v56 = vrot.slane %v161_v47, 7  ;;  %v2218_v57 = vcombine.high %v2166_v27, %v2166_v27 }
   0xf   :  { %v105_v58 = vrot.slane %v104_v48, 2  ;;  %v169_v59 = vrot.slane %v167_v51, 7  ;;  %v185_v60 = vshrl.u32 %v2166_v27, 16  ;;  %v188_v61 = vshll.u32 %v2166_v27, 16  ;;  %v1983_v51 = vld [vmem:[%s2847_s1 + $0x88] sm:$0xff]  }
  0x10   :  { %v119_v0 = vrot.slane %v118_v54, 2  ;;  %v164_v3 = vor.u32 %v163_v56, %v160_v55  ;;  %v194_v4 = vshll.u32 %v2218_v57, 16  ;;  %v45_v10 = vcombine.high %v2156_v25, %v2156_v25  ;;  %1865 = vmatpush3.bf16.msra.mxu1 %v1983_v51 }
  0x11   :  { %v2239_v13 = vsel %vm2212_vm10, %v105_v58, %v109_v49  ;;  %v187_v22 = vrot.slane %v185_v60, 6  ;;  %v190_v23 = vrot.slane %v188_v61, 7  ;;  %v84_v26 = vshrl.u32 %v2156_v25, 16 }
  0x12   :  { %v2247_v31 = vsel %vm2212_vm10, %v119_v0, %v123_v50  ;;  %v165_v32 = vrot.slane %v164_v3, 2  ;;  %v196_v33 = vrot.slane %v194_v4, 7  ;;  %v87_v34 = vshll.u32 %v2156_v25, 16  ;;  %v1982_v50 = vld [vmem:[%s2847_s1 + $0x10] sm:$0xff]  }
  0x13   :  { %v191_v37 = vor.u32 %v190_v23, %v187_v22  ;;  %v220_v38 = vcombine.low %v2239_v13, %v2247_v31  ;;  %v86_v39 = vrot.slane %v84_v26, 6  ;;  %v93_v40 = vshll.u32 %v45_v10, 16  ;;  %1845 = vmatpush3.bf16.msra.mxu0 %v1982_v50  ;;  %v1985_v0 = vld [vmem:[%s2847_s1 + $0xd0] sm:$0xff]   ;;  %v1986_v23 = vld [vmem:[%s2847_s1 + $0x18] sm:$0xff]  }
  0x14   :  { %v2264_v42 = vsel %vm2212_vm10, %v165_v32, %v169_v59  ;;  %v89_v43 = vrot.slane %v87_v34, 7  ;;  %v2268_v44 = vcombine.high %v2152_v24, %v2152_v24  ;;  %v70_v45 = vshrl.u32 %v2152_v24, 16  ;;  %v1984_v59 = vld [vmem:[%s2847_s1 + $0x58] sm:$0xff]   ;;  %1866 = vmatprep.subr.bf16.mxu1 %v1985_v0  ;;  %v1987_v32 = vld [vmem:[%s2847_s1 + $0x90] sm:$0xff]  }
  0x15   :  { %v192_v46 = vrot.slane %v191_v37, 2  ;;  %v2272_v47 = vrot.slane %v220_v38, %v2122_v15  ;;  %v95_v49 = vrot.slane %v93_v40, 7  ;;  %v73_v55 = vshll.u32 %v2152_v24, 16  ;;  %1846 = vmatprep.subr.bf16.mxu0 %v1984_v59  ;;  %v2348_v40 = vld [vmem:[%s2846_s0 + $0x18] sm:$0x7]  ;;  %1867 = vmatpush3.bf16.msra.mxu1 %v1987_v32 }
  0x16   :  { %v90_v52 = vor.u32 %v89_v43, %v86_v39  ;;  %v72_v54 = vrot.slane %v70_v45, 6  ;;  %v79_v56 = vshll.u32 %v2268_v44, 16  ;;  %v1734_v61 = vrot.slane %v2156_v25, 9  ;;  %1868 = vmatprep.subr.bf16.mxu1 %v1989_v41 }
  0x17   :  { %v197_v60 = vsel %vm2212_vm10, %v192_v46, %v196_v33  ;;  %v138_v62 = vrot.slane %v45_v10, 7  ;;  %v1735_v63 = vrot.slane %v2138_v19, 9  ;;  %v75_v11 = vrot.slane %v73_v55, 7  ;;  %1847 = vmatpush3.bf16.msra.mxu0 %v1986_v23 }
  0x18   :  { %v319_v3 = vcombine.low %v2264_v42, %v197_v60  ;;  %v91_v4 = vrot.slane %v90_v52, 2  ;;  %v81_v22 = vrot.slane %v79_v56, 7  ;;  %v142_v19 = vrot.slane %v2173_v29, 7  ;;  %1848 = vmatprep.subr.bf16.mxu0 %v1988_v35  ;;  %v1994_v35 = vld [vmem:[%s2847_s1 + $0x28] sm:$0xff]  }
  0x19   :  { %v2307_v25 = vsel %vm2287_vm13, %v1734_v61, %v138_v62  ;;  %v1736_v10 = vrot.slane %v2142_v20, 9  ;;  %v146_v26 = vrot.slane %v2177_v30, 7  ;;  %v76_v29 = vor.u32 %v75_v11, %v72_v54  ;;  %v2329_v30 = vld [vmem:[%s2846_s0 + $0x28] sm:$0x7] }
  0x1a   :  { %v326_v33 = vrot.slane %v319_v3, %v2122_v15  ;;  %v2323_v34 = vsel %vm2212_vm10, %v91_v4, %v95_v49  ;;  %v1737_v20 = vrot.slane %v2146_v21, 9  ;;  %v2338_v38 = vsel %vm2287_vm13, %v1735_v63, %v142_v19  ;;  %v1991_v63 = vld [vmem:[%s2847_s1 + $0x98] sm:$0xff]  }
  0x1b   :  { %v274_v37 = vcombine.low %v2323_v34, %v2239_v13  ;;  %v2342_v39 = vsel %vm2287_vm13, %v1736_v10, %v146_v26  ;;  %v173_v21 = vrot.slane %v2185_v36, 7  ;;  %v77_v45 = vrot.slane %v76_v29, 2  ;;  %v1990_v36 = vld [vmem:[%s2847_s1 + $0x20] sm:$0xff]   ;;  %1869 = vmatpush3.bf16.msra.mxu1 %v1991_v63 }
  0x1c   :  { %v327_v43 = vcombine.low %v2272_v47, %v326_v33  ;;  %v1738_v46 = vrot.slane %v2166_v27, 9  ;;  %v200_v49 = vrot.slane %v2218_v57, 7  ;;  %v291_v51 = vcombine.low %v2307_v25, %v2338_v38  ;;  %1849 = vmatpush3.bf16.msra.mxu0 %v1990_v36  ;;  %v1993_v26 = vld [vmem:[%s2847_s1 + $0xe0] sm:$0xff]  }
  0x1d   :  { %v2361_v50 = vsel %vm2287_vm13, %v1737_v20, %v173_v21  ;;  %v2367_v52 = vrot.slane %v2127_v16, %v2122_v15  ;;  %v2371_v27 = vrot.slane %v2132_v17, %v2122_v15  ;;  %v82_v57 = vsel %vm2212_vm10, %v77_v45, %v81_v22  ;;  %v1992_v22 = vld [vmem:[%s2847_s1 + $0x68] sm:$0xff]   ;;  %1870 = vmatprep.subr.bf16.mxu1 %v1993_v26 }
  0x1e   :  { %328 = vrot.lane.b32.xlu1 %v327_v43, %s2051_s11  ;;  %v2378_v54 = vsel %vm2287_vm13, %v1738_v46, %v200_v49  ;;  %v292_v55 = vcombine.low %v2342_v39, %v2361_v50  ;;  %v2384_v56 = vrot.slane %v2315_v28, %v2122_v15  ;;  %v219_v59 = vcombine.low %v82_v57, %v2323_v34  ;;  %v1995_v46 = vld [vmem:[%s2847_s1 + $0xa0] sm:$0xff]  }
  0x1f   :  { %v299_v60 = vrot.slane %v291_v51, %v2122_v15  ;;  %v330_v61 = vcombine.low %v2361_v50, %v2378_v54  ;;  %v2392_v62 = vrot.slane %v2329_v30, %v2122_v15  ;;  %v1113_v3 = vcombine.low %v2315_v28, %v2329_v30  ;;  %1850 = vmatprep.subr.bf16.mxu0 %v1992_v22 }
  0x20   :  { %v306_v0 = vrot.slane %v292_v55, %v2122_v15  ;;  %v1120_v4 = vrot.slane %v1112_v18, %v2122_v15  ;;  %v2406_v11 = vrot.slane %v2348_v40, %v2122_v15  ;;  %v227_v23 = vrot.slane %v219_v59, %v2122_v15  ;;  %1851 = vmatpush3.bf16.msra.mxu0 %v1994_v35 }
  0x21   :  { %v2414_v19 = vcombine.high %v2367_v52, %v2367_v52  ;;  %v2418_v10 = vcombine.high %v2371_v27, %v2371_v27  ;;  %v2422_v18 = vcombine.high %v2384_v56, %v2384_v56  ;;  %v1127_v33 = vrot.slane %v1113_v3, %v2122_v15  ;;  %1871 = vmatpush3.bf16.msra.mxu1 %v1995_v46  ;;  %v1998_v46 = vld [vmem:[%s2847_s1 + $0x30] sm:$0xff]  }
  0x22   :  { %v307_v32 = vcombine.low %v299_v60, %v306_v0  ;;  %v2430_v29 = vcombine.high %v2406_v11, %v2406_v11  ;;  %v934_v20 = vshrl.u32 %v2406_v11, 16  ;;  %v235_v21 = vcombine.low %v227_v23, %v2272_v47  ;;  %v1996_v47 = vld [vmem:[%s2847_s1 + $0x70] sm:$0xff]  }
  0x23   :  { %v937_v41 = vshll.u32 %v2406_v11, 16  ;;  %v948_v43 = vshrl.u32 %v2367_v52, 16  ;;  %v951_v45 = vshll.u32 %v2367_v52, 16  ;;  %v1128_v49 = vcombine.low %v1120_v4, %v1127_v33  ;;  %1852 = vmatprep.subr.bf16.mxu0 %v1996_v47 }
  0x24   :  { %308 = vrot.lane.b32.xlu1 %v307_v32, %s2051_s11  ;;  %v936_v36 = vrot.slane %v934_v20, 6  ;;  %v943_v51 = vshll.u32 %v2430_v29, 16  ;;  %v957_v57 = vshll.u32 %v2414_v19, 16  ;;  %236 = vrot.lane.b32.xlu0 %v235_v21, %s2051_s11  ;;  %v962_v63 = vshrl.u32 %v2371_v27, 16 }
  0x25   :  { %v939_v55 = vrot.slane %v937_v41, 7  ;;  %v950_v59 = vrot.slane %v948_v43, 6  ;;  %v953_v60 = vrot.slane %v951_v45, 7  ;;  %v965_v4 = vshll.u32 %v2371_v27, 16  ;;  %v2459_v43 = vld [vmem:[%s2846_s0 + $0x2c] sm:$0x7]  ;;  %1853 = vmatpush3.bf16.msra.mxu0 %v1998_v46 }
  0x26   :  { %v945_v0 = vrot.slane %v943_v51, 7  ;;  %v959_v3 = vrot.slane %v957_v57, 7  ;;  %v971_v22 = vshll.u32 %v2418_v10, 16  ;;  %v964_v32 = vrot.slane %v962_v63, 6  ;;  %v1997_v45 = vld [vmem:[%s2847_s1 + $0xe8] sm:$0xff]  }
  0x27   :  { %v940_v23 = vor.u32 %v939_v55, %v936_v36  ;;  %v954_v26 = vor.u32 %v953_v60, %v950_v59  ;;  %v976_v33 = vshrl.u32 %v2384_v56, 16  ;;  %v967_v20 = vrot.slane %v965_v4, 7  ;;  %v1999_v55 = vld [vmem:[%s2847_s1 + $0xa8] sm:$0xff]   ;;  %1872 = vmatprep.subr.bf16.mxu1 %v1997_v45 }
  0x28   :  { %v973_v35 = vrot.slane %v971_v22, 7  ;;  %v979_v21 = vshll.u32 %v2384_v56, 16  ;;  %v985_v41 = vshll.u32 %v2422_v18, 16  ;;  %1129 = vrot.lane.b32.xlu0 %v1128_v49, %s2051_s11  ;;  %v2470_v47 = vcombine.high %v2392_v62, %v2392_v62  ;;  %v2000_v49 = vld [vmem:[%s2847_s1 + $0x78] sm:$0xff]   ;;  %1873 = vmatpush3.bf16.msra.mxu1 %v1999_v55 }
  0x29   :  { %v941_v36 = vrot.slane %v940_v23, 2  ;;  %v955_v51 = vrot.slane %v954_v26, 2  ;;  %v978_v57 = vrot.slane %v976_v33, 6  ;;  %v968_v59 = vor.u32 %v967_v20, %v964_v32  ;;  %1854 = vmatprep.subr.bf16.mxu0 %v2000_v49 }
  0x2a   :  { %v981_v60 = vrot.slane %v979_v21, 7  ;;  %v987_v63 = vrot.slane %v985_v41, 7  ;;  %v1015_v4 = vshrl.u32 %v2392_v62, 16  ;;  %v1018_v26 = vshll.u32 %v2392_v62, 16 }
  0x2b   :  { %v946_v22 = vsel %vm2212_vm10, %v941_v36, %v945_v0  ;;  %v2483_v23 = vsel %vm2212_vm10, %v955_v51, %v959_v3  ;;  %v1024_v32 = vshll.u32 %v2470_v47, 16  ;;  %v969_v33 = vrot.slane %v968_v59, 2  ;;  %v2001_v3 = vld [vmem:[%s2847_s1 + $0xf0] sm:$0xff]  }
  0x2c   :  { %v982_v20 = vor.u32 %v981_v60, %v978_v57  ;;  %v1076_v21 = vcombine.low %v946_v22, %v2483_v23  ;;  %v1017_v41 = vrot.slane %v1015_v4, 6  ;;  %v1020_v45 = vrot.slane %v1018_v26, 7  ;;  %1874 = vmatprep.subr.bf16.mxu1 %v2001_v3 }
  0x2d   :  { %v1026_v46 = vrot.slane %v1024_v32, 7  ;;  %v1039_v0 = vrot.slane %v2459_v43, %v2122_v15  ;;  %v1790_v36 = vrot.slane %v2406_v11, 9  ;;  %v2496_v51 = vsel %vm2212_vm10, %v969_v33, %v973_v35  ;;  %v2002_v11 = vld [vmem:[%s2847_s1 + $0x38] sm:$0xff]   ;;  %v2003_v33 = vld [vmem:[%s2847_s1 + $0xb0] sm:$0xff]  }
  0x2e   :  { %v983_v57 = vrot.slane %v982_v20, 2  ;;  %v1084_v55 = vrot.slane %v1076_v21, %v2122_v15  ;;  %v991_v59 = vrot.slane %v2430_v29, 7  ;;  %v1021_v4 = vor.u32 %v1020_v45, %v1017_v41  ;;  %v2004_v20 = vld [vmem:[%s2847_s1 + $0xf8] sm:$0xff]   ;;  %1855 = vmatpush3.bf16.msra.mxu0 %v2002_v11  ;;  %1875 = vmatpush3.bf16.msra.mxu1 %v2003_v33 }
  0x2f   :  { %v1040_v49 = vcombine.high %v1039_v0, %v1039_v0  ;;  %v1042_v22 = vshrl.u32 %v1039_v0, 16  ;;  %v1045_v26 = vshll.u32 %v1039_v0, 16  ;;  %v1791_v29 = vrot.slane %v2367_v52, 9  ;;  %1876 = vmatprep.subr.bf16.mxu1 %v2004_v20 }
  0x30   :  { %v2507_v35 = vsel %vm2212_vm10, %v983_v57, %v987_v63  ;;  %v2511_v32 = vsel %vm2287_vm13, %v1790_v36, %v991_v59  ;;  %v1022_v63 = vrot.slane %v1021_v4, 2  ;;  %v2005_v36 = vld [vmem:[%s2847_s1 + $0xb8] sm:$0xff]   ;;  %v995_v3 = vrot.slane %v2414_v19, 7 }
  0x31   :  { %v1077_v21 = vcombine.low %v2496_v51, %v2507_v35  ;;  %v1044_v41 = vrot.slane %v1042_v22, 6  ;;  %v1051_v45 = vshll.u32 %v1040_v49, 16  ;;  %v1047_v52 = vrot.slane %v1045_v26, 7 }
  0x32   :  { %v1792_v57 = vrot.slane %v2371_v27, 9  ;;  %v999_v59 = vrot.slane %v2418_v10, 7  ;;  %v2531_v4 = vsel %vm2212_vm10, %v1022_v63, %v1026_v46  ;;  %v1793_v11 = vrot.slane %v2384_v56, 9  ;;  %v2008_v56 = vld [vmem:[%s2847_s1 + $0x40] sm:$0xff]   ;;  %1877 = vmatpush3.bf16.msra.mxu1 %v2005_v36 }
  0x33   :  { %v1091_v60 = vrot.slane %v1077_v21, %v2122_v15  ;;  %v1053_v22 = vrot.slane %v1051_v45, 7  ;;  %v1048_v48 = vor.u32 %v1047_v52, %v1044_v41  ;;  %v1132_v26 = vcombine.low %v2507_v35, %v2531_v4  ;;  %1889 = vmatprep.subr.bf16.mxu1 %v2008_v56  ;;  %v2010_v35 = vld [vmem:[%s2847_s1] sm:$0xff]  }
  0x34   :  { %v996_v27 = vsel %vm2287_vm13, %v1791_v29, %v995_v3  ;;  %v1000_v19 = vsel %vm2287_vm13, %v1792_v57, %v999_v59  ;;  %v1003_v33 = vrot.slane %v2422_v18, 7  ;;  %v1794_v46 = vrot.slane %v2392_v62, 9 }
  0x35   :  { %v1092_v10 = vcombine.low %v1084_v55, %v1091_v60  ;;  %v1030_v21 = vrot.slane %v2470_v47, 7  ;;  %v1049_v20 = vrot.slane %v1048_v48, 2  ;;  %v1795_v63 = vrot.slane %v1039_v0, 9 }
  0x36   :  { %v1057_v41 = vrot.slane %v1040_v49, 7  ;;  %v1095_v45 = vcombine.low %v2511_v32, %v996_v27  ;;  %v1004_v55 = vsel %vm2287_vm13, %v1793_v11, %v1003_v33  ;;  %v1148_v18 = vcombine.low %v996_v27, %v1000_v19 }
  0x37   :  { %1093 = vrot.lane.b32.xlu1 %v1092_v10, %s2051_s11  ;;  %v1031_v62 = vsel %vm2287_vm13, %v1794_v46, %v1030_v21  ;;  %v1733_v47 = vrot.slane %v2152_v24, 9  ;;  %v1054_v48 = vsel %vm2212_vm10, %v1049_v20, %v1053_v22  ;;  %v1096_v49 = vcombine.low %v1000_v19, %v1004_v55 }
  0x38   :  { %v1058_v0 = vsel %vm2287_vm13, %v1795_v63, %v1057_v41  ;;  %v1149_v32 = vcombine.low %v1004_v55, %v1031_v62  ;;  %v1176_v29 = vcombine.low %v2531_v4, %v1054_v48  ;;  %v1156_v36 = vrot.slane %v1148_v18, %v2122_v15  ;;  %v2006_v4 = vld [vmem:[%s2847_s1 + $0x100] sm:$0xff]   ;;  %v2011_v63 = vld [vmem:[%s2847_s1 + $0x48] sm:$0xff]  }
  0x39   :  { %v1187_v52 = vcombine.low %v1031_v62, %v1058_v0  ;;  %v134_v3 = vrot.slane %v2268_v44, 7  ;;  %v239_v24 = vcombine.low %v2338_v38, %v2342_v39  ;;  %v2567_v53 = vrot.slane %v330_v61, %v2122_v15  ;;  %v2013_v62 = vld [vmem:[%s2847_s1 + $0x8] sm:$0xff]  }
  0x3a   :  { %v1163_v57 = vrot.slane %v1149_v32, %v2122_v15  ;;  %v1183_v59 = vrot.slane %v1176_v29, %v2122_v15  ;;  %v2052_v11 = vmov 0.0   ;;  %v210_v44 = vrot.slane %v202_v12, %v2122_v15  ;;  %v2009_v18 = vld [vmem:[%s2847_s1 + $0x108] sm:$0xff]   ;;  %v2012_v32 = vld [vmem:[%s2847_s1 + $0x110] sm:$0xff]   ;;  %v2017_v29 = vld [vmem:[%s2847_s1 + $0x58] sm:$0xff]  }
  0x3b   :  { %v135_v22 = vsel %vm2287_vm13, %v1733_v47, %v134_v3  ;;  %1938 = vmatprep.subr.bf16.mxu0 %v2052_v11  ;;  %v2579_v50 = vrot.slane %v239_v24, %v2122_v15  ;;  %v217_v58 = vrot.slane %v203_v7, %v2122_v15  ;;  %v310_v61 = vcombine.low %v2108_v9, %v2119_v14  ;;  %v2014_v47 = vld [vmem:[%s2847_s1 + $0x50] sm:$0xff]   ;;  %v2021_v3 = vld [vmem:[%s2847_s1 + $0x60] sm:$0xff]  }
  0x3c   :  { %v1164_v38 = vcombine.low %v1156_v36, %v1163_v57  ;;  %v238_v39 = vcombine.low %v135_v22, %v2307_v25  ;;  %v1184_v54 = vcombine.low %v1091_v60, %v1183_v59  ;;  %v282_v5 = vrot.slane %v274_v37, %v2122_v15  ;;  %v2019_v36 = vld [vmem:[%s2847_s1 + $0x18] sm:$0xff]   ;;  %v2018_v57 = vld [vmem:[%s2847_s1 + $0xc0] sm:$0xff]   ;;  %v2025_v22 = vld [vmem:[%s2847_s1 + $0x68] sm:$0xff]  }
  0x3d   :  { %v2863_v8 = vcombine.low %v2247_v31, %v2264_v42  ;;  %v2596_v25 = vrot.slane %v1187_v52, %v2122_v15  ;;  %v338_v2 = vcombine.low %v2579_v50, %v2567_v53  ;;  %v218_v7 = vcombine.low %v210_v44, %v217_v58  ;;  %v2015_v52 = vld [vmem:[%s2847_s1 + $0x118] sm:$0xff]   ;;  %v2023_v24 = vld [vmem:[%s2847_s1 + $0x20] sm:$0xff]   ;;  %v2022_v44 = vld [vmem:[%s2847_s1 + $0xc8] sm:$0xff]  }
  0x3e   :  { %1165 = vrot.lane.b32.xlu1 %v1164_v38, %s2051_s11  ;;  %v246_v1 = vrot.slane %v238_v39, %v2122_v15  ;;  %1185 = vrot.lane.b32.xlu0 %v1184_v54, %s2051_s11  ;;  %v317_v9 = vrot.slane %v310_v61, %v2122_v15  ;;  %v1059_v13 = vcombine.low %v2348_v40, %v2127_v16  ;;  %v2020_v59 = vld [vmem:[%s2847_s1 + $0x80] sm:$0xff]   ;;  %v2027_v38 = vld [vmem:[%s2847_s1 + $0x28] sm:$0xff]   ;;  %vm847_vm2 = vcmask 1045509  }
  0x3f   :  { %v289_v12 = vrot.slane %v2863_v8, %v2122_v15  ;;  %v1060_v31 = vcombine.low %v2132_v17, %v2315_v28  ;;  %v1103_v34 = vrot.slane %v1095_v45, %v2122_v15  ;;  %v2611_v37 = vrot.slane %v1096_v49, %v2122_v15  ;;  %v2016_v49 = vld [vmem:[%s2847_s1 + $0x10] sm:$0xff]   ;;  %v2024_v39 = vld [vmem:[%s2847_s1 + $0x88] sm:$0xff]   ;;  %v2033_v61 = vld [vmem:[%s2847_s1 + $0x78] sm:$0xff]  }
  0x40   :  { %v254_v42 = vcombine.low %v246_v1, %v2579_v50  ;;  %v318_v60 = vcombine.low %v217_v58, %v317_v9  ;;  %v2614_v27 = vrot.slane %v1059_v13, %v2122_v15  ;;  %v1167_v16 = vcombine.low %v2329_v30, %v2459_v43  ;;  %v2029_v58 = vld [vmem:[%s2847_s1 + $0x70] sm:$0xff]   ;;  %v2035_v8 = vld [vmem:[%s2847_s1 + $0x38] sm:$0xff]   ;;  %v2034_v9 = vld [vmem:[%s2847_s1 + $0xe0] sm:$0xff]  }
  0x41   :  { %v290_v14 = vcombine.low %v282_v5, %v289_v12  ;;  %v2617_v19 = vrot.slane %v1060_v31, %v2122_v15  ;;  %v1111_v40 = vcombine.low %v1103_v34, %v2611_v37  ;;  %v1195_v17 = vcombine.low %v2611_v37, %v2596_v25  ;;  %v2026_v53 = vld [vmem:[%s2847_s1 + $0xd0] sm:$0xff]   ;;  %v2030_v5 = vld [vmem:[%s2847_s1 + $0xd8] sm:$0xff]   ;;  %v2041_v13 = vld [vmem:[%s2847_s1 + $0x100] sm:$0xff]  }
  0x42   :  { %v2627_v10 = vrot.slane %v1167_v16, %v2122_v15  ;;  %v2864_v33 = vcombine.low %v2483_v23, %v2496_v51  ;;  %v2639_v30 = vrot.slane %v1132_v26, %v2122_v15  ;;  %v2031_v50 = vld [vmem:[%s2847_s1 + $0x30] sm:$0xff]   ;;  %v2032_v1 = vld [vmem:[%s2847_s1 + $0x98] sm:$0xff]   ;;  %v2036_v31 = vld [vmem:[%s2847_s1 + $0xa0] sm:$0xff]  }
  0x43   :  { %v1075_v28 = vcombine.low %v2614_v27, %v2617_v19  ;;  %v2028_v54 = vld [vmem:[%s2847_s1 + $0x90] sm:$0xff]   ;;  %v2044_v34 = vld [vmem:[%s2847_s1 + $0x108] sm:$0xff]   ;;  %v2801_v25 = vld [vmem:[%s2848_s2] ss:$0 sm:$0xff] }
  0x44   :  { %v2633_v46 = vrot.slane %v2864_v33, %v2122_v15  ;;  %v1175_v43 = vcombine.low %v2617_v19, %v2627_v10  ;;  %v2042_v27 = vld [vmem:[%s2847_s1 + $0xf0] sm:$0xff]   ;;  %v2046_v10 = vld [vmem:[%s2847_s1 + $0xb8] sm:$0xff]  }
  0x45   :  { %v2047_v19 = vld [vmem:[%s2847_s1 + $0x110] sm:$0xff]  }
  0x46   :  { %v1147_v21 = vcombine.low %v2633_v46, %v2639_v30  ;;  %v2043_v16 = vld [vmem:[%s2847_s1 + $0xb0] sm:$0xff]  }
  0x7e   :  { %v273_v56 = vpop.permute.xlu0 %272 }
  0x7f   :  { %v346_v20 = vsel %vm339_vm14, %v254_v42, %v273_v56  ;;  %v2039_v42 = vld [vmem:[%s2847_s1 + $0xe8] sm:$0xff]  }
  0x80   :  { %679 = vmatprep.mubr.bf16.mxu0 %v346_v20 }
  0x90   :  { %v329_v23 = vpop.permute.xlu1 %328 }
  0x91   :  { %v354_v51 = vsel %vm339_vm14, %v318_v60, %v329_v23  ;;  %v2040_v60 = vld [vmem:[%s2847_s1 + $0xa8] sm:$0xff]  }
  0x92   :  { %720 = vmatprep.mubr.bf16.mxu1 %v354_v51 }
  0x96   :  { %v309_v26 = vpop.permute.xlu1 %308  ;;  %v237_v41 = vpop.permute.xlu0 %236 }
  0x97   :  { %v350_v45 = vsel %vm339_vm14, %v290_v14, %v309_v26  ;;  %v342_v55 = vsel %vm339_vm14, %v218_v7, %v237_v41 }
  0x98   :  { %721 = vmatmul.mubr.bf16.vlgmr.msra.gmra.mrb[0].mxu1 %v350_v45  ;;  %680 = vmatmul.mubr.bf16.vlgmr.msra.gmra.mrb[0].mxu0 %v342_v55 }
  0x99   :  { %1890 = vmatpush3.bf16.msra.mxu1 %v2010_v35  ;;  %1939 = vmatpush3.bf16.msra.mxu0 %v2006_v4 }
  0x9a   :  { %1891 = vmatprep.subr.bf16.mxu1 %v2011_v63  ;;  %1940 = vmatprep.subr.bf16.mxu0 %v2052_v11  ;;  %v1130_v48 = vpop.permute.xlu0 %1129 }
  0x9b   :  { %1946 = vmatprep.mubr.msk.bf16.mxu0 %vm2053_vm15, %v2052_v11  ;;  %v1202_v0 = vsel %vm339_vm14, %v1111_v40, %v1130_v48  ;;  %v2045_v40 = vld [vmem:[%s2847_s1 + $0xf8] sm:$0xff]  }
  0x9c   :  { %1535 = vmatprep.mubr.bf16.mxu1 %v1202_v0 }
  0x9d   :  { %1892 = vmatpush3.bf16.msra.mxu1 %v2013_v62  ;;  %1941 = vmatpush3.bf16.msra.mxu0 %v2009_v18  ;;  %v2806_v18 = vld [vmem:[%s2849_s3] ss:$0 sm:$0xff] }
  0x9e   :  { %1893 = vmatprep.subr.bf16.mxu1 %v2014_v47  ;;  %1942 = vmatprep.subr.bf16.mxu0 %v2052_v11 }
  0xa1   :  { %1894 = vmatpush3.bf16.msra.mxu1 %v2016_v49  ;;  %1943 = vmatpush3.bf16.msra.mxu0 %v2012_v32 }
  0xa2   :  { %1895 = vmatprep.subr.bf16.mxu1 %v2017_v29  ;;  %1944 = vmatprep.subr.bf16.mxu0 %v2052_v11 }
  0xa5   :  { %1896 = vmatpush3.bf16.msra.mxu1 %v2019_v36  ;;  %1945 = vmatpush3.bf16.msra.mxu0 %v2015_v52 }
  0xa6   :  { %1897 = vmatprep.subr.bf16.mxu1 %v2021_v3  ;;  %1911 = vmatprep.subr.bf16.mxu0 %v2018_v57 }
  0xa8   :  { %1947 = vmatmul.mubr.msk.bf16.vlgmr.msra.gmra.mrb[4].mxu0 %vm339_vm14, %v338_v2 }
  0xa9   :  { %1898 = vmatpush3.bf16.msra.mxu1 %v2023_v24  ;;  %1912 = vmatpush3.bf16.msra.mxu0 %v2020_v59  ;;  %v1094_v2 = vpop.permute.xlu1 %1093 }
  0xaa   :  { %1899 = vmatprep.subr.bf16.mxu1 %v2025_v22  ;;  %1913 = vmatprep.subr.bf16.mxu0 %v2022_v44  ;;  %v1198_v14 = vsel %vm339_vm14, %v1075_v28, %v1094_v2  ;;  %v2049_v28 = vld [vmem:[%s2847_s1 + $0x118] sm:$0xff]  }
  0xad   :  { %1900 = vmatpush3.bf16.msra.mxu1 %v2027_v38  ;;  %1914 = vmatpush3.bf16.msra.mxu0 %v2024_v39 }
  0xae   :  { %1901 = vmatprep.subr.bf16.mxu1 %v2029_v58  ;;  %1915 = vmatprep.subr.bf16.mxu0 %v2026_v53 }
  0xb0   :  { %v1186_v12 = vpop.permute.xlu0 %1185  ;;  %v1166_v33 = vpop.permute.xlu1 %1165 }
  0xb1   :  { %1902 = vmatpush3.bf16.msra.mxu1 %v2031_v50  ;;  %1916 = vmatpush3.bf16.msra.mxu0 %v2028_v54  ;;  %v1210_v7 = vsel %vm339_vm14, %v1175_v43, %v1186_v12  ;;  %v1206_v43 = vsel %vm339_vm14, %v1147_v21, %v1166_v33  ;;  %v2055_v33 = vmov 1966171168  }
  0xb2   :  { %1903 = vmatprep.subr.bf16.mxu1 %v2033_v61  ;;  %1917 = vmatprep.subr.bf16.mxu0 %v2030_v5 }
  0xb3   :  { %1576 = vmatprep.mubr.bf16.mxu0 %v1210_v7 }
  0xb5   :  { %1904 = vmatpush3.bf16.msra.mxu1 %v2035_v8  ;;  %1918 = vmatpush3.bf16.msra.mxu0 %v2032_v1  ;;  %v2054_v8 = vmov 1934713408  }
  0xb6   :  { %1950 = vmatprep.subr.bf16.mxu1 %v2052_v11  ;;  %1919 = vmatprep.subr.bf16.mxu0 %v2034_v9  ;;  %v862_v12 = vunpack.c.l.s4 %v2054_v8 }
  0xb8   :  { %1536 = vmatmul.mubr.bf16.vlgmr.msra.gmra.mrb[4].mxu1 %v1198_v14 }
  0xb9   :  { %1951 = vmatpush3.bf16.msra.mxu1 %v2041_v13  ;;  %1958 = vmatprep.mubr.msk.bf16.mxu1 %vm2053_vm15, %v2052_v11 }
  0xba   :  { %1920 = vmatpush3.bf16.msra.mxu0 %v2036_v31  ;;  %1952 = vmatprep.subr.bf16.mxu1 %v2052_v11 }
  0xbb   :  { %1921 = vmatprep.subr.bf16.mxu0 %v2039_v42 }
  0xbd   :  { %1953 = vmatpush3.bf16.msra.mxu1 %v2044_v34 }
  0xbe   :  { %1922 = vmatpush3.bf16.msra.mxu0 %v2040_v60  ;;  %1954 = vmatprep.subr.bf16.mxu1 %v2052_v11 }
  0xbf   :  { %1923 = vmatprep.subr.bf16.mxu0 %v2042_v27 }
  0xc1   :  { %1955 = vmatpush3.bf16.msra.mxu1 %v2047_v19 }
  0xc2   :  { %1924 = vmatpush3.bf16.msra.mxu0 %v2043_v16  ;;  %1956 = vmatprep.subr.bf16.mxu1 %v2052_v11  ;;  %v863_v16 = vunpack.c.0.s8 %v862_v12 }
  0xc3   :  { %1925 = vmatprep.subr.bf16.mxu0 %v2045_v40 }
  0xc5   :  { %1957 = vmatpush3.bf16.msra.mxu1 %v2049_v28 }
  0xc6   :  { %1926 = vmatpush3.bf16.msra.mxu0 %v2046_v10 }
  0xc8   :  { %1959 = vmatmul.mubr.msk.bf16.vlgmr.msra.gmra.mrb[8].mxu1 %vm339_vm14, %v1195_v17 }
  0xc9   :  { %1577 = vmatmul.mubr.bf16.vlgmr.msra.gmra.mrb[8].mxu0 %v1206_v43  ;;  %v875_v43 = vunpack.c.l.s4 %v2055_v33 }
 0x16b   :  { %v1878_v56 = vpop.f32.mrb[0].mxu1  ;;  %v1856_v20 = vpop.f32.mrb[0].mxu0 }
 0x16c   :  { %v1879_v23 = vpop.f32.mrb[1].mxu1  ;;  %v1857_v51 = vpop.f32.mrb[1].mxu0 }
 0x16d   :  { %v1880_v35 = vadd.f32 %v1879_v23, %v1878_v56  ;;  %v1881_v4 = vpop.f32.mrb[2].mxu1  ;;  %v1858_v26 = vadd.f32 %v1857_v51, %v1856_v20  ;;  %v1859_v63 = vpop.f32.mrb[2].mxu0  ;;  %v866_v23 = vsub.s32 %v863_v16, %v2096_v6 }
 0x16e   :  { %v1882_v41 = vpop.f32.mrb[3].mxu1  ;;  %v1860_v45 = vpop.f32.mrb[3].mxu0 }
 0x16f   :  { %v1883_v55 = vadd.f32 %v1882_v41, %v1881_v4  ;;  %v1861_v46 = vadd.f32 %v1860_v45, %v1859_v63  ;;  %v723_v30 = vadd.f32 %v1880_v35, %v1858_v26  ;;  %v876_v26 = vunpack.c.0.s8 %v875_v43 }
 0x171   :  { %v726_v21 = vadd.f32 %v1883_v55, %v1861_v46 }
 0x17b   :  { %v763_v37 = vpop.f32.mrb[4].mxu0 }
 0x17c   :  { %v764_v17 = vadd.f32 %v763_v37, %v723_v30  ;;  %v1948_v62 = vpop.f32.mrb[5].mxu0  ;;  %v879_v30 = vsub.s32 %v876_v26, %v2096_v6 }
 0x17d   :  { %v766_v47 = vpop.f32.mrb[6].mxu0 }
 0x17e   :  { %v776_v48 = vmul.f32 %v2801_v25, %v764_v17  ;;  %v767_v0 = vadd.f32 %v766_v47, %v726_v21  ;;  %v1949_v49 = vpop.f32.mrb[7].mxu0 }
 0x180   :  { %v784_v32 = vadd.f32 %v2806_v18, %v776_v48  ;;  %v777_v29 = vmul.f32 %v2801_v25, %v767_v0 }
 0x182   :  { %v786_v36 = vmax.f32 %v784_v32, 0.0  ;;  %v785_v52 = vadd.f32 %v2806_v18, %v777_v29 }
 0x184   :  { %v790_v3 = vcombine.high %v786_v36, %v786_v36  ;;  %v787_v57 = vmax.f32 %v785_v52, 0.0 }
 0x186   :  { %v794_v24 = vmax.f32 %v786_v36, %v790_v3  ;;  %v791_v59 = vcombine.high %v787_v57, %v787_v57 }
 0x188   :  { %v804_v22 = vrot.slane %v794_v24, %v2122_v15  ;;  %v795_v44 = vmax.f32 %v787_v57, %v791_v59 }
 0x18a   :  { %v805_v38 = vcombine.high %v804_v22, %v804_v22  ;;  %v812_v39 = vrot.slane %v795_v44, %v2122_v15  ;;  %v1778_v50 = vrot.slane %v804_v22, 9 }
 0x18b   :  { %v1905_v58 = vpop.f32.mrb[4].mxu1 }
 0x18c   :  { %v1906_v53 = vpop.f32.mrb[5].mxu1  ;;  %v1779_v54 = vrot.slane %v805_v38, 9  ;;  %v813_v61 = vcombine.high %v812_v39, %v812_v39  ;;  %v1780_v9 = vrot.slane %v812_v39, 9  ;;  %v830_v31 = vmax.f32 %v804_v22, %v1778_v50 }
 0x18d   :  { %v1908_v5 = vpop.f32.mrb[6].mxu1  ;;  %v1907_v1 = vadd.f32 %v1906_v53, %v1905_v58 }
 0x18e   :  { %v1909_v2 = vpop.f32.mrb[7].mxu1  ;;  %v831_v7 = vmax.f32 %v805_v38, %v1779_v54  ;;  %v1781_v14 = vrot.slane %v813_v61, 9  ;;  %v832_v27 = vmax.f32 %v812_v39, %v1780_v9 }
 0x18f   :  { %v1910_v13 = vadd.f32 %v1909_v2, %v1908_v5 }
 0x190   :  { %v842_v42 = vrot.slane %v831_v7, 7  ;;  %v833_v34 = vmax.f32 %v813_v61, %v1781_v14 }
 0x192   :  { %v844_v60 = vsel %vm843_vm0, %v842_v42, %v830_v31  ;;  %v853_v19 = vrot.slane %v833_v34, 7 }
 0x193   :  { %v846_v40 = vsel %vm845_vm1, %v842_v42, %v844_v60 }
 0x194   :  { %v848_v28 = vsel %vm847_vm2, %v842_v42, %v846_v40  ;;  %v854_v10 = vsel %vm843_vm0, %v853_v19, %v832_v27 }
 0x195   :  { %v855_v56 = vsel %vm845_vm1, %v853_v19, %v854_v10  ;;  %v850_v51 = vsel %vm849_vm3, %v842_v42, %v848_v28 }
 0x196   :  { %v856_v20 = vsel %vm847_vm2, %v853_v19, %v855_v56 }
 0x197   :  { %v857_v35 = vsel %vm849_vm3, %v853_v19, %v856_v20 }
 0x198   :  { %v860_v4 = vcombine.low %v850_v51, %v857_v35 }
 0x19a   :  { %v867_v63 = vrot.slane %v860_v4, %v866_v23 }
 0x19b   :  { %v1619_v41 = vpop.f32.mrb[8].mxu1 }
 0x19c   :  { %v1927_v45 = vpop.f32.mrb[8].mxu0  ;;  %v1960_v55 = vpop.f32.mrb[9].mxu1  ;;  %v868_v46 = vcombine.high %v867_v63, %v2052_v11 }
 0x19d   :  { %v1928_v21 = vpop.f32.mrb[9].mxu0  ;;  %v1622_v37 = vpop.f32.mrb[10].mxu1 }
 0x19e   :  { %v1929_v17 = vadd.f32 %v1928_v21, %v1927_v45  ;;  %v1930_v62 = vpop.f32.mrb[10].mxu0  ;;  %v1961_v47 = vpop.f32.mrb[11].mxu1  ;;  %v1782_v48 = vpack.c.bf16 %v868_v46, %v867_v63 }
 0x19f   :  { %v1931_v0 = vpop.f32.mrb[11].mxu0 }
 0x1a0   :  { %v1932_v49 = vadd.f32 %v1931_v0, %v1930_v62  ;;  %v1579_v32 = vadd.f32 %v1929_v17, %v1907_v1  ;;  %v880_v29 = vrot.slane %v1782_v48, %v879_v30 }
 0x1a2   :  { %v1620_v36 = vadd.f32 %v1619_v41, %v1579_v32  ;;  %v1582_v52 = vadd.f32 %v1932_v49, %v1910_v13  ;;  %1783 = vst.sshfl [vmem:[%s2850_s4] sm:$0x5 pattern:$0x73625140] %v880_v29 }
 0x1a4   :  { %v1626_v3 = vmul.f32 %v2801_v25, %v1620_v36  ;;  %v1623_v57 = vadd.f32 %v1622_v37, %v1582_v52 }
 0x1a6   :  { %v1628_v6 = vadd.f32 %v2806_v18, %v1626_v3  ;;  %v1627_v24 = vmul.f32 %v2801_v25, %v1623_v57 }
 0x1a8   :  { %v1630_v59 = vmax.f32 %v1628_v6, 0.0  ;;  %v1629_v22 = vadd.f32 %v2806_v18, %v1627_v24 }
 0x1aa   :  { %v1634_v44 = vcombine.high %v1630_v59, %v1630_v59  ;;  %v1631_v38 = vmax.f32 %v1629_v22, 0.0 }
 0x1ac   :  { %v1638_v39 = vmax.f32 %v1630_v59, %v1634_v44  ;;  %v1635_v58 = vcombine.high %v1631_v38, %v1631_v38 }
 0x1ae   :  { %v1648_v53 = vrot.slane %v1638_v39, %v2122_v15  ;;  %v1639_v50 = vmax.f32 %v1631_v38, %v1635_v58 }
 0x1b0   :  { %v1649_v54 = vcombine.high %v1648_v53, %v1648_v53  ;;  %v1656_v61 = vrot.slane %v1639_v50, %v2122_v15  ;;  %v1833_v5 = vrot.slane %v1648_v53, 9 }
 0x1b2   :  { %v1834_v8 = vrot.slane %v1649_v54, 9  ;;  %v1657_v12 = vcombine.high %v1656_v61, %v1656_v61  ;;  %v1835_v2 = vrot.slane %v1656_v61, 9  ;;  %v1674_v25 = vmax.f32 %v1648_v53, %v1833_v5 }
 0x1b4   :  { %v1675_v1 = vmax.f32 %v1649_v54, %v1834_v8  ;;  %v1836_v7 = vrot.slane %v1657_v12, 9  ;;  %v1676_v13 = vmax.f32 %v1656_v61, %v1835_v2 }
 0x1b6   :  { %v1684_v9 = vrot.slane %v1675_v1, 7  ;;  %v1677_v14 = vmax.f32 %v1657_v12, %v1836_v7 }
 0x1b8   :  { %v1685_v18 = vsel %vm843_vm0, %v1684_v9, %v1674_v25  ;;  %v1691_v31 = vrot.slane %v1677_v14, 7 }
 0x1b9   :  { %v1686_v42 = vsel %vm845_vm1, %v1684_v9, %v1685_v18 }
 0x1ba   :  { %v1687_v34 = vsel %vm847_vm2, %v1684_v9, %v1686_v42  ;;  %v1692_v60 = vsel %vm843_vm0, %v1691_v31, %v1676_v13 }
 0x1bb   :  { %v1693_v15 = vsel %vm845_vm1, %v1691_v31, %v1692_v60  ;;  %v1688_v19 = vsel %vm849_vm3, %v1684_v9, %v1687_v34 }
 0x1bc   :  { %v1694_v27 = vsel %vm847_vm2, %v1691_v31, %v1693_v15 }
 0x1bd   :  { %v1695_v16 = vsel %vm849_vm3, %v1691_v31, %v1694_v27 }
 0x1be   :  { %v1698_v40 = vcombine.low %v1688_v19, %v1695_v16 }
 0x1c0   :  { %v1705_v28 = vrot.slane %v1698_v40, %v866_v23 }
 0x1c2   :  { %v1706_v10 = vcombine.high %v1705_v28, %v2052_v11 }
 0x1c4   :  { %v1837_v33 = vpack.c.bf16 %v1706_v10, %v1705_v28 }
 0x1c6   :  { %v1718_v43 = vrot.slane %v1837_v33, %v879_v30 }
 0x1c8   :  { %1839 = vst.sshfl [vmem:[%s2850_s4 + $0x2] sm:$0x5 pattern:$0x73625140] %v1718_v43 }

// kernel: crnn_forward.11
= control target key start
LH: loop header
LB: loop body
LE: loop exit
PB: predicated region body
PF: predicated region fallthrough
CT: control target
= control target key end

     0   :  { %s1355_s1 = inlined_call_operand.vmem [shape: bf16[256,768], index: 1, kind: input, shape index: {}]   ;;  %s1356_s0 = inlined_call_operand.vmem [shape: bf16[8,256], index: 0, kind: input, shape index: {}]   ;;  %s1357_s2 = inlined_call_operand.vmem [shape: f32[1,768], index: 2, kind: input, shape index: {}]   ;;  %s1358_s3 = inlined_call_operand.vmem [shape: f32[8,768], index: 3, kind: output, shape index: {}]  }
   0x1   :  { %v861_v0 = vld [vmem:[%s1355_s1 + $0x4] ss:$24 sps:$4 sm:$0xff]   ;;  %v863_v1 = vld [vmem:[%s1355_s1] ss:$24 sps:$4 sm:$0xff]   ;;  %v864_v2 = vld [vmem:[%s1355_s1 + $0x34] ss:$24 sps:$4 sm:$0xff]  }
   0x2   :  { %630 = vmatprep.subr.bf16.mxu0 %v861_v0  ;;  %v866_v3 = vld [vmem:[%s1355_s1 + $0x30] ss:$24 sps:$4 sm:$0xff]   ;;  %v867_v4 = vld [vmem:[%s1355_s1 + $0x64] ss:$24 sps:$4 sm:$0xff]   ;;  %v869_v5 = vld [vmem:[%s1355_s1 + $0x60] ss:$24 sps:$4 sm:$0xff]  }
   0x3   :  { %631 = vmatpush1.bf16.msra.mxu0 %v863_v1  ;;  %v870_v6 = vld [vmem:[%s1355_s1 + $0x94] ss:$24 sps:$4 sm:$0xff]   ;;  %v872_v7 = vld [vmem:[%s1355_s1 + $0x90] ss:$24 sps:$4 sm:$0xff]   ;;  %v873_v8 = vld [vmem:[%s1355_s1 + $0xc4] ss:$24 sps:$4 sm:$0xff]  }
   0x4   :  { %632 = vmatprep.subr.bf16.mxu0 %v864_v2  ;;  %v875_v9 = vld [vmem:[%s1355_s1 + $0xc0] ss:$24 sps:$4 sm:$0xff]   ;;  %v876_v10 = vld [vmem:[%s1355_s1 + $0xf4] ss:$24 sps:$4 sm:$0xff]   ;;  %v878_v11 = vld [vmem:[%s1355_s1 + $0xf0] ss:$24 sps:$4 sm:$0xff]  }
   0x5   :  { %v879_v12 = vld [vmem:[%s1355_s1 + $0x124] ss:$24 sps:$4 sm:$0xff]   ;;  %v911_v14 = vld [vmem:[%s1355_s1 + $0x8] ss:$24 sps:$4 sm:$0xff]   ;;  %v882_v18 = vld [vmem:[%s1355_s1 + $0x154] ss:$24 sps:$4 sm:$0xff]  }
   0x6   :  { %v909_v13 = vld [vmem:[%s1355_s1 + $0xc] ss:$24 sps:$4 sm:$0xff]   ;;  %v881_v16 = vld [vmem:[%s1355_s1 + $0x120] ss:$24 sps:$4 sm:$0xff]   ;;  %v917_v19 = vld [vmem:[%s1355_s1 + $0x3c] ss:$24 sps:$4 sm:$0xff]  }
   0x7   :  { %633 = vmatpush1.bf16.msra.mxu0 %v866_v3  ;;  %v1075_v15 = vld [vmem:[%s1356_s0] sm:$0xff]  ;;  %671 = vmatprep.subr.bf16.mxu1 %v909_v13  ;;  %v919_v20 = vld [vmem:[%s1355_s1 + $0x38] ss:$24 sps:$4 sm:$0xff]   ;;  %v929_v25 = vld [vmem:[%s1355_s1 + $0x9c] ss:$24 sps:$4 sm:$0xff]  }
   0x8   :  { %634 = vmatprep.subr.bf16.mxu0 %v867_v4  ;;  %v1082_v17 = vcombine.high %v1075_v15, %v1075_v15  ;;  %672 = vmatpush1.bf16.msra.mxu1 %v911_v14  ;;  %v884_v21 = vld [vmem:[%s1355_s1 + $0x150] ss:$24 sps:$4 sm:$0xff]   ;;  %v923_v22 = vld [vmem:[%s1355_s1 + $0x6c] ss:$24 sps:$4 sm:$0xff]   ;;  %v887_v26 = vld [vmem:[%s1355_s1 + $0x180] ss:$24 sps:$4 sm:$0xff]   ;;  %v1205_v57 = vcombine.low %v1075_v15, %v1075_v15 }
   0x9   :  { %673 = vmatprep.subr.bf16.mxu1 %v917_v19  ;;  %v885_v23 = vld [vmem:[%s1355_s1 + $0x184] ss:$24 sps:$4 sm:$0xff]   ;;  %v925_v24 = vld [vmem:[%s1355_s1 + $0x68] ss:$24 sps:$4 sm:$0xff]   ;;  %v888_v27 = vld [vmem:[%s1355_s1 + $0x1b4] ss:$24 sps:$4 sm:$0xff]  }
   0xa   :  { %662 = vmatprep.mubr.bf16.mxu0 %v1082_v17  ;;  %703 = vmatprep.mubr.bf16.mxu1 %v1082_v17  ;;  %v931_v28 = vld [vmem:[%s1355_s1 + $0x98] ss:$24 sps:$4 sm:$0xff]   ;;  %v935_v29 = vld [vmem:[%s1355_s1 + $0xcc] ss:$24 sps:$4 sm:$0xff]   ;;  %v937_v32 = vld [vmem:[%s1355_s1 + $0xc8] ss:$24 sps:$4 sm:$0xff]  }
   0xb   :  { %635 = vmatpush1.bf16.msra.mxu0 %v869_v5  ;;  %v890_v30 = vld [vmem:[%s1355_s1 + $0x1b0] ss:$24 sps:$4 sm:$0xff]   ;;  %v891_v31 = vld [vmem:[%s1355_s1 + $0x1e4] ss:$24 sps:$4 sm:$0xff]   ;;  %v893_v34 = vld [vmem:[%s1355_s1 + $0x1e0] ss:$24 sps:$4 sm:$0xff]  }
   0xc   :  { %636 = vmatprep.subr.bf16.mxu0 %v870_v6  ;;  %674 = vmatpush1.bf16.msra.mxu1 %v919_v20  ;;  %v941_v33 = vld [vmem:[%s1355_s1 + $0xfc] ss:$24 sps:$4 sm:$0xff]   ;;  %v943_v36 = vld [vmem:[%s1355_s1 + $0xf8] ss:$24 sps:$4 sm:$0xff]   ;;  %v947_v37 = vld [vmem:[%s1355_s1 + $0x12c] ss:$24 sps:$4 sm:$0xff]  }
   0xd   :  { %675 = vmatprep.subr.bf16.mxu1 %v923_v22  ;;  %v894_v35 = vld [vmem:[%s1355_s1 + $0x214] ss:$24 sps:$4 sm:$0xff]   ;;  %v896_v38 = vld [vmem:[%s1355_s1 + $0x210] ss:$24 sps:$4 sm:$0xff]   ;;  %v897_v39 = vld [vmem:[%s1355_s1 + $0x244] ss:$24 sps:$4 sm:$0xff]  }
   0xe   :  { %v949_v40 = vld [vmem:[%s1355_s1 + $0x128] ss:$24 sps:$4 sm:$0xff]   ;;  %v953_v41 = vld [vmem:[%s1355_s1 + $0x15c] ss:$24 sps:$4 sm:$0xff]   ;;  %v955_v44 = vld [vmem:[%s1355_s1 + $0x158] ss:$24 sps:$4 sm:$0xff]  }
   0xf   :  { %637 = vmatpush1.bf16.msra.mxu0 %v872_v7  ;;  %v899_v42 = vld [vmem:[%s1355_s1 + $0x240] ss:$24 sps:$4 sm:$0xff]   ;;  %v900_v43 = vld [vmem:[%s1355_s1 + $0x274] ss:$24 sps:$4 sm:$0xff]   ;;  %v902_v46 = vld [vmem:[%s1355_s1 + $0x270] ss:$24 sps:$4 sm:$0xff]  }
  0x10   :  { %638 = vmatprep.subr.bf16.mxu0 %v873_v8  ;;  %676 = vmatpush1.bf16.msra.mxu1 %v925_v24  ;;  %v959_v45 = vld [vmem:[%s1355_s1 + $0x18c] ss:$24 sps:$4 sm:$0xff]   ;;  %v961_v48 = vld [vmem:[%s1355_s1 + $0x188] ss:$24 sps:$4 sm:$0xff]   ;;  %v965_v49 = vld [vmem:[%s1355_s1 + $0x1bc] ss:$24 sps:$4 sm:$0xff]  }
  0x11   :  { %677 = vmatprep.subr.bf16.mxu1 %v929_v25  ;;  %v903_v47 = vld [vmem:[%s1355_s1 + $0x2a4] ss:$24 sps:$4 sm:$0xff]   ;;  %v905_v50 = vld [vmem:[%s1355_s1 + $0x2a0] ss:$24 sps:$4 sm:$0xff]   ;;  %v906_v51 = vld [vmem:[%s1355_s1 + $0x2d4] ss:$24 sps:$4 sm:$0xff]  }
  0x12   :  { %v967_v52 = vld [vmem:[%s1355_s1 + $0x1b8] ss:$24 sps:$4 sm:$0xff]   ;;  %v971_v53 = vld [vmem:[%s1355_s1 + $0x1ec] ss:$24 sps:$4 sm:$0xff]   ;;  %v973_v56 = vld [vmem:[%s1355_s1 + $0x1e8] ss:$24 sps:$4 sm:$0xff]  }
  0x13   :  { %639 = vmatpush1.bf16.msra.mxu0 %v875_v9  ;;  %v908_v54 = vld [vmem:[%s1355_s1 + $0x2d0] ss:$24 sps:$4 sm:$0xff]   ;;  %v916_v55 = vld [vmem:[%s1355_s1 + $0x14] ss:$24 sps:$4 sm:$0xff]   ;;  %v922_v60 = vld [vmem:[%s1355_s1 + $0x44] ss:$24 sps:$4 sm:$0xff]  }
  0x14   :  { %640 = vmatprep.subr.bf16.mxu0 %v876_v10  ;;  %678 = vmatpush1.bf16.msra.mxu1 %v931_v28  ;;  %v977_v58 = vld [vmem:[%s1355_s1 + $0x21c] ss:$24 sps:$4 sm:$0xff]   ;;  %v914_v59 = vld [vmem:[%s1355_s1 + $0x10] ss:$24 sps:$4 sm:$0xff]   ;;  %v983_v62 = vld [vmem:[%s1355_s1 + $0x24c] ss:$24 sps:$4 sm:$0xff]  }
  0x15   :  { %679 = vmatprep.subr.bf16.mxu1 %v935_v29  ;;  %v979_v61 = vld [vmem:[%s1355_s1 + $0x218] ss:$24 sps:$4 sm:$0xff]   ;;  %v928_v0 = vld [vmem:[%s1355_s1 + $0x74] ss:$24 sps:$4 sm:$0xff]   ;;  %v985_v1 = vld [vmem:[%s1355_s1 + $0x248] ss:$24 sps:$4 sm:$0xff]  }
  0x16   :  { %v920_v63 = vld [vmem:[%s1355_s1 + $0x40] ss:$24 sps:$4 sm:$0xff]   ;;  %v989_v2 = vld [vmem:[%s1355_s1 + $0x27c] ss:$24 sps:$4 sm:$0xff]   ;;  %v926_v3 = vld [vmem:[%s1355_s1 + $0x70] ss:$24 sps:$4 sm:$0xff]  }
  0x17   :  { %641 = vmatpush1.bf16.msra.mxu0 %v878_v11  ;;  %v934_v4 = vld [vmem:[%s1355_s1 + $0xa4] ss:$24 sps:$4 sm:$0xff]   ;;  %v991_v5 = vld [vmem:[%s1355_s1 + $0x278] ss:$24 sps:$4 sm:$0xff]   ;;  %v940_v8 = vld [vmem:[%s1355_s1 + $0xd4] ss:$24 sps:$4 sm:$0xff]  }
  0x18   :  { %642 = vmatprep.subr.bf16.mxu0 %v879_v12  ;;  %680 = vmatpush1.bf16.msra.mxu1 %v937_v32  ;;  %v995_v6 = vld [vmem:[%s1355_s1 + $0x2ac] ss:$24 sps:$4 sm:$0xff]   ;;  %v932_v7 = vld [vmem:[%s1355_s1 + $0xa0] ss:$24 sps:$4 sm:$0xff]   ;;  %v1001_v10 = vld [vmem:[%s1355_s1 + $0x2dc] ss:$24 sps:$4 sm:$0xff]  }
  0x19   :  { %681 = vmatprep.subr.bf16.mxu1 %v941_v33  ;;  %v997_v9 = vld [vmem:[%s1355_s1 + $0x2a8] ss:$24 sps:$4 sm:$0xff]   ;;  %v946_v12 = vld [vmem:[%s1355_s1 + $0x104] ss:$24 sps:$4 sm:$0xff]   ;;  %v1003_v13 = vld [vmem:[%s1355_s1 + $0x2d8] ss:$24 sps:$4 sm:$0xff]  }
  0x1a   :  { %v938_v11 = vld [vmem:[%s1355_s1 + $0xd0] ss:$24 sps:$4 sm:$0xff]   ;;  %v944_v14 = vld [vmem:[%s1355_s1 + $0x100] ss:$24 sps:$4 sm:$0xff]   ;;  %v952_v15 = vld [vmem:[%s1355_s1 + $0x134] ss:$24 sps:$4 sm:$0xff]  }
  0x1b   :  { %643 = vmatpush1.bf16.msra.mxu0 %v881_v16  ;;  %v950_v16 = vld [vmem:[%s1355_s1 + $0x130] ss:$24 sps:$4 sm:$0xff]   ;;  %v964_v19 = vld [vmem:[%s1355_s1 + $0x194] ss:$24 sps:$4 sm:$0xff]   ;;  %v968_v22 = vld [vmem:[%s1355_s1 + $0x1c0] ss:$24 sps:$4 sm:$0xff]  }
  0x1c   :  { %644 = vmatprep.subr.bf16.mxu0 %v882_v18  ;;  %682 = vmatpush1.bf16.msra.mxu1 %v943_v36  ;;  %v956_v18 = vld [vmem:[%s1355_s1 + $0x160] ss:$24 sps:$4 sm:$0xff]   ;;  %v962_v20 = vld [vmem:[%s1355_s1 + $0x190] ss:$24 sps:$4 sm:$0xff]   ;;  %v982_v25 = vld [vmem:[%s1355_s1 + $0x224] ss:$24 sps:$4 sm:$0xff]  }
  0x1d   :  { %683 = vmatprep.subr.bf16.mxu1 %v947_v37  ;;  %v974_v24 = vld [vmem:[%s1355_s1 + $0x1f0] ss:$24 sps:$4 sm:$0xff]   ;;  %v994_v29 = vld [vmem:[%s1355_s1 + $0x284] ss:$24 sps:$4 sm:$0xff]  }
  0x1e   :  { %v986_v28 = vld [vmem:[%s1355_s1 + $0x250] ss:$24 sps:$4 sm:$0xff]   ;;  %v1006_v33 = vld [vmem:[%s1355_s1 + $0x2e4] ss:$24 sps:$4 sm:$0xff]  }
  0x1f   :  { %645 = vmatpush1.bf16.msra.mxu0 %v884_v21  ;;  %v970_v21 = vld [vmem:[%s1355_s1 + $0x1c4] ss:$24 sps:$4 sm:$0xff]   ;;  %v998_v32 = vld [vmem:[%s1355_s1 + $0x2b0] ss:$24 sps:$4 sm:$0xff]  }
  0x20   :  { %646 = vmatprep.subr.bf16.mxu0 %v885_v23  ;;  %684 = vmatpush1.bf16.msra.mxu1 %v949_v40  ;;  %v976_v23 = vld [vmem:[%s1355_s1 + $0x1f4] ss:$24 sps:$4 sm:$0xff]  }
  0x21   :  { %685 = vmatprep.subr.bf16.mxu1 %v953_v41 }
  0x23   :  { %647 = vmatpush1.bf16.msra.mxu0 %v887_v26  ;;  %v980_v26 = vld [vmem:[%s1355_s1 + $0x220] ss:$24 sps:$4 sm:$0xff]  }
  0x24   :  { %648 = vmatprep.subr.bf16.mxu0 %v888_v27  ;;  %686 = vmatpush1.bf16.msra.mxu1 %v955_v44  ;;  %v988_v27 = vld [vmem:[%s1355_s1 + $0x254] ss:$24 sps:$4 sm:$0xff]  }
  0x25   :  { %687 = vmatprep.subr.bf16.mxu1 %v959_v45 }
  0x27   :  { %649 = vmatpush1.bf16.msra.mxu0 %v890_v30  ;;  %v992_v30 = vld [vmem:[%s1355_s1 + $0x280] ss:$24 sps:$4 sm:$0xff]  }
  0x28   :  { %650 = vmatprep.subr.bf16.mxu0 %v891_v31  ;;  %688 = vmatpush1.bf16.msra.mxu1 %v961_v48  ;;  %v1000_v31 = vld [vmem:[%s1355_s1 + $0x2b4] ss:$24 sps:$4 sm:$0xff]  }
  0x29   :  { %689 = vmatprep.subr.bf16.mxu1 %v965_v49 }
  0x2b   :  { %651 = vmatpush1.bf16.msra.mxu0 %v893_v34  ;;  %v1004_v34 = vld [vmem:[%s1355_s1 + $0x2e0] ss:$24 sps:$4 sm:$0xff]  }
  0x2c   :  { %652 = vmatprep.subr.bf16.mxu0 %v894_v35  ;;  %690 = vmatpush1.bf16.msra.mxu1 %v967_v52  ;;  %v113_v35 = vlaneseq }
  0x2d   :  { %691 = vmatprep.subr.bf16.mxu1 %v971_v53 }
  0x2e   :  { %v114_v36 = vshrl.u32 %v113_v35, 7 }
  0x2f   :  { %653 = vmatpush1.bf16.msra.mxu0 %v896_v38  ;;  %v111_v38 = vld [vmem:[%s1357_s2] sm:$0x3f] }
  0x30   :  { %654 = vmatprep.subr.bf16.mxu0 %v897_v39  ;;  %692 = vmatpush1.bf16.msra.mxu1 %v973_v56  ;;  %v115_v37 = vsub.s32 0, %v114_v36  ;;  %v119_v39 = vsub.s32 1, %v114_v36  ;;  %v123_v48 = vsub.s32 2, %v114_v36  ;;  %v127_v49 = vsub.s32 3, %v114_v36 }
  0x31   :  { %693 = vmatprep.subr.bf16.mxu1 %v977_v58  ;;  %v131_v58 = vsub.s32 4, %v114_v36 }
  0x32   :  { %v116_v40 = vrot.slane %v111_v38, %v115_v37  ;;  %v120_v41 = vrot.slane %v111_v38, %v119_v39 }
  0x33   :  { %655 = vmatpush1.bf16.msra.mxu0 %v899_v42 }
  0x34   :  { %656 = vmatprep.subr.bf16.mxu0 %v900_v43  ;;  %694 = vmatpush1.bf16.msra.mxu1 %v979_v61 }
  0x35   :  { %695 = vmatprep.subr.bf16.mxu1 %v983_v62 }
  0x37   :  { %657 = vmatpush1.bf16.msra.mxu0 %v902_v46 }
  0x38   :  { %658 = vmatprep.subr.bf16.mxu0 %v903_v47  ;;  %696 = vmatpush1.bf16.msra.mxu1 %v985_v1 }
  0x39   :  { %697 = vmatprep.subr.bf16.mxu1 %v989_v2 }
  0x3b   :  { %659 = vmatpush1.bf16.msra.mxu0 %v905_v50  ;;  %v124_v50 = vrot.slane %v111_v38, %v123_v48 }
  0x3c   :  { %660 = vmatprep.subr.bf16.mxu0 %v906_v51  ;;  %698 = vmatpush1.bf16.msra.mxu1 %v991_v5  ;;  %v128_v51 = vrot.slane %v111_v38, %v127_v49 }
  0x3d   :  { %699 = vmatprep.subr.bf16.mxu1 %v995_v6 }
  0x3f   :  { %661 = vmatpush1.bf16.msra.mxu0 %v908_v54 }
  0x40   :  { %712 = vmatprep.subr.bf16.mxu0 %v916_v55  ;;  %700 = vmatpush1.bf16.msra.mxu1 %v997_v9 }
  0x41   :  { %701 = vmatprep.subr.bf16.mxu1 %v1001_v10 }
  0x42   :  { %663 = vmatmul.mubr.bf16.vlgmr.msra.gmra.mrb[0].mxu0 %v1205_v57 }
  0x43   :  { %713 = vmatpush1.bf16.msra.mxu0 %v914_v59  ;;  %744 = vmatprep.mubr.bf16.mxu0 %v1082_v17  ;;  %v958_v17 = vld [vmem:[%s1355_s1 + $0x164] ss:$24 sps:$4 sm:$0xff]   ;;  %v135_v59 = vsub.s32 5, %v114_v36 }
  0x44   :  { %714 = vmatprep.subr.bf16.mxu0 %v922_v60  ;;  %702 = vmatpush1.bf16.msra.mxu1 %v1003_v13  ;;  %v132_v60 = vrot.slane %v111_v38, %v131_v58 }
  0x45   :  { %v136_v61 = vrot.slane %v111_v38, %v135_v59 }
  0x47   :  { %715 = vmatpush1.bf16.msra.mxu0 %v920_v63  ;;  %704 = vmatmul.mubr.bf16.vlgmr.msra.gmra.mrb[0].mxu1 %v1205_v57 }
  0x48   :  { %716 = vmatprep.subr.bf16.mxu0 %v928_v0 }
  0x4b   :  { %717 = vmatpush1.bf16.msra.mxu0 %v926_v3 }
  0x4c   :  { %718 = vmatprep.subr.bf16.mxu0 %v934_v4 }
  0x4f   :  { %719 = vmatpush1.bf16.msra.mxu0 %v932_v7 }
  0x50   :  { %720 = vmatprep.subr.bf16.mxu0 %v940_v8 }
  0x53   :  { %721 = vmatpush1.bf16.msra.mxu0 %v938_v11 }
  0x54   :  { %722 = vmatprep.subr.bf16.mxu0 %v946_v12 }
  0x57   :  { %723 = vmatpush1.bf16.msra.mxu0 %v944_v14 }
  0x58   :  { %724 = vmatprep.subr.bf16.mxu0 %v952_v15 }
  0x5b   :  { %725 = vmatpush1.bf16.msra.mxu0 %v950_v16 }
  0x5c   :  { %726 = vmatprep.subr.bf16.mxu0 %v958_v17 }
  0x5f   :  { %727 = vmatpush1.bf16.msra.mxu0 %v956_v18 }
  0x60   :  { %728 = vmatprep.subr.bf16.mxu0 %v964_v19 }
  0x63   :  { %729 = vmatpush1.bf16.msra.mxu0 %v962_v20 }
  0x64   :  { %730 = vmatprep.subr.bf16.mxu0 %v970_v21 }
  0x67   :  { %731 = vmatpush1.bf16.msra.mxu0 %v968_v22 }
  0x68   :  { %732 = vmatprep.subr.bf16.mxu0 %v976_v23 }
  0x6b   :  { %733 = vmatpush1.bf16.msra.mxu0 %v974_v24 }
  0x6c   :  { %734 = vmatprep.subr.bf16.mxu0 %v982_v25 }
  0x6f   :  { %735 = vmatpush1.bf16.msra.mxu0 %v980_v26 }
  0x70   :  { %736 = vmatprep.subr.bf16.mxu0 %v988_v27 }
  0x73   :  { %737 = vmatpush1.bf16.msra.mxu0 %v986_v28 }
  0x74   :  { %738 = vmatprep.subr.bf16.mxu0 %v994_v29 }
  0x77   :  { %739 = vmatpush1.bf16.msra.mxu0 %v992_v30 }
  0x78   :  { %740 = vmatprep.subr.bf16.mxu0 %v1000_v31 }
  0x7b   :  { %741 = vmatpush1.bf16.msra.mxu0 %v998_v32 }
  0x7c   :  { %742 = vmatprep.subr.bf16.mxu0 %v1006_v33 }
  0x7f   :  { %743 = vmatpush1.bf16.msra.mxu0 %v1004_v34 }
  0x82   :  { %745 = vmatmul.mubr.bf16.vlgmr.msra.gmra.mrb[4].mxu0 %v1205_v57 }
 0x115   :  { %v664_v42 = vpop.f32.mrb[0].mxu0 }
 0x116   :  { %v665_v43 = vadd.f32 %v664_v42, %v116_v40  ;;  %v666_v44 = vpop.f32.mrb[1].mxu0 }
 0x117   :  { %v667_v45 = vadd.f32 %v666_v44, %v120_v41  ;;  %v668_v46 = vpop.f32.mrb[2].mxu0 }
 0x118   :  { %753 = vst [vmem:[%s1358_s3] sm:$0xff] %v665_v43  ;;  %v669_v47 = vpop.f32.mrb[3].mxu0 }
 0x119   :  { %754 = vst [vmem:[%s1358_s3 + $0x8] sm:$0xff] %v667_v45 }
 0x11a   :  { %v705_v52 = vpop.f32.mrb[0].mxu1 }
 0x11b   :  { %v706_v53 = vadd.f32 %v705_v52, %v124_v50  ;;  %v707_v54 = vpop.f32.mrb[1].mxu1 }
 0x11c   :  { %v708_v55 = vadd.f32 %v707_v54, %v128_v51  ;;  %v709_v56 = vpop.f32.mrb[2].mxu1 }
 0x11d   :  { %755 = vst [vmem:[%s1358_s3 + $0x10] sm:$0xff] %v706_v53  ;;  %v710_v57 = vpop.f32.mrb[3].mxu1 }
 0x11e   :  { %756 = vst [vmem:[%s1358_s3 + $0x18] sm:$0xff] %v708_v55 }
 0x155   :  { %v746_v62 = vpop.f32.mrb[4].mxu0 }
 0x156   :  { %v747_v63 = vadd.f32 %v746_v62, %v132_v60  ;;  %v748_v0 = vpop.f32.mrb[5].mxu0 }
 0x157   :  { %v749_v1 = vadd.f32 %v748_v0, %v136_v61  ;;  %v750_v2 = vpop.f32.mrb[6].mxu0 }
 0x158   :  { %757 = vst [vmem:[%s1358_s3 + $0x20] sm:$0xff] %v747_v63  ;;  %v751_v3 = vpop.f32.mrb[7].mxu0 }
 0x159   :  { %758 = vst [vmem:[%s1358_s3 + $0x28] sm:$0xff] %v749_v1 }

// kernel: crnn_forward.8
= control target key start
LH: loop header
LB: loop body
LE: loop exit
PB: predicated region body
PF: predicated region fallthrough
CT: control target
= control target key end

     0   :  { %v5755_v0 = vmov 0   ;;  %vm596_vm0 = vcmask 1045504   ;;  %vm319_vm1 = vcmask 1046528   ;;  %vm2164_vm2 = vcmask 1041409   ;;  %s5758_s11 = smov 32   ;;  %s5759_s12 = smov 64   ;;  %s10598_s0 = inlined_call_operand.vmem [shape: f32[2,18,18,1], index: 0, kind: input, shape index: {}]   ;;  %s10599_s1 = inlined_call_operand.vmem [shape: bf16[9,32], index: 1, kind: input, shape index: {}]   ;;  %s10600_s2 = inlined_call_operand.vmem [shape: f32[1,32], index: 2, kind: input, shape index: {}]   ;;  %s10601_s3 = inlined_call_operand.vmem [shape: f32[1,32], index: 3, kind: input, shape index: {}]   ;;  %s10602_s4 = inlined_call_operand.vmem [shape: bf16[2,8,256], index: 4, kind: output, shape index: {}]  }
   0x1   :  { %5718 = vset.pattern.permute.xlu1 %v5755_v0  ;;  %5717 = vset.pattern.permute.xlu0 %v5755_v0  ;;  %v5789_v1 = vld [vmem:[%s10598_s0 + $0x18] sm:$0xff]  ;;  %v5794_v2 = vld [vmem:[%s10598_s0] sm:$0xff]  ;;  %v5806_v4 = vld [vmem:[%s10598_s0 + $0x8] sm:$0xff]  ;;  %vm2166_vm3 = vcmask 1043459   ;;  %vm2168_vm4 = vcmask 1045509   ;;  %vm2170_vm5 = vcmask 1047559  }
   0x2   :  { %87 = vperm.xlu1 %5718, %v5789_v1   ;;  %77 = vperm.xlu0 %5717, %v5794_v2   ;;  %v5801_v3 = vld [vmem:[%s10598_s0 + $0x20] sm:$0xff]  ;;  %v5813_v5 = vld [vmem:[%s10598_s0 + $0x38] sm:$0xff]  ;;  %v5818_v6 = vld [vmem:[%s10598_s0 + $0x30] sm:$0xff]  ;;  %v602_v15 = vrot.slane %v5789_v1, 2  ;;  %v597_v16 = vrot.slane %v5794_v2, 2  ;;  %v598_v18 = vrot.slane %v5806_v4, 2 }
   0x3   :  { %v5825_v7 = vld [vmem:[%s10598_s0 + $0x50] sm:$0xff]  ;;  %v5830_v8 = vld [vmem:[%s10598_s0 + $0x48] sm:$0xff]  ;;  %v5842_v10 = vld [vmem:[%s10598_s0 + $0x60] sm:$0xff]  ;;  %v603_v17 = vrot.slane %v5801_v3, 2  ;;  %v608_v19 = vrot.slane %v5813_v5, 2  ;;  %v607_v22 = vrot.slane %v5818_v6, 2 }
   0x4   :  { %v5837_v9 = vld [vmem:[%s10598_s0 + $0x68] sm:$0xff]  ;;  %v5849_v11 = vld [vmem:[%s10598_s0 + $0x80] sm:$0xff]  ;;  %v5854_v12 = vld [vmem:[%s10598_s0 + $0x78] sm:$0xff]  ;;  %v613_v23 = vrot.slane %v5825_v7, 2  ;;  %v612_v24 = vrot.slane %v5830_v8, 2  ;;  %v617_v26 = vrot.slane %v5842_v10, 2  ;;  %v5926_v40 = vsel %vm596_vm0, %v597_v16, %v598_v18 }
   0x5   :  { %v5861_v13 = vld [vmem:[%s10598_s0 + $0x98] sm:$0xff]  ;;  %v5866_v14 = vld [vmem:[%s10598_s0 + $0x90] sm:$0xff]  ;;  %v5883_v21 = vld [vmem:[%s10598_s0 + $0xa8] sm:$0xff]  ;;  %v618_v25 = vrot.slane %v5837_v9, 2  ;;  %v623_v27 = vrot.slane %v5849_v11, 2  ;;  %v622_v28 = vrot.slane %v5854_v12, 2  ;;  %v5950_v48 = vsel %vm596_vm0, %v602_v15, %v603_v17 }
   0x6   :  { %92 = vperm.xlu1 %5718, %v5801_v3   ;;  %82 = vperm.xlu0 %5717, %v5806_v4   ;;  %v5878_v20 = vld [vmem:[%s10598_s0 + $0xb0] sm:$0xff]  ;;  %v628_v29 = vrot.slane %v5861_v13, 2  ;;  %v627_v31 = vrot.slane %v5866_v14, 2  ;;  %v5905_v33 = vld [vmem:[%s10598_s0 + $0xc8] sm:$0xff]  ;;  %v632_v36 = vrot.slane %v5883_v21, 2  ;;  %v5918_v38 = vld [vmem:[%s10598_s0 + $0xc0] sm:$0xff]  ;;  %v5982_v58 = vsel %vm596_vm0, %v607_v22, %v608_v19 }
   0x7   :  { %v5896_v30 = vld [vmem:[%s10598_s0 + $0x10] sm:$0x3]  ;;  %v633_v32 = vrot.slane %v5878_v20, 2  ;;  %v5910_v34 = vld [vmem:[%s10598_s0 + $0x28] sm:$0x3]  ;;  %v638_v37 = vrot.slane %v5905_v33, 2  ;;  %v5986_v60 = vsel %vm596_vm0, %v612_v24, %v613_v23  ;;  %v5998_v0 = vsel %vm596_vm0, %v617_v26, %v618_v25 }
   0x8   :  { %v600_v35 = vrot.slane %v5896_v30, 2  ;;  %v5923_v39 = vld [vmem:[%s10598_s0 + $0xe0] sm:$0xff]  ;;  %v605_v41 = vrot.slane %v5910_v34, 2  ;;  %v637_v42 = vrot.slane %v5918_v38, 2  ;;  %v5934_v44 = vld [vmem:[%s10598_s0 + $0xd8] sm:$0xff]  ;;  %v5957_v51 = vld [vmem:[%s10598_s0 + $0xf0] sm:$0xff]  ;;  %v6014_v22 = vsel %vm596_vm0, %v627_v31, %v628_v29 }
   0x9   :  { %v643_v43 = vrot.slane %v5923_v39, 2  ;;  %v5939_v45 = vld [vmem:[%s10598_s0 + $0xf8] sm:$0xff]  ;;  %v5944_v46 = vld [vmem:[%s10598_s0 + $0x40] sm:$0x3]  ;;  %v642_v49 = vrot.slane %v5934_v44, 2  ;;  %v647_v55 = vrot.slane %v5957_v51, 2  ;;  %v6034_v31 = vsel %vm596_vm0, %v632_v36, %v633_v32 }
   0xa   :  { %102 = vperm.xlu1 %5718, %v5813_v5   ;;  %97 = vperm.xlu0 %5717, %v5818_v6   ;;  %v5947_v47 = vsel %vm596_vm0, %v598_v18, %v600_v35  ;;  %v648_v50 = vrot.slane %v5939_v45, 2  ;;  %v5962_v52 = vld [vmem:[%s10598_s0 + $0x58] sm:$0x3]  ;;  %v5965_v53 = vsel %vm596_vm0, %v603_v17, %v605_v41  ;;  %v610_v54 = vrot.slane %v5944_v46, 2  ;;  %v5974_v56 = vld [vmem:[%s10598_s0 + $0x70] sm:$0x3] }
   0xb   :  { %v5979_v57 = vld [vmem:[%s10598_s0 + $0x88] sm:$0x3]  ;;  %10674 = vst [vmem:[#allocation2_spill] sm:$0xff] %v5982_v58  ;;  %v615_v59 = vrot.slane %v5962_v52, 2  ;;  %10675 = vst [vmem:[#allocation3_spill] sm:$0xff] %v5986_v60  ;;  %v620_v63 = vrot.slane %v5974_v56, 2  ;;  %v6010_v18 = vsel %vm596_vm0, %v622_v28, %v623_v27 }
   0xc   :  { %v5991_v61 = vld [vmem:[%s10598_s0 + $0xa0] sm:$0x3]  ;;  %v5994_v62 = vsel %vm596_vm0, %v608_v19, %v610_v54  ;;  %10676 = vst [vmem:[#allocation4_spill] sm:$0xff] %v5998_v0  ;;  %v625_v15 = vrot.slane %v5979_v57, 2  ;;  %v6004_v16 = vld [vmem:[%s10598_s0 + $0xb8] sm:$0x3] }
   0xd   :  { %v6007_v17 = vsel %vm596_vm0, %v613_v23, %v615_v59  ;;  %10678 = vst [vmem:[#allocation6_spill] sm:$0xff] %v6010_v18  ;;  %v630_v19 = vrot.slane %v5991_v61, 2  ;;  %10679 = vst [vmem:[#allocation7_spill] sm:$0xff] %v6014_v22  ;;  %v6019_v24 = vld [vmem:[%s10598_s0 + $0xd0] sm:$0x3]  ;;  %v6027_v23 = vsel %vm596_vm0, %v618_v25, %v620_v63  ;;  %v635_v35 = vrot.slane %v6004_v16, 2 }
   0xe   :  { %112 = vperm.xlu1 %5718, %v5825_v7   ;;  %107 = vperm.xlu0 %5717, %v5830_v8   ;;  %10677 = vst [vmem:[#allocation5_spill] sm:$0xff] %v6007_v17  ;;  %v6024_v26 = vld [vmem:[%s10598_s0 + $0xe8] sm:$0x3]  ;;  %10680 = vst [vmem:[#allocation8_spill] sm:$0xff] %v6027_v23  ;;  %v6030_v28 = vsel %vm596_vm0, %v623_v27, %v625_v15  ;;  %v640_v54 = vrot.slane %v6019_v24, 2  ;;  %v6043_v25 = vsel %vm596_vm0, %v637_v42, %v638_v37  ;;  %v6145_v22 = vld [vmem:[%s10598_s0 + $0x158] sm:$0xff] }
   0xf   :  { %10681 = vst [vmem:[#allocation9_spill] sm:$0xff] %v6030_v28  ;;  %10682 = vst [vmem:[#allocation10_spill] sm:$0xff] %v6034_v31  ;;  %v6039_v41 = vsel %vm596_vm0, %v628_v29, %v630_v19  ;;  %v645_v27 = vrot.slane %v6024_v26, 2  ;;  %v6049_v59 = vld [vmem:[%s10598_s0 + $0x100] sm:$0x3]  ;;  %v6052_v36 = vsel %vm596_vm0, %v633_v32, %v635_v35  ;;  %v6055_v63 = vsel %vm596_vm0, %v642_v49, %v643_v43  ;;  %v6067_v19 = vld [vmem:[%s10598_s0 + $0x110] sm:$0xff] }
  0x10   :  { %10683 = vst [vmem:[#allocation11_spill] sm:$0xff] %v6039_v41  ;;  %10684 = vst [vmem:[#allocation12_spill] sm:$0xff] %v6043_v25  ;;  %v6058_v29 = vsel %vm596_vm0, %v638_v37, %v640_v54  ;;  %v650_v42 = vrot.slane %v6049_v59, 2  ;;  %v6072_v32 = vld [vmem:[%s10598_s0 + $0x108] sm:$0xff]  ;;  %v653_v37 = vrot.slane %v6067_v19, 2  ;;  %v6082_v35 = vsel %vm596_vm0, %v647_v55, %v648_v50  ;;  %v6171_v28 = vld [vmem:[%s10598_s0 + $0x170] sm:$0xff] }
  0x11   :  { %10685 = vst [vmem:[#allocation13_spill] sm:$0xff] %v6052_v36  ;;  %10686 = vst [vmem:[#allocation14_spill] sm:$0xff] %v6055_v63  ;;  %v6061_v15 = vsel %vm596_vm0, %v643_v43, %v645_v27  ;;  %v652_v43 = vrot.slane %v6072_v32, 2  ;;  %v6087_v54 = vld [vmem:[%s10598_s0 + $0x118] sm:$0x3]  ;;  %v6093_v63 = vld [vmem:[%s10598_s0 + $0x128] sm:$0xff] }
  0x12   :  { %122 = vperm.xlu1 %5718, %v5837_v9   ;;  %117 = vperm.xlu0 %5717, %v5842_v10   ;;  %10687 = vst [vmem:[#allocation15_spill] sm:$0xff] %v6058_v29  ;;  %10688 = vst [vmem:[#allocation16_spill] sm:$0xff] %v6061_v15  ;;  %v6079_v49 = vsel %vm596_vm0, %v648_v50, %v650_v42  ;;  %v655_v27 = vrot.slane %v6087_v54, 2  ;;  %v6098_v42 = vld [vmem:[%s10598_s0 + $0x120] sm:$0xff]  ;;  %v658_v50 = vrot.slane %v6093_v63, 2  ;;  %v320_v0 = vrot.slane %v5794_v2, 1 }
  0x13   :  { %10689 = vst [vmem:[#allocation17_spill] sm:$0xff] %v6079_v49  ;;  %10690 = vst [vmem:[#allocation18_spill] sm:$0xff] %v6082_v35  ;;  %v657_v55 = vrot.slane %v6098_v42, 2  ;;  %v6108_v49 = vsel %vm596_vm0, %v652_v43, %v653_v37  ;;  %v6113_v15 = vld [vmem:[%s10598_s0 + $0x130] sm:$0x3]  ;;  %v6119_v29 = vld [vmem:[%s10598_s0 + $0x140] sm:$0xff] }
  0x14   :  { %v6105_v35 = vsel %vm596_vm0, %v653_v37, %v655_v27  ;;  %10692 = vst [vmem:[#allocation20_spill] sm:$0xff] %v6108_v49  ;;  %v660_v25 = vrot.slane %v6113_v15, 2  ;;  %v6124_v27 = vld [vmem:[%s10598_s0 + $0x138] sm:$0xff]  ;;  %v663_v37 = vrot.slane %v6119_v29, 2  ;;  %v6139_v31 = vld [vmem:[%s10598_s0 + $0x148] sm:$0x3] }
  0x15   :  { %10691 = vst [vmem:[#allocation19_spill] sm:$0xff] %v6105_v35  ;;  %v662_v43 = vrot.slane %v6124_v27, 2  ;;  %v6134_v35 = vsel %vm596_vm0, %v657_v55, %v658_v50  ;;  %v665_v36 = vrot.slane %v6139_v31, 2  ;;  %v6165_v41 = vld [vmem:[%s10598_s0 + $0x160] sm:$0x3]  ;;  %v321_v23 = vrot.slane %v5806_v4, 1 }
  0x16   :  { %132 = vperm.xlu1 %5718, %v5849_v11   ;;  %127 = vperm.xlu0 %5717, %v5854_v12   ;;  %v6131_v49 = vsel %vm596_vm0, %v658_v50, %v660_v25  ;;  %10694 = vst [vmem:[#allocation22_spill] sm:$0xff] %v6134_v35  ;;  %v6150_v25 = vld [vmem:[%s10598_s0 + $0x150] sm:$0xff]  ;;  %v668_v50 = vrot.slane %v6145_v22, 2  ;;  %v670_v18 = vrot.slane %v6165_v41, 2  ;;  %v323_v60 = vrot.slane %v5896_v30, 1  ;;  %s5760_s13 = smov 96  }
  0x17   :  { %10693 = vst [vmem:[#allocation21_spill] sm:$0xff] %v6131_v49  ;;  %v667_v55 = vrot.slane %v6150_v25, 2  ;;  %v6157_v35 = vsel %vm596_vm0, %v663_v37, %v665_v36  ;;  %v6160_v49 = vsel %vm596_vm0, %v662_v43, %v663_v37  ;;  %v6176_v36 = vld [vmem:[%s10598_s0 + $0x168] sm:$0xff]  ;;  %v673_v37 = vrot.slane %v6171_v28, 2  ;;  %v6194_v17 = vld [vmem:[%s10598_s0 + $0x178] sm:$0x3] }
  0x18   :  { %10695 = vst [vmem:[#allocation23_spill] sm:$0xff] %v6157_v35  ;;  %10696 = vst [vmem:[#allocation24_spill] sm:$0xff] %v6160_v49  ;;  %v672_v43 = vrot.slane %v6176_v36, 2  ;;  %v6183_v49 = vsel %vm596_vm0, %v668_v50, %v670_v18  ;;  %v675_v58 = vrot.slane %v6194_v17, 2  ;;  %v325_v18 = vrot.slane %v5789_v1, 1 }
  0x19   :  { %10697 = vst [vmem:[#allocation25_spill] sm:$0xff] %v6183_v49  ;;  %v6186_v35 = vsel %vm596_vm0, %v667_v55, %v668_v50  ;;  %v326_v30 = vrot.slane %v5801_v3, 1  ;;  %v324_v50 = vsel %vm319_vm1, %v321_v23, %v323_v60  ;;  %v322_v55 = vsel %vm319_vm1, %v320_v0, %v321_v23 }
  0x1a   :  { %142 = vperm.xlu1 %5718, %v5861_v13   ;;  %137 = vperm.xlu0 %5717, %v5866_v14   ;;  %10698 = vst [vmem:[#allocation26_spill] sm:$0xff] %v6186_v35  ;;  %v6201_v2 = vsel %vm596_vm0, %v673_v37, %v675_v58  ;;  %v6204_v4 = vsel %vm596_vm0, %v672_v43, %v673_v37  ;;  %v328_v35 = vrot.slane %v5910_v34, 1  ;;  %v331_v1 = vrot.slane %v5813_v5, 1 }
  0x1b   :  { %10699 = vst [vmem:[#allocation27_spill] sm:$0xff] %v6201_v2  ;;  %v330_v49 = vrot.slane %v5818_v6, 1  ;;  %v327_v2 = vsel %vm319_vm1, %v325_v18, %v326_v30  ;;  %v333_v37 = vrot.slane %v5944_v46, 1  ;;  %v336_v3 = vrot.slane %v5825_v7, 1 }
  0x1c   :  { %v329_v58 = vsel %vm319_vm1, %v326_v30, %v328_v35  ;;  %v335_v60 = vrot.slane %v5830_v8, 1  ;;  %v338_v0 = vrot.slane %v5962_v52, 1  ;;  %v341_v6 = vrot.slane %v5837_v9, 1 }
  0x1d   :  { %v334_v34 = vsel %vm319_vm1, %v331_v1, %v333_v37  ;;  %v332_v5 = vsel %vm319_vm1, %v330_v49, %v331_v1  ;;  %v340_v23 = vrot.slane %v5842_v10, 1  ;;  %v343_v35 = vrot.slane %v5974_v56, 1 }
  0x1e   :  { %152 = vperm.xlu1 %5718, %v5878_v20   ;;  %147 = vperm.xlu0 %5717, %v5883_v21   ;;  %v339_v46 = vsel %vm319_vm1, %v336_v3, %v338_v0  ;;  %v337_v7 = vsel %vm319_vm1, %v335_v60, %v336_v3  ;;  %v346_v8 = vrot.slane %v5849_v11, 1  ;;  %v345_v49 = vrot.slane %v5854_v12, 1 }
  0x1f   :  { %v344_v52 = vsel %vm319_vm1, %v341_v6, %v343_v35  ;;  %v342_v9 = vsel %vm319_vm1, %v340_v23, %v341_v6  ;;  %v348_v43 = vrot.slane %v5979_v57, 1  ;;  %v351_v10 = vrot.slane %v5861_v13, 1 }
  0x20   :  { %v350_v18 = vrot.slane %v5866_v14, 1  ;;  %v347_v11 = vsel %vm319_vm1, %v345_v49, %v346_v8  ;;  %v356_v12 = vrot.slane %v5878_v20, 1  ;;  %v355_v30 = vrot.slane %v5883_v21, 1 }
  0x21   :  { %v349_v56 = vsel %vm319_vm1, %v346_v8, %v348_v43  ;;  %v361_v14 = vrot.slane %v5905_v33, 1  ;;  %v363_v1 = vrot.slane %v6019_v24, 1  ;;  %v366_v21 = vrot.slane %v5923_v39, 1 }
  0x22   :  { %162 = vperm.xlu1 %5718, %v5905_v33   ;;  %157 = vperm.xlu0 %5717, %v5918_v38   ;;  %v352_v13 = vsel %vm319_vm1, %v350_v18, %v351_v10  ;;  %v357_v20 = vsel %vm319_vm1, %v355_v30, %v356_v12  ;;  %v368_v37 = vrot.slane %v6024_v26, 1  ;;  %v370_v3 = vrot.slane %v5957_v51, 1  ;;  %v10705_v30 = vld [vmem:[#allocation9_spill] sm:$0xff] }
  0x23   :  { %v373_v60 = vrot.slane %v6049_v59, 1  ;;  %v380_v0 = vrot.slane %v6098_v42, 1  ;;  %v383_v6 = vrot.slane %v6113_v15, 1  ;;  %v385_v23 = vrot.slane %v6124_v27, 1 }
  0x24   :  { %v369_v24 = vsel %vm319_vm1, %v366_v21, %v368_v37  ;;  %v393_v35 = vrot.slane %v6165_v41, 1  ;;  %v395_v8 = vrot.slane %v6176_v36, 1  ;;  %v398_v49 = vrot.slane %v6194_v17, 1  ;;  %v10712_v37 = vld [vmem:[#allocation12_spill] sm:$0xff] }
  0x25   :  { %vm2753_vm6 = vcmask 261120   ;;  %vm2755_vm7 = vcmask 523264   ;;  %vm2757_vm8 = vcmask 785408  }
  0x26   :  { %172 = vperm.xlu1 %5718, %v5923_v39   ;;  %167 = vperm.xlu0 %5717, %v5934_v44  }
  0x2a   :  { %182 = vperm.xlu1 %5718, %v5939_v45   ;;  %177 = vperm.xlu0 %5717, %v5957_v51   ;;  %v381_v51 = vrot.slane %v6093_v63, 1 }
  0x2e   :  { %192 = vperm.xlu1 %5718, %v6067_v19   ;;  %187 = vperm.xlu0 %5717, %v6072_v32  }
  0x32   :  { %202 = vperm.xlu1 %5718, %v6093_v63   ;;  %197 = vperm.xlu0 %5717, %v6098_v42   ;;  %v382_v63 = vsel %vm319_vm1, %v380_v0, %v381_v51  ;;  %v391_v42 = vrot.slane %v6145_v22, 1  ;;  %v10718_v0 = vld [vmem:[#allocation20_spill] sm:$0xff] }
  0x36   :  { %212 = vperm.xlu1 %5718, %v6119_v29   ;;  %207 = vperm.xlu0 %5717, %v6124_v27   ;;  %v396_v27 = vrot.slane %v6171_v28, 1 }
  0x3a   :  { %222 = vperm.xlu1 %5718, %v6145_v22   ;;  %217 = vperm.xlu0 %5717, %v6150_v25  }
  0x3e   :  { %232 = vperm.xlu1 %5718, %v6171_v28   ;;  %227 = vperm.xlu0 %5717, %v6176_v36  }
  0x42   :  { %405 = vperm.xlu1 %5718, %v324_v50   ;;  %401 = vperm.xlu0 %5717, %v322_v55   ;;  %v358_v50 = vrot.slane %v6004_v16, 1  ;;  %v360_v55 = vrot.slane %v5918_v38, 1  ;;  %v364_v16 = vsel %vm319_vm1, %v361_v14, %v363_v1  ;;  %v371_v38 = vrot.slane %v5939_v45, 1  ;;  %v10709_v1 = vld [vmem:[#allocation13_spill] sm:$0xff] }
  0x44   :  { %v362_v33 = vsel %vm319_vm1, %v360_v55, %v361_v14  ;;  %v374_v26 = vsel %vm319_vm1, %v371_v38, %v373_v60  ;;  %v372_v45 = vsel %vm319_vm1, %v370_v3, %v371_v38  ;;  %v10707_v14 = vld [vmem:[#allocation11_spill] sm:$0xff] }
  0x45   :  { %v10708_v55 = vld [vmem:[#allocation7_spill] sm:$0xff] }
  0x46   :  { %413 = vperm.xlu1 %5718, %v329_v58   ;;  %409 = vperm.xlu0 %5717, %v327_v2   ;;  %v353_v2 = vrot.slane %v5991_v61, 1  ;;  %v359_v61 = vsel %vm319_vm1, %v356_v12, %v358_v50  ;;  %v365_v58 = vrot.slane %v5934_v44, 1  ;;  %v376_v44 = vrot.slane %v6067_v19, 1 }
  0x48   :  { %v354_v57 = vsel %vm319_vm1, %v351_v10, %v353_v2  ;;  %v367_v39 = vsel %vm319_vm1, %v365_v58, %v366_v21  ;;  %v10700_v10 = vld [vmem:[#allocation2_spill] sm:$0xff]  ;;  %v10704_v2 = vld [vmem:[#allocation4_spill] sm:$0xff] }
  0x49   :  { %v10710_v21 = vld [vmem:[#allocation10_spill] sm:$0xff] }
  0x4a   :  { %421 = vperm.xlu1 %5718, %v334_v34   ;;  %417 = vperm.xlu0 %5717, %v332_v5   ;;  %v375_v34 = vrot.slane %v6072_v32, 1  ;;  %v378_v5 = vrot.slane %v6087_v54, 1  ;;  %v386_v32 = vrot.slane %v6119_v29, 1  ;;  %v384_v54 = vsel %vm319_vm1, %v381_v51, %v383_v6  ;;  %v10717_v51 = vld [vmem:[#allocation19_spill] sm:$0xff]  ;;  %v10719_v6 = vld [vmem:[#allocation21_spill] sm:$0xff] }
  0x4c   :  { %v379_v59 = vsel %vm319_vm1, %v376_v44, %v378_v5  ;;  %v377_v19 = vsel %vm319_vm1, %v375_v34, %v376_v44  ;;  %v387_v29 = vsel %vm319_vm1, %v385_v23, %v386_v32  ;;  %v10715_v34 = vld [vmem:[#allocation17_spill] sm:$0xff] }
  0x4e   :  { %429 = vperm.xlu1 %5718, %v339_v46   ;;  %425 = vperm.xlu0 %5717, %v337_v7   ;;  %v388_v46 = vrot.slane %v6139_v31, 1  ;;  %v390_v7 = vrot.slane %v6150_v25, 1  ;;  %v394_v31 = vsel %vm319_vm1, %v391_v42, %v393_v35  ;;  %v399_v25 = vsel %vm319_vm1, %v396_v27, %v398_v49  ;;  %v68_v35 = vld [vmem:[%s10598_s0 + $0x188] sm:$0xff] }
  0x4f   :  { %v10726_v49 = vld [vmem:[#allocation27_spill] sm:$0xff] }
  0x50   :  { %v389_v15 = vsel %vm319_vm1, %v386_v32, %v388_v46  ;;  %v392_v22 = vsel %vm319_vm1, %v390_v7, %v391_v42  ;;  %v10720_v32 = vld [vmem:[#allocation22_spill] sm:$0xff]  ;;  %v10722_v46 = vld [vmem:[#allocation24_spill] sm:$0xff] }
  0x52   :  { %437 = vperm.xlu1 %5718, %v344_v52   ;;  %433 = vperm.xlu0 %5717, %v342_v9   ;;  %v397_v52 = vsel %vm319_vm1, %v395_v8, %v396_v27  ;;  %v69_v27 = vld [vmem:[%s10598_s0 + $0x190] sm:$0x3] }
  0x56   :  { %445 = vperm.xlu1 %5718, %v349_v56   ;;  %441 = vperm.xlu0 %5717, %v347_v11   ;;  %v10702_v56 = vld [vmem:[#allocation3_spill] sm:$0xff] }
  0x5a   :  { %453 = vperm.xlu1 %5718, %v354_v57   ;;  %449 = vperm.xlu0 %5717, %v352_v13   ;;  %v10706_v57 = vld [vmem:[#allocation6_spill] sm:$0xff] }
  0x5e   :  { %461 = vperm.xlu1 %5718, %v359_v61   ;;  %457 = vperm.xlu0 %5717, %v357_v20  }
  0x62   :  { %469 = vperm.xlu1 %5718, %v364_v16   ;;  %465 = vperm.xlu0 %5717, %v362_v33   ;;  %v10711_v33 = vld [vmem:[#allocation15_spill] sm:$0xff] }
  0x66   :  { %477 = vperm.xlu1 %5718, %v369_v24   ;;  %473 = vperm.xlu0 %5717, %v367_v39   ;;  %v10713_v24 = vld [vmem:[#allocation16_spill] sm:$0xff]  ;;  %v10714_v39 = vld [vmem:[#allocation14_spill] sm:$0xff] }
  0x6a   :  { %485 = vperm.xlu1 %5718, %v374_v26   ;;  %481 = vperm.xlu0 %5717, %v372_v45   ;;  %v10716_v26 = vld [vmem:[#allocation18_spill] sm:$0xff] }
  0x6e   :  { %493 = vperm.xlu1 %5718, %v379_v59   ;;  %489 = vperm.xlu0 %5717, %v377_v19  }
  0x72   :  { %501 = vperm.xlu1 %5718, %v384_v54   ;;  %497 = vperm.xlu0 %5717, %v382_v63   ;;  %v10721_v63 = vld [vmem:[#allocation23_spill] sm:$0xff] }
  0x76   :  { %509 = vperm.xlu1 %5718, %v389_v15   ;;  %505 = vperm.xlu0 %5717, %v387_v29   ;;  %v10723_v15 = vld [vmem:[#allocation25_spill] sm:$0xff]  ;;  %v10724_v29 = vld [vmem:[#allocation26_spill] sm:$0xff] }
  0x7a   :  { %517 = vperm.xlu1 %5718, %v394_v31   ;;  %513 = vperm.xlu0 %5717, %v392_v22   ;;  %v67_v22 = vld [vmem:[%s10598_s0 + $0x180] sm:$0xff] }
  0x7e   :  { %525 = vperm.xlu1 %5718, %v399_v25   ;;  %521 = vperm.xlu0 %5717, %v397_v52   ;;  %v955_v25 = vrot.slane %v68_v35, 1  ;;  %v957_v52 = vrot.slane %v69_v27, 1 }
  0x81   :  { %v6282_v41 = vpop.permute.xlu1 %87  ;;  %v6284_v28 = vpop.permute.xlu0 %77 }
  0x82   :  { %684 = vperm.xlu1 %5718, %v5947_v47   ;;  %680 = vperm.xlu0 %5717, %v5926_v40   ;;  %v10701_v40 = vld [vmem:[#allocation5_spill] sm:$0xff] }
  0x85   :  { %v6288_v36 = vpop.permute.xlu1 %92  ;;  %v6290_v9 = vpop.permute.xlu0 %82 }
  0x86   :  { %692 = vperm.xlu1 %5718, %v5965_v53   ;;  %688 = vperm.xlu0 %5717, %v5950_v48   ;;  %v10703_v48 = vld [vmem:[#allocation8_spill] sm:$0xff] }
  0x89   :  { %v6294_v17 = vpop.permute.xlu1 %102  ;;  %v6296_v43 = vpop.permute.xlu0 %97 }
  0x8a   :  { %700 = vperm.xlu1 %5718, %v5994_v62   ;;  %696 = vperm.xlu0 %5717, %v10700_v10   ;;  %v235_v10 = vlaneseq }
  0x8d   :  { %v6300_v18 = vpop.permute.xlu1 %112  ;;  %v6302_v47 = vpop.permute.xlu0 %107 }
  0x8e   :  { %708 = vperm.xlu1 %5718, %v10701_v40   ;;  %704 = vperm.xlu0 %5717, %v10702_v56   ;;  %v954_v40 = vrot.slane %v67_v22, 1 }
  0x91   :  { %v6306_v11 = vpop.permute.xlu1 %122  ;;  %v6308_v53 = vpop.permute.xlu0 %117 }
  0x92   :  { %716 = vperm.xlu1 %5718, %v10703_v48   ;;  %712 = vperm.xlu0 %5717, %v10704_v2   ;;  %v1038_v2 = vrot.slane %v68_v35, 2 }
  0x95   :  { %v6312_v12 = vpop.permute.xlu1 %132  ;;  %v6314_v62 = vpop.permute.xlu0 %127 }
  0x96   :  { %724 = vperm.xlu1 %5718, %v10705_v30   ;;  %720 = vperm.xlu0 %5717, %v10706_v57   ;;  %v958_v30 = vsel %vm319_vm1, %v955_v25, %v957_v52  ;;  %v1040_v57 = vrot.slane %v69_v27, 2 }
  0x99   :  { %v6318_v13 = vpop.permute.xlu1 %142  ;;  %v6320_v50 = vpop.permute.xlu0 %137 }
  0x9a   :  { %732 = vperm.xlu1 %5718, %v10707_v14   ;;  %728 = vperm.xlu0 %5717, %v10708_v55   ;;  %v73_v14 = vld [vmem:[%s10599_s1] sm:$0x1]  ;;  %v6395_v55 = vshrl.u32 %v235_v10, 7 }
  0x9c   :  { %10727 = vst [vmem:[#allocation5_spill] sm:$0xff] %v6395_v55  ;;  %v10608_v27 = vsub.s32 1, %v6395_v55 }
  0x9d   :  { %v6324_v61 = vpop.permute.xlu1 %152  ;;  %v6326_v20 = vpop.permute.xlu0 %147 }
  0x9e   :  { %740 = vperm.xlu1 %5718, %v10709_v1   ;;  %736 = vperm.xlu0 %5717, %v10710_v21   ;;  %v956_v1 = vsel %vm319_vm1, %v954_v40, %v955_v25  ;;  %v677_v21 = vld [vmem:[%s10599_s1] sm:$0x2] }
  0xa1   :  { %v6330_v58 = vpop.permute.xlu1 %162  ;;  %v6332_v16 = vpop.permute.xlu0 %157 }
  0xa2   :  { %748 = vperm.xlu1 %5718, %v10711_v33   ;;  %744 = vperm.xlu0 %5717, %v10712_v37  }
  0xa5   :  { %v6336_v38 = vpop.permute.xlu1 %172  ;;  %v6338_v3 = vpop.permute.xlu0 %167 }
  0xa6   :  { %756 = vperm.xlu1 %5718, %v10713_v24   ;;  %752 = vperm.xlu0 %5717, %v10714_v39   ;;  %v1118_v24 = vld [vmem:[%s10599_s1] sm:$0x8]  ;;  %v959_v39 = vld [vmem:[%s10599_s1] sm:$0x4] }
  0xa9   :  { %v6342_v60 = vpop.permute.xlu1 %182  ;;  %v6344_v44 = vpop.permute.xlu0 %177 }
  0xaa   :  { %764 = vperm.xlu1 %5718, %v10715_v34   ;;  %760 = vperm.xlu0 %5717, %v10716_v26   ;;  %v74_v34 = vunpack.c.l.bf16 %v73_v14  ;;  %v1041_v26 = vsel %vm596_vm0, %v1038_v2, %v1040_v57 }
  0xad   :  { %v6348_v45 = vpop.permute.xlu1 %192  ;;  %v6350_v5 = vpop.permute.xlu0 %187 }
  0xae   :  { %772 = vperm.xlu1 %5718, %v10717_v51   ;;  %768 = vperm.xlu0 %5717, %v10718_v0   ;;  %v71_v51 = vld [vmem:[%s10598_s0 + $0x1a0] sm:$0xff]  ;;  %v70_v0 = vld [vmem:[%s10598_s0 + $0x198] sm:$0xff] }
  0xaf   :  { %v1200_v40 = vrot.slane %v71_v51, 1  ;;  %v1280_v57 = vrot.slane %v70_v0, 2 }
  0xb1   :  { %v6354_v59 = vpop.permute.xlu1 %202  ;;  %v6356_v19 = vpop.permute.xlu0 %197 }
  0xb2   :  { %780 = vperm.xlu1 %5718, %v10719_v6   ;;  %776 = vperm.xlu0 %5717, %v10720_v32   ;;  %v6419_v6 = vsub.s32 0, %v6395_v55  ;;  %v678_v32 = vunpack.c.l.bf16 %v677_v21 }
  0xb4   :  { %10728 = vst [vmem:[#allocation3_spill] sm:$0xff] %v6419_v6  ;;  %v6438_v21 = vrot.slane %v74_v34, %v6419_v6 }
  0xb5   :  { %v6360_v23 = vpop.permute.xlu1 %212  ;;  %v6362_v54 = vpop.permute.xlu0 %207 }
  0xb6   :  { %788 = vperm.xlu1 %5718, %v10721_v63   ;;  %784 = vperm.xlu0 %5717, %v10722_v46   ;;  %v10604_v63 = vsub.s32 3, %v6395_v55  ;;  %v6472_v52 = vmul.f32 %v6438_v21, %v6282_v41 }
  0xb9   :  { %v6366_v42 = vpop.permute.xlu1 %222  ;;  %v6368_v7 = vpop.permute.xlu0 %217 }
  0xba   :  { %796 = vperm.xlu1 %5718, %v10723_v15   ;;  %792 = vperm.xlu0 %5717, %v10724_v29   ;;  %v72_v15 = vld [vmem:[%s10598_s0 + $0x1a8] sm:$0x3]  ;;  %v1119_v29 = vunpack.c.l.bf16 %v1118_v24  ;;  %v6442_v24 = vrot.slane %v678_v32, %v10604_v63 }
  0xbb   :  { %v1202_v14 = vrot.slane %v72_v15, 1 }
  0xbc   :  { %10731 = vst [vmem:[#allocation9_spill] sm:$0xff] %v6442_v24 }
  0xbd   :  { %v6378_v8 = vpop.permute.xlu1 %232  ;;  %v6380_v31 = vpop.permute.xlu0 %227 }
  0xbe   :  { %10725 = vst [vmem:[#allocation2_spill] sm:$0xff] %v6380_v31  ;;  %804 = vperm.xlu1 %5718, %v10726_v49   ;;  %800 = vperm.xlu0 %5717, %v6204_v4   ;;  %v1037_v4 = vrot.slane %v67_v22, 2 }
  0xc0   :  { %v1039_v46 = vsel %vm596_vm0, %v1037_v4, %v1038_v2  ;;  %v1199_v2 = vrot.slane %v70_v0, 1  ;;  %v1283_v4 = vrot.slane %v72_v15, 2 }
  0xc1   :  { %v6387_v56 = vpop.permute.xlu1 %405  ;;  %v6389_v48 = vpop.permute.xlu0 %401 }
  0xc2   :  { %882 = vperm.xlu1 %5718, %v68_v35   ;;  %877 = vperm.xlu0 %5717, %v67_v22   ;;  %v10606_v35 = vsub.s32 6, %v6395_v55  ;;  %v960_v22 = vunpack.c.l.bf16 %v959_v39  ;;  %v10736_v39 = vsub.s32 7, %v6395_v55 }
  0xc5   :  { %v6401_v33 = vpop.permute.xlu1 %413  ;;  %v6403_v37 = vpop.permute.xlu0 %409 }
  0xc6   :  { %966 = vperm.xlu1 %5718, %v958_v30   ;;  %962 = vperm.xlu0 %5717, %v956_v1   ;;  %v1281_v30 = vrot.slane %v71_v51, 2  ;;  %v1285_v1 = vld [vmem:[%s10599_s1 + $0x4] sm:$0x1] }
  0xc7   :  { %v1286_v31 = vunpack.c.l.bf16 %v1285_v1 }
  0xc9   :  { %v6428_v49 = vpop.permute.xlu1 %421  ;;  %v6430_v25 = vpop.permute.xlu0 %417 }
  0xca   :  { %10729 = vst [vmem:[#allocation8_spill] sm:$0xff] %v6428_v49  ;;  %10730 = vst [vmem:[#allocation4_spill] sm:$0xff] %v6430_v25  ;;  %1047 = vperm.xlu1 %5718, %v1041_v26   ;;  %1043 = vperm.xlu0 %5717, %v1039_v46   ;;  %v6447_v26 = vrot.slane %v1119_v29, %v10606_v35  ;;  %v6451_v46 = vrot.slane %v74_v34, %v10608_v27  ;;  %v10734_v25 = vsub.s32 4, %v6395_v55 }
  0xcb   :  { %v6464_v49 = vrot.slane %v1119_v29, %v10736_v39  ;;  %v1201_v35 = vsel %vm319_vm1, %v1199_v2, %v1200_v40  ;;  %v1203_v34 = vsel %vm319_vm1, %v1200_v40, %v1202_v14  ;;  %v1284_v27 = vsel %vm596_vm0, %v1281_v30, %v1283_v4 }
  0xcc   :  { %10732 = vst [vmem:[#allocation6_spill] sm:$0xff] %v6447_v26  ;;  %v6460_v63 = vrot.slane %v960_v22, %v10734_v25  ;;  %v6476_v25 = vmul.f32 %v6442_v24, %v6282_v41  ;;  %v6488_v40 = vmul.f32 %v6438_v21, %v6288_v36  ;;  %v6492_v2 = vmul.f32 %v6442_v24, %v6288_v36 }
  0xcd   :  { %v6453_v15 = vpop.permute.xlu1 %429  ;;  %v6455_v10 = vpop.permute.xlu0 %425  ;;  %10737 = vst [vmem:[#allocation13_spill] sm:$0xff] %v6464_v49  ;;  %v6496_v41 = vmul.f32 %v6438_v21, %v6290_v9  ;;  %v6508_v14 = vmul.f32 %v6438_v21, %v6294_v17  ;;  %v6512_v36 = vmul.f32 %v6442_v24, %v6294_v17  ;;  %v6515_v9 = vrot.slane %v1286_v31, %v6419_v6 }
  0xce   :  { %10733 = vst [vmem:[#allocation11_spill] sm:$0xff] %v6455_v10  ;;  %10735 = vst [vmem:[#allocation7_spill] sm:$0xff] %v6460_v63  ;;  %1127 = vperm.xlu1 %5718, %v71_v51   ;;  %1122 = vperm.xlu0 %5717, %v70_v0   ;;  %v1282_v10 = vsel %vm596_vm0, %v1280_v57, %v1281_v30  ;;  %v6480_v51 = vmul.f32 %v6438_v21, %v6284_v28  ;;  %v10739_v0 = vsub.s32 2, %v6395_v55  ;;  %v5756_v4 = vmov 1983009808  }
  0xcf   :  { %10738 = vst [vmem:[#allocation10_spill] sm:$0xff] %v6476_v25  ;;  %10740 = vst [vmem:[#allocation15_spill] sm:$0xff] %v6492_v2  ;;  %v10741_v57 = vsub.s32 5, %v6395_v55  ;;  %v1505_v1 = vunpack.c.l.s4 %v5756_v4  ;;  %v6519_v39 = vmul.f32 %v6447_v26, %v6294_v17  ;;  %v6535_v31 = vmul.f32 %v6438_v21, %v6300_v18 }
  0xd0   :  { %v6484_v29 = vrot.slane %v678_v32, %v10739_v0  ;;  %10743 = vst [vmem:[#allocation16_spill] sm:$0xff] %v6512_v36  ;;  %10744 = vst [vmem:[#allocation14_spill] sm:$0xff] %v6515_v9  ;;  %v6527_v0 = vmul.f32 %v6442_v24, %v6296_v43  ;;  %v6539_v17 = vmul.f32 %v6442_v24, %v6300_v18 }
  0xd1   :  { %v6498_v30 = vpop.permute.xlu1 %437  ;;  %v6500_v28 = vpop.permute.xlu0 %433  ;;  %v6504_v32 = vrot.slane %v960_v22, %v10741_v57  ;;  %10745 = vst [vmem:[#allocation17_spill] sm:$0xff] %v6519_v39  ;;  %v6523_v22 = vmul.f32 %v6438_v21, %v6296_v43  ;;  %v6543_v57 = vmul.f32 %v6447_v26, %v6300_v18  ;;  %v6547_v4 = vmul.f32 %v6438_v21, %v6302_v47 }
  0xd2   :  { %1209 = vperm.xlu1 %5718, %v1203_v34   ;;  %10746 = vst [vmem:[#allocation18_spill] sm:$0xff] %v6527_v0  ;;  %v6531_v34 = vmul.f32 %v6447_v26, %v6296_v43  ;;  %1205 = vperm.xlu0 %5717, %v1201_v35   ;;  %10748 = vst [vmem:[#allocation20_spill] sm:$0xff] %v6539_v17  ;;  %v6551_v43 = vmul.f32 %v6442_v24, %v6302_v47 }
  0xd3   :  { %10742 = vst [vmem:[#allocation12_spill] sm:$0xff] %v6504_v32  ;;  %10749 = vst [vmem:[#allocation21_spill] sm:$0xff] %v6543_v57  ;;  %v6555_v35 = vmul.f32 %v6447_v26, %v6302_v47  ;;  %v6559_v6 = vmul.f32 %v6438_v21, %v6306_v11  ;;  %v6563_v18 = vmul.f32 %v6442_v24, %v6306_v11 }
  0xd4   :  { %10747 = vst [vmem:[#allocation19_spill] sm:$0xff] %v6531_v34  ;;  %10750 = vst [vmem:[#allocation22_spill] sm:$0xff] %v6551_v43  ;;  %v6571_v34 = vmul.f32 %v6447_v26, %v6306_v11  ;;  %v6575_v47 = vmul.f32 %v6438_v21, %v6308_v53  ;;  %v1506_v43 = vunpack.c.0.s8 %v1505_v1  ;;  %v6587_v39 = vmul.f32 %v6438_v21, %v6312_v12 }
  0xd5   :  { %10751 = vst [vmem:[#allocation23_spill] sm:$0xff] %v6555_v35  ;;  %10752 = vst [vmem:[#allocation24_spill] sm:$0xff] %v6563_v18  ;;  %v6565_v57 = vpop.permute.xlu1 %445  ;;  %v6567_v17 = vpop.permute.xlu0 %441  ;;  %v6579_v35 = vmul.f32 %v6442_v24, %v6308_v53  ;;  %v6583_v18 = vmul.f32 %v6447_v26, %v6308_v53  ;;  %v6591_v11 = vmul.f32 %v6442_v24, %v6312_v12 }
  0xd6   :  { %10753 = vst [vmem:[#allocation25_spill] sm:$0xff] %v6571_v34  ;;  %1292 = vperm.xlu1 %5718, %v1284_v27   ;;  %v6595_v34 = vmul.f32 %v6447_v26, %v6312_v12  ;;  %1288 = vperm.xlu0 %5717, %v1282_v10   ;;  %v6599_v27 = vmul.f32 %v6438_v21, %v6314_v62 }
  0xd7   :  { %10754 = vst [vmem:[#allocation26_spill] sm:$0xff] %v6579_v35  ;;  %10755 = vst [vmem:[#allocation27_spill] sm:$0xff] %v6583_v18  ;;  %v6603_v53 = vmul.f32 %v6442_v24, %v6314_v62  ;;  %v6607_v1 = vmul.f32 %v6447_v26, %v6314_v62  ;;  %v6615_v12 = vmul.f32 %v6442_v24, %v6318_v13 }
  0xd8   :  { %10756 = vst [vmem:[#allocation28_spill] sm:$0xff] %v6591_v11  ;;  %10757 = vst [vmem:[#allocation29_spill] sm:$0xff] %v6595_v34  ;;  %v6611_v11 = vmul.f32 %v6438_v21, %v6318_v13  ;;  %v6619_v10 = vmul.f32 %v6447_v26, %v6318_v13  ;;  %v6623_v34 = vmul.f32 %v6438_v21, %v6320_v50 }
  0xd9   :  { %10758 = vst [vmem:[#allocation30_spill] sm:$0xff] %v6603_v53  ;;  %10759 = vst [vmem:[#allocation31_spill] sm:$0xff] %v6607_v1  ;;  %v6627_v62 = vmul.f32 %v6442_v24, %v6320_v50  ;;  %v6629_v1 = vpop.permute.xlu1 %453  ;;  %v6631_v53 = vpop.permute.xlu0 %449  ;;  %v6635_v18 = vmul.f32 %v6447_v26, %v6320_v50  ;;  %v6639_v13 = vmul.f32 %v6438_v21, %v6324_v61 }
  0xda   :  { %10760 = vst [vmem:[#allocation32_spill] sm:$0xff] %v6615_v12  ;;  %10761 = vst [vmem:[#allocation33_spill] sm:$0xff] %v6619_v10  ;;  %v6643_v10 = vmul.f32 %v6442_v24, %v6324_v61  ;;  %v6646_v12 = vsub.s32 %v1506_v43, %v6395_v55  ;;  %v6654_v35 = vmul.f32 %v6438_v21, %v6326_v20 }
  0xdb   :  { %10762 = vst [vmem:[#allocation34_spill] sm:$0xff] %v6627_v62  ;;  %10763 = vst [vmem:[#allocation35_spill] sm:$0xff] %v6635_v18  ;;  %v6650_v62 = vmul.f32 %v6447_v26, %v6324_v61  ;;  %v6658_v50 = vmul.f32 %v6442_v24, %v6326_v20  ;;  %v6662_v18 = vmul.f32 %v6447_v26, %v6326_v20 }
  0xdc   :  { %10764 = vst [vmem:[#allocation36_spill] sm:$0xff] %v6643_v10  ;;  %10765 = vst [vmem:[#allocation37_spill] sm:$0xff] %v6646_v12  ;;  %v6666_v43 = vmul.f32 %v6438_v21, %v6330_v58  ;;  %v6670_v61 = vmul.f32 %v6442_v24, %v6330_v58  ;;  %v6674_v55 = vmul.f32 %v6447_v26, %v6330_v58 }
  0xdd   :  { %10766 = vst [vmem:[#allocation38_spill] sm:$0xff] %v6650_v62  ;;  %10767 = vst [vmem:[#allocation39_spill] sm:$0xff] %v6658_v50  ;;  %v6678_v62 = vmul.f32 %v6438_v21, %v6332_v16  ;;  %v6682_v20 = vmul.f32 %v6442_v24, %v6332_v16  ;;  %v6690_v50 = vmul.f32 %v6438_v21, %v6336_v38 }
  0xde   :  { %10768 = vst [vmem:[#allocation40_spill] sm:$0xff] %v6662_v18  ;;  %10769 = vst [vmem:[#allocation41_spill] sm:$0xff] %v6670_v61  ;;  %v6686_v18 = vmul.f32 %v6447_v26, %v6332_v16  ;;  %v6694_v58 = vmul.f32 %v6442_v24, %v6336_v38  ;;  %v6698_v61 = vpop.permute.xlu0 %457  ;;  %v6702_v10 = vmul.f32 %v6447_v26, %v6336_v38 }
  0xdf   :  { %10770 = vst [vmem:[#allocation42_spill] sm:$0xff] %v6674_v55  ;;  %10771 = vst [vmem:[#allocation43_spill] sm:$0xff] %v6682_v20  ;;  %v6696_v55 = vpop.permute.xlu1 %461  ;;  %v6706_v16 = vmul.f32 %v6438_v21, %v6338_v3  ;;  %v6714_v20 = vmul.f32 %v6447_v26, %v6338_v3  ;;  %v6722_v38 = vmul.f32 %v6442_v24, %v6342_v60 }
  0xe0   :  { %10772 = vst [vmem:[#allocation44_spill] sm:$0xff] %v6686_v18  ;;  %10773 = vst [vmem:[#allocation45_spill] sm:$0xff] %v6694_v58  ;;  %v6710_v18 = vmul.f32 %v6442_v24, %v6338_v3  ;;  %v6718_v58 = vmul.f32 %v6438_v21, %v6342_v60  ;;  %v6730_v12 = vmul.f32 %v6438_v21, %v6344_v44 }
  0xe1   :  { %10774 = vst [vmem:[#allocation46_spill] sm:$0xff] %v6702_v10  ;;  %10776 = vst [vmem:[#allocation48_spill] sm:$0xff] %v6714_v20  ;;  %v6726_v10 = vmul.f32 %v6447_v26, %v6342_v60  ;;  %v6734_v3 = vmul.f32 %v6442_v24, %v6344_v44  ;;  %v6738_v20 = vmul.f32 %v6447_v26, %v6344_v44 }
  0xe2   :  { %10775 = vst [vmem:[#allocation47_spill] sm:$0xff] %v6710_v18  ;;  %10777 = vst [vmem:[#allocation49_spill] sm:$0xff] %v6722_v38  ;;  %v6742_v18 = vmul.f32 %v6438_v21, %v6348_v45  ;;  %v6746_v60 = vmul.f32 %v6442_v24, %v6348_v45  ;;  %v6754_v38 = vmul.f32 %v6438_v21, %v6350_v5  ;;  %v6766_v9 = vpop.permute.xlu0 %465 }
  0xe3   :  { %10778 = vst [vmem:[#allocation50_spill] sm:$0xff] %v6726_v10  ;;  %10779 = vst [vmem:[#allocation51_spill] sm:$0xff] %v6734_v3  ;;  %v6750_v10 = vmul.f32 %v6447_v26, %v6348_v45  ;;  %v6758_v44 = vmul.f32 %v6442_v24, %v6350_v5  ;;  %v6764_v3 = vpop.permute.xlu1 %469  ;;  %v6770_v45 = vmul.f32 %v6438_v21, %v6354_v59 }
  0xe4   :  { %10780 = vst [vmem:[#allocation52_spill] sm:$0xff] %v6738_v20  ;;  %10781 = vst [vmem:[#allocation53_spill] sm:$0xff] %v6746_v60  ;;  %v6762_v20 = vmul.f32 %v6447_v26, %v6350_v5  ;;  %v6778_v60 = vmul.f32 %v6447_v26, %v6354_v59  ;;  %v6782_v5 = vmul.f32 %v6438_v21, %v6356_v19 }
  0xe5   :  { %10782 = vst [vmem:[#allocation54_spill] sm:$0xff] %v6750_v10  ;;  %10783 = vst [vmem:[#allocation55_spill] sm:$0xff] %v6758_v44  ;;  %v6774_v10 = vmul.f32 %v6442_v24, %v6354_v59  ;;  %v6790_v44 = vmul.f32 %v6447_v26, %v6356_v19  ;;  %v6794_v0 = vmul.f32 %v6438_v21, %v6360_v23 }
  0xe6   :  { %10784 = vst [vmem:[#allocation56_spill] sm:$0xff] %v6762_v20  ;;  %10786 = vst [vmem:[#allocation58_spill] sm:$0xff] %v6778_v60  ;;  %v6786_v20 = vmul.f32 %v6442_v24, %v6356_v19  ;;  %v6798_v59 = vmul.f32 %v6442_v24, %v6360_v23  ;;  %v6802_v60 = vmul.f32 %v6447_v26, %v6360_v23 }
  0xe7   :  { %10785 = vst [vmem:[#allocation57_spill] sm:$0xff] %v6774_v10  ;;  %10788 = vst [vmem:[#allocation60_spill] sm:$0xff] %v6790_v44  ;;  %v6806_v10 = vmul.f32 %v6438_v21, %v6362_v54  ;;  %v6810_v19 = vmul.f32 %v6442_v24, %v6362_v54  ;;  %v6814_v44 = vmul.f32 %v6447_v26, %v6362_v54  ;;  %v6828_v36 = vpop.permute.xlu1 %477 }
  0xe8   :  { %10787 = vst [vmem:[#allocation59_spill] sm:$0xff] %v6786_v20  ;;  %10789 = vst [vmem:[#allocation61_spill] sm:$0xff] %v6798_v59  ;;  %v6818_v20 = vmul.f32 %v6438_v21, %v6366_v42  ;;  %v6822_v23 = vmul.f32 %v6442_v24, %v6366_v42  ;;  %v532_v59 = vmul.f32 %v6451_v46, %v6389_v48 }
  0xe9   :  { %10790 = vst [vmem:[#allocation62_spill] sm:$0xff] %v6802_v60  ;;  %10791 = vst [vmem:[#allocation63_spill] sm:$0xff] %v6810_v19  ;;  %v533_v60 = vmul.f32 %v6451_v46, %v6387_v56  ;;  %v6830_v19 = vpop.permute.xlu0 %473  ;;  %v6834_v54 = vmul.f32 %v6447_v26, %v6366_v42  ;;  %v6846_v56 = vmul.f32 %v6447_v26, %v6368_v7 }
  0xea   :  { %10792 = vst [vmem:[#allocation64_spill] sm:$0xff] %v6814_v44  ;;  %10793 = vst [vmem:[#allocation65_spill] sm:$0xff] %v6822_v23  ;;  %v6838_v44 = vmul.f32 %v6438_v21, %v6368_v7  ;;  %v6842_v23 = vmul.f32 %v6442_v24, %v6368_v7  ;;  %v6850_v48 = vmul.f32 %v6438_v21, %v6378_v8  ;;  %v10801_v7 = vld [vmem:[#allocation2_spill] sm:$0xff] }
  0xeb   :  { %10794 = vst [vmem:[#allocation66_spill] sm:$0xff] %v6834_v54  ;;  %10797 = vst [vmem:[#allocation69_spill] sm:$0xff] %v6846_v56  ;;  %v6854_v42 = vmul.f32 %v6442_v24, %v6378_v8  ;;  %v535_v54 = vmul.f32 %v6451_v46, %v6401_v33  ;;  %v534_v32 = vmul.f32 %v6451_v46, %v6403_v37 }
  0xec   :  { %10795 = vst [vmem:[#allocation67_spill] sm:$0xff] %v6838_v44  ;;  %10796 = vst [vmem:[#allocation68_spill] sm:$0xff] %v6842_v23  ;;  %v6862_v23 = vmul.f32 %v6447_v26, %v6378_v8  ;;  %v6866_v56 = vmul.f32 %v6438_v21, %v10801_v7  ;;  %v6877_v25 = vadd.f32 %v533_v60, %v6496_v41  ;;  %v10805_v8 = vld [vmem:[#allocation8_spill] sm:$0xff]  ;;  %v10808_v60 = vld [vmem:[#allocation11_spill] sm:$0xff] }
  0xed   :  { %10798 = vst [vmem:[#allocation70_spill] sm:$0xff] %v6850_v48  ;;  %10799 = vst [vmem:[#allocation71_spill] sm:$0xff] %v6854_v42  ;;  %v6870_v48 = vmul.f32 %v6442_v24, %v10801_v7  ;;  %v6874_v42 = vmul.f32 %v6447_v26, %v10801_v7  ;;  %v6880_v2 = vadd.f32 %v532_v59, %v6480_v51  ;;  %v10806_v44 = vld [vmem:[#allocation4_spill] sm:$0xff]  ;;  %v6888_v24 = vpop.permute.xlu0 %481 }
  0xee   :  { %10800 = vst [vmem:[#allocation72_spill] sm:$0xff] %v6862_v23  ;;  %10802 = vst [vmem:[#allocation2_spill] sm:$0xff] %v6866_v56  ;;  %v537_v23 = vmul.f32 %v6451_v46, %v10805_v8  ;;  %v536_v21 = vmul.f32 %v6451_v46, %v10806_v44  ;;  %v6886_v56 = vpop.permute.xlu1 %485  ;;  %v6892_v7 = vmul.f32 %v6460_v63, %v6401_v33 }
  0xef   :  { %10803 = vst [vmem:[#allocation73_spill] sm:$0xff] %v6870_v48  ;;  %10804 = vst [vmem:[#allocation74_spill] sm:$0xff] %v6874_v42  ;;  %v6896_v41 = vmul.f32 %v6460_v63, %v6403_v37  ;;  %v539_v51 = vmul.f32 %v6451_v46, %v6453_v15  ;;  %v538_v59 = vmul.f32 %v6451_v46, %v10808_v60 }
  0xf0   :  { %v6903_v26 = vadd.f32 %v535_v54, %v6488_v40  ;;  %v6906_v42 = vadd.f32 %v534_v32, %v6472_v52  ;;  %v6910_v33 = vmul.f32 %v6460_v63, %v10805_v8  ;;  %v6914_v37 = vmul.f32 %v6464_v49, %v10805_v8 }
  0xf1   :  { %10807 = vst [vmem:[#allocation8_spill] sm:$0xff] %v6896_v41  ;;  %v6918_v48 = vmul.f32 %v6460_v63, %v10806_v44  ;;  %v6922_v41 = vmul.f32 %v6464_v49, %v10806_v44  ;;  %v541_v52 = vmul.f32 %v6451_v46, %v6498_v30  ;;  %v540_v40 = vmul.f32 %v6451_v46, %v6500_v28 }
  0xf2   :  { %10809 = vst [vmem:[#allocation4_spill] sm:$0xff] %v6914_v37  ;;  %v6929_v32 = vadd.f32 %v537_v23, %v6508_v14  ;;  %v6932_v54 = vadd.f32 %v536_v21, %v6523_v22  ;;  %v6936_v8 = vmul.f32 %v6460_v63, %v6453_v15  ;;  %v6940_v44 = vmul.f32 %v6464_v49, %v6453_v15  ;;  %v6944_v37 = vpop.permute.xlu0 %489 }
  0xf3   :  { %10810 = vst [vmem:[#allocation11_spill] sm:$0xff] %v6918_v48  ;;  %10811 = vst [vmem:[#allocation75_spill] sm:$0xff] %v6922_v41  ;;  %v6942_v41 = vpop.permute.xlu1 %493  ;;  %v6947_v48 = vadd.f32 %v539_v51, %v6535_v31  ;;  %v6950_v14 = vadd.f32 %v538_v59, %v6547_v4  ;;  %v6954_v22 = vmul.f32 %v6460_v63, %v10808_v60 }
  0xf4   :  { %v6958_v23 = vmul.f32 %v6464_v49, %v10808_v60  ;;  %v6962_v15 = vmul.f32 %v6460_v63, %v6498_v30  ;;  %v6966_v21 = vmul.f32 %v6464_v49, %v6498_v30  ;;  %v543_v31 = vmul.f32 %v6451_v46, %v6565_v57 }
  0xf5   :  { %v542_v4 = vmul.f32 %v6451_v46, %v6567_v17  ;;  %v6973_v51 = vadd.f32 %v541_v52, %v6559_v6  ;;  %v6976_v60 = vadd.f32 %v540_v40, %v6575_v47  ;;  %v6980_v59 = vmul.f32 %v6460_v63, %v6500_v28 }
  0xf6   :  { %10812 = vst [vmem:[#allocation76_spill] sm:$0xff] %v6962_v15  ;;  %10813 = vst [vmem:[#allocation77_spill] sm:$0xff] %v6966_v21  ;;  %v6984_v30 = vmul.f32 %v6464_v49, %v6500_v28  ;;  %v6988_v21 = vmul.f32 %v6460_v63, %v6565_v57  ;;  %v6992_v15 = vmul.f32 %v6464_v49, %v6565_v57  ;;  %v6998_v40 = vpop.permute.xlu0 %497 }
  0xf7   :  { %10814 = vst [vmem:[#allocation78_spill] sm:$0xff] %v6976_v60  ;;  %10815 = vst [vmem:[#allocation79_spill] sm:$0xff] %v6980_v59  ;;  %v545_v6 = vmul.f32 %v6451_v46, %v6629_v1  ;;  %v544_v47 = vmul.f32 %v6451_v46, %v6631_v53  ;;  %v502_v52 = vpop.permute.xlu1 %501  ;;  %v7002_v28 = vmul.f32 %v6460_v63, %v6567_v17 }
  0xf8   :  { %10816 = vst [vmem:[#allocation80_spill] sm:$0xff] %v6984_v30  ;;  %10817 = vst [vmem:[#allocation81_spill] sm:$0xff] %v6988_v21  ;;  %v7006_v21 = vmul.f32 %v6464_v49, %v6567_v17  ;;  %v547_v57 = vmul.f32 %v6451_v46, %v6696_v55  ;;  %v7013_v60 = vadd.f32 %v543_v31, %v6587_v39 }
  0xf9   :  { %10818 = vst [vmem:[#allocation82_spill] sm:$0xff] %v6992_v15  ;;  %10819 = vst [vmem:[#allocation83_spill] sm:$0xff] %v7002_v28  ;;  %v546_v15 = vmul.f32 %v6451_v46, %v6698_v61  ;;  %v7016_v30 = vadd.f32 %v542_v4, %v6599_v27  ;;  %v7020_v59 = vmul.f32 %v6460_v63, %v6629_v1 }
  0xfa   :  { %10820 = vst [vmem:[#allocation84_spill] sm:$0xff] %v7006_v21  ;;  %v7024_v17 = vmul.f32 %v6464_v49, %v6629_v1  ;;  %v7028_v21 = vmul.f32 %v6460_v63, %v6631_v53  ;;  %v7032_v28 = vmul.f32 %v6464_v49, %v6631_v53  ;;  %v549_v39 = vmul.f32 %v6451_v46, %v6764_v3 }
  0xfb   :  { %10821 = vst [vmem:[#allocation85_spill] sm:$0xff] %v7016_v30  ;;  %v548_v27 = vmul.f32 %v6451_v46, %v6766_v9  ;;  %v7039_v31 = vadd.f32 %v545_v6, %v6611_v11  ;;  %v7042_v1 = vadd.f32 %v544_v47, %v6623_v34  ;;  %v7046_v4 = vmul.f32 %v6460_v63, %v6696_v55 }
  0xfc   :  { %10822 = vst [vmem:[#allocation86_spill] sm:$0xff] %v7024_v17  ;;  %10823 = vst [vmem:[#allocation87_spill] sm:$0xff] %v7028_v21  ;;  %v7050_v53 = vmul.f32 %v6464_v49, %v6696_v55  ;;  %v506_v21 = vpop.permute.xlu0 %505  ;;  %v7053_v17 = vadd.f32 %v547_v57, %v6639_v13  ;;  %v7056_v30 = vadd.f32 %v546_v15, %v6654_v35 }
  0xfd   :  { %10824 = vst [vmem:[#allocation88_spill] sm:$0xff] %v7032_v28  ;;  %v510_v28 = vpop.permute.xlu1 %509  ;;  %v7060_v34 = vmul.f32 %v6460_v63, %v6698_v61  ;;  %v7064_v11 = vmul.f32 %v6464_v49, %v6698_v61  ;;  %v7068_v55 = vmul.f32 %v6460_v63, %v6764_v3  ;;  %v7072_v6 = vmul.f32 %v6464_v49, %v6764_v3 }
  0xfe   :  { %10825 = vst [vmem:[#allocation89_spill] sm:$0xff] %v7056_v30  ;;  %v551_v35 = vmul.f32 %v6451_v46, %v6828_v36  ;;  %v550_v13 = vmul.f32 %v6451_v46, %v6830_v19  ;;  %v7079_v15 = vadd.f32 %v549_v39, %v6666_v43  ;;  %v7082_v61 = vadd.f32 %v548_v27, %v6678_v62 }
  0xff   :  { %v7086_v47 = vmul.f32 %v6460_v63, %v6766_v9  ;;  %v7090_v3 = vmul.f32 %v6464_v49, %v6766_v9  ;;  %v7094_v57 = vmul.f32 %v6460_v63, %v6828_v36  ;;  %v7098_v30 = vmul.f32 %v6464_v49, %v6828_v36 }
 0x100   :  { %10826 = vst [vmem:[#allocation90_spill] sm:$0xff] %v7082_v61  ;;  %v553_v62 = vmul.f32 %v6451_v46, %v6886_v56  ;;  %v552_v43 = vmul.f32 %v6451_v46, %v6888_v24  ;;  %v514_v27 = vpop.permute.xlu0 %513  ;;  %v7106_v9 = vmul.f32 %v6460_v63, %v6830_v19  ;;  %v7110_v61 = vmul.f32 %v6464_v49, %v6830_v19 }
 0x101   :  { %10827 = vst [vmem:[#allocation91_spill] sm:$0xff] %v7086_v47  ;;  %10828 = vst [vmem:[#allocation92_spill] sm:$0xff] %v7090_v3  ;;  %v518_v39 = vpop.permute.xlu1 %517  ;;  %v555_v36 = vmul.f32 %v6451_v46, %v6942_v41  ;;  %v7120_v3 = vadd.f32 %v550_v13, %v6706_v16  ;;  %v7124_v47 = vmul.f32 %v6460_v63, %v6886_v56 }
 0x102   :  { %10829 = vst [vmem:[#allocation93_spill] sm:$0xff] %v7094_v57  ;;  %10830 = vst [vmem:[#allocation94_spill] sm:$0xff] %v7098_v30  ;;  %v554_v30 = vmul.f32 %v6451_v46, %v6944_v37  ;;  %v7117_v57 = vadd.f32 %v551_v35, %v6690_v50  ;;  %v7128_v19 = vmul.f32 %v6464_v49, %v6886_v56 }
 0x103   :  { %10831 = vst [vmem:[#allocation95_spill] sm:$0xff] %v7106_v9  ;;  %10832 = vst [vmem:[#allocation96_spill] sm:$0xff] %v7110_v61  ;;  %v7132_v61 = vmul.f32 %v6460_v63, %v6888_v24  ;;  %v7136_v9 = vmul.f32 %v6464_v49, %v6888_v24  ;;  %v557_v50 = vmul.f32 %v6451_v46, %v502_v52 }
 0x104   :  { %10833 = vst [vmem:[#allocation97_spill] sm:$0xff] %v7120_v3  ;;  %10834 = vst [vmem:[#allocation98_spill] sm:$0xff] %v7128_v19  ;;  %v556_v16 = vmul.f32 %v6451_v46, %v6998_v40  ;;  %v7142_v35 = vadd.f32 %v553_v62, %v6718_v58  ;;  %v7145_v13 = vadd.f32 %v552_v43, %v6730_v12 }
 0x105   :  { %10835 = vst [vmem:[#allocation99_spill] sm:$0xff] %v7132_v61  ;;  %10836 = vst [vmem:[#allocation100_spill] sm:$0xff] %v7136_v9  ;;  %v7149_v56 = vmul.f32 %v6460_v63, %v6942_v41  ;;  %v7153_v61 = vmul.f32 %v6464_v49, %v6942_v41  ;;  %v526_v24 = vpop.permute.xlu1 %525  ;;  %v522_v9 = vpop.permute.xlu0 %521  ;;  %v7156_v3 = vadd.f32 %v555_v36, %v6742_v18 }
 0x106   :  { %v7159_v19 = vadd.f32 %v554_v30, %v6754_v38  ;;  %v7163_v12 = vmul.f32 %v6460_v63, %v6944_v37  ;;  %v7167_v58 = vmul.f32 %v6464_v49, %v6944_v37  ;;  %v7170_v62 = vmul.f32 %v6460_v63, %v502_v52 }
 0x107   :  { %v7173_v41 = vmul.f32 %v6464_v49, %v502_v52  ;;  %v559_v18 = vmul.f32 %v6451_v46, %v510_v28  ;;  %v558_v43 = vmul.f32 %v6451_v46, %v506_v21  ;;  %v7178_v38 = vadd.f32 %v557_v50, %v6770_v45 }
 0x108   :  { %10837 = vst [vmem:[#allocation101_spill] sm:$0xff] %v7159_v19  ;;  %v7181_v30 = vadd.f32 %v556_v16, %v6782_v5  ;;  %v7185_v37 = vmul.f32 %v6460_v63, %v6998_v40  ;;  %v7189_v36 = vmul.f32 %v6464_v49, %v6998_v40  ;;  %v7192_v52 = vmul.f32 %v6460_v63, %v510_v28 }
 0x109   :  { %10838 = vst [vmem:[#allocation102_spill] sm:$0xff] %v7178_v38  ;;  %v7195_v19 = vmul.f32 %v6464_v49, %v510_v28  ;;  %v561_v45 = vmul.f32 %v6451_v46, %v518_v39  ;;  %v560_v50 = vmul.f32 %v6451_v46, %v514_v27  ;;  %v685_v5 = vpop.permute.xlu1 %684  ;;  %v681_v16 = vpop.permute.xlu0 %680  ;;  %v7211_v28 = vadd.f32 %v558_v43, %v6806_v10  ;;  %v10850_v10 = vld [vmem:[#allocation67_spill] sm:$0xff] }
 0x10a   :  { %10839 = vst [vmem:[#allocation103_spill] sm:$0xff] %v7181_v30  ;;  %10840 = vst [vmem:[#allocation104_spill] sm:$0xff] %v7185_v37  ;;  %v7200_v30 = vmul.f32 %v6460_v63, %v506_v21  ;;  %v7203_v37 = vmul.f32 %v6464_v49, %v506_v21  ;;  %v812_v40 = vmul.f32 %v6484_v29, %v685_v5 }
 0x10b   :  { %10841 = vst [vmem:[#allocation105_spill] sm:$0xff] %v7189_v36  ;;  %10842 = vst [vmem:[#allocation106_spill] sm:$0xff] %v7192_v52  ;;  %v811_v36 = vmul.f32 %v6484_v29, %v681_v16  ;;  %v7208_v52 = vadd.f32 %v559_v18, %v6794_v0  ;;  %v7217_v38 = vmul.f32 %v6464_v49, %v518_v39 }
 0x10c   :  { %10843 = vst [vmem:[#allocation107_spill] sm:$0xff] %v7195_v19  ;;  %10844 = vst [vmem:[#allocation108_spill] sm:$0xff] %v7200_v30  ;;  %v7214_v19 = vmul.f32 %v6460_v63, %v518_v39  ;;  %v7220_v30 = vmul.f32 %v6460_v63, %v514_v27  ;;  %v7223_v21 = vmul.f32 %v6464_v49, %v514_v27  ;;  %v10853_v27 = vld [vmem:[#allocation15_spill] sm:$0xff] }
 0x10d   :  { %10845 = vst [vmem:[#allocation109_spill] sm:$0xff] %v7211_v28  ;;  %10846 = vst [vmem:[#allocation110_spill] sm:$0xff] %v7217_v38  ;;  %v844_v5 = vadd.f32 %v812_v40, %v6877_v25  ;;  %v843_v0 = vadd.f32 %v811_v36, %v6880_v2  ;;  %v7228_v18 = vadd.f32 %v561_v45, %v6818_v20  ;;  %v693_v28 = vpop.permute.xlu1 %692  ;;  %v689_v38 = vpop.permute.xlu0 %688  ;;  %v10854_v25 = vld [vmem:[#allocation10_spill] sm:$0xff]  ;;  %v10857_v45 = vld [vmem:[#allocation12_spill] sm:$0xff] }
 0x10e   :  { %10847 = vst [vmem:[#allocation111_spill] sm:$0xff] %v7220_v30  ;;  %10848 = vst [vmem:[#allocation112_spill] sm:$0xff] %v7223_v21  ;;  %v7231_v43 = vadd.f32 %v560_v50, %v10850_v10  ;;  %v563_v16 = vmul.f32 %v6451_v46, %v526_v24  ;;  %v562_v39 = vmul.f32 %v6451_v46, %v522_v9 }
 0x10f   :  { %10849 = vst [vmem:[#allocation113_spill] sm:$0xff] %v7228_v18  ;;  %v7236_v30 = vmul.f32 %v6460_v63, %v526_v24  ;;  %v922_v21 = vadd.f32 %v10853_v27, %v844_v5  ;;  %v921_v40 = vadd.f32 %v10854_v25, %v843_v0  ;;  %v814_v2 = vmul.f32 %v6484_v29, %v693_v28  ;;  %v10859_v27 = vld [vmem:[#allocation70_spill] sm:$0xff]  ;;  %v10864_v18 = vld [vmem:[#allocation16_spill] sm:$0xff] }
 0x110   :  { %10851 = vst [vmem:[#allocation67_spill] sm:$0xff] %v7231_v43  ;;  %v7242_v20 = vmul.f32 %v6464_v49, %v526_v24  ;;  %v7245_v36 = vmul.f32 %v6460_v63, %v522_v9  ;;  %v1055_v50 = vmul.f32 %v10857_v45, %v693_v28  ;;  %v813_v46 = vmul.f32 %v6484_v29, %v689_v38  ;;  %v10858_v43 = vld [vmem:[#allocation8_spill] sm:$0xff]  ;;  %v10861_v24 = vld [vmem:[#allocation2_spill] sm:$0xff] }
 0x111   :  { %10852 = vst [vmem:[#allocation114_spill] sm:$0xff] %v7236_v30  ;;  %v846_v10 = vadd.f32 %v814_v2, %v6903_v26  ;;  %v1006_v30 = vadd.f32 %v6892_v7, %v922_v21  ;;  %v1005_v5 = vadd.f32 %v10858_v43, %v921_v40  ;;  %v1054_v0 = vmul.f32 %v10857_v45, %v689_v38  ;;  %v697_v43 = vpop.permute.xlu0 %696  ;;  %v10865_v38 = vld [vmem:[#allocation18_spill] sm:$0xff] }
 0x112   :  { %10855 = vst [vmem:[#allocation15_spill] sm:$0xff] %v7242_v20  ;;  %10856 = vst [vmem:[#allocation10_spill] sm:$0xff] %v7245_v36  ;;  %v7254_v25 = vadd.f32 %v563_v16, %v10859_v27  ;;  %v7257_v20 = vadd.f32 %v562_v39, %v10861_v24  ;;  %v7260_v63 = vmul.f32 %v6464_v49, %v522_v9  ;;  %v701_v36 = vpop.permute.xlu1 %700  ;;  %v10866_v27 = vld [vmem:[#allocation14_spill] sm:$0xff]  ;;  %v10867_v49 = vld [vmem:[#allocation17_spill] sm:$0xff] }
 0x113   :  { %v845_v28 = vadd.f32 %v813_v46, %v6906_v42  ;;  %v924_v26 = vadd.f32 %v10864_v18, %v846_v10  ;;  %v1087_v2 = vadd.f32 %v1055_v50, %v1006_v30  ;;  %v1086_v7 = vadd.f32 %v1054_v0, %v1005_v5  ;;  %v10868_v46 = vld [vmem:[#allocation19_spill] sm:$0xff] }
 0x114   :  { %10860 = vst [vmem:[#allocation12_spill] sm:$0xff] %v7254_v25  ;;  %10862 = vst [vmem:[#allocation8_spill] sm:$0xff] %v7257_v20  ;;  %v816_v21 = vmul.f32 %v6484_v29, %v701_v36  ;;  %v1057_v16 = vmul.f32 %v10857_v45, %v701_v36  ;;  %v1300_v39 = vmul.f32 %v10866_v27, %v701_v36  ;;  %v10869_v18 = vld [vmem:[#allocation11_spill] sm:$0xff]  ;;  %v10870_v36 = vld [vmem:[#allocation4_spill] sm:$0xff] }
 0x115   :  { %10863 = vst [vmem:[#allocation70_spill] sm:$0xff] %v7260_v63  ;;  %v923_v40 = vadd.f32 %v10865_v38, %v845_v28  ;;  %v815_v24 = vmul.f32 %v6484_v29, %v697_v43  ;;  %v1008_v9 = vadd.f32 %v6910_v33, %v924_v26  ;;  %v1167_v42 = vadd.f32 %v10867_v49, %v1087_v2  ;;  %v10871_v25 = vld [vmem:[#allocation75_spill] sm:$0xff]  ;;  %v10872_v33 = vld [vmem:[#allocation20_spill] sm:$0xff]  ;;  %v10873_v2 = vld [vmem:[#allocation22_spill] sm:$0xff] }
 0x116   :  { %v1166_v20 = vadd.f32 %v10868_v46, %v1086_v7  ;;  %v848_v30 = vadd.f32 %v816_v21, %v6929_v32  ;;  %v1056_v5 = vmul.f32 %v10857_v45, %v697_v43  ;;  %v1299_v0 = vmul.f32 %v10866_v27, %v697_v43  ;;  %v709_v28 = vpop.permute.xlu1 %708  ;;  %v7283_v32 = vld [vmem:[%s10600_s2] ss:$0 sm:$0xff] }
 0x117   :  { %v1007_v50 = vadd.f32 %v10869_v18, %v923_v40  ;;  %v847_v10 = vadd.f32 %v815_v24, %v6932_v54  ;;  %v1249_v38 = vadd.f32 %v10870_v36, %v1167_v42  ;;  %v1089_v49 = vadd.f32 %v1057_v16, %v1008_v9  ;;  %v705_v40 = vpop.permute.xlu0 %704  ;;  %v10874_v24 = vld [vmem:[#allocation21_spill] sm:$0xff]  ;;  %v7293_v16 = vld [vmem:[%s10601_s3] ss:$0 sm:$0xff]  ;;  %v10875_v9 = vld [vmem:[#allocation23_spill] sm:$0xff] }
 0x118   :  { %v1248_v63 = vadd.f32 %v10871_v25, %v1166_v20  ;;  %v926_v26 = vadd.f32 %v10872_v33, %v848_v30  ;;  %v818_v21 = vmul.f32 %v6484_v29, %v709_v28  ;;  %v1059_v43 = vmul.f32 %v10857_v45, %v709_v28 }
 0x119   :  { %v925_v7 = vadd.f32 %v10873_v2, %v847_v10  ;;  %v1088_v54 = vadd.f32 %v1056_v5, %v1007_v50  ;;  %v1169_v42 = vadd.f32 %v10874_v24, %v1089_v49  ;;  %v1332_v46 = vadd.f32 %v1300_v39, %v1249_v38 }
 0x11a   :  { %v1331_v20 = vadd.f32 %v1299_v0, %v1248_v63  ;;  %v1010_v25 = vadd.f32 %v6936_v8, %v926_v26  ;;  %v850_v18 = vadd.f32 %v818_v21, %v6947_v48  ;;  %v1302_v50 = vmul.f32 %v10866_v27, %v709_v28  ;;  %v10876_v0 = vld [vmem:[#allocation24_spill] sm:$0xff] }
 0x11b   :  { %v1168_v30 = vadd.f32 %v10875_v9, %v1088_v54  ;;  %v1009_v10 = vadd.f32 %v6954_v22, %v925_v7  ;;  %v1370_v5 = vmul.f32 %v7283_v32, %v1332_v46  ;;  %v1251_v63 = vadd.f32 %v6940_v44, %v1169_v42  ;;  %v10877_v22 = vld [vmem:[#allocation25_spill] sm:$0xff]  ;;  %v717_v7 = vpop.permute.xlu1 %716 }
 0x11c   :  { %v1369_v39 = vmul.f32 %v7283_v32, %v1331_v20  ;;  %v1091_v8 = vadd.f32 %v1059_v43, %v1010_v25  ;;  %v928_v36 = vadd.f32 %v10876_v0, %v850_v18  ;;  %v817_v33 = vmul.f32 %v6484_v29, %v705_v40  ;;  %v10878_v43 = vld [vmem:[#allocation76_spill] sm:$0xff]  ;;  %v10879_v25 = vld [vmem:[#allocation77_spill] sm:$0xff] }
 0x11d   :  { %v1250_v38 = vadd.f32 %v6958_v23, %v1168_v30  ;;  %v1058_v26 = vmul.f32 %v10857_v45, %v705_v40  ;;  %v1408_v48 = vadd.f32 %v7293_v16, %v1370_v5  ;;  %v1334_v2 = vadd.f32 %v1302_v50, %v1251_v63  ;;  %v713_v23 = vpop.permute.xlu0 %712  ;;  %v10880_v30 = vld [vmem:[#allocation26_spill] sm:$0xff]  ;;  %v10881_v5 = vld [vmem:[#allocation27_spill] sm:$0xff] }
 0x11e   :  { %v1407_v28 = vadd.f32 %v7293_v16, %v1369_v39  ;;  %v1171_v49 = vadd.f32 %v10877_v22, %v1091_v8  ;;  %v849_v54 = vadd.f32 %v817_v33, %v6950_v14  ;;  %v1301_v21 = vmul.f32 %v10866_v27, %v705_v40  ;;  %v10882_v33 = vld [vmem:[#allocation79_spill] sm:$0xff] }
 0x11f   :  { %v1090_v44 = vadd.f32 %v1058_v26, %v1009_v10  ;;  %v1012_v24 = vadd.f32 %v10878_v43, %v928_v36  ;;  %v1440_v42 = vmax.f32 %v1408_v48, 0.0  ;;  %v1372_v20 = vmul.f32 %v7283_v32, %v1334_v2  ;;  %v10883_v48 = vld [vmem:[#allocation80_spill] sm:$0xff]  ;;  %v10884_v2 = vld [vmem:[#allocation78_spill] sm:$0xff] }
 0x120   :  { %v1439_v46 = vmax.f32 %v1407_v28, 0.0  ;;  %v1253_v9 = vadd.f32 %v10879_v25, %v1171_v49  ;;  %v927_v18 = vadd.f32 %v10880_v30, %v849_v54  ;;  %v1333_v50 = vadd.f32 %v1301_v21, %v1250_v38  ;;  %v10885_v21 = vld [vmem:[#allocation28_spill] sm:$0xff]  ;;  %v10886_v30 = vld [vmem:[#allocation29_spill] sm:$0xff] }
 0x121   :  { %v1170_v39 = vadd.f32 %v10881_v5, %v1090_v44  ;;  %v820_v63 = vmul.f32 %v6484_v29, %v717_v7  ;;  %v1410_v14 = vadd.f32 %v7293_v16, %v1372_v20  ;;  %v1061_v40 = vmul.f32 %v10857_v45, %v717_v7  ;;  %v10887_v5 = vld [vmem:[#allocation30_spill] sm:$0xff] }
 0x122   :  { %v1304_v10 = vmul.f32 %v10866_v27, %v717_v7  ;;  %v819_v8 = vmul.f32 %v6484_v29, %v713_v23  ;;  %v1371_v0 = vmul.f32 %v7283_v32, %v1333_v50  ;;  %v1011_v26 = vadd.f32 %v10882_v33, %v927_v18  ;;  %v725_v50 = vpop.permute.xlu1 %724 }
 0x123   :  { %v852_v36 = vadd.f32 %v820_v63, %v6973_v51  ;;  %v1252_v28 = vadd.f32 %v10883_v48, %v1170_v39  ;;  %v1442_v22 = vmax.f32 %v1410_v14, 0.0  ;;  %v1093_v38 = vadd.f32 %v1061_v40, %v1012_v24  ;;  %v10888_v14 = vld [vmem:[#allocation81_spill] sm:$0xff]  ;;  %v10891_v48 = vld [vmem:[#allocation31_spill] sm:$0xff] }
 0x124   :  { %v1336_v49 = vadd.f32 %v1304_v10, %v1253_v9  ;;  %v851_v54 = vadd.f32 %v819_v8, %v10884_v2  ;;  %v1409_v44 = vadd.f32 %v7293_v16, %v1371_v0  ;;  %v1060_v7 = vmul.f32 %v10857_v45, %v713_v23  ;;  %v10889_v8 = vld [vmem:[#allocation37_spill] sm:$0xff] }
 0x125   :  { %v930_v43 = vadd.f32 %v10885_v21, %v852_v36  ;;  %v1303_v20 = vmul.f32 %v10866_v27, %v713_v23  ;;  %v1472_v25 = vmax.f32 %v1440_v42, %v1442_v22  ;;  %v1173_v51 = vadd.f32 %v10886_v30, %v1093_v38  ;;  %v10890_v23 = vld [vmem:[#allocation82_spill] sm:$0xff] }
 0x126   :  { %v1374_v18 = vmul.f32 %v7283_v32, %v1336_v49  ;;  %v929_v39 = vadd.f32 %v10887_v5, %v851_v54  ;;  %v1441_v24 = vmax.f32 %v1409_v44, 0.0  ;;  %v1092_v9 = vadd.f32 %v1060_v7, %v1011_v26 }
 0x127   :  { %v1335_v63 = vadd.f32 %v1303_v20, %v1252_v28  ;;  %v1014_v40 = vadd.f32 %v10888_v14, %v930_v43  ;;  %v1520_v10 = vcombine.high %v1472_v25, %v1472_v25  ;;  %v1527_v0 = vrot.slane %v1472_v25, %v10889_v8 }
 0x128   :  { %v7336_v36 = vadd.f32 %v7293_v16, %v1374_v18  ;;  %v1255_v42 = vadd.f32 %v10890_v23, %v1173_v51  ;;  %v1471_v33 = vmax.f32 %v1439_v46, %v1441_v24  ;;  %v1172_v22 = vadd.f32 %v10891_v48, %v1092_v9 }
 0x129   :  { %v1373_v38 = vmul.f32 %v7283_v32, %v1335_v63  ;;  %v822_v49 = vmul.f32 %v6484_v29, %v725_v50  ;;  %v1534_v26 = vrot.slane %v1520_v10, %v10889_v8  ;;  %v1535_v28 = vcombine.high %v1527_v0, %v1527_v0  ;;  %v10894_v10 = vld [vmem:[#allocation32_spill] sm:$0xff] }
 0x12a   :  { %v5512_v2 = vrot.slane %v1527_v0, 9  ;;  %v1503_v44 = vcombine.high %v1471_v33, %v1471_v33  ;;  %v1510_v21 = vrot.slane %v1471_v33, %v10889_v8  ;;  %v1306_v54 = vmul.f32 %v10866_v27, %v725_v50 }
 0x12b   :  { %v7346_v43 = vadd.f32 %v7293_v16, %v1373_v38  ;;  %v854_v46 = vadd.f32 %v822_v49, %v7013_v60  ;;  %v1536_v7 = vcombine.high %v1534_v26, %v1534_v26  ;;  %v5513_v20 = vrot.slane %v1535_v28, 9  ;;  %v721_v49 = vpop.permute.xlu0 %720 }
 0x12c   :  { %v5514_v25 = vrot.slane %v1534_v26, 9  ;;  %v7349_v30 = vmax.f32 %v1527_v0, %v5512_v2  ;;  %v1517_v51 = vrot.slane %v1503_v44, %v10889_v8  ;;  %v1518_v18 = vcombine.high %v1510_v21, %v1510_v21 }
 0x12d   :  { %v5508_v5 = vrot.slane %v1510_v21, 9  ;;  %v5515_v9 = vrot.slane %v1536_v7, 9  ;;  %v2036_v63 = vmax.f32 %v1535_v28, %v5513_v20  ;;  %v932_v23 = vadd.f32 %v10894_v10, %v854_v46 }
 0x12e   :  { %10892 = vst [vmem:[#allocation2_spill] sm:$0xff] %v7349_v30  ;;  %v7353_v14 = vmax.f32 %v1534_v26, %v5514_v25  ;;  %v1519_v33 = vcombine.high %v1517_v51, %v1517_v51  ;;  %v5509_v48 = vrot.slane %v1518_v18, 9  ;;  %v5510_v60 = vrot.slane %v1517_v51, 9  ;;  %v10896_v26 = vld [vmem:[#allocation83_spill] sm:$0xff] }
 0x12f   :  { %v7356_v38 = vmax.f32 %v1510_v21, %v5508_v5  ;;  %v2038_v0 = vmax.f32 %v1536_v7, %v5515_v9  ;;  %v7358_v2 = vrot.slane %v2036_v63, 7  ;;  %v1063_v44 = vmul.f32 %v10857_v45, %v725_v50  ;;  %v10898_v21 = vld [vmem:[#allocation84_spill] sm:$0xff] }
 0x130   :  { %10893 = vst [vmem:[#allocation16_spill] sm:$0xff] %v7353_v14  ;;  %v5511_v24 = vrot.slane %v1519_v33, 9  ;;  %v2032_v30 = vmax.f32 %v1518_v18, %v5509_v48  ;;  %v7362_v28 = vmax.f32 %v1517_v51, %v5510_v60  ;;  %v1013_v20 = vadd.f32 %v10896_v26, %v929_v39  ;;  %v733_v14 = vpop.permute.xlu1 %732  ;;  %v10902_v26 = vld [vmem:[#allocation34_spill] sm:$0xff] }
 0x131   :  { %10895 = vst [vmem:[#allocation18_spill] sm:$0xff] %v7358_v2  ;;  %v7365_v46 = vrot.slane %v2038_v0, 7  ;;  %v1095_v25 = vadd.f32 %v1063_v44, %v1014_v40  ;;  %v1338_v10 = vadd.f32 %v1306_v54, %v1255_v42  ;;  %v1254_v5 = vadd.f32 %v10898_v21, %v1172_v22  ;;  %v10899_v2 = vld [vmem:[#allocation33_spill] sm:$0xff]  ;;  %v10901_v0 = vld [vmem:[#allocation86_spill] sm:$0xff] }
 0x132   :  { %v2034_v7 = vmax.f32 %v1519_v33, %v5511_v24  ;;  %v7368_v9 = vrot.slane %v2032_v30, 7  ;;  %v821_v63 = vmul.f32 %v6484_v29, %v721_v49  ;;  %v1062_v50 = vmul.f32 %v10857_v45, %v721_v49  ;;  %v10900_v42 = vld [vmem:[#allocation85_spill] sm:$0xff]  ;;  %v729_v24 = vpop.permute.xlu0 %728 }
 0x133   :  { %10897 = vst [vmem:[#allocation14_spill] sm:$0xff] %v7365_v46  ;;  %v1175_v18 = vadd.f32 %v10899_v2, %v1095_v25  ;;  %v1376_v51 = vmul.f32 %v7283_v32, %v1338_v10  ;;  %v1305_v39 = vmul.f32 %v10866_v27, %v721_v49  ;;  %v1016_v48 = vadd.f32 %v7020_v59, %v932_v23  ;;  %v10903_v49 = vld [vmem:[#allocation35_spill] sm:$0xff] }
 0x134   :  { %v7376_v40 = vrot.slane %v2034_v7, 7  ;;  %v853_v22 = vadd.f32 %v821_v63, %v10900_v42  ;;  %v1094_v54 = vadd.f32 %v1062_v50, %v1013_v20  ;;  %v824_v30 = vmul.f32 %v6484_v29, %v733_v14  ;;  %v10904_v50 = vld [vmem:[#allocation36_spill] sm:$0xff] }
 0x135   :  { %v1414_v33 = vadd.f32 %v7293_v16, %v1376_v51  ;;  %v1337_v60 = vadd.f32 %v1305_v39, %v1254_v5  ;;  %v1257_v44 = vadd.f32 %v10901_v0, %v1175_v18  ;;  %v1065_v2 = vmul.f32 %v10857_v45, %v733_v14  ;;  %v10905_v18 = vld [vmem:[#allocation87_spill] sm:$0xff]  ;;  %v10906_v42 = vld [vmem:[#allocation88_spill] sm:$0xff] }
 0x136   :  { %v931_v25 = vadd.f32 %v10902_v26, %v853_v22  ;;  %v1174_v10 = vadd.f32 %v10903_v49, %v1094_v54  ;;  %v856_v59 = vadd.f32 %v824_v30, %v7039_v31  ;;  %v1308_v23 = vmul.f32 %v10866_v27, %v733_v14  ;;  %v10908_v30 = vld [vmem:[#allocation38_spill] sm:$0xff] }
 0x137   :  { %v1446_v21 = vmax.f32 %v1414_v33, 0.0  ;;  %v1375_v20 = vmul.f32 %v7283_v32, %v1337_v60  ;;  %v1097_v7 = vadd.f32 %v1065_v2, %v1016_v48  ;;  %v823_v63 = vmul.f32 %v6484_v29, %v729_v24 }
 0x138   :  { %v934_v5 = vadd.f32 %v10904_v50, %v856_v59  ;;  %v1340_v51 = vadd.f32 %v1308_v23, %v1257_v44  ;;  %v1015_v39 = vadd.f32 %v10905_v18, %v931_v25  ;;  %v1256_v0 = vadd.f32 %v10906_v42, %v1174_v10  ;;  %v741_v59 = vpop.permute.xlu1 %740 }
 0x139   :  { %v10907_v22 = vmax.f32 %v7336_v36, 0.0  ;;  %v1413_v31 = vadd.f32 %v7293_v16, %v1375_v20  ;;  %v1177_v14 = vadd.f32 %v10908_v30, %v1097_v7  ;;  %v855_v33 = vadd.f32 %v823_v63, %v7042_v1  ;;  %v10909_v36 = vld [vmem:[#allocation39_spill] sm:$0xff] }
 0x13a   :  { %v1378_v48 = vmul.f32 %v7283_v32, %v1340_v51  ;;  %v1064_v60 = vmul.f32 %v10857_v45, %v729_v24  ;;  %v1307_v2 = vmul.f32 %v10866_v27, %v729_v24  ;;  %v1018_v44 = vadd.f32 %v7046_v4, %v934_v5  ;;  %v10911_v51 = vld [vmem:[#allocation40_spill] sm:$0xff] }
 0x13b   :  { %v1474_v54 = vmax.f32 %v10907_v22, %v1446_v21  ;;  %v1445_v49 = vmax.f32 %v1413_v31, 0.0  ;;  %v933_v10 = vadd.f32 %v10909_v36, %v855_v33  ;;  %v1259_v20 = vadd.f32 %v7050_v53, %v1177_v14 }
 0x13c   :  { %v7404_v23 = vadd.f32 %v7293_v16, %v1378_v48  ;;  %v1096_v21 = vadd.f32 %v1064_v60, %v1015_v39  ;;  %v1339_v1 = vadd.f32 %v1307_v2, %v1256_v0  ;;  %v10910_v4 = vmax.f32 %v7346_v43, 0.0 }
 0x13d   :  { %v1554_v26 = vcombine.high %v1474_v54, %v1474_v54  ;;  %v1561_v25 = vrot.slane %v1474_v54, %v10889_v8  ;;  %v826_v22 = vmul.f32 %v6484_v29, %v741_v59  ;;  %v1067_v2 = vmul.f32 %v10857_v45, %v741_v59 }
 0x13e   :  { %v1473_v50 = vmax.f32 %v10910_v4, %v1445_v49  ;;  %v1448_v5 = vmax.f32 %v7404_v23, 0.0  ;;  %v1176_v18 = vadd.f32 %v10911_v51, %v1096_v21  ;;  %v1377_v42 = vmul.f32 %v7283_v32, %v1339_v1  ;;  %v737_v51 = vpop.permute.xlu0 %736 }
 0x13f   :  { %v1568_v7 = vrot.slane %v1554_v26, %v10889_v8  ;;  %v1569_v63 = vcombine.high %v1561_v25, %v1561_v25  ;;  %v5520_v24 = vrot.slane %v1561_v25, 9  ;;  %v858_v43 = vadd.f32 %v826_v22, %v7053_v17 }
 0x140   :  { %v1537_v53 = vcombine.high %v1473_v50, %v1473_v50  ;;  %v1544_v30 = vrot.slane %v1473_v50, %v10889_v8  ;;  %v7418_v14 = vadd.f32 %v7293_v16, %v1377_v42  ;;  %v1099_v50 = vadd.f32 %v1067_v2, %v1018_v44 }
 0x141   :  { %v1570_v54 = vcombine.high %v1568_v7, %v1568_v7  ;;  %v5521_v39 = vrot.slane %v1569_v63, 9  ;;  %v5522_v0 = vrot.slane %v1568_v7, 9  ;;  %v7414_v31 = vmax.f32 %v1561_v25, %v5520_v24  ;;  %v10913_v24 = vld [vmem:[#allocation41_spill] sm:$0xff] }
 0x142   :  { %v1551_v26 = vrot.slane %v1537_v53, %v10889_v8  ;;  %v1552_v49 = vcombine.high %v1544_v30, %v1544_v30  ;;  %v5516_v36 = vrot.slane %v1544_v30, 9  ;;  %v936_v4 = vadd.f32 %v10913_v24, %v858_v43 }
 0x143   :  { %v5523_v33 = vrot.slane %v1570_v54, 9  ;;  %v2044_v48 = vmax.f32 %v1569_v63, %v5521_v39  ;;  %v7421_v60 = vmax.f32 %v1568_v7, %v5522_v0  ;;  %v10915_v39 = vld [vmem:[#allocation42_spill] sm:$0xff]  ;;  %v1310_v53 = vmul.f32 %v10866_v27, %v741_v59 }
 0x144   :  { %v1553_v17 = vcombine.high %v1551_v26, %v1551_v26  ;;  %v5517_v42 = vrot.slane %v1552_v49, 9  ;;  %v5518_v63 = vrot.slane %v1551_v26, 9  ;;  %v7429_v7 = vmax.f32 %v1544_v30, %v5516_v36 }
 0x145   :  { %10912 = vst [vmem:[#allocation17_spill] sm:$0xff] %v7421_v60  ;;  %v2046_v21 = vmax.f32 %v1570_v54, %v5523_v33  ;;  %v7426_v1 = vrot.slane %v2044_v48, 7  ;;  %v1179_v0 = vadd.f32 %v10915_v39, %v1099_v50  ;;  %v1017_v25 = vadd.f32 %v7060_v34, %v933_v10 }
 0x146   :  { %v5519_v54 = vrot.slane %v1553_v17, 9  ;;  %v2040_v33 = vmax.f32 %v1552_v49, %v5517_v42  ;;  %v7436_v48 = vmax.f32 %v1551_v26, %v5518_v63  ;;  %v1258_v44 = vadd.f32 %v7064_v11, %v1176_v18  ;;  %v10917_v26 = vld [vmem:[#allocation89_spill] sm:$0xff]  ;;  %v745_v18 = vpop.permute.xlu0 %744 }
 0x147   :  { %v7431_v22 = vrot.slane %v2046_v21, 7  ;;  %v1342_v43 = vadd.f32 %v1310_v53, %v1259_v20  ;;  %v825_v2 = vmul.f32 %v6484_v29, %v737_v51  ;;  %v1066_v30 = vmul.f32 %v10857_v45, %v737_v51  ;;  %v749_v21 = vpop.permute.xlu1 %748 }
 0x148   :  { %10916 = vst [vmem:[#allocation11_spill] sm:$0xff] %v7436_v48  ;;  %v1309_v36 = vmul.f32 %v10866_v27, %v737_v51  ;;  %v2042_v24 = vmax.f32 %v1553_v17, %v5519_v54  ;;  %v7442_v50 = vrot.slane %v2040_v33, 7  ;;  %v1020_v59 = vadd.f32 %v7068_v55, %v936_v4  ;;  %v10919_v55 = vld [vmem:[#allocation43_spill] sm:$0xff] }
 0x149   :  { %10914 = vst [vmem:[#allocation19_spill] sm:$0xff] %v7431_v22  ;;  %v1261_v34 = vadd.f32 %v7072_v6, %v1179_v0  ;;  %v1380_v10 = vmul.f32 %v7283_v32, %v1342_v43  ;;  %v857_v49 = vadd.f32 %v825_v2, %v10917_v26  ;;  %v1098_v11 = vadd.f32 %v1066_v30, %v1017_v25  ;;  %v10920_v6 = vld [vmem:[#allocation44_spill] sm:$0xff]  ;;  %v10921_v30 = vld [vmem:[#allocation91_spill] sm:$0xff] }
 0x14a   :  { %v1341_v20 = vadd.f32 %v1309_v36, %v1258_v44  ;;  %v7448_v42 = vrot.slane %v2042_v24, 7  ;;  %v828_v63 = vmul.f32 %v6484_v29, %v749_v21  ;;  %v1069_v51 = vmul.f32 %v10857_v45, %v749_v21 }
 0x14b   :  { %v1312_v17 = vmul.f32 %v10866_v27, %v749_v21  ;;  %v1418_v39 = vadd.f32 %v7293_v16, %v1380_v10  ;;  %v935_v4 = vadd.f32 %v10919_v55, %v857_v49  ;;  %v1178_v0 = vadd.f32 %v10920_v6, %v1098_v11  ;;  %v10922_v21 = vld [vmem:[#allocation92_spill] sm:$0xff]  ;;  %v10923_v10 = vld [vmem:[#allocation45_spill] sm:$0xff]  ;;  %v10924_v49 = vld [vmem:[#allocation46_spill] sm:$0xff] }
 0x14c   :  { %10918 = vst [vmem:[#allocation4_spill] sm:$0xff] %v7448_v42  ;;  %v1379_v53 = vmul.f32 %v7283_v32, %v1341_v20  ;;  %v860_v25 = vadd.f32 %v828_v63, %v7079_v15  ;;  %v1101_v54 = vadd.f32 %v1069_v51, %v1020_v59  ;;  %v827_v44 = vmul.f32 %v6484_v29, %v745_v18  ;;  %v10925_v20 = vld [vmem:[#allocation90_spill] sm:$0xff]  ;;  %v757_v51 = vpop.permute.xlu1 %756 }
 0x14d   :  { %v1344_v33 = vadd.f32 %v1312_v17, %v1261_v34  ;;  %v1450_v43 = vmax.f32 %v1418_v39, 0.0  ;;  %v1019_v36 = vadd.f32 %v10921_v30, %v935_v4  ;;  %v1260_v24 = vadd.f32 %v10922_v21, %v1178_v0  ;;  %v10926_v39 = vld [vmem:[#allocation47_spill] sm:$0xff]  ;;  %v10927_v0 = vld [vmem:[#allocation93_spill] sm:$0xff] }
 0x14e   :  { %v1417_v2 = vadd.f32 %v7293_v16, %v1379_v53  ;;  %v938_v26 = vadd.f32 %v10923_v10, %v860_v25  ;;  %v1181_v55 = vadd.f32 %v10924_v49, %v1101_v54  ;;  %v859_v6 = vadd.f32 %v827_v44, %v10925_v20  ;;  %v10928_v25 = vld [vmem:[#allocation94_spill] sm:$0xff]  ;;  %v10930_v20 = vld [vmem:[#allocation48_spill] sm:$0xff] }
 0x14f   :  { %v1382_v11 = vmul.f32 %v7283_v32, %v1344_v33  ;;  %v1476_v15 = vmax.f32 %v1448_v5, %v1450_v43  ;;  %v1068_v34 = vmul.f32 %v10857_v45, %v745_v18  ;;  %v1311_v63 = vmul.f32 %v10866_v27, %v745_v18 }
 0x150   :  { %v1449_v59 = vmax.f32 %v1417_v2, 0.0  ;;  %v937_v4 = vadd.f32 %v10926_v39, %v859_v6  ;;  %v1022_v53 = vadd.f32 %v10927_v0, %v938_v26  ;;  %v1263_v54 = vadd.f32 %v10928_v25, %v1181_v55 }
 0x151   :  { %v7471_v17 = vadd.f32 %v7293_v16, %v1382_v11  ;;  %v1588_v33 = vcombine.high %v1476_v15, %v1476_v15  ;;  %v1595_v44 = vrot.slane %v1476_v15, %v10889_v8  ;;  %v10929_v23 = vmax.f32 %v7418_v14, 0.0 }
 0x152   :  { %v1100_v43 = vadd.f32 %v1068_v34, %v1019_v36  ;;  %v1343_v18 = vadd.f32 %v1311_v63, %v1260_v24  ;;  %v830_v30 = vmul.f32 %v6484_v29, %v757_v51  ;;  %v1071_v21 = vmul.f32 %v10857_v45, %v757_v51 }
 0x153   :  { %v1475_v5 = vmax.f32 %v10929_v23, %v1449_v59  ;;  %v1602_v10 = vrot.slane %v1588_v33, %v10889_v8  ;;  %v1603_v49 = vcombine.high %v1595_v44, %v1595_v44  ;;  %v5528_v26 = vrot.slane %v1595_v44, 9 }
 0x154   :  { %v1180_v6 = vadd.f32 %v10930_v20, %v1100_v43  ;;  %v1381_v14 = vmul.f32 %v7283_v32, %v1343_v18  ;;  %v862_v36 = vadd.f32 %v830_v30, %v7117_v57  ;;  %v10932_v43 = vld [vmem:[#allocation49_spill] sm:$0xff]  ;;  %v753_v20 = vpop.permute.xlu0 %752  ;;  %v1103_v60 = vadd.f32 %v1071_v21, %v1022_v53 }
 0x155   :  { %v1571_v11 = vcombine.high %v1475_v5, %v1475_v5  ;;  %v1578_v55 = vrot.slane %v1475_v5, %v10889_v8  ;;  %v1604_v15 = vcombine.high %v1602_v10, %v1602_v10  ;;  %v5529_v59 = vrot.slane %v1603_v49, 9 }
 0x156   :  { %v5530_v24 = vrot.slane %v1602_v10, 9  ;;  %v7487_v34 = vmax.f32 %v1595_v44, %v5528_v26  ;;  %v7491_v25 = vadd.f32 %v7293_v16, %v1381_v14  ;;  %v940_v18 = vadd.f32 %v10932_v43, %v862_v36  ;;  %v10935_v36 = vld [vmem:[#allocation50_spill] sm:$0xff] }
 0x157   :  { %v1585_v63 = vrot.slane %v1571_v11, %v10889_v8  ;;  %v1586_v39 = vcombine.high %v1578_v55, %v1578_v55  ;;  %v5524_v0 = vrot.slane %v1578_v55, 9  ;;  %v5531_v33 = vrot.slane %v1604_v15, 9 }
 0x158   :  { %v2052_v23 = vmax.f32 %v1603_v49, %v5529_v59  ;;  %v7493_v5 = vmax.f32 %v1602_v10, %v5530_v24  ;;  %v1451_v11 = vmax.f32 %v7491_v25, 0.0  ;;  %v1314_v10 = vmul.f32 %v10866_v27, %v757_v51  ;;  %v10936_v24 = vld [vmem:[#allocation95_spill] sm:$0xff] }
 0x159   :  { %v1587_v57 = vcombine.high %v1585_v63, %v1585_v63  ;;  %v5525_v30 = vrot.slane %v1586_v39, 9  ;;  %v5526_v2 = vrot.slane %v1585_v63, 9  ;;  %v7496_v22 = vmax.f32 %v1578_v55, %v5524_v0  ;;  %v10937_v55 = vld [vmem:[#allocation96_spill] sm:$0xff] }
 0x15a   :  { %10931 = vst [vmem:[#allocation75_spill] sm:$0xff] %v7493_v5  ;;  %v2054_v44 = vmax.f32 %v1604_v15, %v5531_v33  ;;  %v7498_v26 = vrot.slane %v2052_v23, 7  ;;  %v1183_v59 = vadd.f32 %v10935_v36, %v1103_v60  ;;  %v1021_v43 = vadd.f32 %v10936_v24, %v937_v4  ;;  %v765_v15 = vpop.permute.xlu1 %764  ;;  %v761_v60 = vpop.permute.xlu0 %760  ;;  %v10942_v24 = vld [vmem:[#allocation52_spill] sm:$0xff] }
 0x15b   :  { %v5527_v14 = vrot.slane %v1587_v57, 9  ;;  %v2048_v42 = vmax.f32 %v1586_v39, %v5525_v30  ;;  %v7501_v48 = vmax.f32 %v1585_v63, %v5526_v2  ;;  %v1262_v0 = vadd.f32 %v10937_v55, %v1180_v6  ;;  %v10938_v63 = vld [vmem:[#allocation98_spill] sm:$0xff]  ;;  %v10940_v6 = vld [vmem:[#allocation97_spill] sm:$0xff] }
 0x15c   :  { %v7504_v49 = vrot.slane %v2054_v44, 7  ;;  %v1346_v25 = vadd.f32 %v1314_v10, %v1263_v54  ;;  %v829_v53 = vmul.f32 %v6484_v29, %v753_v20  ;;  %v1070_v2 = vmul.f32 %v10857_v45, %v753_v20 }
 0x15d   :  { %10933 = vst [vmem:[#allocation20_spill] sm:$0xff] %v7501_v48  ;;  %v2050_v33 = vmax.f32 %v1587_v57, %v5527_v14  ;;  %v7509_v23 = vrot.slane %v2048_v42, 7  ;;  %v1313_v21 = vmul.f32 %v10866_v27, %v753_v20  ;;  %v1024_v51 = vadd.f32 %v7124_v47, %v940_v18  ;;  %v10941_v47 = vld [vmem:[#allocation51_spill] sm:$0xff] }
 0x15e   :  { %10934 = vst [vmem:[#allocation22_spill] sm:$0xff] %v7504_v49  ;;  %v1265_v39 = vadd.f32 %v10938_v63, %v1183_v59  ;;  %v1384_v4 = vmul.f32 %v7283_v32, %v1346_v25  ;;  %v861_v57 = vadd.f32 %v829_v53, %v10940_v6  ;;  %v832_v42 = vmul.f32 %v6484_v29, %v765_v15  ;;  %v10945_v6 = vld [vmem:[#allocation54_spill] sm:$0xff] }
 0x15f   :  { %v7516_v30 = vrot.slane %v2050_v33, 7  ;;  %v1102_v54 = vadd.f32 %v1070_v2, %v1021_v43  ;;  %v1345_v44 = vadd.f32 %v1313_v21, %v1262_v0  ;;  %v1073_v14 = vmul.f32 %v10857_v45, %v765_v15  ;;  %v10943_v0 = vld [vmem:[#allocation53_spill] sm:$0xff]  ;;  %v10944_v21 = vld [vmem:[#allocation99_spill] sm:$0xff] }
 0x160   :  { %v1316_v10 = vmul.f32 %v10866_v27, %v765_v15  ;;  %v1422_v20 = vadd.f32 %v7293_v16, %v1384_v4  ;;  %v939_v18 = vadd.f32 %v10941_v47, %v861_v57  ;;  %v864_v36 = vadd.f32 %v832_v42, %v7142_v35  ;;  %v10946_v42 = vld [vmem:[#allocation100_spill] sm:$0xff] }
 0x161   :  { %10939 = vst [vmem:[#allocation21_spill] sm:$0xff] %v7516_v30  ;;  %v831_v59 = vmul.f32 %v6484_v29, %v761_v60  ;;  %v1182_v55 = vadd.f32 %v10942_v24, %v1102_v54  ;;  %v1383_v33 = vmul.f32 %v7283_v32, %v1345_v44  ;;  %v1105_v25 = vadd.f32 %v1073_v14, %v1024_v51  ;;  %v10948_v51 = vld [vmem:[#allocation55_spill] sm:$0xff] }
 0x162   :  { %v1348_v53 = vadd.f32 %v1316_v10, %v1265_v39  ;;  %v1454_v43 = vmax.f32 %v1422_v20, 0.0  ;;  %v942_v2 = vadd.f32 %v10943_v0, %v864_v36  ;;  %v1023_v63 = vadd.f32 %v10944_v21, %v939_v18  ;;  %v773_v20 = vpop.permute.xlu1 %772 }
 0x163   :  { %v863_v15 = vadd.f32 %v831_v59, %v7145_v13  ;;  %v1421_v4 = vadd.f32 %v7293_v16, %v1383_v33  ;;  %v1185_v57 = vadd.f32 %v10945_v6, %v1105_v25  ;;  %v1264_v47 = vadd.f32 %v10946_v42, %v1182_v55 }
 0x164   :  { %v1386_v35 = vmul.f32 %v7283_v32, %v1348_v53  ;;  %v10947_v54 = vmax.f32 %v7471_v17, 0.0  ;;  %v1072_v14 = vmul.f32 %v10857_v45, %v761_v60  ;;  %v1315_v10 = vmul.f32 %v10866_v27, %v761_v60 }
 0x165   :  { %v941_v39 = vadd.f32 %v10948_v51, %v863_v15  ;;  %v1453_v18 = vmax.f32 %v1421_v4, 0.0  ;;  %v1026_v36 = vadd.f32 %v7149_v56, %v942_v2  ;;  %v1267_v59 = vadd.f32 %v7153_v61, %v1185_v57  ;;  %v10949_v4 = vld [vmem:[#allocation56_spill] sm:$0xff] }
 0x166   :  { %v1478_v44 = vmax.f32 %v10947_v54, %v1454_v43  ;;  %v7542_v13 = vadd.f32 %v7293_v16, %v1386_v35  ;;  %v1104_v17 = vadd.f32 %v1072_v14, %v1023_v63  ;;  %v1347_v33 = vadd.f32 %v1315_v10, %v1264_v47 }
 0x167   :  { %v1477_v25 = vmax.f32 %v1451_v11, %v1453_v18  ;;  %v834_v43 = vmul.f32 %v6484_v29, %v773_v20  ;;  %v1075_v60 = vmul.f32 %v10857_v45, %v773_v20 }
 0x168   :  { %v1622_v24 = vcombine.high %v1478_v44, %v1478_v44  ;;  %v1629_v55 = vrot.slane %v1478_v44, %v10889_v8  ;;  %v1184_v56 = vadd.f32 %v10949_v4, %v1104_v17  ;;  %v1385_v6 = vmul.f32 %v7283_v32, %v1347_v33  ;;  %v769_v33 = vpop.permute.xlu0 %768 }
 0x169   :  { %v1605_v2 = vcombine.high %v1477_v25, %v1477_v25  ;;  %v1612_v61 = vrot.slane %v1477_v25, %v10889_v8  ;;  %v866_v63 = vadd.f32 %v834_v43, %v7156_v3  ;;  %v1107_v53 = vadd.f32 %v1075_v60, %v1026_v36 }
 0x16a   :  { %v1636_v0 = vrot.slane %v1622_v24, %v10889_v8  ;;  %v1637_v21 = vcombine.high %v1629_v55, %v1629_v55  ;;  %v5536_v15 = vrot.slane %v1629_v55, 9  ;;  %v7559_v51 = vadd.f32 %v7293_v16, %v1385_v6  ;;  %v10951_v24 = vld [vmem:[#allocation57_spill] sm:$0xff] }
 0x16b   :  { %v1619_v47 = vrot.slane %v1605_v2, %v10889_v8  ;;  %v1620_v54 = vcombine.high %v1612_v61, %v1612_v61  ;;  %v5532_v44 = vrot.slane %v1612_v61, 9  ;;  %v944_v17 = vadd.f32 %v10951_v24, %v866_v63  ;;  %v10954_v63 = vld [vmem:[#allocation58_spill] sm:$0xff] }
 0x16c   :  { %v1638_v11 = vcombine.high %v1636_v0, %v1636_v0  ;;  %v5537_v57 = vrot.slane %v1637_v21, 9  ;;  %v5538_v35 = vrot.slane %v1636_v0, 9  ;;  %v7555_v42 = vmax.f32 %v1629_v55, %v5536_v15 }
 0x16d   :  { %v1621_v3 = vcombine.high %v1619_v47, %v1619_v47  ;;  %v5533_v25 = vrot.slane %v1620_v54, 9  ;;  %v5534_v43 = vrot.slane %v1619_v47, 9  ;;  %v7564_v4 = vmax.f32 %v1612_v61, %v5532_v44 }
 0x16e   :  { %v5539_v14 = vrot.slane %v1638_v11, 9  ;;  %v2060_v10 = vmax.f32 %v1637_v21, %v5537_v57  ;;  %v7561_v18 = vmax.f32 %v1636_v0, %v5538_v35  ;;  %v1455_v2 = vmax.f32 %v7559_v51, 0.0 }
 0x16f   :  { %v5535_v6 = vrot.slane %v1621_v3, 9  ;;  %v2056_v49 = vmax.f32 %v1620_v54, %v5533_v25  ;;  %v7569_v5 = vmax.f32 %v1619_v47, %v5534_v43  ;;  %v1318_v0 = vmul.f32 %v10866_v27, %v773_v20 }
 0x170   :  { %10950 = vst [vmem:[#allocation23_spill] sm:$0xff] %v7561_v18  ;;  %v2062_v55 = vmax.f32 %v1638_v11, %v5539_v14  ;;  %v7566_v15 = vrot.slane %v2060_v10, 7  ;;  %v1187_v57 = vadd.f32 %v10954_v63, %v1107_v53  ;;  %v1025_v35 = vadd.f32 %v7163_v12, %v941_v39  ;;  %v781_v11 = vpop.permute.xlu1 %780  ;;  %v777_v53 = vpop.permute.xlu0 %776 }
 0x171   :  { %10952 = vst [vmem:[#allocation24_spill] sm:$0xff] %v7569_v5  ;;  %v1266_v61 = vadd.f32 %v7167_v58, %v1184_v56  ;;  %v2058_v44 = vmax.f32 %v1621_v3, %v5535_v6  ;;  %v7577_v14 = vrot.slane %v2056_v49, 7  ;;  %v1350_v51 = vadd.f32 %v1318_v0, %v1267_v59  ;;  %v10956_v58 = vld [vmem:[#allocation101_spill] sm:$0xff] }
 0x172   :  { %v7572_v21 = vrot.slane %v2062_v55, 7  ;;  %v833_v36 = vmul.f32 %v6484_v29, %v769_v33  ;;  %v1074_v60 = vmul.f32 %v10857_v45, %v769_v33  ;;  %v1317_v47 = vmul.f32 %v10866_v27, %v769_v33  ;;  %v10959_v55 = vld [vmem:[#allocation60_spill] sm:$0xff] }
 0x173   :  { %v1028_v20 = vadd.f32 %v7170_v62, %v944_v17  ;;  %v1269_v54 = vadd.f32 %v7173_v41, %v1187_v57  ;;  %v7584_v10 = vrot.slane %v2058_v44, 7  ;;  %v1388_v12 = vmul.f32 %v7283_v32, %v1350_v51  ;;  %v10957_v62 = vld [vmem:[#allocation59_spill] sm:$0xff]  ;;  %v10958_v41 = vld [vmem:[#allocation102_spill] sm:$0xff]  ;;  %v10961_v51 = vld [vmem:[#allocation104_spill] sm:$0xff] }
 0x174   :  { %10953 = vst [vmem:[#allocation25_spill] sm:$0xff] %v7572_v21  ;;  %v865_v39 = vadd.f32 %v833_v36, %v10956_v58  ;;  %v836_v49 = vmul.f32 %v6484_v29, %v781_v11  ;;  %v1106_v59 = vadd.f32 %v1074_v60, %v1025_v35  ;;  %v1349_v56 = vadd.f32 %v1317_v47, %v1266_v61  ;;  %v10960_v61 = vld [vmem:[#allocation61_spill] sm:$0xff] }
 0x175   :  { %10955 = vst [vmem:[#allocation76_spill] sm:$0xff] %v7584_v10  ;;  %v1077_v24 = vmul.f32 %v10857_v45, %v781_v11  ;;  %v1320_v3 = vmul.f32 %v10866_v27, %v781_v11  ;;  %v1426_v33 = vadd.f32 %v7293_v16, %v1388_v12  ;;  %v835_v43 = vmul.f32 %v6484_v29, %v777_v53  ;;  %v10962_v11 = vld [vmem:[#allocation103_spill] sm:$0xff]  ;;  %v10963_v12 = vld [vmem:[#allocation62_spill] sm:$0xff] }
 0x176   :  { %v943_v17 = vadd.f32 %v10957_v62, %v865_v39  ;;  %v868_v25 = vadd.f32 %v836_v49, %v10958_v41  ;;  %v1186_v6 = vadd.f32 %v10959_v55, %v1106_v59  ;;  %v1387_v0 = vmul.f32 %v7283_v32, %v1349_v56  ;;  %v10964_v49 = vld [vmem:[#allocation105_spill] sm:$0xff]  ;;  %v10968_v55 = vld [vmem:[#allocation107_spill] sm:$0xff] }
 0x177   :  { %v1109_v63 = vadd.f32 %v1077_v24, %v1028_v20  ;;  %v1352_v57 = vadd.f32 %v1320_v3, %v1269_v54  ;;  %v1458_v35 = vmax.f32 %v1426_v33, 0.0  ;;  %v867_v60 = vadd.f32 %v835_v43, %v10962_v11  ;;  %v10966_v20 = vld [vmem:[#allocation63_spill] sm:$0xff]  ;;  %v789_v33 = vpop.permute.xlu1 %788  ;;  %v785_v11 = vpop.permute.xlu0 %784 }
 0x178   :  { %v946_v44 = vadd.f32 %v10960_v61, %v868_v25  ;;  %v1027_v36 = vadd.f32 %v10961_v51, %v943_v17  ;;  %v1425_v47 = vadd.f32 %v7293_v16, %v1387_v0  ;;  %v1268_v62 = vadd.f32 %v10964_v49, %v1186_v6  ;;  %v10967_v25 = vld [vmem:[#allocation106_spill] sm:$0xff] }
 0x179   :  { %v1189_v58 = vadd.f32 %v10963_v12, %v1109_v63  ;;  %v1390_v39 = vmul.f32 %v7283_v32, %v1352_v57  ;;  %v10965_v59 = vmax.f32 %v7542_v13, 0.0  ;;  %v945_v54 = vadd.f32 %v10966_v20, %v867_v60 }
 0x17a   :  { %v1076_v24 = vmul.f32 %v10857_v45, %v777_v53  ;;  %v1319_v3 = vmul.f32 %v10866_v27, %v777_v53  ;;  %v1457_v17 = vmax.f32 %v1425_v47, 0.0  ;;  %v1030_v43 = vadd.f32 %v10967_v25, %v946_v44  ;;  %v10969_v44 = vld [vmem:[#allocation64_spill] sm:$0xff] }
 0x17b   :  { %v1480_v56 = vmax.f32 %v10965_v59, %v1458_v35  ;;  %v7610_v41 = vadd.f32 %v7293_v16, %v1390_v39  ;;  %v1271_v0 = vadd.f32 %v10968_v55, %v1189_v58  ;;  %v838_v51 = vmul.f32 %v6484_v29, %v789_v33 }
 0x17c   :  { %v1108_v13 = vadd.f32 %v1076_v24, %v1027_v36  ;;  %v1351_v57 = vadd.f32 %v1319_v3, %v1268_v62  ;;  %v1479_v35 = vmax.f32 %v1455_v2, %v1457_v17  ;;  %v1079_v53 = vmul.f32 %v10857_v45, %v789_v33 }
 0x17d   :  { %v1656_v63 = vcombine.high %v1480_v56, %v1480_v56  ;;  %v1663_v6 = vrot.slane %v1480_v56, %v10889_v8  ;;  %v870_v2 = vadd.f32 %v838_v51, %v7208_v52 }
 0x17e   :  { %v1188_v39 = vadd.f32 %v10969_v44, %v1108_v13  ;;  %v1639_v58 = vcombine.high %v1479_v35, %v1479_v35  ;;  %v1646_v49 = vrot.slane %v1479_v35, %v10889_v8  ;;  %v1389_v36 = vmul.f32 %v7283_v32, %v1351_v57  ;;  %v10971_v35 = vld [vmem:[#allocation65_spill] sm:$0xff]  ;;  %v797_v44 = vpop.permute.xlu1 %796 }
 0x17f   :  { %v1670_v60 = vrot.slane %v1656_v63, %v10889_v8  ;;  %v1671_v47 = vcombine.high %v1663_v6, %v1663_v6  ;;  %v5544_v12 = vrot.slane %v1663_v6, 9  ;;  %v948_v57 = vadd.f32 %v10971_v35, %v870_v2  ;;  %v10975_v35 = vld [vmem:[#allocation108_spill] sm:$0xff] }
 0x180   :  { %v1653_v24 = vrot.slane %v1639_v58, %v10889_v8  ;;  %v1654_v3 = vcombine.high %v1646_v49, %v1646_v49  ;;  %v5540_v17 = vrot.slane %v1646_v49, 9  ;;  %v7627_v25 = vadd.f32 %v7293_v16, %v1389_v36 }
 0x181   :  { %v1672_v62 = vcombine.high %v1670_v60, %v1670_v60  ;;  %v5545_v59 = vrot.slane %v1671_v47, 9  ;;  %v5546_v56 = vrot.slane %v1670_v60, 9  ;;  %v7623_v20 = vmax.f32 %v1663_v6, %v5544_v12  ;;  %v793_v6 = vpop.permute.xlu0 %792 }
 0x182   :  { %v1655_v52 = vcombine.high %v1653_v24, %v1653_v24  ;;  %v5541_v51 = vrot.slane %v1654_v3, 9  ;;  %v5542_v61 = vrot.slane %v1653_v24, 9  ;;  %v7632_v21 = vmax.f32 %v1646_v49, %v5540_v17 }
 0x183   :  { %v5547_v55 = vrot.slane %v1672_v62, 9  ;;  %v2068_v63 = vmax.f32 %v1671_v47, %v5545_v59  ;;  %v7629_v13 = vmax.f32 %v1670_v60, %v5546_v56  ;;  %v1459_v18 = vmax.f32 %v7627_v25, 0.0  ;;  %v10974_v59 = vld [vmem:[#allocation66_spill] sm:$0xff]  ;;  %v805_v25 = vpop.permute.xlu1 %804 }
 0x184   :  { %v1111_v36 = vadd.f32 %v1079_v53, %v1030_v43  ;;  %v5543_v10 = vrot.slane %v1655_v52, 9  ;;  %v2064_v5 = vmax.f32 %v1654_v3, %v5541_v51  ;;  %v7637_v47 = vmax.f32 %v1653_v24, %v5542_v61  ;;  %v10976_v24 = vld [vmem:[#allocation110_spill] sm:$0xff] }
 0x185   :  { %10970 = vst [vmem:[#allocation77_spill] sm:$0xff] %v7629_v13  ;;  %v2070_v12 = vmax.f32 %v1672_v62, %v5547_v55  ;;  %v7634_v58 = vrot.slane %v2068_v63, 7  ;;  %v1322_v60 = vmul.f32 %v10866_v27, %v789_v33  ;;  %v1029_v49 = vadd.f32 %v10975_v35, %v945_v54  ;;  %v10981_v35 = vld [vmem:[#allocation69_spill] sm:$0xff] }
 0x186   :  { %10972 = vst [vmem:[#allocation26_spill] sm:$0xff] %v7637_v47  ;;  %v1191_v56 = vadd.f32 %v10974_v59, %v1111_v36  ;;  %v1270_v17 = vadd.f32 %v7203_v37, %v1188_v39  ;;  %v2066_v62 = vmax.f32 %v1655_v52, %v5543_v10  ;;  %v7645_v55 = vrot.slane %v2064_v5, 7  ;;  %v10978_v37 = vld [vmem:[#allocation109_spill] sm:$0xff] }
 0x187   :  { %v7640_v2 = vrot.slane %v2070_v12, 7  ;;  %v1354_v63 = vadd.f32 %v1322_v60, %v1271_v0  ;;  %v837_v43 = vmul.f32 %v6484_v29, %v785_v11  ;;  %v1078_v53 = vmul.f32 %v10857_v45, %v785_v11  ;;  %v7657_v0 = vpop.permute.xlu0 %800  ;;  %v10980_v60 = vld [vmem:[#allocation113_spill] sm:$0xff] }
 0x188   :  { %v1321_v61 = vmul.f32 %v10866_v27, %v785_v11  ;;  %v1032_v33 = vadd.f32 %v7214_v19, %v948_v57  ;;  %v1273_v3 = vadd.f32 %v10976_v24, %v1191_v56  ;;  %v7652_v51 = vrot.slane %v2066_v62, 7  ;;  %v10979_v57 = vld [vmem:[#allocation68_spill] sm:$0xff] }
 0x189   :  { %10973 = vst [vmem:[#allocation27_spill] sm:$0xff] %v7640_v2  ;;  %v1392_v54 = vmul.f32 %v7283_v32, %v1354_v63  ;;  %v869_v10 = vadd.f32 %v837_v43, %v10978_v37  ;;  %v840_v5 = vmul.f32 %v6484_v29, %v797_v44  ;;  %v1110_v39 = vadd.f32 %v1078_v53, %v1029_v49  ;;  %v10984_v37 = vld [vmem:[#allocation67_spill] sm:$0xff]  ;;  %v10986_v2 = vld [vmem:[#allocation112_spill] sm:$0xff] }
 0x18a   :  { %10977 = vst [vmem:[#allocation79_spill] sm:$0xff] %v7652_v51  ;;  %v1353_v52 = vadd.f32 %v1321_v61, %v1270_v17  ;;  %v1081_v12 = vmul.f32 %v10857_v45, %v797_v44  ;;  %v1324_v11 = vmul.f32 %v10866_v27, %v797_v44  ;;  %v839_v56 = vmul.f32 %v6484_v29, %v793_v6  ;;  %v10982_v17 = vld [vmem:[#allocation71_spill] sm:$0xff] }
 0x18b   :  { %v1430_v19 = vadd.f32 %v7293_v16, %v1392_v54  ;;  %v947_v36 = vadd.f32 %v10979_v57, %v869_v10  ;;  %v872_v59 = vadd.f32 %v840_v5, %v10980_v60  ;;  %v1190_v62 = vadd.f32 %v10981_v35, %v1110_v39  ;;  %v10983_v61 = vld [vmem:[#allocation111_spill] sm:$0xff]  ;;  %v10985_v57 = vld [vmem:[#allocation72_spill] sm:$0xff]  ;;  %v7676_v35 = vpop.permute.xlu1 %882 }
 0x18c   :  { %v1391_v63 = vmul.f32 %v7283_v32, %v1353_v52  ;;  %v1113_v43 = vadd.f32 %v1081_v12, %v1032_v33  ;;  %v1356_v24 = vadd.f32 %v1324_v11, %v1273_v3  ;;  %v871_v54 = vadd.f32 %v839_v56, %v10984_v37  ;;  %v10988_v52 = vld [vmem:[#allocation73_spill] sm:$0xff] }
 0x18d   :  { %v1462_v49 = vmax.f32 %v1430_v19, 0.0  ;;  %v7668_v53 = vadd.f32 %v10982_v17, %v872_v59  ;;  %v1031_v44 = vadd.f32 %v10983_v61, %v947_v36  ;;  %v1272_v39 = vadd.f32 %v10986_v2, %v1190_v62  ;;  %v7685_v36 = vpop.permute.xlu0 %877 }
 0x18e   :  { %v1429_v10 = vadd.f32 %v7293_v16, %v1391_v63  ;;  %v1193_v5 = vadd.f32 %v10985_v57, %v1113_v43  ;;  %v1394_v60 = vmul.f32 %v7283_v32, %v1356_v24  ;;  %v10987_v33 = vmax.f32 %v7610_v41, 0.0  ;;  %v10989_v32 = vld [vmem:[#allocation15_spill] sm:$0xff] }
 0x18f   :  { %v7681_v12 = vadd.f32 %v10988_v52, %v871_v54  ;;  %v1080_v11 = vmul.f32 %v10857_v45, %v793_v6  ;;  %v1323_v19 = vmul.f32 %v10866_v27, %v793_v6  ;;  %v842_v2 = vmul.f32 %v6484_v29, %v805_v25 }
 0x190   :  { %v1482_v3 = vmax.f32 %v10987_v33, %v1462_v49  ;;  %v1461_v59 = vmax.f32 %v1429_v10, 0.0  ;;  %v1432_v56 = vadd.f32 %v7293_v16, %v1394_v60  ;;  %v1275_v63 = vadd.f32 %v10989_v32, %v1193_v5  ;;  %v10990_v16 = vld [vmem:[#allocation74_spill] sm:$0xff]  ;;  %v7702_v33 = vpop.permute.xlu1 %966 }
 0x191   :  { %v1112_v43 = vadd.f32 %v1080_v11, %v1031_v44  ;;  %v1355_v24 = vadd.f32 %v1323_v19, %v1272_v39  ;;  %v1083_v61 = vmul.f32 %v10857_v45, %v805_v25  ;;  %v1326_v6 = vmul.f32 %v10866_v27, %v805_v25  ;;  %v7699_v44 = vld [vmem:[%s10600_s2] ss:$0 sm:$0xff]  ;;  %v7706_v19 = vpop.permute.xlu0 %962 }
 0x192   :  { %v1690_v62 = vcombine.high %v1482_v3, %v1482_v3  ;;  %v1697_v41 = vrot.slane %v1482_v3, %v10889_v8  ;;  %v1481_v49 = vmax.f32 %v1459_v18, %v1461_v59  ;;  %v1464_v17 = vmax.f32 %v1432_v56, 0.0 }
 0x193   :  { %v1192_v57 = vadd.f32 %v10990_v16, %v1112_v43  ;;  %v1393_v18 = vmul.f32 %v7699_v44, %v1355_v24  ;;  %v1358_v39 = vadd.f32 %v1326_v6, %v1275_v63 }
 0x194   :  { %v1704_v37 = vrot.slane %v1690_v62, %v10889_v8  ;;  %v1705_v54 = vcombine.high %v1697_v41, %v1697_v41  ;;  %v5552_v10 = vrot.slane %v1697_v41, 9  ;;  %v1673_v5 = vcombine.high %v1481_v49, %v1481_v49  ;;  %v7712_v62 = vld [vmem:[%s10601_s3] ss:$0 sm:$0xff] }
 0x195   :  { %v1680_v60 = vrot.slane %v1481_v49, %v10889_v8  ;;  %v7715_v63 = vadd.f32 %v7712_v62, %v1393_v18 }
 0x196   :  { %v1706_v25 = vcombine.high %v1704_v37, %v1704_v37  ;;  %v5553_v3 = vrot.slane %v1705_v54, 9  ;;  %v5554_v52 = vrot.slane %v1704_v37, 9  ;;  %v7704_v11 = vmax.f32 %v1697_v41, %v5552_v10 }
 0x197   :  { %v1687_v59 = vrot.slane %v1673_v5, %v10889_v8  ;;  %v1688_v56 = vcombine.high %v1680_v60, %v1680_v60  ;;  %v5548_v32 = vrot.slane %v1680_v60, 9  ;;  %v1396_v41 = vmul.f32 %v7699_v44, %v1358_v39 }
 0x198   :  { %v5555_v43 = vrot.slane %v1706_v25, 9  ;;  %v2076_v24 = vmax.f32 %v1705_v54, %v5553_v3  ;;  %v7717_v49 = vmax.f32 %v1704_v37, %v5554_v52  ;;  %v1463_v47 = vmax.f32 %v7715_v63, 0.0  ;;  %v10993_v37 = vld [vmem:[#allocation70_spill] sm:$0xff]  ;;  %v1048_v3 = vpop.permute.xlu1 %1047 }
 0x199   :  { %v1689_v6 = vcombine.high %v1687_v59, %v1687_v59  ;;  %v5549_v10 = vrot.slane %v1688_v56, 9  ;;  %v5550_v16 = vrot.slane %v1687_v59, 9  ;;  %v7720_v5 = vmax.f32 %v1680_v60, %v5548_v32  ;;  %v1044_v32 = vpop.permute.xlu0 %1043 }
 0x19a   :  { %10991 = vst [vmem:[#allocation80_spill] sm:$0xff] %v7717_v49  ;;  %v2078_v13 = vmax.f32 %v1706_v25, %v5555_v43  ;;  %v7722_v51 = vrot.slane %v2076_v24, 7  ;;  %v1434_v30 = vadd.f32 %v7712_v62, %v1396_v41  ;;  %v1274_v54 = vadd.f32 %v10993_v37, %v1192_v57 }
 0x19b   :  { %v5551_v18 = vrot.slane %v1689_v6, 9  ;;  %v2072_v48 = vmax.f32 %v1688_v56, %v5549_v10  ;;  %v7726_v46 = vmax.f32 %v1687_v59, %v5550_v16  ;;  %v841_v60 = vmul.f32 %v6484_v29, %v7657_v0  ;;  %v10995_v56 = vld [vmem:[#allocation12_spill] sm:$0xff]  ;;  %v10998_v29 = vld [vmem:[#allocation6_spill] sm:$0xff] }
 0x19c   :  { %v7729_v39 = vrot.slane %v2078_v13, 7  ;;  %v1466_v52 = vmax.f32 %v1434_v30, 0.0  ;;  %v1082_v25 = vmul.f32 %v10857_v45, %v7657_v0  ;;  %v1325_v59 = vmul.f32 %v10866_v27, %v7657_v0  ;;  %v10996_v13 = vld [vmem:[#allocation114_spill] sm:$0xff]  ;;  %v10997_v30 = vld [vmem:[#allocation9_spill] sm:$0xff] }
 0x19d   :  { %10992 = vst [vmem:[#allocation78_spill] sm:$0xff] %v7726_v46  ;;  %v2074_v63 = vmax.f32 %v1689_v6, %v5551_v18  ;;  %v7735_v43 = vrot.slane %v2072_v48, 7  ;;  %v874_v24 = vadd.f32 %v842_v2, %v10995_v56  ;;  %v1034_v41 = vadd.f32 %v10996_v13, %v7668_v53  ;;  %v11000_v48 = vld [vmem:[#allocation8_spill] sm:$0xff] }
 0x19e   :  { %10994 = vst [vmem:[#allocation28_spill] sm:$0xff] %v7729_v39  ;;  %v1484_v57 = vmax.f32 %v1464_v17, %v1466_v52  ;;  %v920_v10 = vmul.f32 %v10997_v30, %v7676_v35  ;;  %v1163_v16 = vmul.f32 %v10998_v29, %v7676_v35  ;;  %v1357_v6 = vadd.f32 %v1325_v59, %v1274_v54  ;;  %v11001_v39 = vld [vmem:[#allocation10_spill] sm:$0xff]  ;;  %v1128_v54 = vpop.permute.xlu1 %1127 }
 0x19f   :  { %v7746_v37 = vrot.slane %v2074_v63, 7  ;;  %v873_v18 = vadd.f32 %v841_v60, %v11000_v48  ;;  %v1033_v0 = vadd.f32 %v11001_v39, %v7681_v12  ;;  %v1115_v17 = vadd.f32 %v1083_v61, %v1034_v41  ;;  %v1123_v39 = vpop.permute.xlu0 %1122  ;;  %v11002_v41 = vld [vmem:[#allocation7_spill] sm:$0xff] }
 0x1a0   :  { %v1724_v49 = vcombine.high %v1484_v57, %v1484_v57  ;;  %v1731_v2 = vrot.slane %v1484_v57, %v10889_v8  ;;  %v952_v52 = vadd.f32 %v920_v10, %v874_v24  ;;  %v1395_v53 = vmul.f32 %v7699_v44, %v1357_v6 }
 0x1a1   :  { %10999 = vst [vmem:[#allocation29_spill] sm:$0xff] %v7746_v37  ;;  %v1114_v56 = vadd.f32 %v1082_v25, %v1033_v0  ;;  %v919_v13 = vmul.f32 %v10997_v30, %v7685_v36  ;;  %v1162_v35 = vmul.f32 %v10998_v29, %v7685_v36  ;;  %v1195_v12 = vadd.f32 %v1163_v16, %v1115_v17 }
 0x1a2   :  { %v1738_v60 = vrot.slane %v1724_v49, %v10889_v8  ;;  %v1739_v63 = vcombine.high %v1731_v2, %v1731_v2  ;;  %v5560_v59 = vrot.slane %v1731_v2, 9  ;;  %v1433_v57 = vadd.f32 %v7712_v62, %v1395_v53  ;;  %v11003_v49 = vld [vmem:[#allocation13_spill] sm:$0xff] }
 0x1a3   :  { %v951_v61 = vadd.f32 %v919_v13, %v873_v18  ;;  %v1194_v24 = vadd.f32 %v1162_v35, %v1114_v56  ;;  %v1004_v25 = vmul.f32 %v11002_v41, %v7702_v33  ;;  %v1245_v37 = vmul.f32 %v11003_v49, %v7702_v33 }
 0x1a4   :  { %v1740_v10 = vcombine.high %v1738_v60, %v1738_v60  ;;  %v5561_v6 = vrot.slane %v1739_v63, 9  ;;  %v5562_v30 = vrot.slane %v1738_v60, 9  ;;  %v7761_v48 = vmax.f32 %v1731_v2, %v5560_v59  ;;  %v1210_v59 = vpop.permute.xlu1 %1209 }
 0x1a5   :  { %v1465_v36 = vmax.f32 %v1433_v57, 0.0  ;;  %v1036_v0 = vadd.f32 %v1004_v25, %v952_v52  ;;  %v1003_v16 = vmul.f32 %v11002_v41, %v7706_v19  ;;  %v1244_v56 = vmul.f32 %v11003_v49, %v7706_v19  ;;  %v1206_v25 = vpop.permute.xlu0 %1205 }
 0x1a6   :  { %v5563_v17 = vrot.slane %v1740_v10, 9  ;;  %v2084_v53 = vmax.f32 %v1739_v63, %v5561_v6  ;;  %v7767_v18 = vmax.f32 %v1738_v60, %v5562_v30  ;;  %v1277_v35 = vadd.f32 %v1245_v37, %v1195_v12 }
 0x1a7   :  { %v1483_v13 = vmax.f32 %v1463_v47, %v1465_v36  ;;  %v1035_v46 = vadd.f32 %v1003_v16, %v951_v61  ;;  %v1085_v2 = vmul.f32 %v10857_v45, %v1048_v3  ;;  %v1276_v33 = vadd.f32 %v1244_v56, %v1194_v24 }
 0x1a8   :  { %v2086_v52 = vmax.f32 %v1740_v10, %v5563_v17  ;;  %v7772_v57 = vrot.slane %v2084_v53, 7  ;;  %v1328_v41 = vmul.f32 %v10866_v27, %v1048_v3  ;;  %v1084_v19 = vmul.f32 %v10857_v45, %v1044_v32 }
 0x1a9   :  { %v1707_v63 = vcombine.high %v1483_v13, %v1483_v13  ;;  %v1714_v60 = vrot.slane %v1483_v13, %v10889_v8  ;;  %v1117_v6 = vadd.f32 %v1085_v2, %v1036_v0  ;;  %v1327_v12 = vmul.f32 %v10866_v27, %v1044_v32 }
 0x1aa   :  { %v7777_v47 = vrot.slane %v2086_v52, 7  ;;  %v1360_v37 = vadd.f32 %v1328_v41, %v1277_v35  ;;  %v1165_v61 = vmul.f32 %v10998_v29, %v1128_v54  ;;  %v1116_v36 = vadd.f32 %v1084_v19, %v1035_v46  ;;  %v1293_v35 = vpop.permute.xlu1 %1292  ;;  %v1289_v46 = vpop.permute.xlu0 %1288 }
 0x1ab   :  { %v1721_v10 = vrot.slane %v1707_v63, %v10889_v8  ;;  %v1722_v30 = vcombine.high %v1714_v60, %v1714_v60  ;;  %v5556_v24 = vrot.slane %v1714_v60, 9  ;;  %v1359_v16 = vadd.f32 %v1327_v12, %v1276_v33 }
 0x1ac   :  { %v1398_v3 = vmul.f32 %v7699_v44, %v1360_v37  ;;  %v1197_v17 = vadd.f32 %v1165_v61, %v1117_v6  ;;  %v1164_v0 = vmul.f32 %v10998_v29, %v1123_v39  ;;  %v1247_v52 = vmul.f32 %v11003_v49, %v1210_v59 }
 0x1ad   :  { %v1723_v53 = vcombine.high %v1721_v10, %v1721_v10  ;;  %v5557_v45 = vrot.slane %v1722_v30, 9  ;;  %v5558_v56 = vrot.slane %v1721_v10, 9  ;;  %v7784_v13 = vmax.f32 %v1714_v60, %v5556_v24 }
 0x1ae   :  { %v1436_v32 = vadd.f32 %v7712_v62, %v1398_v3  ;;  %v1397_v54 = vmul.f32 %v7699_v44, %v1359_v16  ;;  %v1196_v2 = vadd.f32 %v1164_v0, %v1116_v36  ;;  %v1246_v29 = vmul.f32 %v11003_v49, %v1206_v25 }
 0x1af   :  { %v5559_v41 = vrot.slane %v1723_v53, 9  ;;  %v2080_v63 = vmax.f32 %v1722_v30, %v5557_v45  ;;  %v7789_v33 = vmax.f32 %v1721_v10, %v5558_v56  ;;  %v1279_v60 = vadd.f32 %v1247_v52, %v1197_v17  ;;  %v11005_v17 = vld [vmem:[#allocation18_spill] sm:$0xff] }
 0x1b0   :  { %v1468_v39 = vmax.f32 %v1436_v32, 0.0  ;;  %v1435_v6 = vadd.f32 %v7712_v62, %v1397_v54  ;;  %v1330_v19 = vmul.f32 %v10866_v27, %v1293_v35  ;;  %v1278_v61 = vadd.f32 %v1246_v29, %v1196_v2 }
 0x1b1   :  { %v2082_v37 = vmax.f32 %v1723_v53, %v5559_v41  ;;  %v7794_v12 = vrot.slane %v2080_v63, 7  ;;  %v1329_v24 = vmul.f32 %v10866_v27, %v1289_v46  ;;  %v2165_v10 = vsel %vm2164_vm2, %v7368_v9, %v7356_v38  ;;  %v11004_v27 = vld [vmem:[#allocation2_spill] sm:$0xff] }
 0x1b2   :  { %v1467_v59 = vmax.f32 %v1435_v6, 0.0  ;;  %v1362_v36 = vadd.f32 %v1330_v19, %v1279_v60  ;;  %v2167_v30 = vsel %vm2166_vm3, %v7368_v9, %v2165_v10  ;;  %v2182_v0 = vsel %vm2164_vm2, %v11005_v17, %v11004_v27 }
 0x1b3   :  { %v7800_v49 = vrot.slane %v2082_v37, 7  ;;  %v1361_v25 = vadd.f32 %v1329_v24, %v1278_v61  ;;  %v2169_v16 = vsel %vm2168_vm4, %v7368_v9, %v2167_v30  ;;  %v2183_v45 = vsel %vm2166_vm3, %v11005_v17, %v2182_v0 }
 0x1b4   :  { %v1400_v3 = vmul.f32 %v7699_v44, %v1362_v36  ;;  %v7813_v53 = vsel %vm2170_vm5, %v7368_v9, %v2169_v16  ;;  %v2196_v56 = vsel %vm2164_vm2, %v7442_v50, %v7429_v7  ;;  %v2184_v32 = vsel %vm2168_vm4, %v11005_v17, %v2183_v45 }
 0x1b5   :  { %v1399_v38 = vmul.f32 %v7699_v44, %v1361_v25  ;;  %v2197_v54 = vsel %vm2166_vm3, %v7442_v50, %v2196_v56  ;;  %v2210_v9 = vsel %vm2164_vm2, %v7426_v1, %v7414_v31  ;;  %v7831_v2 = vsel %vm2170_vm5, %v11005_v17, %v2184_v32 }
 0x1b6   :  { %v1438_v35 = vadd.f32 %v7712_v62, %v1400_v3  ;;  %v2198_v7 = vsel %vm2168_vm4, %v7442_v50, %v2197_v54  ;;  %v2211_v52 = vsel %vm2166_vm3, %v7426_v1, %v2210_v9  ;;  %v2266_v30 = vsel %vm2164_vm2, %v7566_v15, %v7555_v42 }
 0x1b7   :  { %v1437_v44 = vadd.f32 %v7712_v62, %v1399_v38  ;;  %v7839_v41 = vsel %vm2170_vm5, %v7442_v50, %v2198_v7  ;;  %v2212_v31 = vsel %vm2168_vm4, %v7426_v1, %v2211_v52  ;;  %v2224_v62 = vsel %vm2164_vm2, %v7509_v23, %v7496_v22 }
 0x1b8   :  { %v1470_v46 = vmax.f32 %v1438_v35, 0.0  ;;  %v7848_v29 = vsel %vm2170_vm5, %v7426_v1, %v2212_v31  ;;  %v2225_v6 = vsel %vm2166_vm3, %v7509_v23, %v2224_v62  ;;  %v2238_v50 = vsel %vm2164_vm2, %v7498_v26, %v7487_v34 }
 0x1b9   :  { %v1469_v63 = vmax.f32 %v1437_v44, 0.0  ;;  %v2226_v19 = vsel %vm2168_vm4, %v7509_v23, %v2225_v6  ;;  %v2239_v37 = vsel %vm2166_vm3, %v7498_v26, %v2238_v50  ;;  %v2252_v22 = vsel %vm2164_vm2, %v7577_v14, %v7564_v4 }
 0x1ba   :  { %v1486_v60 = vmax.f32 %v1468_v39, %v1470_v46  ;;  %v7864_v61 = vsel %vm2170_vm5, %v7509_v23, %v2226_v19  ;;  %v2240_v24 = vsel %vm2168_vm4, %v7498_v26, %v2239_v37  ;;  %v2253_v34 = vsel %vm2166_vm3, %v7577_v14, %v2252_v22 }
 0x1bb   :  { %v1485_v1 = vmax.f32 %v1467_v59, %v1469_v63  ;;  %v7873_v10 = vsel %vm2170_vm5, %v7498_v26, %v2240_v24  ;;  %v2254_v4 = vsel %vm2168_vm4, %v7577_v14, %v2253_v34  ;;  %v2267_v26 = vsel %vm2166_vm3, %v7566_v15, %v2266_v30 }
 0x1bc   :  { %v1758_v39 = vcombine.high %v1486_v60, %v1486_v60  ;;  %v1765_v36 = vrot.slane %v1486_v60, %v10889_v8  ;;  %v7880_v25 = vsel %vm2170_vm5, %v7577_v14, %v2254_v4  ;;  %v2268_v45 = vsel %vm2168_vm4, %v7566_v15, %v2267_v26 }
 0x1bd   :  { %v1741_v59 = vcombine.high %v1485_v1, %v1485_v1  ;;  %v1748_v23 = vrot.slane %v1485_v1, %v10889_v8  ;;  %v7893_v31 = vsel %vm2170_vm5, %v7566_v15, %v2268_v45  ;;  %v2280_v50 = vsel %vm2164_vm2, %v7645_v55, %v7632_v21 }
 0x1be   :  { %v1772_v3 = vrot.slane %v1758_v39, %v10889_v8  ;;  %v1773_v16 = vcombine.high %v1765_v36, %v1765_v36  ;;  %v5568_v27 = vrot.slane %v1765_v36, 9  ;;  %v2281_v37 = vsel %vm2166_vm3, %v7645_v55, %v2280_v50 }
 0x1bf   :  { %v1755_v17 = vrot.slane %v1741_v59, %v10889_v8  ;;  %v1756_v0 = vcombine.high %v1748_v23, %v1748_v23  ;;  %v5564_v38 = vrot.slane %v1748_v23, 9  ;;  %v2294_v22 = vsel %vm2164_vm2, %v7634_v58, %v7623_v20 }
 0x1c0   :  { %v1774_v14 = vcombine.high %v1772_v3, %v1772_v3  ;;  %v5569_v56 = vrot.slane %v1773_v16, 9  ;;  %v5570_v35 = vrot.slane %v1772_v3, 9  ;;  %v2091_v32 = vmax.f32 %v1765_v36, %v5568_v27 }
 0x1c1   :  { %v1757_v54 = vcombine.high %v1755_v17, %v1755_v17  ;;  %v5565_v42 = vrot.slane %v1756_v0, 9  ;;  %v5566_v9 = vrot.slane %v1755_v17, 9  ;;  %v2087_v44 = vmax.f32 %v1748_v23, %v5564_v38 }
 0x1c2   :  { %v5571_v7 = vrot.slane %v1774_v14, 9  ;;  %v2092_v52 = vmax.f32 %v1773_v16, %v5569_v56  ;;  %v2093_v46 = vmax.f32 %v1772_v3, %v5570_v35  ;;  %v2282_v15 = vsel %vm2168_vm4, %v7645_v55, %v2281_v37 }
 0x1c3   :  { %v5567_v62 = vrot.slane %v1757_v54, 9  ;;  %v2088_v63 = vmax.f32 %v1756_v0, %v5565_v42  ;;  %v2089_v6 = vmax.f32 %v1755_v17, %v5566_v9  ;;  %v2295_v34 = vsel %vm2166_vm3, %v7634_v58, %v2294_v22  ;;  %v11011_v22 = vld [vmem:[#allocation19_spill] sm:$0xff] }
 0x1c4   :  { %v2094_v60 = vmax.f32 %v1774_v14, %v5571_v7  ;;  %v2377_v19 = vrot.slane %v2092_v52, 7  ;;  %v2283_v36 = vsel %vm2170_vm5, %v7645_v55, %v2282_v15  ;;  %v2296_v4 = vsel %vm2168_vm4, %v7634_v58, %v2295_v34 }
 0x1c5   :  { %v2090_v1 = vmax.f32 %v1757_v54, %v5567_v62  ;;  %v2363_v24 = vrot.slane %v2088_v63, 7  ;;  %v2297_v23 = vsel %vm2170_vm5, %v7634_v58, %v2296_v4  ;;  %v2308_v30 = vsel %vm2164_vm2, %v7735_v43, %v7720_v5 }
 0x1c6   :  { %v2378_v39 = vsel %vm2164_vm2, %v2377_v19, %v2091_v32  ;;  %v7908_v21 = vrot.slane %v2094_v60, 7  ;;  %v2309_v55 = vsel %vm2166_vm3, %v7735_v43, %v2308_v30  ;;  %v2322_v16 = vsel %vm2164_vm2, %v7722_v51, %v7704_v11  ;;  %v11006_v60 = vld [vmem:[#allocation16_spill] sm:$0xff] }
 0x1c7   :  { %v2364_v20 = vsel %vm2164_vm2, %v2363_v24, %v2087_v44  ;;  %v7915_v59 = vrot.slane %v2090_v1, 7  ;;  %v2336_v27 = vsel %vm2164_vm2, %v7794_v12, %v7784_v13  ;;  %v2310_v5 = vsel %vm2168_vm4, %v7735_v43, %v2309_v55 }
 0x1c8   :  { %v7924_v3 = vsel %vm2164_vm2, %v7908_v21, %v2093_v46  ;;  %v2323_v26 = vsel %vm2166_vm3, %v7722_v51, %v2322_v16  ;;  %v2337_v17 = vsel %vm2166_vm3, %v7794_v12, %v2336_v27  ;;  %v2311_v11 = vsel %vm2170_vm5, %v7735_v43, %v2310_v5 }
 0x1c9   :  { %v7936_v58 = vsel %vm2164_vm2, %v7915_v59, %v2089_v6  ;;  %v2324_v0 = vsel %vm2168_vm4, %v7722_v51, %v2323_v26  ;;  %v2338_v13 = vsel %vm2168_vm4, %v7794_v12, %v2337_v17  ;;  %v2350_v38 = vsel %vm2164_vm2, %v7772_v57, %v7761_v48 }
 0x1ca   :  { %v2325_v45 = vsel %vm2170_vm5, %v7722_v51, %v2324_v0  ;;  %v2339_v14 = vsel %vm2170_vm5, %v7794_v12, %v2338_v13  ;;  %v2351_v56 = vsel %vm2166_vm3, %v7772_v57, %v2350_v38  ;;  %v2365_v43 = vsel %vm2166_vm3, %v2363_v24, %v2364_v20 }
 0x1cb   :  { %v2352_v35 = vsel %vm2168_vm4, %v7772_v57, %v2351_v56  ;;  %v2366_v32 = vsel %vm2168_vm4, %v2363_v24, %v2365_v43  ;;  %v2379_v54 = vsel %vm2166_vm3, %v2377_v19, %v2378_v39  ;;  %v2421_v48 = vcombine.low %v7813_v53, %v7839_v41  ;;  %v11014_v43 = vld [vmem:[#allocation20_spill] sm:$0xff] }
 0x1cc   :  { %v2353_v51 = vsel %vm2170_vm5, %v7772_v57, %v2352_v35  ;;  %v2367_v12 = vsel %vm2170_vm5, %v2363_v24, %v2366_v32  ;;  %v2380_v42 = vsel %vm2168_vm4, %v2377_v19, %v2379_v54  ;;  %v5757_v44 = vmov 1934713408   ;;  %v11012_v24 = vld [vmem:[#allocation5_spill] sm:$0xff] }
 0x1cd   :  { %v2381_v9 = vsel %vm2170_vm5, %v2377_v19, %v2380_v42  ;;  %v2423_v7 = vunpack.c.l.s4 %v5757_v44  ;;  %v2430_v52 = vcombine.low %v7864_v61, %v7880_v25  ;;  %v2439_v46 = vcombine.low %v2283_v36, %v2311_v11  ;;  %v11007_v19 = vld [vmem:[#allocation14_spill] sm:$0xff]  ;;  %v11009_v25 = vld [vmem:[#allocation4_spill] sm:$0xff]  ;;  %v11015_v35 = vld [vmem:[#allocation21_spill] sm:$0xff] }
 0x1ce   :  { %v2448_v62 = vcombine.low %v2339_v14, %v2367_v12  ;;  %v2493_v63 = vcombine.low %v7831_v2, %v7848_v29  ;;  %v2502_v53 = vcombine.low %v7873_v10, %v7893_v31  ;;  %v2511_v57 = vcombine.low %v2297_v23, %v2325_v45  ;;  %v11008_v29 = vld [vmem:[#allocation11_spill] sm:$0xff]  ;;  %v11010_v31 = vld [vmem:[#allocation17_spill] sm:$0xff]  ;;  %v11017_v42 = vld [vmem:[#allocation22_spill] sm:$0xff] }
 0x1cf   :  { %v2424_v41 = vunpack.c.0.s8 %v2423_v7  ;;  %v2520_v6 = vcombine.low %v2353_v51, %v2381_v9  ;;  %v2175_v50 = vsel %vm2164_vm2, %v7376_v40, %v7362_v28  ;;  %v2189_v37 = vsel %vm2164_vm2, %v11007_v19, %v11006_v60  ;;  %v11016_v12 = vld [vmem:[#allocation75_spill] sm:$0xff] }
 0x1d0   :  { %v2176_v61 = vsel %vm2166_vm3, %v7376_v40, %v2175_v50  ;;  %v2190_v2 = vsel %vm2166_vm3, %v11007_v19, %v2189_v37  ;;  %v2203_v10 = vsel %vm2164_vm2, %v11009_v25, %v11008_v29  ;;  %v2217_v1 = vsel %vm2164_vm2, %v11011_v22, %v11010_v31  ;;  %v11020_v37 = vld [vmem:[#allocation23_spill] sm:$0xff] }
 0x1d1   :  { %v7994_v28 = vsub.s32 %v2424_v41, %v11012_v24  ;;  %v2177_v15 = vsel %vm2168_vm4, %v7376_v40, %v2176_v61  ;;  %v2191_v34 = vsel %vm2168_vm4, %v11007_v19, %v2190_v2  ;;  %v2204_v39 = vsel %vm2166_vm3, %v11009_v25, %v2203_v10  ;;  %v11019_v41 = vld [vmem:[#allocation76_spill] sm:$0xff]  ;;  %v11021_v61 = vld [vmem:[#allocation25_spill] sm:$0xff]  ;;  %v11022_v10 = vld [vmem:[#allocation26_spill] sm:$0xff] }
 0x1d2   :  { %v8004_v36 = vsel %vm2170_vm5, %v7376_v40, %v2177_v15  ;;  %v8008_v4 = vsel %vm2170_vm5, %v11007_v19, %v2191_v34  ;;  %v2205_v20 = vsel %vm2168_vm4, %v11009_v25, %v2204_v39  ;;  %v2218_v23 = vsel %vm2166_vm3, %v11011_v22, %v2217_v1  ;;  %v11023_v31 = vld [vmem:[#allocation79_spill] sm:$0xff]  ;;  %v11024_v1 = vld [vmem:[#allocation77_spill] sm:$0xff] }
 0x1d3   :  { %11013 = vst [vmem:[#allocation30_spill] sm:$0xff] %v7994_v28  ;;  %v8015_v30 = vrot.slane %v2421_v48, %v7994_v28  ;;  %v8018_v55 = vrot.slane %v2430_v52, %v7994_v28  ;;  %v8021_v16 = vrot.slane %v2439_v46, %v7994_v28  ;;  %v8024_v40 = vrot.slane %v2448_v62, %v7994_v28  ;;  %v11025_v15 = vld [vmem:[#allocation27_spill] sm:$0xff] }
 0x1d4   :  { %v8027_v27 = vrot.slane %v2493_v63, %v7994_v28  ;;  %v8030_v5 = vrot.slane %v2502_v53, %v7994_v28  ;;  %v8033_v26 = vrot.slane %v2511_v57, %v7994_v28  ;;  %v8036_v17 = vrot.slane %v2520_v6, %v7994_v28  ;;  %v11018_v57 = vld [vmem:[#allocation24_spill] sm:$0xff] }
 0x1d5   :  { %v5572_v11 = vcombine.high %v8015_v30, %v8018_v55  ;;  %v5573_v0 = vcombine.high %v8021_v16, %v8024_v40  ;;  %v8044_v13 = vsel %vm2170_vm5, %v11009_v25, %v2205_v20  ;;  %v2219_v38 = vsel %vm2168_vm4, %v11011_v22, %v2218_v23 }
 0x1d6   :  { %v5576_v45 = vcombine.high %v8027_v27, %v8030_v5  ;;  %v5577_v14 = vcombine.high %v8033_v26, %v8036_v17  ;;  %v8054_v56 = vsel %vm2170_vm5, %v11011_v22, %v2219_v38  ;;  %v2231_v32 = vsel %vm2164_vm2, %v11015_v35, %v11014_v43  ;;  %v11027_v43 = vld [vmem:[#allocation29_spill] sm:$0xff] }
 0x1d7   :  { %v2599_v54 = vrot.slane %v5572_v11, %v10889_v8  ;;  %v2606_v48 = vrot.slane %v5573_v0, %v10889_v8  ;;  %v2232_v51 = vsel %vm2166_vm3, %v11015_v35, %v2231_v32  ;;  %v2245_v9 = vsel %vm2164_vm2, %v11017_v42, %v11016_v12  ;;  %v11029_v12 = vld [vmem:[#allocation28_spill] sm:$0xff] }
 0x1d8   :  { %v2693_v44 = vrot.slane %v5576_v45, %v10889_v8  ;;  %v2700_v7 = vrot.slane %v5577_v14, %v10889_v8  ;;  %v2233_v52 = vsel %vm2168_vm4, %v11015_v35, %v2232_v51  ;;  %v2246_v46 = vsel %vm2166_vm3, %v11017_v42, %v2245_v9  ;;  %v11026_v14 = vld [vmem:[#allocation78_spill] sm:$0xff]  ;;  %v11028_v51 = vld [vmem:[#allocation80_spill] sm:$0xff] }
 0x1d9   :  { %v2607_v62 = vcombine.low %v2599_v54, %v2606_v48  ;;  %v2234_v63 = vsel %vm2170_vm5, %v11015_v35, %v2233_v52  ;;  %v2247_v53 = vsel %vm2168_vm4, %v11017_v42, %v2246_v46  ;;  %v2259_v6 = vsel %vm2164_vm2, %v11019_v41, %v11018_v57 }
 0x1da   :  { %v2701_v50 = vcombine.low %v2693_v44, %v2700_v7  ;;  %v2248_v60 = vsel %vm2170_vm5, %v11017_v42, %v2247_v53  ;;  %v2260_v19 = vsel %vm2166_vm3, %v11019_v41, %v2259_v6  ;;  %v2273_v2 = vsel %vm2164_vm2, %v11021_v61, %v11020_v37 }
 0x1db   :  { %v2261_v29 = vsel %vm2168_vm4, %v11019_v41, %v2260_v19  ;;  %v2274_v25 = vsel %vm2166_vm3, %v11021_v61, %v2273_v2  ;;  %v2287_v22 = vsel %vm2164_vm2, %v11023_v31, %v11022_v10  ;;  %v2301_v34 = vsel %vm2164_vm2, %v11025_v15, %v11024_v1 }
 0x1dc   :  { %v5719_v39 = vpack.i.bf16 %v2701_v50, %v2607_v62  ;;  %v2262_v20 = vsel %vm2170_vm5, %v11019_v41, %v2261_v29  ;;  %v2275_v23 = vsel %vm2168_vm4, %v11021_v61, %v2274_v25  ;;  %v2288_v11 = vsel %vm2166_vm3, %v11023_v31, %v2287_v22 }
 0x1dd   :  { %v2276_v0 = vsel %vm2170_vm5, %v11021_v61, %v2275_v23  ;;  %v2289_v38 = vsel %vm2168_vm4, %v11023_v31, %v2288_v11  ;;  %v2302_v45 = vsel %vm2166_vm3, %v11025_v15, %v2301_v34  ;;  %v2315_v35 = vsel %vm2164_vm2, %v11027_v43, %v11026_v14 }
 0x1de   :  { %5720 = vrot.lane.b32.xlu0 %v5719_v39, %s5758_s11  ;;  %v2290_v32 = vsel %vm2170_vm5, %v11023_v31, %v2289_v38  ;;  %v2303_v54 = vsel %vm2168_vm4, %v11025_v15, %v2302_v45  ;;  %v2316_v48 = vsel %vm2166_vm3, %v11027_v43, %v2315_v35  ;;  %v2329_v42 = vsel %vm2164_vm2, %v11029_v12, %v11028_v51 }
 0x1df   :  { %v2304_v9 = vsel %vm2170_vm5, %v11025_v15, %v2303_v54  ;;  %v2317_v44 = vsel %vm2168_vm4, %v11027_v43, %v2316_v48  ;;  %v2330_v7 = vsel %vm2166_vm3, %v11029_v12, %v2329_v42  ;;  %v2343_v52 = vsel %vm2164_vm2, %v7800_v49, %v7789_v33 }
 0x1e0   :  { %v2318_v46 = vsel %vm2170_vm5, %v11027_v43, %v2317_v44  ;;  %v2331_v62 = vsel %vm2168_vm4, %v11029_v12, %v2330_v7  ;;  %v2344_v53 = vsel %vm2166_vm3, %v7800_v49, %v2343_v52  ;;  %v2357_v57 = vsel %vm2164_vm2, %v7777_v47, %v7767_v18 }
 0x1e1   :  { %v2332_v41 = vsel %vm2170_vm5, %v11029_v12, %v2331_v62  ;;  %v2345_v6 = vsel %vm2168_vm4, %v7800_v49, %v2344_v53  ;;  %v2358_v33 = vsel %vm2166_vm3, %v7777_v47, %v2357_v57  ;;  %v2372_v50 = vsel %vm2166_vm3, %v7915_v59, %v7936_v58  ;;  %v8190_v62 = vld [vmem:[%s10598_s0 + $0x1b0] sm:$0xff]  ;;  %v8195_v53 = vld [vmem:[%s10598_s0 + $0x1b8] sm:$0xff]  ;;  %v8202_v57 = vld [vmem:[%s10598_s0 + $0x1c8] sm:$0xff] }
 0x1e2   :  { %v2346_v19 = vsel %vm2170_vm5, %v7800_v49, %v2345_v6  ;;  %v2359_v37 = vsel %vm2168_vm4, %v7777_v47, %v2358_v33  ;;  %v2373_v18 = vsel %vm2168_vm4, %v7915_v59, %v2372_v50  ;;  %v2386_v61 = vsel %vm2166_vm3, %v7908_v21, %v7924_v3  ;;  %v8214_v6 = vld [vmem:[%s10598_s0 + $0x1e0] sm:$0xff]  ;;  %v8219_v33 = vld [vmem:[%s10598_s0 + $0x1e8] sm:$0xff]  ;;  %v8226_v50 = vld [vmem:[%s10598_s0 + $0x1f8] sm:$0xff] }
 0x1e3   :  { %v2360_v2 = vsel %vm2170_vm5, %v7777_v47, %v2359_v37  ;;  %v2374_v29 = vsel %vm2170_vm5, %v7915_v59, %v2373_v18  ;;  %v2387_v58 = vsel %vm2168_vm4, %v7908_v21, %v2386_v61  ;;  %v2457_v49 = vcombine.low %v8004_v36, %v8044_v13  ;;  %v8238_v37 = vld [vmem:[%s10598_s0 + $0x210] sm:$0xff]  ;;  %v8243_v18 = vld [vmem:[%s10598_s0 + $0x218] sm:$0xff] }
 0x1e4   :  { %v2388_v25 = vsel %vm2170_vm5, %v7908_v21, %v2387_v58  ;;  %v2466_v10 = vcombine.low %v2234_v63, %v2262_v20  ;;  %v2475_v31 = vcombine.low %v2290_v32, %v2318_v46  ;;  %v2484_v22 = vcombine.low %v2346_v19, %v2374_v29  ;;  %v8231_v19 = vld [vmem:[%s10598_s0 + $0x200] sm:$0xff] }
 0x1e5   :  { %v2464_v3 = vrot.slane %v2457_v49, %v7994_v28  ;;  %v2529_v47 = vcombine.low %v8008_v4, %v8054_v56  ;;  %v2538_v1 = vcombine.low %v2248_v60, %v2276_v0  ;;  %v2547_v15 = vcombine.low %v2304_v9, %v2332_v41  ;;  %v8207_v41 = vld [vmem:[%s10598_s0 + $0x1d0] sm:$0xff]  ;;  %v8258_v49 = vld [vmem:[%s10598_s0 + $0x228] sm:$0xff] }
 0x1e6   :  { %v2473_v59 = vrot.slane %v2466_v10, %v7994_v28  ;;  %v2482_v34 = vrot.slane %v2475_v31, %v7994_v28  ;;  %v2491_v39 = vrot.slane %v2484_v22, %v7994_v28  ;;  %v2556_v36 = vcombine.low %v2360_v2, %v2388_v25  ;;  %v8288_v22 = vld [vmem:[%s10598_s0 + $0x240] sm:$0xff] }
 0x1e7   :  { %v2536_v13 = vrot.slane %v2529_v47, %v7994_v28  ;;  %v2545_v21 = vrot.slane %v2538_v1, %v7994_v28  ;;  %v2554_v63 = vrot.slane %v2547_v15, %v7994_v28  ;;  %v2569_v61 = vcombine.low %v8015_v30, %v8018_v55 }
 0x1e8   :  { %v2563_v20 = vrot.slane %v2556_v36, %v7994_v28  ;;  %v2615_v23 = vcombine.low %v2464_v3, %v2473_v59  ;;  %v2616_v11 = vcombine.low %v2482_v34, %v2491_v39  ;;  %v5574_v4 = vcombine.high %v2464_v3, %v2473_v59  ;;  %v8473_v3 = vld [vmem:[%s10598_s0 + $0x298] sm:$0x3] }
 0x1e9   :  { %v2709_v56 = vcombine.low %v2536_v13, %v2545_v21  ;;  %v5575_v60 = vcombine.high %v2482_v34, %v2491_v39  ;;  %v5578_v0 = vcombine.high %v2536_v13, %v2545_v21  ;;  %v2663_v2 = vcombine.low %v8027_v27, %v8030_v5  ;;  %v8300_v34 = vld [vmem:[%s10598_s0 + $0x1c0] sm:$0x3]  ;;  %v8307_v13 = vld [vmem:[%s10598_s0 + $0x248] sm:$0xff]  ;;  %v8312_v21 = vld [vmem:[%s10598_s0 + $0x258] sm:$0xff] }
 0x1ea   :  { %v2623_v38 = vrot.slane %v2615_v23, %v10889_v8  ;;  %v2630_v45 = vrot.slane %v2616_v11, %v10889_v8  ;;  %v2710_v14 = vcombine.low %v2554_v63, %v2563_v20  ;;  %v2647_v43 = vrot.slane %v5574_v4, %v10889_v8 }
 0x1eb   :  { %v2654_v35 = vrot.slane %v5575_v60, %v10889_v8  ;;  %v5579_v32 = vcombine.high %v2554_v63, %v2563_v20  ;;  %v2717_v48 = vrot.slane %v2709_v56, %v10889_v8  ;;  %v2741_v42 = vrot.slane %v5578_v0, %v10889_v8  ;;  %v8324_v56 = vld [vmem:[%s10598_s0 + $0x260] sm:$0xff]  ;;  %v8329_v60 = vld [vmem:[%s10598_s0 + $0x1d8] sm:$0x3] }
 0x1ec   :  { %v2631_v54 = vcombine.low %v2623_v38, %v2630_v45  ;;  %v2724_v51 = vrot.slane %v2710_v14, %v10889_v8  ;;  %v2664_v29 = vcombine.low %v8033_v26, %v8036_v17  ;;  %v2570_v58 = vcombine.low %v8021_v16, %v8024_v40  ;;  %v8271_v16 = vld [vmem:[%s10598_s0 + $0x230] sm:$0xff] }
 0x1ed   :  { %v2655_v12 = vcombine.low %v2647_v43, %v2654_v35  ;;  %v2748_v9 = vrot.slane %v5579_v32, %v10889_v8  ;;  %v8261_v30 = vrot.slane %v2663_v2, %v10889_v8  ;;  %v3348_v27 = vrot.slane %v8190_v62, 2  ;;  %v8340_v14 = vld [vmem:[%s10598_s0 + $0x270] sm:$0xff] }
 0x1ee   :  { %v2725_v44 = vcombine.low %v2717_v48, %v2724_v51  ;;  %v8264_v55 = vrot.slane %v2664_v29, %v10889_v8  ;;  %v3349_v5 = vrot.slane %v8195_v53, 2  ;;  %v8274_v40 = vrot.slane %v2569_v61, %v10889_v8  ;;  %v8345_v43 = vld [vmem:[%s10598_s0 + $0x1f0] sm:$0x3]  ;;  %v8356_v48 = vld [vmem:[%s10598_s0 + $0x278] sm:$0xff]  ;;  %v8361_v51 = vld [vmem:[%s10598_s0 + $0x208] sm:$0x3] }
 0x1ef   :  { %v2749_v7 = vcombine.low %v2741_v42, %v2748_v9  ;;  %v8277_v26 = vrot.slane %v2570_v58, %v10889_v8  ;;  %v3353_v17 = vrot.slane %v8202_v57, 2  ;;  %v3354_v25 = vrot.slane %v8207_v41, 2  ;;  %v8391_v29 = vld [vmem:[%s10598_s0 + $0x250] sm:$0x3] }
 0x1f0   :  { %v5724_v52 = vpack.i.bf16 %v2725_v44, %v2631_v54  ;;  %v3358_v31 = vrot.slane %v8214_v6, 2  ;;  %v3359_v47 = vrot.slane %v8219_v33, 2  ;;  %v3363_v1 = vrot.slane %v8226_v50, 2 }
 0x1f1   :  { %v5729_v46 = vpack.i.bf16 %v2749_v7, %v2655_v12  ;;  %v3364_v15 = vrot.slane %v8231_v19, 2  ;;  %v3368_v59 = vrot.slane %v8238_v37, 2  ;;  %v3369_v39 = vrot.slane %v8243_v18, 2  ;;  %v8374_v7 = vld [vmem:[%s10598_s0 + $0x220] sm:$0x3] }
 0x1f2   :  { %5725 = vrot.lane.b32.xlu1 %v5724_v52, %s5759_s12  ;;  %v3373_v36 = vrot.slane %v8258_v49, 2  ;;  %v8315_v63 = vsel %vm596_vm0, %v3348_v27, %v3349_v5  ;;  %v3351_v20 = vrot.slane %v8300_v34, 2  ;;  %v3374_v23 = vrot.slane %v8271_v16, 2  ;;  %v8379_v52 = vld [vmem:[%s10598_s0 + $0x238] sm:$0x3] }
 0x1f3   :  { %5730 = vrot.lane.b32.xlu0 %v5729_v46, %s5760_s13  ;;  %v3378_v11 = vrot.slane %v8288_v22, 2  ;;  %v3379_v4 = vrot.slane %v8307_v13, 2  ;;  %v8332_v0 = vsel %vm596_vm0, %v3353_v17, %v3354_v25  ;;  %v3383_v38 = vrot.slane %v8312_v21, 2 }
 0x1f4   :  { %11030 = vst [vmem:[#allocation81_spill] sm:$0xff] %v8332_v0  ;;  %v3384_v45 = vrot.slane %v8324_v56, 2  ;;  %v8348_v35 = vsel %vm596_vm0, %v3349_v5, %v3351_v20  ;;  %v3356_v32 = vrot.slane %v8329_v60, 2  ;;  %v3388_v54 = vrot.slane %v8340_v14, 2 }
 0x1f5   :  { %v8364_v12 = vsel %vm596_vm0, %v3358_v31, %v3359_v47  ;;  %v3361_v42 = vrot.slane %v8345_v43, 2  ;;  %v8368_v9 = vsel %vm596_vm0, %v3363_v1, %v3364_v15  ;;  %v3389_v44 = vrot.slane %v8356_v48, 2 }
 0x1f6   :  { %2830 = vperm.xlu1 %5718, %v8190_v62   ;;  %11031 = vst [vmem:[#allocation82_spill] sm:$0xff] %v8364_v12  ;;  %11032 = vst [vmem:[#allocation31_spill] sm:$0xff] %v8368_v9  ;;  %v8382_v46 = vsel %vm596_vm0, %v3354_v25, %v3356_v32  ;;  %v3366_v61 = vrot.slane %v8361_v51, 2  ;;  %v8386_v2 = vsel %vm596_vm0, %v3368_v59, %v3369_v39  ;;  %v3371_v27 = vrot.slane %v8374_v7, 2  ;;  %v8405_v25 = vld [vmem:[%s10598_s0 + $0x268] sm:$0x3] }
 0x1f7   :  { %2835 = vperm.xlu0 %5717, %v8195_v53   ;;  %11033 = vst [vmem:[#allocation32_spill] sm:$0xff] %v8382_v46  ;;  %11034 = vst [vmem:[#allocation83_spill] sm:$0xff] %v8386_v2  ;;  %v8394_v58 = vsel %vm596_vm0, %v3359_v47, %v3361_v42  ;;  %v8398_v5 = vsel %vm596_vm0, %v3373_v36, %v3374_v23  ;;  %v3376_v17 = vrot.slane %v8379_v52, 2  ;;  %v3381_v1 = vrot.slane %v8391_v29, 2  ;;  %v8447_v42 = vld [vmem:[%s10598_s0 + $0x280] sm:$0x3] }
 0x1f8   :  { %11035 = vst [vmem:[#allocation84_spill] sm:$0xff] %v8394_v58  ;;  %11036 = vst [vmem:[#allocation33_spill] sm:$0xff] %v8398_v5  ;;  %v8408_v31 = vsel %vm596_vm0, %v3364_v15, %v3366_v61  ;;  %v8411_v47 = vsel %vm596_vm0, %v3378_v11, %v3379_v4  ;;  %v8415_v59 = vsel %vm596_vm0, %v3383_v38, %v3384_v45  ;;  %v3386_v32 = vrot.slane %v8405_v25, 2  ;;  %v8431_v11 = vld [vmem:[%s10598_s0 + $0x288] sm:$0xff]  ;;  %v8436_v38 = vld [vmem:[%s10598_s0 + $0x290] sm:$0xff] }
 0x1f9   :  { %11037 = vst [vmem:[#allocation85_spill] sm:$0xff] %v8408_v31  ;;  %11038 = vst [vmem:[#allocation86_spill] sm:$0xff] %v8411_v47  ;;  %v8419_v36 = vsel %vm596_vm0, %v3369_v39, %v3371_v27  ;;  %v8422_v20 = vsel %vm596_vm0, %v3374_v23, %v3376_v17  ;;  %v8426_v15 = vsel %vm596_vm0, %v3379_v4, %v3381_v1  ;;  %v3393_v23 = vrot.slane %v8431_v11, 2  ;;  %v8462_v17 = vld [vmem:[%s10598_s0 + $0x2a8] sm:$0xff]  ;;  %v8551_v47 = vld [vmem:[%s10598_s0 + $0x2e0] sm:$0x3] }
 0x1fa   :  { %2840 = vperm.xlu1 %5718, %v8202_v57   ;;  %11039 = vst [vmem:[#allocation34_spill] sm:$0xff] %v8415_v59  ;;  %11040 = vst [vmem:[#allocation35_spill] sm:$0xff] %v8419_v36  ;;  %v8439_v39 = vsel %vm596_vm0, %v3384_v45, %v3386_v32  ;;  %v3394_v4 = vrot.slane %v8436_v38, 2  ;;  %v8450_v61 = vsel %vm596_vm0, %v3388_v54, %v3389_v44  ;;  %v3391_v27 = vrot.slane %v8447_v42, 2  ;;  %v8457_v45 = vld [vmem:[%s10598_s0 + $0x2a0] sm:$0xff] }
 0x1fb   :  { %2845 = vperm.xlu0 %5717, %v8207_v41   ;;  %11041 = vst [vmem:[#allocation36_spill] sm:$0xff] %v8422_v20  ;;  %11042 = vst [vmem:[#allocation87_spill] sm:$0xff] %v8426_v15  ;;  %v3398_v54 = vrot.slane %v8457_v45, 2  ;;  %v3399_v32 = vrot.slane %v8462_v17, 2  ;;  %v3396_v28 = vrot.slane %v8473_v3, 2  ;;  %v3411_v5 = vrot.slane %v8551_v47, 2 }
 0x1fc   :  { %11043 = vst [vmem:[#allocation88_spill] sm:$0xff] %v8439_v39  ;;  %11044 = vst [vmem:[#allocation38_spill] sm:$0xff] %v8450_v61  ;;  %v8465_v1 = vsel %vm596_vm0, %v3389_v44, %v3391_v27  ;;  %v8476_v10 = vsel %vm596_vm0, %v3393_v23, %v3394_v4  ;;  %v8483_v44 = vld [vmem:[%s10598_s0 + $0x2b8] sm:$0xff]  ;;  %v8488_v27 = vld [vmem:[%s10598_s0 + $0x2c0] sm:$0xff]  ;;  %v3072_v12 = vrot.slane %v8190_v62, 1  ;;  %v3073_v46 = vrot.slane %v8195_v53, 1 }
 0x1fd   :  { %11045 = vst [vmem:[#allocation39_spill] sm:$0xff] %v8465_v1  ;;  %11046 = vst [vmem:[#allocation40_spill] sm:$0xff] %v8476_v10  ;;  %v8491_v8 = vsel %vm596_vm0, %v3394_v4, %v3396_v28  ;;  %v3403_v23 = vrot.slane %v8483_v44, 2  ;;  %v3404_v24 = vrot.slane %v8488_v27, 2  ;;  %v8499_v10 = vld [vmem:[%s10598_s0 + $0x2b0] sm:$0x3]  ;;  %v8502_v1 = vsel %vm596_vm0, %v3398_v54, %v3399_v32 }
 0x1fe   :  { %2850 = vperm.xlu1 %5718, %v8214_v6   ;;  %11047 = vst [vmem:[#allocation41_spill] sm:$0xff] %v8491_v8  ;;  %11048 = vst [vmem:[#allocation42_spill] sm:$0xff] %v8502_v1  ;;  %v3401_v61 = vrot.slane %v8499_v10, 2  ;;  %v8509_v28 = vld [vmem:[%s10598_s0 + $0x2d0] sm:$0xff]  ;;  %v8514_v4 = vld [vmem:[%s10598_s0 + $0x2d8] sm:$0xff]  ;;  %v3077_v53 = vrot.slane %v8202_v57, 1 }
 0x1ff   :  { %2855 = vperm.xlu0 %5717, %v8219_v33   ;;  %v3408_v54 = vrot.slane %v8509_v28, 2  ;;  %v3409_v1 = vrot.slane %v8514_v4, 2  ;;  %v8525_v39 = vld [vmem:[%s10598_s0 + $0x2c8] sm:$0x3]  ;;  %v8528_v59 = vsel %vm596_vm0, %v3403_v23, %v3404_v24  ;;  %v8577_v36 = vld [vmem:[%s10598_s0 + $0x2f8] sm:$0x3] }
 0x200   :  { %v8517_v8 = vsel %vm596_vm0, %v3399_v32, %v3401_v61  ;;  %11050 = vst [vmem:[#allocation43_spill] sm:$0xff] %v8528_v59  ;;  %v3406_v15 = vrot.slane %v8525_v39, 2  ;;  %v8535_v61 = vld [vmem:[%s10598_s0 + $0x2e8] sm:$0xff]  ;;  %v8540_v32 = vld [vmem:[%s10598_s0 + $0x2f0] sm:$0xff]  ;;  %v3416_v31 = vrot.slane %v8577_v36, 2  ;;  %v3083_v57 = vrot.slane %v8219_v33, 1 }
 0x201   :  { %11049 = vst [vmem:[#allocation89_spill] sm:$0xff] %v8517_v8  ;;  %v3413_v23 = vrot.slane %v8535_v61, 2  ;;  %v3414_v59 = vrot.slane %v8540_v32, 2  ;;  %v8554_v20 = vsel %vm596_vm0, %v3408_v54, %v3409_v1  ;;  %v8603_v9 = vld [vmem:[%s10598_s0 + $0x310] sm:$0x3]  ;;  %v3092_v33 = vrot.slane %v8238_v37, 1 }
 0x202   :  { %2860 = vperm.xlu1 %5718, %v8226_v50   ;;  %v8543_v8 = vsel %vm596_vm0, %v3404_v24, %v3406_v15  ;;  %11052 = vst [vmem:[#allocation91_spill] sm:$0xff] %v8554_v20  ;;  %v8561_v24 = vld [vmem:[%s10598_s0 + $0x300] sm:$0xff]  ;;  %v8566_v15 = vld [vmem:[%s10598_s0 + $0x308] sm:$0xff] }
 0x203   :  { %2865 = vperm.xlu0 %5717, %v8231_v19   ;;  %11051 = vst [vmem:[#allocation44_spill] sm:$0xff] %v8543_v8  ;;  %v8569_v8 = vsel %vm596_vm0, %v3409_v1, %v3411_v5  ;;  %v3418_v54 = vrot.slane %v8561_v24, 2  ;;  %v3419_v20 = vrot.slane %v8566_v15, 2  ;;  %v8580_v2 = vsel %vm596_vm0, %v3413_v23, %v3414_v59  ;;  %v8587_v5 = vld [vmem:[%s10598_s0 + $0x318] sm:$0xff]  ;;  %v8592_v1 = vld [vmem:[%s10598_s0 + $0x320] sm:$0xff] }
 0x204   :  { %11053 = vst [vmem:[#allocation92_spill] sm:$0xff] %v8569_v8  ;;  %11054 = vst [vmem:[#allocation45_spill] sm:$0xff] %v8580_v2  ;;  %v8595_v8 = vsel %vm596_vm0, %v3414_v59, %v3416_v31  ;;  %v3423_v23 = vrot.slane %v8587_v5, 2  ;;  %v3424_v2 = vrot.slane %v8592_v1, 2  ;;  %v3421_v31 = vrot.slane %v8603_v9, 2 }
 0x205   :  { %11055 = vst [vmem:[#allocation46_spill] sm:$0xff] %v8595_v8  ;;  %v8606_v58 = vsel %vm596_vm0, %v3418_v54, %v3419_v20  ;;  %v3075_v59 = vrot.slane %v8300_v34, 1  ;;  %v8620_v54 = vld [vmem:[%s10598_s0 + $0x328] sm:$0x3]  ;;  %v3074_v34 = vsel %vm319_vm1, %v3072_v12, %v3073_v46  ;;  %v3085_v12 = vrot.slane %v8345_v43, 1 }
 0x206   :  { %2870 = vperm.xlu1 %5718, %v8238_v37   ;;  %11056 = vst [vmem:[#allocation90_spill] sm:$0xff] %v8606_v58  ;;  %v8614_v8 = vsel %vm596_vm0, %v3419_v20, %v3421_v31  ;;  %v8623_v62 = vsel %vm596_vm0, %v3423_v23, %v3424_v2  ;;  %v3078_v58 = vrot.slane %v8207_v41, 1  ;;  %v3426_v20 = vrot.slane %v8620_v54, 2 }
 0x207   :  { %2875 = vperm.xlu0 %5717, %v8243_v18   ;;  %11057 = vst [vmem:[#allocation47_spill] sm:$0xff] %v8614_v8  ;;  %11058 = vst [vmem:[#allocation93_spill] sm:$0xff] %v8623_v62  ;;  %v3076_v31 = vsel %vm319_vm1, %v3073_v46, %v3075_v59  ;;  %v3080_v8 = vrot.slane %v8329_v60, 1  ;;  %v3082_v23 = vrot.slane %v8214_v6, 1  ;;  %v3087_v46 = vrot.slane %v8226_v50, 1 }
 0x208   :  { %v8633_v0 = vsel %vm596_vm0, %v3424_v2, %v3426_v20  ;;  %v3079_v41 = vsel %vm319_vm1, %v3077_v53, %v3078_v58  ;;  %v3088_v60 = vrot.slane %v8231_v19, 1  ;;  %v3086_v59 = vsel %vm319_vm1, %v3083_v57, %v3085_v12 }
 0x209   :  { %v3081_v62 = vsel %vm319_vm1, %v3078_v58, %v3080_v8  ;;  %v3084_v2 = vsel %vm319_vm1, %v3082_v23, %v3083_v57  ;;  %v3090_v6 = vrot.slane %v8361_v51, 1  ;;  %v3093_v53 = vrot.slane %v8243_v18, 1 }
 0x20a   :  { %2880 = vperm.xlu1 %5718, %v8258_v49   ;;  %v3089_v8 = vsel %vm319_vm1, %v3087_v46, %v3088_v60  ;;  %v3095_v50 = vrot.slane %v8374_v7, 1  ;;  %v3097_v19 = vrot.slane %v8258_v49, 1  ;;  %v3098_v58 = vrot.slane %v8271_v16, 1 }
 0x20b   :  { %2885 = vperm.xlu0 %5717, %v8271_v16   ;;  %v3091_v43 = vsel %vm319_vm1, %v3088_v60, %v3090_v6  ;;  %v3094_v51 = vsel %vm319_vm1, %v3092_v33, %v3093_v53  ;;  %v3100_v37 = vrot.slane %v8379_v52, 1  ;;  %v3102_v18 = vrot.slane %v8288_v22, 1 }
 0x20c   :  { %v3099_v7 = vsel %vm319_vm1, %v3097_v19, %v3098_v58  ;;  %v3105_v49 = vrot.slane %v8391_v29, 1  ;;  %v3107_v16 = vrot.slane %v8312_v21, 1  ;;  %v3113_v57 = vrot.slane %v8356_v48, 1 }
 0x20d   :  { %v3101_v20 = vsel %vm319_vm1, %v3098_v58, %v3100_v37  ;;  %v3118_v12 = vrot.slane %v8436_v38, 1  ;;  %v3123_v60 = vrot.slane %v8462_v17, 1  ;;  %v3132_v33 = vrot.slane %v8509_v28, 1 }
 0x20e   :  { %2890 = vperm.xlu1 %5718, %v8288_v22   ;;  %v3110_v22 = vrot.slane %v8405_v25, 1  ;;  %v11060_v58 = vcombine.low %v8274_v40, %v8277_v26 }
 0x20f   :  { %2895 = vperm.xlu0 %5717, %v8307_v13  }
 0x212   :  { %2900 = vperm.xlu1 %5718, %v8312_v21   ;;  %v3115_v21 = vrot.slane %v8447_v42, 1 }
 0x213   :  { %2905 = vperm.xlu0 %5717, %v8324_v56  }
 0x214   :  { %v3116_v46 = vsel %vm319_vm1, %v3113_v57, %v3115_v21  ;;  %v11062_v21 = vld [vmem:[#allocation32_spill] sm:$0xff] }
 0x216   :  { %2910 = vperm.xlu1 %5718, %v8340_v14  }
 0x217   :  { %2915 = vperm.xlu0 %5717, %v8356_v48   ;;  %v3122_v48 = vrot.slane %v8457_v45, 1 }
 0x21a   :  { %2920 = vperm.xlu1 %5718, %v8431_v11  }
 0x21b   :  { %2925 = vperm.xlu0 %5717, %v8436_v38   ;;  %v3127_v38 = vrot.slane %v8483_v44, 1 }
 0x21e   :  { %2930 = vperm.xlu1 %5718, %v8457_v45   ;;  %v3130_v45 = vrot.slane %v8525_v39, 1  ;;  %v3138_v39 = vrot.slane %v8540_v32, 1 }
 0x21f   :  { %2935 = vperm.xlu0 %5717, %v8462_v17  }
 0x222   :  { %2940 = vperm.xlu1 %5718, %v8483_v44  }
 0x223   :  { %2945 = vperm.xlu0 %5717, %v8488_v27  }
 0x226   :  { %2950 = vperm.xlu1 %5718, %v8509_v28  }
 0x227   :  { %2955 = vperm.xlu0 %5717, %v8514_v4  }
 0x22a   :  { %2960 = vperm.xlu1 %5718, %v8535_v61  }
 0x22b   :  { %2965 = vperm.xlu0 %5717, %v8540_v32  }
 0x22e   :  { %2970 = vperm.xlu1 %5718, %v8561_v24  }
 0x22f   :  { %2975 = vperm.xlu0 %5717, %v8566_v15  }
 0x232   :  { %2980 = vperm.xlu1 %5718, %v8587_v5  }
 0x233   :  { %2985 = vperm.xlu0 %5717, %v8592_v1  }
 0x236   :  { %3153 = vperm.xlu1 %5718, %v3074_v34   ;;  %v3103_v34 = vrot.slane %v8307_v13, 1  ;;  %v3112_v13 = vrot.slane %v8340_v14, 1  ;;  %v3120_v14 = vrot.slane %v8473_v3, 1  ;;  %v3124_v3 = vsel %vm319_vm1, %v3122_v48, %v3123_v60  ;;  %v11066_v48 = vld [vmem:[#allocation85_spill] sm:$0xff] }
 0x237   :  { %3157 = vperm.xlu0 %5717, %v3076_v31   ;;  %v3108_v31 = vrot.slane %v8324_v56, 1  ;;  %v3117_v56 = vrot.slane %v8431_v11, 1  ;;  %v3125_v11 = vrot.slane %v8499_v10, 1 }
 0x238   :  { %v3104_v52 = vsel %vm319_vm1, %v3102_v18, %v3103_v34  ;;  %v3106_v23 = vsel %vm319_vm1, %v3103_v34, %v3105_v49  ;;  %v3114_v25 = vsel %vm319_vm1, %v3112_v13, %v3113_v57  ;;  %v3142_v34 = vrot.slane %v8561_v24, 1 }
 0x239   :  { %v3109_v29 = vsel %vm319_vm1, %v3107_v16, %v3108_v31  ;;  %v3119_v42 = vsel %vm319_vm1, %v3117_v56, %v3118_v12  ;;  %v3126_v6 = vsel %vm319_vm1, %v3123_v60, %v3125_v11  ;;  %v3145_v24 = vrot.slane %v8603_v9, 1  ;;  %v11068_v11 = vld [vmem:[#allocation35_spill] sm:$0xff] }
 0x23a   :  { %3161 = vperm.xlu1 %5718, %v3079_v41   ;;  %v3111_v41 = vsel %vm319_vm1, %v3108_v31, %v3110_v22  ;;  %v3150_v13 = vrot.slane %v8620_v54, 1 }
 0x23b   :  { %3165 = vperm.xlu0 %5717, %v3081_v62   ;;  %v3096_v62 = vsel %vm319_vm1, %v3093_v53, %v3095_v50  ;;  %v3133_v53 = vrot.slane %v8514_v4, 1  ;;  %v3137_v50 = vrot.slane %v8535_v61, 1  ;;  %v11059_v4 = vcombine.low %v8261_v30, %v8264_v55 }
 0x23c   :  { %v3140_v61 = vrot.slane %v8577_v36, 1  ;;  %v3143_v55 = vrot.slane %v8566_v15, 1  ;;  %v3148_v15 = vrot.slane %v8592_v1, 1 }
 0x23d   :  { %v3134_v28 = vsel %vm319_vm1, %v3132_v33, %v3133_v53 }
 0x23e   :  { %3169 = vperm.xlu1 %5718, %v3084_v2   ;;  %v3121_v2 = vsel %vm319_vm1, %v3118_v12, %v3120_v14  ;;  %v3141_v16 = vsel %vm319_vm1, %v3138_v39, %v3140_v61  ;;  %v3146_v22 = vsel %vm319_vm1, %v3143_v55, %v3145_v24  ;;  %v11063_v12 = vld [vmem:[#allocation82_spill] sm:$0xff]  ;;  %v11065_v14 = vld [vmem:[#allocation31_spill] sm:$0xff] }
 0x23f   :  { %3173 = vperm.xlu0 %5717, %v3086_v59   ;;  %v3128_v59 = vrot.slane %v8488_v27, 1 }
 0x241   :  { %v3129_v10 = vsel %vm319_vm1, %v3127_v38, %v3128_v59  ;;  %v3131_v27 = vsel %vm319_vm1, %v3128_v59, %v3130_v45  ;;  %v11069_v59 = vld [vmem:[#allocation33_spill] sm:$0xff] }
 0x242   :  { %3177 = vperm.xlu1 %5718, %v3089_v8  }
 0x243   :  { %3181 = vperm.xlu0 %5717, %v3091_v43   ;;  %v3135_v43 = vrot.slane %v8551_v47, 1 }
 0x246   :  { %3185 = vperm.xlu1 %5718, %v3094_v51  }
 0x247   :  { %3189 = vperm.xlu0 %5717, %v3096_v62   ;;  %v3136_v62 = vsel %vm319_vm1, %v3133_v53, %v3135_v43  ;;  %v11072_v53 = vld [vmem:[#allocation87_spill] sm:$0xff] }
 0x24a   :  { %3193 = vperm.xlu1 %5718, %v3099_v7  }
 0x24b   :  { %3197 = vperm.xlu0 %5717, %v3101_v20   ;;  %v3139_v20 = vsel %vm319_vm1, %v3137_v50, %v3138_v39  ;;  %v11075_v50 = vld [vmem:[#allocation38_spill] sm:$0xff] }
 0x24e   :  { %3201 = vperm.xlu1 %5718, %v3104_v52   ;;  %v3147_v52 = vrot.slane %v8587_v5, 1 }
 0x24f   :  { %3205 = vperm.xlu0 %5717, %v3106_v23   ;;  %v3144_v23 = vsel %vm319_vm1, %v3142_v34, %v3143_v55  ;;  %v11083_v55 = vld [vmem:[#allocation91_spill] sm:$0xff] }
 0x250   :  { %v5721_v17 = vpop.permute.xlu0 %5720  ;;  %v3149_v57 = vsel %vm319_vm1, %v3147_v52, %v3148_v15 }
 0x251   :  { %v5723_v8 = vunpack.i.h.bf16 %v5721_v17  ;;  %v5722_v44 = vunpack.i.l.bf16 %v5721_v17  ;;  %v11071_v17 = vld [vmem:[#allocation86_spill] sm:$0xff] }
 0x252   :  { %3209 = vperm.xlu1 %5718, %v3109_v29   ;;  %v3151_v29 = vsel %vm319_vm1, %v3148_v15, %v3150_v13  ;;  %v11088_v15 = vld [vmem:[#allocation47_spill] sm:$0xff] }
 0x253   :  { %3213 = vperm.xlu0 %5717, %v3111_v41   ;;  %v2759_v19 = vsel %vm2753_vm6, %v11059_v4, %v5723_v8  ;;  %v2754_v47 = vsel %vm2753_vm6, %v11060_v58, %v5722_v44  ;;  %v11061_v41 = vld [vmem:[#allocation81_spill] sm:$0xff]  ;;  %v11073_v8 = vld [vmem:[#allocation34_spill] sm:$0xff] }
 0x256   :  { %3217 = vperm.xlu1 %5718, %v3114_v25  }
 0x257   :  { %3221 = vperm.xlu0 %5717, %v3116_v46   ;;  %v11064_v46 = vld [vmem:[#allocation84_spill] sm:$0xff] }
 0x25a   :  { %3225 = vperm.xlu1 %5718, %v3119_v42   ;;  %v11067_v42 = vld [vmem:[#allocation83_spill] sm:$0xff] }
 0x25b   :  { %3229 = vperm.xlu0 %5717, %v3121_v2  }
 0x25e   :  { %3233 = vperm.xlu1 %5718, %v3124_v3  }
 0x25f   :  { %3237 = vperm.xlu0 %5717, %v3126_v6   ;;  %v11070_v6 = vld [vmem:[#allocation36_spill] sm:$0xff] }
 0x262   :  { %3241 = vperm.xlu1 %5718, %v3129_v10  }
 0x263   :  { %3245 = vperm.xlu0 %5717, %v3131_v27   ;;  %v11074_v27 = vld [vmem:[#allocation88_spill] sm:$0xff] }
 0x264   :  { %v5726_v51 = vpop.permute.xlu1 %5725 }
 0x265   :  { %v5728_v32 = vunpack.i.h.bf16 %v5726_v51  ;;  %v5727_v37 = vunpack.i.l.bf16 %v5726_v51  ;;  %v5731_v18 = vpop.permute.xlu0 %5730 }
 0x266   :  { %v5733_v7 = vunpack.i.h.bf16 %v5731_v18  ;;  %v5732_v30 = vunpack.i.l.bf16 %v5731_v18  ;;  %3249 = vperm.xlu1 %5718, %v3134_v28   ;;  %v11076_v28 = vld [vmem:[#allocation39_spill] sm:$0xff] }
 0x267   :  { %v2760_v40 = vsel %vm2755_vm7, %v2759_v19, %v5728_v32  ;;  %v2756_v26 = vsel %vm2755_vm7, %v2754_v47, %v5727_v37  ;;  %3253 = vperm.xlu0 %5717, %v3136_v62   ;;  %v11077_v19 = vld [vmem:[#allocation40_spill] sm:$0xff]  ;;  %v11078_v47 = vld [vmem:[#allocation41_spill] sm:$0xff]  ;;  %v11079_v62 = vld [vmem:[#allocation42_spill] sm:$0xff] }
 0x268   :  { %v2758_v36 = vsel %vm2757_vm8, %v2756_v26, %v5732_v30  ;;  %v2761_v49 = vsel %vm2757_vm8, %v2760_v40, %v5733_v7  ;;  %v11080_v32 = vld [vmem:[#allocation89_spill] sm:$0xff]  ;;  %v11081_v18 = vld [vmem:[#allocation43_spill] sm:$0xff]  ;;  %v11082_v7 = vld [vmem:[#allocation44_spill] sm:$0xff] }
 0x269   :  { %v5709_v31 = vpack.c.bf16 %v2761_v49, %v2758_v36  ;;  %v11084_v26 = vld [vmem:[#allocation92_spill] sm:$0xff]  ;;  %v11085_v36 = vld [vmem:[#allocation45_spill] sm:$0xff] }
 0x26a   :  { %3257 = vperm.xlu1 %5718, %v3139_v20  }
 0x26b   :  { %3261 = vperm.xlu0 %5717, %v3141_v16   ;;  %2770 = vst [vmem:[%s10602_s4] sm:$0xff] %v5709_v31  ;;  %v11086_v16 = vld [vmem:[#allocation46_spill] sm:$0xff] }
 0x26c   :  { %v11087_v31 = vld [vmem:[#allocation90_spill] sm:$0xff] }
 0x26e   :  { %3265 = vperm.xlu1 %5718, %v3144_v23   ;;  %v5629_v23 = vld [vmem:[%s10598_s0 + $0x330] sm:$0xff] }
 0x26f   :  { %3269 = vperm.xlu0 %5717, %v3146_v22   ;;  %v5630_v22 = vld [vmem:[%s10598_s0 + $0x338] sm:$0xff] }
 0x272   :  { %3273 = vperm.xlu1 %5718, %v3149_v57   ;;  %v5631_v57 = vld [vmem:[%s10598_s0 + $0x340] sm:$0x3] }
 0x273   :  { %3277 = vperm.xlu0 %5717, %v3151_v29   ;;  %v11089_v29 = vld [vmem:[#allocation93_spill] sm:$0xff] }
 0x275   :  { %v8719_v9 = vpop.permute.xlu1 %2830 }
 0x276   :  { %3431 = vperm.xlu1 %5718, %v8315_v63   ;;  %v8722_v5 = vpop.permute.xlu0 %2835 }
 0x277   :  { %3435 = vperm.xlu0 %5717, %v8348_v35  }
 0x279   :  { %v8725_v1 = vpop.permute.xlu1 %2840 }
 0x27a   :  { %3439 = vperm.xlu1 %5718, %v11061_v41   ;;  %v8728_v54 = vpop.permute.xlu0 %2845 }
 0x27b   :  { %3443 = vperm.xlu0 %5717, %v11062_v21   ;;  %v3705_v21 = vrot.slane %v5629_v23, 1 }
 0x27d   :  { %v8731_v56 = vpop.permute.xlu1 %2850 }
 0x27e   :  { %3447 = vperm.xlu1 %5718, %v11063_v12   ;;  %v8734_v25 = vpop.permute.xlu0 %2855  ;;  %v3706_v12 = vrot.slane %v5630_v22, 1 }
 0x27f   :  { %3451 = vperm.xlu0 %5717, %v11064_v46   ;;  %v3708_v46 = vrot.slane %v5631_v57, 1 }
 0x281   :  { %v8737_v63 = vpop.permute.xlu1 %2860 }
 0x282   :  { %3455 = vperm.xlu1 %5718, %v11065_v14   ;;  %v8740_v35 = vpop.permute.xlu0 %2865 }
 0x283   :  { %3459 = vperm.xlu0 %5717, %v11066_v48  }
 0x285   :  { %v8743_v60 = vpop.permute.xlu1 %2870 }
 0x286   :  { %3463 = vperm.xlu1 %5718, %v11067_v42   ;;  %v8746_v2 = vpop.permute.xlu0 %2875  ;;  %v3788_v42 = vrot.slane %v5629_v23, 2 }
 0x287   :  { %3467 = vperm.xlu0 %5717, %v11068_v11   ;;  %v3789_v11 = vrot.slane %v5630_v22, 2 }
 0x289   :  { %v8749_v38 = vpop.permute.xlu1 %2880 }
 0x28a   :  { %3471 = vperm.xlu1 %5718, %v11069_v59   ;;  %v8752_v3 = vpop.permute.xlu0 %2885  ;;  %v3707_v59 = vsel %vm319_vm1, %v3705_v21, %v3706_v12 }
 0x28b   :  { %3475 = vperm.xlu0 %5717, %v11070_v6   ;;  %v3709_v6 = vsel %vm319_vm1, %v3706_v12, %v3708_v46  ;;  %v11090_v12 = vld [vmem:[#allocation3_spill] sm:$0xff] }
 0x28d   :  { %v8755_v45 = vpop.permute.xlu1 %2890 }
 0x28e   :  { %3479 = vperm.xlu1 %5718, %v11071_v17   ;;  %v8761_v33 = vpop.permute.xlu0 %2895  ;;  %v3791_v17 = vrot.slane %v5631_v57, 2 }
 0x28f   :  { %3483 = vperm.xlu0 %5717, %v11072_v53  }
 0x291   :  { %v8764_v10 = vpop.permute.xlu1 %2900 }
 0x292   :  { %3487 = vperm.xlu1 %5718, %v11073_v8   ;;  %v8767_v44 = vpop.permute.xlu0 %2905  ;;  %v3428_v8 = vld [vmem:[%s10599_s1] sm:$0x2] }
 0x293   :  { %3491 = vperm.xlu0 %5717, %v11074_v27  }
 0x295   :  { %v8770_v43 = vpop.permute.xlu1 %2910 }
 0x296   :  { %3495 = vperm.xlu1 %5718, %v11075_v50   ;;  %v8773_v39 = vpop.permute.xlu0 %2915  ;;  %v3869_v50 = vld [vmem:[%s10599_s1] sm:$0x8] }
 0x297   :  { %3499 = vperm.xlu0 %5717, %v11076_v28   ;;  %v3790_v28 = vsel %vm596_vm0, %v3788_v42, %v3789_v11  ;;  %v11091_v42 = vld [vmem:[#allocation5_spill] sm:$0xff] }
 0x299   :  { %v8776_v4 = vpop.permute.xlu1 %2920 }
 0x29a   :  { %3503 = vperm.xlu1 %5718, %v11077_v19   ;;  %v8779_v58 = vpop.permute.xlu0 %2925  ;;  %v3710_v19 = vld [vmem:[%s10599_s1] sm:$0x4] }
 0x29b   :  { %3507 = vperm.xlu0 %5717, %v11078_v47   ;;  %v3792_v47 = vsel %vm596_vm0, %v3789_v11, %v3791_v17  ;;  %v11092_v11 = vsub.s32 3, %v11091_v42  ;;  %v11095_v17 = vsub.s32 6, %v11091_v42 }
 0x29d   :  { %v8782_v51 = vpop.permute.xlu1 %2930 }
 0x29e   :  { %3511 = vperm.xlu1 %5718, %v11079_v62   ;;  %v8785_v61 = vpop.permute.xlu0 %2935  ;;  %v5632_v62 = vld [vmem:[%s10598_s0 + $0x348] sm:$0xff] }
 0x29f   :  { %3515 = vperm.xlu0 %5717, %v11080_v32   ;;  %v5633_v32 = vld [vmem:[%s10598_s0 + $0x350] sm:$0xff] }
 0x2a0   :  { %v4032_v57 = vrot.slane %v5633_v32, 2 }
 0x2a1   :  { %v8788_v37 = vpop.permute.xlu1 %2940 }
 0x2a2   :  { %3519 = vperm.xlu1 %5718, %v11081_v18   ;;  %v8791_v34 = vpop.permute.xlu0 %2945 }
 0x2a3   :  { %3523 = vperm.xlu0 %5717, %v11082_v7   ;;  %v3429_v7 = vunpack.c.l.bf16 %v3428_v8 }
 0x2a5   :  { %v8794_v30 = vpop.permute.xlu1 %2950 }
 0x2a6   :  { %3527 = vperm.xlu1 %5718, %v11083_v55   ;;  %v8797_v40 = vpop.permute.xlu0 %2955 }
 0x2a7   :  { %3531 = vperm.xlu0 %5717, %v11084_v26   ;;  %v5634_v26 = vld [vmem:[%s10598_s0 + $0x358] sm:$0x3] }
 0x2a8   :  { %v4034_v21 = vrot.slane %v5634_v26, 2 }
 0x2a9   :  { %v8800_v20 = vpop.permute.xlu1 %2960 }
 0x2aa   :  { %3535 = vperm.xlu1 %5718, %v11085_v36   ;;  %v8803_v49 = vpop.permute.xlu0 %2965  ;;  %v3870_v36 = vunpack.c.l.bf16 %v3869_v50  ;;  %v11098_v50 = vsub.s32 1, %v11091_v42 }
 0x2ab   :  { %3539 = vperm.xlu0 %5717, %v11086_v16  }
 0x2ad   :  { %v8806_v24 = vpop.permute.xlu1 %2970 }
 0x2ae   :  { %3543 = vperm.xlu1 %5718, %v11087_v31   ;;  %v8809_v52 = vpop.permute.xlu0 %2975  ;;  %v3711_v31 = vunpack.c.l.bf16 %v3710_v19  ;;  %v11099_v19 = vsub.s32 4, %v11091_v42 }
 0x2af   :  { %3547 = vperm.xlu0 %5717, %v11088_v15   ;;  %v3950_v15 = vrot.slane %v5632_v62, 1 }
 0x2b1   :  { %v8818_v13 = vpop.permute.xlu1 %2980 }
 0x2b2   :  { %3551 = vperm.xlu1 %5718, %v11089_v29   ;;  %v8824_v41 = vpop.permute.xlu0 %2985  ;;  %v3953_v29 = vrot.slane %v5634_v26, 1  ;;  %v11101_v26 = vsub.s32 7, %v11091_v42 }
 0x2b3   :  { %3555 = vperm.xlu0 %5717, %v8633_v0   ;;  %v2826_v0 = vld [vmem:[%s10599_s1] sm:$0x1] }
 0x2b4   :  { %v2827_v18 = vunpack.c.l.bf16 %v2826_v0  ;;  %v8875_v0 = vrot.slane %v3870_v36, %v11095_v17 }
 0x2b5   :  { %v8827_v14 = vpop.permute.xlu1 %3153 }
 0x2b6   :  { %3628 = vperm.xlu1 %5718, %v5629_v23   ;;  %v8829_v48 = vpop.permute.xlu0 %3157  ;;  %v3951_v23 = vrot.slane %v5633_v32, 1  ;;  %v8865_v46 = vrot.slane %v2827_v18, %v11090_v12  ;;  %11096 = vst [vmem:[#allocation49_spill] sm:$0xff] %v8875_v0 }
 0x2b7   :  { %3633 = vperm.xlu0 %5717, %v5630_v22   ;;  %v4031_v22 = vrot.slane %v5632_v62, 2 }
 0x2b8   :  { %v3954_v17 = vsel %vm319_vm1, %v3951_v23, %v3953_v29 }
 0x2b9   :  { %v8833_v53 = vpop.permute.xlu1 %3161 }
 0x2ba   :  { %3713 = vperm.xlu1 %5718, %v3707_v59   ;;  %v8841_v27 = vpop.permute.xlu0 %3165  ;;  %v8869_v59 = vrot.slane %v3429_v7, %v11092_v11  ;;  %v8889_v11 = vrot.slane %v3870_v36, %v11101_v26  ;;  %v8904_v36 = vmul.f32 %v8865_v46, %v8719_v9 }
 0x2bb   :  { %3717 = vperm.xlu0 %5717, %v3709_v6  }
 0x2bc   :  { %11093 = vst [vmem:[#allocation94_spill] sm:$0xff] %v8869_v59  ;;  %v8926_v9 = vmul.f32 %v8869_v59, %v8728_v54  ;;  %v8940_v26 = vmul.f32 %v8869_v59, %v8731_v56 }
 0x2bd   :  { %v8857_v55 = vpop.permute.xlu1 %3169 }
 0x2be   :  { %3794 = vperm.xlu1 %5718, %v3790_v28   ;;  %v8862_v16 = vpop.permute.xlu0 %3173  ;;  %v8881_v28 = vrot.slane %v2827_v18, %v11098_v50  ;;  %v4033_v18 = vsel %vm596_vm0, %v4031_v22, %v4032_v57  ;;  %v4035_v50 = vsel %vm596_vm0, %v4032_v57, %v4034_v21  ;;  %11103 = vst [vmem:[#allocation96_spill] sm:$0xff] %v8926_v9  ;;  %v11104_v57 = vsub.s32 5, %v11091_v42 }
 0x2bf   :  { %3798 = vperm.xlu0 %5717, %v3792_v47   ;;  %v8885_v47 = vrot.slane %v3711_v31, %v11099_v19  ;;  %v11102_v19 = vsub.s32 2, %v11091_v42  ;;  %11106 = vst [vmem:[#allocation97_spill] sm:$0xff] %v8940_v26  ;;  %v8956_v42 = vmul.f32 %v8875_v0, %v8734_v25 }
 0x2c0   :  { %v8932_v29 = vrot.slane %v3711_v31, %v11104_v57  ;;  %v8952_v31 = vmul.f32 %v8869_v59, %v8734_v25  ;;  %v8980_v57 = vmul.f32 %v8875_v0, %v8740_v35 }
 0x2c1   :  { %v8871_v6 = vpop.permute.xlu1 %3177  ;;  %11100 = vst [vmem:[#allocation95_spill] sm:$0xff] %v8885_v47  ;;  %11109 = vst [vmem:[#allocation53_spill] sm:$0xff] %v8956_v42 }
 0x2c2   :  { %11094 = vst [vmem:[#allocation48_spill] sm:$0xff] %v8871_v6  ;;  %3873 = vperm.xlu1 %5718, %v5632_v62   ;;  %v8877_v8 = vpop.permute.xlu0 %3181  ;;  %v3952_v6 = vsel %vm319_vm1, %v3950_v15, %v3951_v23  ;;  %v4036_v62 = vld [vmem:[%s10599_s1 + $0x4] sm:$0x1]  ;;  %v8912_v15 = vmul.f32 %v8865_v46, %v8725_v1  ;;  %v8916_v23 = vmul.f32 %v8869_v59, %v8725_v1  ;;  %11105 = vst [vmem:[#allocation98_spill] sm:$0xff] %v8932_v29 }
 0x2c3   :  { %11097 = vst [vmem:[#allocation50_spill] sm:$0xff] %v8877_v8  ;;  %3878 = vperm.xlu0 %5717, %v5633_v32   ;;  %v8900_v8 = vrot.slane %v3429_v7, %v11102_v19  ;;  %v8908_v32 = vmul.f32 %v8865_v46, %v8722_v5  ;;  %v8922_v7 = vmul.f32 %v8865_v46, %v8728_v54  ;;  %v4037_v21 = vunpack.c.l.bf16 %v4036_v62 }
 0x2c4   :  { %v8936_v1 = vmul.f32 %v8865_v46, %v8731_v56  ;;  %v8944_v54 = vmul.f32 %v8875_v0, %v8731_v56  ;;  %11108 = vst [vmem:[#allocation52_spill] sm:$0xff] %v8952_v31  ;;  %v8960_v62 = vmul.f32 %v8865_v46, %v8737_v63  ;;  %v8964_v56 = vmul.f32 %v8869_v59, %v8737_v63 }
 0x2c5   :  { %v8918_v22 = vpop.permute.xlu1 %3185  ;;  %v8968_v19 = vmul.f32 %v8875_v0, %v8737_v63  ;;  %11113 = vst [vmem:[#allocation55_spill] sm:$0xff] %v8980_v57  ;;  %v8990_v63 = vmul.f32 %v8869_v59, %v8743_v60  ;;  %v9003_v57 = vmul.f32 %v8865_v46, %v8746_v2  ;;  %v9107_v31 = vmul.f32 %v8875_v0, %v8773_v39 }
 0x2c6   :  { %3956 = vperm.xlu1 %5718, %v3952_v6   ;;  %v8928_v5 = vpop.permute.xlu0 %3189  ;;  %11107 = vst [vmem:[#allocation51_spill] sm:$0xff] %v8944_v54  ;;  %v8948_v6 = vmul.f32 %v8865_v46, %v8734_v25  ;;  %11110 = vst [vmem:[#allocation99_spill] sm:$0xff] %v8964_v56  ;;  %v8976_v25 = vmul.f32 %v8869_v59, %v8740_v35  ;;  %v8986_v56 = vmul.f32 %v8865_v46, %v8743_v60 }
 0x2c7   :  { %3960 = vperm.xlu0 %5717, %v3954_v17   ;;  %11111 = vst [vmem:[#allocation54_spill] sm:$0xff] %v8968_v19  ;;  %v8972_v17 = vmul.f32 %v8865_v46, %v8740_v35  ;;  %11114 = vst [vmem:[#allocation56_spill] sm:$0xff] %v8990_v63  ;;  %v8994_v19 = vmul.f32 %v8875_v0, %v8743_v60  ;;  %v8999_v35 = vrot.slane %v4037_v21, %v11090_v12 }
 0x2c8   :  { %11112 = vst [vmem:[#allocation100_spill] sm:$0xff] %v8976_v25  ;;  %v9007_v54 = vmul.f32 %v8869_v59, %v8746_v2  ;;  %v9011_v63 = vmul.f32 %v8875_v0, %v8746_v2  ;;  %v9015_v60 = vmul.f32 %v8865_v46, %v8749_v38  ;;  %v9019_v12 = vmul.f32 %v8869_v59, %v8749_v38 }
 0x2c9   :  { %v8982_v42 = vpop.permute.xlu1 %3193  ;;  %11115 = vst [vmem:[#allocation57_spill] sm:$0xff] %v8994_v19  ;;  %11116 = vst [vmem:[#allocation58_spill] sm:$0xff] %v8999_v35  ;;  %v9027_v21 = vmul.f32 %v8865_v46, %v8752_v3  ;;  %v9031_v2 = vmul.f32 %v8869_v59, %v8752_v3  ;;  %v9083_v19 = vmul.f32 %v8875_v0, %v8767_v44 }
 0x2ca   :  { %4039 = vperm.xlu1 %5718, %v4033_v18   ;;  %v8996_v25 = vpop.permute.xlu0 %3197  ;;  %11117 = vst [vmem:[#allocation101_spill] sm:$0xff] %v9007_v54  ;;  %11118 = vst [vmem:[#allocation59_spill] sm:$0xff] %v9011_v63  ;;  %v9023_v18 = vmul.f32 %v8875_v0, %v8749_v38  ;;  %v9035_v63 = vmul.f32 %v8875_v0, %v8752_v3  ;;  %v9043_v38 = vmul.f32 %v8869_v59, %v8755_v45 }
 0x2cb   :  { %4043 = vperm.xlu0 %5717, %v4035_v50   ;;  %11119 = vst [vmem:[#allocation102_spill] sm:$0xff] %v9019_v12  ;;  %11121 = vst [vmem:[#allocation61_spill] sm:$0xff] %v9031_v2  ;;  %v9039_v50 = vmul.f32 %v8865_v46, %v8755_v45  ;;  %v3005_v2 = vmul.f32 %v8865_v46, %v8761_v33  ;;  %v9055_v3 = vmul.f32 %v8869_v59, %v8761_v33 }
 0x2cc   :  { %11120 = vst [vmem:[#allocation60_spill] sm:$0xff] %v9023_v18  ;;  %11122 = vst [vmem:[#allocation104_spill] sm:$0xff] %v9035_v63  ;;  %v9047_v18 = vmul.f32 %v8875_v0, %v8755_v45  ;;  %v9059_v63 = vmul.f32 %v8875_v0, %v8761_v33  ;;  %v9067_v45 = vmul.f32 %v8869_v59, %v8764_v10 }
 0x2cd   :  { %11123 = vst [vmem:[#allocation103_spill] sm:$0xff] %v9043_v38  ;;  %v9049_v12 = vpop.permute.xlu1 %3201  ;;  %11125 = vst [vmem:[#allocation105_spill] sm:$0xff] %v9055_v3  ;;  %v3006_v38 = vmul.f32 %v8865_v46, %v8764_v10  ;;  %v3007_v3 = vmul.f32 %v8865_v46, %v8767_v44  ;;  %v3009_v35 = vmul.f32 %v8865_v46, %v8773_v39 }
 0x2ce   :  { %11124 = vst [vmem:[#allocation62_spill] sm:$0xff] %v9047_v18  ;;  %11126 = vst [vmem:[#allocation63_spill] sm:$0xff] %v9059_v63  ;;  %v9063_v54 = vpop.permute.xlu0 %3205  ;;  %v9071_v18 = vmul.f32 %v8875_v0, %v8764_v10  ;;  %v9079_v63 = vmul.f32 %v8869_v59, %v8767_v44  ;;  %v9089_v10 = vmul.f32 %v8869_v59, %v8770_v43 }
 0x2cf   :  { %11127 = vst [vmem:[#allocation106_spill] sm:$0xff] %v9067_v45  ;;  %v3297_v33 = vmul.f32 %v8881_v28, %v9063_v54  ;;  %11130 = vst [vmem:[#allocation65_spill] sm:$0xff] %v9083_v19  ;;  %v3008_v45 = vmul.f32 %v8865_v46, %v8770_v43 }
 0x2d0   :  { %11128 = vst [vmem:[#allocation107_spill] sm:$0xff] %v9071_v18  ;;  %11129 = vst [vmem:[#allocation64_spill] sm:$0xff] %v9079_v63  ;;  %v9093_v18 = vmul.f32 %v8875_v0, %v8770_v43  ;;  %v9099_v63 = vmul.f32 %v8869_v59, %v8773_v39  ;;  %v9113_v43 = vmul.f32 %v8869_v59, %v8776_v4 }
 0x2d1   :  { %11131 = vst [vmem:[#allocation66_spill] sm:$0xff] %v9089_v10  ;;  %v9101_v44 = vadd.f32 %v3297_v33, %v3005_v2  ;;  %v9103_v19 = vpop.permute.xlu1 %3209  ;;  %11135 = vst [vmem:[#allocation68_spill] sm:$0xff] %v9107_v31  ;;  %v3010_v10 = vmul.f32 %v8865_v46, %v8776_v4  ;;  %v9121_v2 = vmul.f32 %v8875_v0, %v8776_v4 }
 0x2d2   :  { %11132 = vst [vmem:[#allocation108_spill] sm:$0xff] %v9093_v18  ;;  %11133 = vst [vmem:[#allocation110_spill] sm:$0xff] %v9099_v63  ;;  %v3298_v18 = vmul.f32 %v8881_v28, %v9103_v19  ;;  %v9117_v26 = vpop.permute.xlu0 %3213  ;;  %v3011_v39 = vmul.f32 %v8865_v46, %v8779_v58  ;;  %v9127_v33 = vmul.f32 %v8869_v59, %v8779_v58 }
 0x2d3   :  { %11134 = vst [vmem:[#allocation109_spill] sm:$0xff] %v9101_v44  ;;  %11136 = vst [vmem:[#allocation113_spill] sm:$0xff] %v9113_v43  ;;  %v3299_v31 = vmul.f32 %v8881_v28, %v9117_v26  ;;  %v9133_v43 = vmul.f32 %v8875_v0, %v8779_v58  ;;  %v3012_v63 = vmul.f32 %v8865_v46, %v8782_v51 }
 0x2d4   :  { %11137 = vst [vmem:[#allocation69_spill] sm:$0xff] %v9121_v2  ;;  %11138 = vst [vmem:[#allocation71_spill] sm:$0xff] %v9127_v33  ;;  %v9139_v4 = vmul.f32 %v8869_v59, %v8782_v51  ;;  %v9141_v2 = vadd.f32 %v3298_v18, %v3006_v38  ;;  %v9145_v44 = vmul.f32 %v8875_v0, %v8782_v51 }
 0x2d5   :  { %11139 = vst [vmem:[#allocation111_spill] sm:$0xff] %v9133_v43  ;;  %v3013_v33 = vmul.f32 %v8865_v46, %v8785_v61  ;;  %v9151_v58 = vmul.f32 %v8869_v59, %v8785_v61  ;;  %v9153_v43 = vadd.f32 %v3299_v31, %v3007_v3  ;;  %v9155_v29 = vpop.permute.xlu1 %3217  ;;  %v9163_v18 = vmul.f32 %v8865_v46, %v8788_v37 }
 0x2d6   :  { %11140 = vst [vmem:[#allocation67_spill] sm:$0xff] %v9139_v4  ;;  %11141 = vst [vmem:[#allocation72_spill] sm:$0xff] %v9141_v2  ;;  %v9159_v4 = vmul.f32 %v8875_v0, %v8785_v61  ;;  %v9167_v51 = vmul.f32 %v8869_v59, %v8788_v37  ;;  %v3300_v38 = vmul.f32 %v8881_v28, %v9155_v29 }
 0x2d7   :  { %11142 = vst [vmem:[#allocation112_spill] sm:$0xff] %v9145_v44  ;;  %11143 = vst [vmem:[#allocation73_spill] sm:$0xff] %v9151_v58  ;;  %v9171_v58 = vpop.permute.xlu0 %3221  ;;  %v9175_v31 = vmul.f32 %v8875_v0, %v8788_v37  ;;  %v9179_v61 = vmul.f32 %v8865_v46, %v8791_v34  ;;  %v9183_v3 = vmul.f32 %v8869_v59, %v8791_v34 }
 0x2d8   :  { %11144 = vst [vmem:[#allocation15_spill] sm:$0xff] %v9153_v43  ;;  %11145 = vst [vmem:[#allocation74_spill] sm:$0xff] %v9159_v4  ;;  %v9189_v4 = vmul.f32 %v8875_v0, %v8791_v34  ;;  %v9193_v44 = vmul.f32 %v8865_v46, %v8794_v30  ;;  %v9197_v37 = vmul.f32 %v8869_v59, %v8794_v30 }
 0x2d9   :  { %11146 = vst [vmem:[#allocation70_spill] sm:$0xff] %v9167_v51  ;;  %11147 = vst [vmem:[#allocation12_spill] sm:$0xff] %v9175_v31  ;;  %v3301_v51 = vmul.f32 %v8881_v28, %v9171_v58  ;;  %v9199_v31 = vadd.f32 %v3300_v38, %v3008_v45  ;;  %v9207_v43 = vmul.f32 %v8865_v46, %v8797_v40  ;;  %v9215_v2 = vpop.permute.xlu1 %3225 }
 0x2da   :  { %11148 = vst [vmem:[#allocation114_spill] sm:$0xff] %v9183_v3  ;;  %11149 = vst [vmem:[#allocation9_spill] sm:$0xff] %v9189_v4  ;;  %v9203_v3 = vmul.f32 %v8875_v0, %v8794_v30  ;;  %v9211_v34 = vmul.f32 %v8869_v59, %v8797_v40  ;;  %v9219_v45 = vmul.f32 %v8875_v0, %v8797_v40 }
 0x2db   :  { %11150 = vst [vmem:[#allocation6_spill] sm:$0xff] %v9197_v37  ;;  %11151 = vst [vmem:[#allocation8_spill] sm:$0xff] %v9199_v31  ;;  %v9213_v4 = vadd.f32 %v3301_v51, %v3009_v35  ;;  %v9223_v30 = vmul.f32 %v8865_v46, %v8800_v20  ;;  %v9227_v38 = vmul.f32 %v8869_v59, %v8800_v20 }
 0x2dc   :  { %11152 = vst [vmem:[#allocation10_spill] sm:$0xff] %v9203_v3  ;;  %11153 = vst [vmem:[#allocation7_spill] sm:$0xff] %v9211_v34  ;;  %v3302_v3 = vmul.f32 %v8881_v28, %v9215_v2  ;;  %v9231_v34 = vpop.permute.xlu0 %3229  ;;  %v9235_v35 = vmul.f32 %v8875_v0, %v8800_v20  ;;  %v9239_v40 = vmul.f32 %v8865_v46, %v8803_v49 }
 0x2dd   :  { %11154 = vst [vmem:[#allocation13_spill] sm:$0xff] %v9213_v4  ;;  %11155 = vst [vmem:[#allocation2_spill] sm:$0xff] %v9219_v45  ;;  %v9243_v51 = vmul.f32 %v8869_v59, %v8803_v49  ;;  %v9249_v45 = vmul.f32 %v8875_v0, %v8803_v49  ;;  %v9253_v37 = vmul.f32 %v8865_v46, %v8806_v24  ;;  %v9273_v31 = vpop.permute.xlu1 %3233 }
 0x2de   :  { %11156 = vst [vmem:[#allocation18_spill] sm:$0xff] %v9227_v38  ;;  %11157 = vst [vmem:[#allocation16_spill] sm:$0xff] %v9235_v35  ;;  %v3303_v38 = vmul.f32 %v8881_v28, %v9231_v34  ;;  %v9257_v20 = vmul.f32 %v8869_v59, %v8806_v24  ;;  %v9259_v35 = vadd.f32 %v3302_v3, %v3010_v10 }
 0x2df   :  { %11158 = vst [vmem:[#allocation14_spill] sm:$0xff] %v9243_v51  ;;  %11159 = vst [vmem:[#allocation11_spill] sm:$0xff] %v9249_v45  ;;  %v9263_v51 = vmul.f32 %v8875_v0, %v8806_v24  ;;  %v9267_v4 = vmul.f32 %v8865_v46, %v8809_v52  ;;  %v3284_v49 = vmul.f32 %v8881_v28, %v8827_v14 }
 0x2e0   :  { %11160 = vst [vmem:[#allocation4_spill] sm:$0xff] %v9257_v20  ;;  %11161 = vst [vmem:[#allocation17_spill] sm:$0xff] %v9259_v35  ;;  %v9271_v45 = vadd.f32 %v3303_v38, %v3011_v39  ;;  %v9277_v20 = vmul.f32 %v8869_v59, %v8809_v52  ;;  %v9281_v10 = vmul.f32 %v8875_v0, %v8809_v52 }
 0x2e1   :  { %11162 = vst [vmem:[#allocation19_spill] sm:$0xff] %v9263_v51  ;;  %v3285_v24 = vmul.f32 %v8881_v28, %v8829_v48  ;;  %v3304_v3 = vmul.f32 %v8881_v28, %v9273_v31  ;;  %v9287_v51 = vpop.permute.xlu0 %3237  ;;  %v9291_v14 = vmul.f32 %v8865_v46, %v8818_v13  ;;  %v9295_v39 = vmul.f32 %v8869_v59, %v8818_v13 }
 0x2e2   :  { %11163 = vst [vmem:[#allocation20_spill] sm:$0xff] %v9271_v45  ;;  %11164 = vst [vmem:[#allocation21_spill] sm:$0xff] %v9277_v20  ;;  %v3286_v52 = vmul.f32 %v8881_v28, %v8833_v53  ;;  %v3305_v38 = vmul.f32 %v8881_v28, %v9287_v51  ;;  %v9303_v48 = vmul.f32 %v8875_v0, %v8818_v13 }
 0x2e3   :  { %11165 = vst [vmem:[#allocation75_spill] sm:$0xff] %v9281_v10  ;;  %11166 = vst [vmem:[#allocation22_spill] sm:$0xff] %v9295_v39  ;;  %v9307_v10 = vmul.f32 %v8865_v46, %v8824_v41  ;;  %v3287_v20 = vmul.f32 %v8881_v28, %v8841_v27  ;;  %v9311_v45 = vadd.f32 %v3304_v3, %v3012_v63  ;;  %v9326_v46 = vpop.permute.xlu1 %3241 }
 0x2e4   :  { %11167 = vst [vmem:[#allocation24_spill] sm:$0xff] %v9303_v48  ;;  %v9315_v39 = vmul.f32 %v8869_v59, %v8824_v41  ;;  %v9319_v35 = vmul.f32 %v8875_v0, %v8824_v41  ;;  %v9322_v13 = vadd.f32 %v3284_v49, %v8904_v36  ;;  %v9324_v48 = vadd.f32 %v3305_v38, %v3013_v33 }
 0x2e5   :  { %11168 = vst [vmem:[#allocation76_spill] sm:$0xff] %v9311_v45  ;;  %v9329_v9 = vadd.f32 %v3285_v24, %v8908_v32  ;;  %v3288_v63 = vmul.f32 %v8881_v28, %v8857_v55  ;;  %v3289_v3 = vmul.f32 %v8881_v28, %v8862_v16  ;;  %v3306_v41 = vmul.f32 %v8881_v28, %v9326_v46  ;;  %v9337_v0 = vpop.permute.xlu0 %3245 }
 0x2e6   :  { %11169 = vst [vmem:[#allocation23_spill] sm:$0xff] %v9315_v39  ;;  %11170 = vst [vmem:[#allocation25_spill] sm:$0xff] %v9319_v35  ;;  %v9340_v36 = vadd.f32 %v3286_v52, %v8912_v15  ;;  %v9344_v33 = vmul.f32 %v8885_v47, %v8833_v53  ;;  %v9348_v32 = vmul.f32 %v8885_v47, %v8841_v27  ;;  %v11173_v52 = vld [vmem:[#allocation48_spill] sm:$0xff] }
 0x2e7   :  { %11171 = vst [vmem:[#allocation26_spill] sm:$0xff] %v9324_v48  ;;  %v3307_v49 = vmul.f32 %v8881_v28, %v9337_v0  ;;  %v9353_v24 = vadd.f32 %v3287_v20, %v8922_v7  ;;  %v9357_v38 = vmul.f32 %v8885_v47, %v8857_v55  ;;  %v9361_v15 = vmul.f32 %v8889_v11, %v8857_v55  ;;  %v11174_v7 = vld [vmem:[#allocation50_spill] sm:$0xff]  ;;  %v9377_v39 = vpop.permute.xlu1 %3249 }
 0x2e8   :  { %v9364_v53 = vadd.f32 %v3306_v41, %v9163_v18  ;;  %v9368_v27 = vmul.f32 %v8885_v47, %v8862_v16  ;;  %v3290_v59 = vmul.f32 %v8881_v28, %v11173_v52  ;;  %v3291_v20 = vmul.f32 %v8881_v28, %v11174_v7 }
 0x2e9   :  { %v9375_v35 = vadd.f32 %v3307_v49, %v9179_v61  ;;  %v9380_v55 = vadd.f32 %v3288_v63, %v8936_v1  ;;  %v9383_v18 = vadd.f32 %v3289_v3, %v8948_v6  ;;  %v9387_v41 = vmul.f32 %v8889_v11, %v8862_v16  ;;  %v9391_v48 = vpop.permute.xlu0 %3253 }
 0x2ea   :  { %11172 = vst [vmem:[#allocation79_spill] sm:$0xff] %v9364_v53  ;;  %v3308_v53 = vmul.f32 %v8881_v28, %v9377_v39  ;;  %v9395_v61 = vmul.f32 %v8885_v47, %v11173_v52  ;;  %v9399_v1 = vmul.f32 %v8889_v11, %v11173_v52  ;;  %v3292_v6 = vmul.f32 %v8881_v28, %v8918_v22 }
 0x2eb   :  { %11175 = vst [vmem:[#allocation77_spill] sm:$0xff] %v9375_v35  ;;  %v3309_v16 = vmul.f32 %v8881_v28, %v9391_v48  ;;  %v9407_v63 = vmul.f32 %v8885_v47, %v11174_v7  ;;  %v9411_v3 = vmul.f32 %v8889_v11, %v11174_v7  ;;  %v3293_v49 = vmul.f32 %v8881_v28, %v8928_v5  ;;  %v9431_v7 = vpop.permute.xlu1 %3257 }
 0x2ec   :  { %11176 = vst [vmem:[#allocation27_spill] sm:$0xff] %v9399_v1  ;;  %v9416_v52 = vadd.f32 %v3308_v53, %v9193_v44  ;;  %v9419_v35 = vadd.f32 %v3290_v59, %v8960_v62  ;;  %v9422_v45 = vadd.f32 %v3291_v20, %v8972_v17  ;;  %v9426_v1 = vmul.f32 %v8885_v47, %v8918_v22 }
 0x2ed   :  { %11177 = vst [vmem:[#allocation78_spill] sm:$0xff] %v9407_v63  ;;  %11178 = vst [vmem:[#allocation29_spill] sm:$0xff] %v9411_v3  ;;  %v9429_v63 = vadd.f32 %v3309_v16, %v9207_v43  ;;  %v9435_v3 = vmul.f32 %v8889_v11, %v8918_v22  ;;  %v3294_v59 = vmul.f32 %v8881_v28, %v8982_v42  ;;  %v9443_v44 = vpop.permute.xlu0 %3261 }
 0x2ee   :  { %11179 = vst [vmem:[#allocation80_spill] sm:$0xff] %v9416_v52  ;;  %v3295_v62 = vmul.f32 %v8881_v28, %v8996_v25  ;;  %v3310_v17 = vmul.f32 %v8881_v28, %v9431_v7  ;;  %v9446_v43 = vadd.f32 %v3292_v6, %v8986_v56  ;;  %v9450_v53 = vmul.f32 %v8885_v47, %v8928_v5 }
 0x2ef   :  { %11180 = vst [vmem:[#allocation28_spill] sm:$0xff] %v9429_v63  ;;  %v9454_v22 = vmul.f32 %v8889_v11, %v8928_v5  ;;  %v3311_v20 = vmul.f32 %v8881_v28, %v9443_v44  ;;  %v9459_v16 = vadd.f32 %v3293_v49, %v9003_v57  ;;  %v9463_v63 = vmul.f32 %v8885_v47, %v8982_v42 }
 0x2f0   :  { %v3296_v56 = vmul.f32 %v8881_v28, %v9049_v12  ;;  %v9468_v6 = vadd.f32 %v3310_v17, %v9223_v30  ;;  %v9472_v5 = vmul.f32 %v8889_v11, %v8982_v42  ;;  %v9476_v52 = vmul.f32 %v8885_v47, %v8996_v25 }
 0x2f1   :  { %11181 = vst [vmem:[#allocation81_spill] sm:$0xff] %v9459_v16  ;;  %11182 = vst [vmem:[#allocation32_spill] sm:$0xff] %v9463_v63  ;;  %v9480_v57 = vmul.f32 %v8889_v11, %v8996_v25  ;;  %v9483_v49 = vadd.f32 %v3311_v20, %v9239_v40  ;;  %v3266_v63 = vpop.permute.xlu1 %3265  ;;  %v9486_v16 = vadd.f32 %v3294_v59, %v9015_v60 }
 0x2f2   :  { %11183 = vst [vmem:[#allocation82_spill] sm:$0xff] %v9468_v6  ;;  %v9489_v30 = vadd.f32 %v3295_v62, %v9027_v21  ;;  %v9493_v42 = vmul.f32 %v8885_v47, %v9049_v12  ;;  %v3312_v17 = vmul.f32 %v8881_v28, %v3266_v63  ;;  %v3270_v6 = vpop.permute.xlu0 %3269  ;;  %v9498_v25 = vmul.f32 %v8889_v11, %v9049_v12 }
 0x2f3   :  { %11184 = vst [vmem:[#allocation84_spill] sm:$0xff] %v9483_v49  ;;  %v9502_v40 = vmul.f32 %v8885_v47, %v9063_v54  ;;  %v9506_v60 = vmul.f32 %v8889_v11, %v9063_v54  ;;  %v3313_v21 = vmul.f32 %v8881_v28, %v3270_v6  ;;  %v9510_v59 = vadd.f32 %v3296_v56, %v9039_v50 }
 0x2f4   :  { %v9514_v62 = vmul.f32 %v8885_v47, %v9103_v19  ;;  %v9518_v12 = vmul.f32 %v8889_v11, %v9103_v19  ;;  %v9521_v20 = vadd.f32 %v3312_v17, %v9253_v37  ;;  %v9525_v54 = vmul.f32 %v8885_v47, %v9117_v26 }
 0x2f5   :  { %v9529_v49 = vmul.f32 %v8889_v11, %v9117_v26  ;;  %v9533_v50 = vmul.f32 %v8885_v47, %v9155_v29  ;;  %v9536_v56 = vadd.f32 %v3313_v21, %v9267_v4  ;;  %v3274_v19 = vpop.permute.xlu1 %3273  ;;  %v9540_v37 = vmul.f32 %v8889_v11, %v9155_v29 }
 0x2f6   :  { %11185 = vst [vmem:[#allocation31_spill] sm:$0xff] %v9521_v20  ;;  %v9544_v17 = vmul.f32 %v8885_v47, %v9171_v58  ;;  %v9548_v26 = vmul.f32 %v8889_v11, %v9171_v58  ;;  %v3314_v20 = vmul.f32 %v8881_v28, %v3274_v19  ;;  %v9555_v4 = vmul.f32 %v8885_v47, %v9215_v2 }
 0x2f7   :  { %11186 = vst [vmem:[#allocation85_spill] sm:$0xff] %v9529_v49  ;;  %11187 = vst [vmem:[#allocation83_spill] sm:$0xff] %v9536_v56  ;;  %v9551_v49 = vpop.permute.xlu0 %3277  ;;  %v9559_v29 = vmul.f32 %v8889_v11, %v9215_v2  ;;  %v9563_v21 = vmul.f32 %v8885_v47, %v9231_v34  ;;  %v9569_v56 = vmul.f32 %v8889_v11, %v9231_v34 }
 0x2f8   :  { %11188 = vst [vmem:[#allocation35_spill] sm:$0xff] %v9548_v26  ;;  %11189 = vst [vmem:[#allocation33_spill] sm:$0xff] %v9555_v4  ;;  %v3315_v58 = vmul.f32 %v8881_v28, %v9551_v49  ;;  %v9573_v26 = vmul.f32 %v8885_v47, %v9273_v31  ;;  %v9577_v4 = vmul.f32 %v8889_v11, %v9273_v31 }
 0x2f9   :  { %11190 = vst [vmem:[#allocation36_spill] sm:$0xff] %v9563_v21  ;;  %v9580_v2 = vadd.f32 %v3314_v20, %v9291_v14  ;;  %v9584_v21 = vmul.f32 %v8885_v47, %v9287_v51  ;;  %v9588_v28 = vmul.f32 %v8889_v11, %v9287_v51  ;;  %v9592_v34 = vmul.f32 %v8885_v47, %v9326_v46  ;;  %v3432_v31 = vpop.permute.xlu1 %3431 }
 0x2fa   :  { %11191 = vst [vmem:[#allocation86_spill] sm:$0xff] %v9573_v26  ;;  %v9595_v26 = vadd.f32 %v3315_v58, %v9307_v10  ;;  %v9599_v14 = vmul.f32 %v8889_v11, %v9326_v46  ;;  %v9603_v20 = vmul.f32 %v8885_v47, %v9337_v0  ;;  %v9607_v51 = vmul.f32 %v8889_v11, %v9337_v0 }
 0x2fb   :  { %11192 = vst [vmem:[#allocation87_spill] sm:$0xff] %v9580_v2  ;;  %11193 = vst [vmem:[#allocation34_spill] sm:$0xff] %v9588_v28  ;;  %v3562_v2 = vmul.f32 %v8900_v8, %v3432_v31  ;;  %v3436_v28 = vpop.permute.xlu0 %3435  ;;  %v9612_v10 = vmul.f32 %v8885_v47, %v9377_v39  ;;  %v9616_v58 = vmul.f32 %v8889_v11, %v9377_v39 }
 0x2fc   :  { %11194 = vst [vmem:[#allocation88_spill] sm:$0xff] %v9595_v26  ;;  %11195 = vst [vmem:[#allocation38_spill] sm:$0xff] %v9603_v20  ;;  %v9620_v46 = vmul.f32 %v8885_v47, %v9391_v48  ;;  %v3563_v26 = vmul.f32 %v8900_v8, %v3436_v28  ;;  %v9625_v0 = vmul.f32 %v8889_v11, %v9391_v48 }
 0x2fd   :  { %11196 = vst [vmem:[#allocation39_spill] sm:$0xff] %v9607_v51  ;;  %11197 = vst [vmem:[#allocation40_spill] sm:$0xff] %v9612_v10  ;;  %v9629_v31 = vmul.f32 %v8885_v47, %v9431_v7  ;;  %v9633_v10 = vmul.f32 %v8889_v11, %v9431_v7  ;;  %v3594_v39 = vadd.f32 %v3562_v2, %v9322_v13 }
 0x2fe   :  { %11198 = vst [vmem:[#allocation41_spill] sm:$0xff] %v9616_v58  ;;  %11199 = vst [vmem:[#allocation42_spill] sm:$0xff] %v9620_v46  ;;  %v9638_v58 = vmul.f32 %v8885_v47, %v9443_v44  ;;  %v9642_v28 = vmul.f32 %v8889_v11, %v9443_v44  ;;  %v9645_v48 = vmul.f32 %v8885_v47, %v3266_v63 }
 0x2ff   :  { %11200 = vst [vmem:[#allocation89_spill] sm:$0xff] %v9625_v0  ;;  %11201 = vst [vmem:[#allocation43_spill] sm:$0xff] %v9629_v31  ;;  %v3595_v0 = vadd.f32 %v3563_v26, %v9329_v9  ;;  %v3440_v31 = vpop.permute.xlu1 %3439  ;;  %v9649_v46 = vmul.f32 %v8889_v11, %v3266_v63  ;;  %v9652_v7 = vmul.f32 %v8885_v47, %v3270_v6 }
 0x300   :  { %11202 = vst [vmem:[#allocation44_spill] sm:$0xff] %v9633_v10  ;;  %11203 = vst [vmem:[#allocation91_spill] sm:$0xff] %v9638_v58  ;;  %v3672_v13 = vadd.f32 %v8916_v23, %v3594_v39  ;;  %v3564_v2 = vmul.f32 %v8900_v8, %v3440_v31  ;;  %v3444_v58 = vpop.permute.xlu0 %3443  ;;  %v9657_v44 = vmul.f32 %v8889_v11, %v3270_v6  ;;  %v11212_v39 = vld [vmem:[#allocation98_spill] sm:$0xff]  ;;  %v11214_v10 = vld [vmem:[#allocation97_spill] sm:$0xff] }
 0x301   :  { %11204 = vst [vmem:[#allocation92_spill] sm:$0xff] %v9642_v28  ;;  %11205 = vst [vmem:[#allocation45_spill] sm:$0xff] %v9645_v48  ;;  %v9660_v28 = vmul.f32 %v8885_v47, %v3274_v19  ;;  %v11210_v48 = vld [vmem:[#allocation96_spill] sm:$0xff]  ;;  %v3565_v26 = vmul.f32 %v8900_v8, %v3444_v58  ;;  %v9665_v63 = vmul.f32 %v8889_v11, %v3274_v19 }
 0x302   :  { %11206 = vst [vmem:[#allocation46_spill] sm:$0xff] %v9649_v46  ;;  %11207 = vst [vmem:[#allocation90_spill] sm:$0xff] %v9652_v7  ;;  %v3673_v9 = vadd.f32 %v11210_v48, %v3595_v0  ;;  %v3756_v7 = vadd.f32 %v9344_v33, %v3672_v13  ;;  %v3596_v23 = vadd.f32 %v3564_v2, %v9340_v36 }
 0x303   :  { %11208 = vst [vmem:[#allocation47_spill] sm:$0xff] %v9657_v44  ;;  %11209 = vst [vmem:[#allocation93_spill] sm:$0xff] %v9660_v28  ;;  %v3805_v46 = vmul.f32 %v11212_v39, %v3440_v31  ;;  %v9672_v6 = vmul.f32 %v8885_v47, %v9551_v49  ;;  %v3597_v28 = vadd.f32 %v3565_v26, %v9353_v24  ;;  %v3448_v48 = vpop.permute.xlu1 %3447  ;;  %v11215_v31 = vld [vmem:[#allocation52_spill] sm:$0xff]  ;;  %v11216_v47 = vld [vmem:[#allocation58_spill] sm:$0xff] }
 0x304   :  { %11211 = vst [vmem:[#allocation3_spill] sm:$0xff] %v9665_v63  ;;  %v3757_v44 = vadd.f32 %v9348_v32, %v3673_v9  ;;  %v3806_v0 = vmul.f32 %v11212_v39, %v3444_v58  ;;  %v3674_v19 = vadd.f32 %v11214_v10, %v3596_v23  ;;  %v3566_v33 = vmul.f32 %v8900_v8, %v3448_v48  ;;  %v3452_v13 = vpop.permute.xlu0 %3451  ;;  %v11217_v9 = vld [vmem:[#allocation51_spill] sm:$0xff] }
 0x305   :  { %11213 = vst [vmem:[#allocation5_spill] sm:$0xff] %v9672_v6  ;;  %v3837_v63 = vadd.f32 %v3805_v46, %v3756_v7  ;;  %v3807_v36 = vmul.f32 %v11212_v39, %v3448_v48  ;;  %v3675_v2 = vadd.f32 %v11215_v31, %v3597_v28  ;;  %v4050_v6 = vmul.f32 %v11216_v47, %v3448_v48  ;;  %v11218_v46 = vld [vmem:[#allocation53_spill] sm:$0xff]  ;;  %v11219_v48 = vld [vmem:[#allocation99_spill] sm:$0xff] }
 0x306   :  { %v3838_v51 = vadd.f32 %v3806_v0, %v3757_v44  ;;  %v3567_v32 = vmul.f32 %v8900_v8, %v3452_v13  ;;  %v3758_v58 = vadd.f32 %v9357_v38, %v3674_v19  ;;  %v3598_v26 = vadd.f32 %v3566_v33, %v9380_v55  ;;  %v11220_v19 = vld [vmem:[#allocation100_spill] sm:$0xff] }
 0x307   :  { %v3917_v24 = vadd.f32 %v11217_v9, %v3837_v63  ;;  %v3808_v10 = vmul.f32 %v11212_v39, %v3452_v13  ;;  %v3759_v23 = vadd.f32 %v9368_v27, %v3675_v2  ;;  %v4051_v28 = vmul.f32 %v11216_v47, %v3452_v13  ;;  %v3456_v44 = vpop.permute.xlu1 %3455  ;;  %v11221_v27 = vld [vmem:[#allocation54_spill] sm:$0xff] }
 0x308   :  { %v3918_v7 = vadd.f32 %v11218_v46, %v3838_v51  ;;  %v3599_v20 = vadd.f32 %v3567_v32, %v9383_v18  ;;  %v3676_v31 = vadd.f32 %v11219_v48, %v3598_v26  ;;  %v3839_v63 = vadd.f32 %v3807_v36, %v3758_v58  ;;  %v11223_v46 = vld [vmem:[#allocation78_spill] sm:$0xff]  ;;  %v11226_v48 = vld [vmem:[#allocation29_spill] sm:$0xff] }
 0x309   :  { %v3999_v0 = vadd.f32 %v9361_v15, %v3917_v24  ;;  %v3568_v38 = vmul.f32 %v8900_v8, %v3456_v44  ;;  %v3840_v9 = vadd.f32 %v3808_v10, %v3759_v23  ;;  %v3809_v51 = vmul.f32 %v11212_v39, %v3456_v44  ;;  %v3460_v15 = vpop.permute.xlu0 %3459  ;;  %v11222_v24 = vld [vmem:[#allocation55_spill] sm:$0xff] }
 0x30a   :  { %v4000_v55 = vadd.f32 %v9387_v41, %v3918_v7  ;;  %v3677_v33 = vadd.f32 %v11220_v19, %v3599_v20  ;;  %v3919_v2 = vadd.f32 %v11221_v27, %v3839_v63  ;;  %v3760_v13 = vadd.f32 %v9395_v61, %v3676_v31  ;;  %v9706_v20 = vld [vmem:[%s10600_s2] ss:$0 sm:$0xff]  ;;  %v11225_v61 = vld [vmem:[#allocation56_spill] sm:$0xff] }
 0x30b   :  { %v4082_v18 = vadd.f32 %v4050_v6, %v3999_v0  ;;  %v3600_v32 = vadd.f32 %v3568_v38, %v9419_v35  ;;  %v3920_v26 = vadd.f32 %v11222_v24, %v3840_v9  ;;  %v4052_v58 = vmul.f32 %v11216_v47, %v3456_v44  ;;  %v11224_v6 = vld [vmem:[#allocation27_spill] sm:$0xff]  ;;  %v9718_v63 = vld [vmem:[%s10601_s3] ss:$0 sm:$0xff] }
 0x30c   :  { %v4083_v36 = vadd.f32 %v4051_v28, %v4000_v55  ;;  %v3761_v41 = vadd.f32 %v11223_v46, %v3677_v33  ;;  %v4001_v7 = vadd.f32 %v11224_v6, %v3919_v2  ;;  %v3841_v35 = vadd.f32 %v3809_v51, %v3760_v13  ;;  %v11227_v55 = vld [vmem:[#allocation57_spill] sm:$0xff]  ;;  %v3464_v51 = vpop.permute.xlu1 %3463 }
 0x30d   :  { %v4114_v10 = vmul.f32 %v9706_v20, %v4082_v18  ;;  %v3678_v23 = vadd.f32 %v11225_v61, %v3600_v32  ;;  %v4002_v28 = vadd.f32 %v11226_v48, %v3920_v26  ;;  %v3569_v44 = vmul.f32 %v8900_v8, %v3460_v15  ;;  %v3468_v46 = vpop.permute.xlu0 %3467  ;;  %v11228_v6 = vld [vmem:[#allocation101_spill] sm:$0xff] }
 0x30e   :  { %v4115_v0 = vmul.f32 %v9706_v20, %v4083_v36  ;;  %v3810_v31 = vmul.f32 %v11212_v39, %v3460_v15  ;;  %v3921_v19 = vadd.f32 %v11227_v55, %v3841_v35  ;;  %v4084_v33 = vadd.f32 %v4052_v58, %v4001_v7  ;;  %v11229_v7 = vld [vmem:[#allocation59_spill] sm:$0xff]  ;;  %v11230_v55 = vld [vmem:[#allocation102_spill] sm:$0xff] }
 0x30f   :  { %v4146_v38 = vadd.f32 %v9718_v63, %v4114_v10  ;;  %v4053_v9 = vmul.f32 %v11216_v47, %v3460_v15  ;;  %v3601_v2 = vadd.f32 %v3569_v44, %v9422_v45  ;;  %v3762_v13 = vadd.f32 %v9426_v1, %v3678_v23 }
 0x310   :  { %v4147_v27 = vadd.f32 %v9718_v63, %v4115_v0  ;;  %v3842_v18 = vadd.f32 %v3810_v31, %v3761_v41  ;;  %v4116_v24 = vmul.f32 %v9706_v20, %v4084_v33  ;;  %v4003_v36 = vadd.f32 %v9435_v3, %v3921_v19  ;;  %v11231_v33 = vld [vmem:[#allocation81_spill] sm:$0xff] }
 0x311   :  { %v4178_v32 = vmax.f32 %v4146_v38, 0.0  ;;  %v4085_v26 = vadd.f32 %v4053_v9, %v4002_v28  ;;  %v3679_v58 = vadd.f32 %v11228_v6, %v3601_v2  ;;  %v3570_v61 = vmul.f32 %v8900_v8, %v3464_v51  ;;  %v11233_v6 = vld [vmem:[#allocation32_spill] sm:$0xff] }
 0x312   :  { %v4179_v10 = vmax.f32 %v4147_v27, 0.0  ;;  %v3922_v15 = vadd.f32 %v11229_v7, %v3842_v18  ;;  %v4148_v35 = vadd.f32 %v9718_v63, %v4116_v24  ;;  %v3811_v1 = vmul.f32 %v11212_v39, %v3464_v51  ;;  %v3472_v24 = vpop.permute.xlu1 %3471 }
 0x313   :  { %v4117_v45 = vmul.f32 %v9706_v20, %v4085_v26  ;;  %v4054_v41 = vmul.f32 %v11216_v47, %v3464_v51  ;;  %v3602_v23 = vadd.f32 %v3570_v61, %v9446_v43  ;;  %v3763_v3 = vadd.f32 %v9450_v53, %v3679_v58  ;;  %v11232_v53 = vld [vmem:[#allocation60_spill] sm:$0xff] }
 0x314   :  { %v4004_v0 = vadd.f32 %v9454_v22, %v3922_v15  ;;  %v3571_v48 = vmul.f32 %v8900_v8, %v3468_v46  ;;  %v4180_v28 = vmax.f32 %v4148_v35, 0.0  ;;  %v3843_v31 = vadd.f32 %v3811_v1, %v3762_v13  ;;  %v11234_v15 = vld [vmem:[#allocation37_spill] sm:$0xff] }
 0x315   :  { %v4149_v44 = vadd.f32 %v9718_v63, %v4117_v45  ;;  %v4086_v38 = vadd.f32 %v4054_v41, %v4003_v36  ;;  %v3680_v19 = vadd.f32 %v11230_v55, %v3602_v23  ;;  %v3812_v27 = vmul.f32 %v11212_v39, %v3468_v46 }
 0x316   :  { %v3603_v9 = vadd.f32 %v3571_v48, %v11231_v33  ;;  %v4055_v51 = vmul.f32 %v11216_v47, %v3468_v46  ;;  %v4210_v43 = vmax.f32 %v4178_v32, %v4180_v28  ;;  %v3923_v18 = vadd.f32 %v11232_v53, %v3843_v31  ;;  %v11235_v46 = vld [vmem:[#allocation61_spill] sm:$0xff] }
 0x317   :  { %v4181_v2 = vmax.f32 %v4149_v44, 0.0  ;;  %v4118_v22 = vmul.f32 %v9706_v20, %v4086_v38  ;;  %v9748_v26 = vmul.f32 %v8889_v11, %v9551_v49  ;;  %v3844_v13 = vadd.f32 %v3812_v27, %v3763_v3  ;;  %v11236_v44 = vld [vmem:[#allocation104_spill] sm:$0xff] }
 0x318   :  { %v4087_v36 = vadd.f32 %v4055_v51, %v4004_v0  ;;  %v3764_v58 = vadd.f32 %v11233_v6, %v3680_v19  ;;  %v4242_v7 = vcombine.high %v4210_v43, %v4210_v43  ;;  %v4249_v61 = vrot.slane %v4210_v43, %v11234_v15 }
 0x319   :  { %v4211_v35 = vmax.f32 %v4179_v10, %v4181_v2  ;;  %v9753_v32 = vadd.f32 %v9718_v63, %v4118_v22  ;;  %v3681_v45 = vadd.f32 %v11235_v46, %v3603_v9  ;;  %v4005_v41 = vadd.f32 %v9472_v5, %v3923_v18 }
 0x31a   :  { %v4119_v1 = vmul.f32 %v9706_v20, %v4087_v36  ;;  %v3572_v49 = vmul.f32 %v8900_v8, %v3472_v24  ;;  %v4256_v23 = vrot.slane %v4242_v7, %v11234_v15  ;;  %v4257_v3 = vcombine.high %v4249_v61, %v4249_v61  ;;  %v11237_v7 = vld [vmem:[#allocation103_spill] sm:$0xff] }
 0x31b   :  { %v5635_v0 = vrot.slane %v4249_v61, 9  ;;  %v4259_v48 = vcombine.high %v4211_v35, %v4211_v35  ;;  %v4266_v28 = vrot.slane %v4211_v35, %v11234_v15  ;;  %v3924_v10 = vadd.f32 %v11236_v44, %v3844_v13 }
 0x31c   :  { %v9763_v31 = vadd.f32 %v9718_v63, %v4119_v1  ;;  %v3604_v38 = vadd.f32 %v3572_v49, %v9486_v16  ;;  %v4258_v55 = vcombine.high %v4256_v23, %v4256_v23  ;;  %v5636_v19 = vrot.slane %v4257_v3, 9  ;;  %v3476_v1 = vpop.permute.xlu0 %3475 }
 0x31d   :  { %v5637_v33 = vrot.slane %v4256_v23, 9  ;;  %v4182_v5 = vmax.f32 %v9753_v32, 0.0  ;;  %v4770_v9 = vmax.f32 %v4249_v61, %v5635_v0  ;;  %v4273_v27 = vrot.slane %v4259_v48, %v11234_v15 }
 0x31e   :  { %v4274_v51 = vcombine.high %v4266_v28, %v4266_v28  ;;  %v5639_v43 = vrot.slane %v4266_v28, 9  ;;  %v5638_v2 = vrot.slane %v4258_v55, 9  ;;  %v4771_v53 = vmax.f32 %v4257_v3, %v5636_v19 }
 0x31f   :  { %v4772_v18 = vmax.f32 %v4256_v23, %v5637_v33  ;;  %v4275_v13 = vcombine.high %v4273_v27, %v4273_v27  ;;  %v5641_v6 = vrot.slane %v4273_v27, 9  ;;  %v3682_v16 = vadd.f32 %v11237_v7, %v3604_v38 }
 0x320   :  { %v5640_v36 = vrot.slane %v4274_v51, 9  ;;  %v4773_v35 = vmax.f32 %v4258_v55, %v5638_v2  ;;  %v9770_v46 = vrot.slane %v4771_v53, 7  ;;  %v3813_v32 = vmul.f32 %v11212_v39, %v3472_v24 }
 0x321   :  { %v4056_v61 = vmul.f32 %v11216_v47, %v3472_v24  ;;  %v5642_v49 = vrot.slane %v4275_v13, 9  ;;  %v4774_v0 = vmax.f32 %v4266_v28, %v5639_v43  ;;  %v3765_v23 = vadd.f32 %v9476_v52, %v3681_v45  ;;  %v11239_v28 = vld [vmem:[#allocation62_spill] sm:$0xff] }
 0x322   :  { %v4775_v48 = vmax.f32 %v4274_v51, %v5640_v36  ;;  %v9775_v3 = vrot.slane %v4773_v35, 7  ;;  %v4776_v44 = vmax.f32 %v4273_v27, %v5641_v6  ;;  %v3845_v19 = vadd.f32 %v3813_v32, %v3764_v58  ;;  %v3480_v27 = vpop.permute.xlu1 %3479  ;;  %v3484_v36 = vpop.permute.xlu0 %3483 }
 0x323   :  { %v4088_v33 = vadd.f32 %v4056_v61, %v4005_v41  ;;  %v4777_v22 = vmax.f32 %v4275_v13, %v5642_v49  ;;  %v4006_v55 = vadd.f32 %v9480_v57, %v3924_v10  ;;  %v3573_v2 = vmul.f32 %v8900_v8, %v3476_v1  ;;  %v11243_v49 = vld [vmem:[#allocation63_spill] sm:$0xff] }
 0x324   :  { %11238 = vst [vmem:[#allocation48_spill] sm:$0xff] %v9775_v3  ;;  %v9777_v38 = vrot.slane %v4775_v48, 7  ;;  %v9783_v24 = vsel %vm2164_vm2, %v9770_v46, %v4770_v9  ;;  %v3925_v51 = vadd.f32 %v11239_v28, %v3845_v19  ;;  %v3814_v45 = vmul.f32 %v11212_v39, %v3476_v1 }
 0x325   :  { %v4120_v52 = vmul.f32 %v9706_v20, %v4088_v33  ;;  %v9790_v58 = vsel %vm2164_vm2, %v9775_v3, %v4772_v18  ;;  %v3605_v41 = vadd.f32 %v3573_v2, %v9489_v30  ;;  %v4057_v10 = vmul.f32 %v11216_v47, %v3476_v1  ;;  %v11242_v18 = vld [vmem:[#allocation105_spill] sm:$0xff]  ;;  %v11244_v2 = vld [vmem:[#allocation106_spill] sm:$0xff] }
 0x326   :  { %11240 = vst [vmem:[#allocation50_spill] sm:$0xff] %v9790_v58  ;;  %v9794_v57 = vsel %vm2164_vm2, %v9777_v38, %v4774_v0  ;;  %v3846_v43 = vadd.f32 %v3814_v45, %v3765_v23  ;;  %v3766_v53 = vadd.f32 %v9493_v42, %v3682_v16  ;;  %v4007_v13 = vadd.f32 %v9498_v25, %v3925_v51  ;;  %v11245_v51 = vld [vmem:[#allocation109_spill] sm:$0xff] }
 0x327   :  { %v4152_v9 = vadd.f32 %v9718_v63, %v4120_v52  ;;  %v9801_v6 = vrot.slane %v4777_v22, 7  ;;  %v3683_v7 = vadd.f32 %v11242_v18, %v3605_v41  ;;  %v4089_v35 = vadd.f32 %v4057_v10, %v4006_v55  ;;  %v11246_v41 = vld [vmem:[#allocation107_spill] sm:$0xff] }
 0x328   :  { %v3574_v32 = vmul.f32 %v8900_v8, %v3480_v27  ;;  %v3926_v30 = vadd.f32 %v11243_v49, %v3846_v43  ;;  %v3815_v1 = vmul.f32 %v11212_v39, %v3480_v27  ;;  %v4058_v0 = vmul.f32 %v11216_v47, %v3480_v27  ;;  %v11249_v49 = vld [vmem:[#allocation65_spill] sm:$0xff] }
 0x329   :  { %11241 = vst [vmem:[#allocation96_spill] sm:$0xff] %v9801_v6  ;;  %v4184_v61 = vmax.f32 %v4152_v9, 0.0  ;;  %v4121_v48 = vmul.f32 %v9706_v20, %v4089_v35  ;;  %v3767_v25 = vadd.f32 %v9502_v40, %v3683_v7  ;;  %v3575_v22 = vmul.f32 %v8900_v8, %v3484_v36  ;;  %v11247_v9 = vld [vmem:[#allocation64_spill] sm:$0xff] }
 0x32a   :  { %v3606_v42 = vadd.f32 %v3574_v32, %v9510_v59  ;;  %v3847_v23 = vadd.f32 %v3815_v1, %v3766_v53  ;;  %v4090_v19 = vadd.f32 %v4058_v0, %v4007_v13  ;;  %v4008_v33 = vadd.f32 %v9506_v60, %v3926_v30 }
 0x32b   :  { %v4212_v16 = vmax.f32 %v4182_v5, %v4184_v61  ;;  %v4153_v55 = vadd.f32 %v9718_v63, %v4121_v48  ;;  %v3607_v52 = vadd.f32 %v3575_v22, %v11245_v51  ;;  %v3816_v45 = vmul.f32 %v11212_v39, %v3484_v36 }
 0x32c   :  { %v3684_v28 = vadd.f32 %v11244_v2, %v3606_v42  ;;  %v3927_v40 = vadd.f32 %v11246_v41, %v3847_v23  ;;  %v4122_v10 = vmul.f32 %v9706_v20, %v4090_v19  ;;  %v4059_v60 = vmul.f32 %v11216_v47, %v3484_v36 }
 0x32d   :  { %v4276_v27 = vcombine.high %v4212_v16, %v4212_v16  ;;  %v4283_v59 = vrot.slane %v4212_v16, %v11234_v15  ;;  %v4185_v5 = vmax.f32 %v4153_v55, 0.0  ;;  %v3685_v43 = vadd.f32 %v11247_v9, %v3607_v52 }
 0x32e   :  { %v3848_v53 = vadd.f32 %v3816_v45, %v3767_v25  ;;  %v9824_v35 = vadd.f32 %v9718_v63, %v4122_v10  ;;  %v11248_v32 = vmax.f32 %v9763_v31, 0.0  ;;  %v4091_v1 = vadd.f32 %v4059_v60, %v4008_v33  ;;  %v3488_v31 = vpop.permute.xlu1 %3487 }
 0x32f   :  { %v4290_v13 = vrot.slane %v4276_v27, %v11234_v15  ;;  %v4291_v18 = vcombine.high %v4283_v59, %v4283_v59  ;;  %v5643_v7 = vrot.slane %v4283_v59, 9  ;;  %v3768_v0 = vadd.f32 %v9514_v62, %v3684_v28 }
 0x330   :  { %v4213_v61 = vmax.f32 %v11248_v32, %v4185_v5  ;;  %v3928_v30 = vadd.f32 %v11249_v49, %v3848_v53  ;;  %v9832_v48 = vsel %vm2164_vm2, %v9801_v6, %v4776_v44  ;;  %v4123_v19 = vmul.f32 %v9706_v20, %v4091_v1 }
 0x331   :  { %11250 = vst [vmem:[#allocation98_spill] sm:$0xff] %v9832_v48  ;;  %v4292_v36 = vcombine.high %v4290_v13, %v4290_v13  ;;  %v5644_v42 = vrot.slane %v4291_v18, 9  ;;  %v5645_v25 = vrot.slane %v4290_v13, 9  ;;  %v4778_v22 = vmax.f32 %v4283_v59, %v5643_v7 }
 0x332   :  { %v4293_v16 = vcombine.high %v4213_v61, %v4213_v61  ;;  %v4300_v23 = vrot.slane %v4213_v61, %v11234_v15  ;;  %v4186_v33 = vmax.f32 %v9824_v35, 0.0  ;;  %v4009_v62 = vadd.f32 %v9518_v12, %v3927_v40 }
 0x333   :  { %v5646_v55 = vrot.slane %v4292_v36, 9  ;;  %v4779_v2 = vmax.f32 %v4291_v18, %v5644_v42  ;;  %v9840_v52 = vadd.f32 %v9718_v63, %v4123_v19  ;;  %v4780_v45 = vmax.f32 %v4290_v13, %v5645_v25  ;;  %v11252_v18 = vld [vmem:[#allocation72_spill] sm:$0xff]  ;;  %v3492_v13 = vpop.permute.xlu0 %3491  ;;  %v11253_v42 = vld [vmem:[#allocation66_spill] sm:$0xff] }
 0x334   :  { %v4307_v28 = vrot.slane %v4293_v16, %v11234_v15  ;;  %v4308_v44 = vcombine.high %v4300_v23, %v4300_v23  ;;  %v5647_v51 = vrot.slane %v4300_v23, 9  ;;  %v3576_v41 = vmul.f32 %v8900_v8, %v3488_v31 }
 0x335   :  { %v4781_v27 = vmax.f32 %v4292_v36, %v5646_v55  ;;  %v9842_v59 = vrot.slane %v4779_v2, 7  ;;  %v3817_v53 = vmul.f32 %v11212_v39, %v3488_v31  ;;  %v4187_v49 = vmax.f32 %v9840_v52, 0.0  ;;  %v11254_v2 = vld [vmem:[#allocation108_spill] sm:$0xff] }
 0x336   :  { %v4309_v10 = vcombine.high %v4307_v28, %v4307_v28  ;;  %v5648_v5 = vrot.slane %v4308_v44, 9  ;;  %v5649_v9 = vrot.slane %v4307_v28, 9  ;;  %v4782_v60 = vmax.f32 %v4300_v23, %v5647_v51  ;;  %v11255_v51 = vld [vmem:[#allocation85_spill] sm:$0xff] }
 0x337   :  { %v9848_v12 = vsel %vm2164_vm2, %v9842_v59, %v4778_v22  ;;  %v9850_v40 = vrot.slane %v4781_v27, 7  ;;  %v3608_v7 = vadd.f32 %v3576_v41, %v11252_v18  ;;  %v3849_v1 = vadd.f32 %v3817_v53, %v3768_v0  ;;  %v3500_v18 = vpop.permute.xlu0 %3499 }
 0x338   :  { %v5650_v32 = vrot.slane %v4309_v10, 9  ;;  %v4783_v61 = vmax.f32 %v4308_v44, %v5648_v5  ;;  %v4784_v36 = vmax.f32 %v4307_v28, %v5649_v9  ;;  %v4060_v16 = vmul.f32 %v11216_v47, %v3488_v31  ;;  %v3496_v28 = vpop.permute.xlu1 %3495 }
 0x339   :  { %11251 = vst [vmem:[#allocation97_spill] sm:$0xff] %v9850_v40  ;;  %v3686_v25 = vadd.f32 %v11253_v42, %v3608_v7  ;;  %v3769_v19 = vadd.f32 %v9525_v54, %v3685_v43  ;;  %v3929_v23 = vadd.f32 %v11254_v2, %v3849_v1  ;;  %v4010_v27 = vadd.f32 %v11255_v51, %v3928_v30 }
 0x33a   :  { %v4785_v22 = vmax.f32 %v4309_v10, %v5650_v32  ;;  %v9857_v55 = vrot.slane %v4783_v61, 7  ;;  %v4092_v41 = vadd.f32 %v4060_v16, %v4009_v62  ;;  %v3577_v44 = vmul.f32 %v8900_v8, %v3492_v13  ;;  %v11257_v10 = vld [vmem:[#allocation15_spill] sm:$0xff] }
 0x33b   :  { %v3818_v52 = vmul.f32 %v11212_v39, %v3492_v13  ;;  %v4061_v0 = vmul.f32 %v11216_v47, %v3492_v13  ;;  %v9866_v31 = vsel %vm2164_vm2, %v9850_v40, %v4780_v45  ;;  %v3770_v43 = vadd.f32 %v9533_v50, %v3686_v25  ;;  %v11259_v50 = vld [vmem:[#allocation110_spill] sm:$0xff]  ;;  %v11261_v25 = vld [vmem:[#allocation8_spill] sm:$0xff] }
 0x33c   :  { %11256 = vst [vmem:[#allocation52_spill] sm:$0xff] %v9866_v31  ;;  %v9870_v54 = vsel %vm2164_vm2, %v9857_v55, %v4782_v60  ;;  %v4011_v30 = vadd.f32 %v9540_v37, %v3929_v23  ;;  %v4124_v62 = vmul.f32 %v9706_v20, %v4092_v41  ;;  %v3609_v5 = vadd.f32 %v3577_v44, %v11257_v10  ;;  %v11260_v37 = vld [vmem:[#allocation68_spill] sm:$0xff]  ;;  %v11262_v41 = vld [vmem:[#allocation35_spill] sm:$0xff] }
 0x33d   :  { %v3850_v9 = vadd.f32 %v3818_v52, %v3769_v19  ;;  %v4093_v53 = vadd.f32 %v4061_v0, %v4010_v27  ;;  %v9876_v7 = vrot.slane %v4785_v22, 7  ;;  %v3578_v45 = vmul.f32 %v8900_v8, %v3496_v28  ;;  %v11263_v52 = vld [vmem:[#allocation113_spill] sm:$0xff] }
 0x33e   :  { %v3819_v13 = vmul.f32 %v11212_v39, %v3496_v28  ;;  %v4062_v60 = vmul.f32 %v11216_v47, %v3496_v28  ;;  %v4156_v32 = vadd.f32 %v9718_v63, %v4124_v62  ;;  %v3687_v61 = vadd.f32 %v11259_v50, %v3609_v5  ;;  %v11264_v28 = vld [vmem:[#allocation69_spill] sm:$0xff] }
 0x33f   :  { %11258 = vst [vmem:[#allocation58_spill] sm:$0xff] %v9876_v7  ;;  %v3930_v1 = vadd.f32 %v11260_v37, %v3850_v9  ;;  %v4125_v42 = vmul.f32 %v9706_v20, %v4093_v53  ;;  %v3610_v16 = vadd.f32 %v3578_v45, %v11261_v25  ;;  %v3579_v22 = vmul.f32 %v8900_v8, %v3500_v18  ;;  %v11265_v5 = vld [vmem:[#allocation13_spill] sm:$0xff] }
 0x340   :  { %v3851_v19 = vadd.f32 %v3819_v13, %v3770_v43  ;;  %v4094_v2 = vadd.f32 %v4062_v60, %v4011_v30  ;;  %v4188_v23 = vmax.f32 %v4156_v32, 0.0  ;;  %v3771_v27 = vadd.f32 %v9544_v17, %v3687_v61  ;;  %v3504_v13 = vpop.permute.xlu1 %3503  ;;  %v11266_v60 = vld [vmem:[#allocation71_spill] sm:$0xff]  ;;  %v11267_v50 = vld [vmem:[#allocation33_spill] sm:$0xff] }
 0x341   :  { %v4157_v51 = vadd.f32 %v9718_v63, %v4125_v42  ;;  %v4012_v44 = vadd.f32 %v11262_v41, %v3930_v1  ;;  %v3688_v0 = vadd.f32 %v11263_v52, %v3610_v16  ;;  %v3611_v9 = vadd.f32 %v3579_v22, %v11265_v5  ;;  %v11269_v41 = vld [vmem:[#allocation111_spill] sm:$0xff] }
 0x342   :  { %v3931_v62 = vadd.f32 %v11264_v28, %v3851_v19  ;;  %v4126_v10 = vmul.f32 %v9706_v20, %v4094_v2  ;;  %v4214_v43 = vmax.f32 %v4186_v33, %v4188_v23  ;;  %v3820_v53 = vmul.f32 %v11212_v39, %v3500_v18 }
 0x343   :  { %v4189_v30 = vmax.f32 %v4157_v51, 0.0  ;;  %v4063_v45 = vmul.f32 %v11216_v47, %v3500_v18  ;;  %v3689_v32 = vadd.f32 %v11266_v60, %v3611_v9  ;;  %v3772_v61 = vadd.f32 %v11267_v50, %v3688_v0  ;;  %v11271_v60 = vld [vmem:[#allocation67_spill] sm:$0xff] }
 0x344   :  { %v9899_v17 = vadd.f32 %v9718_v63, %v4126_v10  ;;  %v4013_v37 = vadd.f32 %v9559_v29, %v3931_v62  ;;  %v4310_v1 = vcombine.high %v4214_v43, %v4214_v43  ;;  %v4317_v42 = vrot.slane %v4214_v43, %v11234_v15 }
 0x345   :  { %v4215_v35 = vmax.f32 %v4187_v49, %v4189_v30  ;;  %v3852_v33 = vadd.f32 %v3820_v53, %v3771_v27  ;;  %v9907_v25 = vsel %vm2164_vm2, %v9876_v7, %v4784_v36  ;;  %v4095_v16 = vadd.f32 %v4063_v45, %v4012_v44  ;;  %v11270_v27 = vld [vmem:[#allocation17_spill] sm:$0xff] }
 0x346   :  { %11268 = vst [vmem:[#allocation51_spill] sm:$0xff] %v9907_v25  ;;  %v3580_v19 = vmul.f32 %v8900_v8, %v3504_v13  ;;  %v4324_v2 = vrot.slane %v4310_v1, %v11234_v15  ;;  %v4325_v22 = vcombine.high %v4317_v42, %v4317_v42  ;;  %v5651_v23 = vrot.slane %v4317_v42, 9 }
 0x347   :  { %v4327_v51 = vcombine.high %v4215_v35, %v4215_v35  ;;  %v4334_v29 = vrot.slane %v4215_v35, %v11234_v15  ;;  %v3932_v52 = vadd.f32 %v11269_v41, %v3852_v33  ;;  %v4127_v49 = vmul.f32 %v9706_v20, %v4095_v16 }
 0x348   :  { %v3612_v0 = vadd.f32 %v3580_v19, %v11270_v27  ;;  %v4326_v36 = vcombine.high %v4324_v2, %v4324_v2  ;;  %v5652_v28 = vrot.slane %v4325_v22, 9  ;;  %v5653_v62 = vrot.slane %v4324_v2, 9 }
 0x349   :  { %v3821_v44 = vmul.f32 %v11212_v39, %v3504_v13  ;;  %v4341_v10 = vrot.slane %v4327_v51, %v11234_v15  ;;  %v4342_v5 = vcombine.high %v4334_v29, %v4334_v29  ;;  %v5655_v9 = vrot.slane %v4334_v29, 9  ;;  %v3508_v51 = vpop.permute.xlu0 %3507 }
 0x34a   :  { %v9919_v43 = vadd.f32 %v9718_v63, %v4127_v49  ;;  %v5654_v30 = vrot.slane %v4326_v36, 9  ;;  %v4786_v53 = vmax.f32 %v4317_v42, %v5651_v23  ;;  %v4787_v45 = vmax.f32 %v4325_v22, %v5652_v28  ;;  %v11273_v23 = vld [vmem:[#allocation112_spill] sm:$0xff] }
 0x34b   :  { %v3690_v50 = vadd.f32 %v11271_v60, %v3612_v0  ;;  %v4788_v1 = vmax.f32 %v4324_v2, %v5653_v62  ;;  %v4343_v35 = vcombine.high %v4341_v10, %v4341_v10  ;;  %v5656_v33 = vrot.slane %v4342_v5, 9  ;;  %v11274_v0 = vld [vmem:[#allocation36_spill] sm:$0xff] }
 0x34c   :  { %v5657_v16 = vrot.slane %v4341_v10, 9  ;;  %v4789_v19 = vmax.f32 %v4326_v36, %v5654_v30  ;;  %v9922_v41 = vrot.slane %v4787_v45, 7  ;;  %v4790_v27 = vmax.f32 %v4334_v29, %v5655_v9 }
 0x34d   :  { %v3853_v18 = vadd.f32 %v3821_v44, %v3772_v61  ;;  %v5658_v7 = vrot.slane %v4343_v35, 9  ;;  %v4791_v25 = vmax.f32 %v4342_v5, %v5656_v33  ;;  %v4191_v49 = vmax.f32 %v9919_v43, 0.0  ;;  %v3512_v5 = vpop.permute.xlu1 %3511  ;;  %v11279_v33 = vld [vmem:[#allocation73_spill] sm:$0xff] }
 0x34e   :  { %v4064_v40 = vmul.f32 %v11216_v47, %v3504_v13  ;;  %v9926_v42 = vrot.slane %v4789_v19, 7  ;;  %v4792_v22 = vmax.f32 %v4341_v10, %v5657_v16  ;;  %v3773_v28 = vadd.f32 %v11274_v0, %v3689_v32  ;;  %v11280_v19 = vld [vmem:[#allocation74_spill] sm:$0xff]  ;;  %v11281_v0 = vld [vmem:[#allocation76_spill] sm:$0xff] }
 0x34f   :  { %v3933_v2 = vadd.f32 %v11273_v23, %v3853_v18  ;;  %v4793_v62 = vmax.f32 %v4343_v35, %v5658_v7  ;;  %v9930_v36 = vrot.slane %v4791_v25, 7  ;;  %v4014_v61 = vadd.f32 %v9569_v56, %v3932_v52  ;;  %v11276_v7 = vld [vmem:[#allocation86_spill] sm:$0xff]  ;;  %v11277_v25 = vld [vmem:[#allocation20_spill] sm:$0xff] }
 0x350   :  { %11272 = vst [vmem:[#allocation53_spill] sm:$0xff] %v9926_v42  ;;  %v4096_v30 = vadd.f32 %v4064_v40, %v4013_v37  ;;  %v9935_v29 = vsel %vm2164_vm2, %v9922_v41, %v4786_v53  ;;  %v3581_v44 = vmul.f32 %v8900_v8, %v3508_v51  ;;  %v3822_v13 = vmul.f32 %v11212_v39, %v3508_v51  ;;  %v3516_v53 = vpop.permute.xlu0 %3515 }
 0x351   :  { %v4065_v10 = vmul.f32 %v11216_v47, %v3508_v51  ;;  %v9942_v32 = vsel %vm2164_vm2, %v9926_v42, %v4788_v1  ;;  %v9946_v40 = vsel %vm2164_vm2, %v9930_v36, %v4790_v27  ;;  %v3774_v37 = vadd.f32 %v11276_v7, %v3690_v50  ;;  %v11284_v7 = vld [vmem:[#allocation70_spill] sm:$0xff] }
 0x352   :  { %11275 = vst [vmem:[#allocation99_spill] sm:$0xff] %v9942_v32  ;;  %v4128_v56 = vmul.f32 %v9706_v20, %v4096_v30  ;;  %v3613_v18 = vadd.f32 %v3581_v44, %v11277_v25  ;;  %v3854_v52 = vadd.f32 %v3822_v13, %v3773_v28  ;;  %v4015_v43 = vadd.f32 %v9577_v4, %v3933_v2  ;;  %v11282_v44 = vld [vmem:[#allocation34_spill] sm:$0xff] }
 0x353   :  { %v4097_v9 = vadd.f32 %v4065_v10, %v4014_v61  ;;  %v9952_v45 = vrot.slane %v4793_v62, 7  ;;  %v3582_v1 = vmul.f32 %v8900_v8, %v3512_v5  ;;  %v3823_v35 = vmul.f32 %v11212_v39, %v3512_v5 }
 0x354   :  { %v4160_v60 = vadd.f32 %v9718_v63, %v4128_v56  ;;  %v3691_v16 = vadd.f32 %v11279_v33, %v3613_v18  ;;  %v3934_v27 = vadd.f32 %v11280_v19, %v3854_v52  ;;  %v4066_v51 = vmul.f32 %v11216_v47, %v3512_v5  ;;  %v11285_v18 = vld [vmem:[#allocation12_spill] sm:$0xff]  ;;  %v11286_v52 = vld [vmem:[#allocation26_spill] sm:$0xff] }
 0x355   :  { %11278 = vst [vmem:[#allocation100_spill] sm:$0xff] %v9952_v45  ;;  %v4129_v50 = vmul.f32 %v9706_v20, %v4097_v9  ;;  %v3614_v4 = vadd.f32 %v3582_v1, %v11281_v0  ;;  %v3855_v2 = vadd.f32 %v3823_v35, %v3774_v37  ;;  %v3583_v28 = vmul.f32 %v8900_v8, %v3516_v53  ;;  %v11287_v33 = vld [vmem:[#allocation114_spill] sm:$0xff] }
 0x356   :  { %v4192_v23 = vmax.f32 %v4160_v60, 0.0  ;;  %v4098_v30 = vadd.f32 %v4066_v51, %v4015_v43  ;;  %v3775_v61 = vadd.f32 %v9584_v21, %v3691_v16  ;;  %v4016_v13 = vadd.f32 %v11282_v44, %v3934_v27 }
 0x357   :  { %v4161_v62 = vadd.f32 %v9718_v63, %v4129_v50  ;;  %v11283_v10 = vmax.f32 %v9899_v17, 0.0  ;;  %v3692_v25 = vadd.f32 %v11284_v7, %v3614_v4  ;;  %v3935_v5 = vadd.f32 %v11285_v18, %v3855_v2 }
 0x358   :  { %v3615_v9 = vadd.f32 %v3583_v28, %v11286_v52  ;;  %v4130_v37 = vmul.f32 %v9706_v20, %v4098_v30  ;;  %v3824_v1 = vmul.f32 %v11212_v39, %v3516_v53  ;;  %v4067_v43 = vmul.f32 %v11216_v47, %v3516_v53  ;;  %v3520_v30 = vpop.permute.xlu1 %3519 }
 0x359   :  { %v4216_v56 = vmax.f32 %v11283_v10, %v4192_v23  ;;  %v4193_v60 = vmax.f32 %v4161_v62, 0.0  ;;  %v3776_v17 = vadd.f32 %v9592_v34, %v3692_v25  ;;  %v4017_v2 = vadd.f32 %v9599_v14, %v3935_v5  ;;  %v11289_v34 = vld [vmem:[#allocation9_spill] sm:$0xff] }
 0x35a   :  { %v3693_v16 = vadd.f32 %v11287_v33, %v3615_v9  ;;  %v9978_v27 = vadd.f32 %v9718_v63, %v4130_v37  ;;  %v3856_v50 = vadd.f32 %v3824_v1, %v3775_v61  ;;  %v4099_v51 = vadd.f32 %v4067_v43, %v4016_v13 }
 0x35b   :  { %v4344_v35 = vcombine.high %v4216_v56, %v4216_v56  ;;  %v4351_v21 = vrot.slane %v4216_v56, %v11234_v15  ;;  %v4217_v19 = vmax.f32 %v4191_v49, %v4193_v60  ;;  %v9984_v53 = vsel %vm2164_vm2, %v9952_v45, %v4792_v22 }
 0x35c   :  { %11288 = vst [vmem:[#allocation54_spill] sm:$0xff] %v9984_v53  ;;  %v3936_v49 = vadd.f32 %v11289_v34, %v3856_v50  ;;  %v4131_v14 = vmul.f32 %v9706_v20, %v4099_v51  ;;  %v3584_v52 = vmul.f32 %v8900_v8, %v3520_v30 }
 0x35d   :  { %v4358_v23 = vrot.slane %v4344_v35, %v11234_v15  ;;  %v4359_v0 = vcombine.high %v4351_v21, %v4351_v21  ;;  %v5659_v4 = vrot.slane %v4351_v21, 9  ;;  %v4361_v28 = vcombine.high %v4217_v19, %v4217_v19 }
 0x35e   :  { %v4368_v62 = vrot.slane %v4217_v19, %v11234_v15  ;;  %v9995_v33 = vadd.f32 %v9718_v63, %v4131_v14  ;;  %v11290_v19 = vld [vmem:[#allocation79_spill] sm:$0xff] }
 0x35f   :  { %v4360_v44 = vcombine.high %v4358_v23, %v4358_v23  ;;  %v5660_v10 = vrot.slane %v4359_v0, 9  ;;  %v5661_v61 = vrot.slane %v4358_v23, 9  ;;  %v4375_v56 = vrot.slane %v4361_v28, %v11234_v15  ;;  %v3524_v28 = vpop.permute.xlu0 %3523 }
 0x360   :  { %v4376_v7 = vcombine.high %v4368_v62, %v4368_v62  ;;  %v5663_v25 = vrot.slane %v4368_v62, 9  ;;  %v4794_v22 = vmax.f32 %v4351_v21, %v5659_v4  ;;  %v3616_v50 = vadd.f32 %v3584_v52, %v11290_v19  ;;  %v11294_v52 = vld [vmem:[#allocation39_spill] sm:$0xff]  ;;  %v3528_v19 = vpop.permute.xlu1 %3527 }
 0x361   :  { %v5662_v18 = vrot.slane %v4360_v44, 9  ;;  %v4795_v5 = vmax.f32 %v4359_v0, %v5660_v10  ;;  %v4796_v9 = vmax.f32 %v4358_v23, %v5661_v61  ;;  %v4377_v60 = vcombine.high %v4375_v56, %v4375_v56 }
 0x362   :  { %v5664_v37 = vrot.slane %v4376_v7, 9  ;;  %v5665_v1 = vrot.slane %v4375_v56, 9  ;;  %v4798_v51 = vmax.f32 %v4368_v62, %v5663_v25  ;;  %v3825_v21 = vmul.f32 %v11212_v39, %v3520_v30 }
 0x363   :  { %v4797_v43 = vmax.f32 %v4360_v44, %v5662_v18  ;;  %v9992_v35 = vrot.slane %v4795_v5, 7  ;;  %v5666_v34 = vrot.slane %v4377_v60, 9  ;;  %v11292_v44 = vld [vmem:[#allocation6_spill] sm:$0xff]  ;;  %v4068_v5 = vmul.f32 %v11216_v47, %v3520_v30 }
 0x364   :  { %v4799_v13 = vmax.f32 %v4376_v7, %v5664_v37  ;;  %v4800_v4 = vmax.f32 %v4375_v56, %v5665_v1  ;;  %v3694_v10 = vadd.f32 %v11292_v44, %v3616_v50  ;;  %v3857_v18 = vadd.f32 %v3825_v21, %v3776_v17  ;;  %v11293_v7 = vld [vmem:[#allocation38_spill] sm:$0xff]  ;;  %v11297_v1 = vld [vmem:[#allocation77_spill] sm:$0xff] }
 0x365   :  { %v10001_v23 = vsel %vm2164_vm2, %v9992_v35, %v4794_v22  ;;  %v10003_v0 = vrot.slane %v4797_v43, 7  ;;  %v4801_v61 = vmax.f32 %v4377_v60, %v5666_v34  ;;  %v4195_v62 = vmax.f32 %v9995_v33, 0.0  ;;  %v11296_v17 = vld [vmem:[#allocation10_spill] sm:$0xff]  ;;  %v11298_v33 = vld [vmem:[#allocation40_spill] sm:$0xff]  ;;  %v3532_v34 = vpop.permute.xlu0 %3531  ;;  %v11300_v44 = vld [vmem:[#allocation41_spill] sm:$0xff] }
 0x366   :  { %v10006_v14 = vrot.slane %v4799_v13, 7  ;;  %v3777_v25 = vadd.f32 %v11293_v7, %v3693_v16  ;;  %v4018_v37 = vadd.f32 %v11294_v52, %v3936_v49  ;;  %v3585_v22 = vmul.f32 %v8900_v8, %v3524_v28  ;;  %v11301_v52 = vld [vmem:[#allocation7_spill] sm:$0xff] }
 0x367   :  { %11291 = vst [vmem:[#allocation55_spill] sm:$0xff] %v10003_v0  ;;  %v10015_v56 = vsel %vm2164_vm2, %v10003_v0, %v4796_v9  ;;  %v3937_v60 = vadd.f32 %v11296_v17, %v3857_v18  ;;  %v4100_v30 = vadd.f32 %v4068_v5, %v4017_v2  ;;  %v3826_v16 = vmul.f32 %v11212_v39, %v3524_v28  ;;  %v11304_v0 = vld [vmem:[#allocation42_spill] sm:$0xff] }
 0x368   :  { %11295 = vst [vmem:[#allocation78_spill] sm:$0xff] %v10015_v56  ;;  %v10019_v13 = vsel %vm2164_vm2, %v10006_v14, %v4798_v51  ;;  %v3617_v43 = vadd.f32 %v3585_v22, %v11297_v1  ;;  %v4069_v49 = vmul.f32 %v11216_v47, %v3524_v28  ;;  %v3778_v50 = vadd.f32 %v11298_v33, %v3694_v10  ;;  %v11302_v28 = vld [vmem:[#allocation80_spill] sm:$0xff]  ;;  %v11303_v33 = vld [vmem:[#allocation2_spill] sm:$0xff] }
 0x369   :  { %v10026_v21 = vrot.slane %v4801_v61, 7  ;;  %v4132_v9 = vmul.f32 %v9706_v20, %v4100_v30  ;;  %v4019_v7 = vadd.f32 %v11300_v44, %v3937_v60  ;;  %v3586_v51 = vmul.f32 %v8900_v8, %v3528_v19 }
 0x36a   :  { %v3695_v18 = vadd.f32 %v11301_v52, %v3617_v43  ;;  %v3858_v2 = vadd.f32 %v3826_v16, %v3777_v25  ;;  %v4101_v5 = vadd.f32 %v4069_v49, %v4018_v37  ;;  %v3827_v22 = vmul.f32 %v11212_v39, %v3528_v19  ;;  %v11305_v25 = vld [vmem:[#allocation18_spill] sm:$0xff]  ;;  %v11306_v49 = vld [vmem:[#allocation28_spill] sm:$0xff] }
 0x36b   :  { %11299 = vst [vmem:[#allocation27_spill] sm:$0xff] %v10026_v21  ;;  %v4164_v17 = vadd.f32 %v9718_v63, %v4132_v9  ;;  %v3618_v1 = vadd.f32 %v3586_v51, %v11302_v28  ;;  %v4070_v10 = vmul.f32 %v11216_v47, %v3528_v19  ;;  %v3587_v61 = vmul.f32 %v8900_v8, %v3532_v34  ;;  %v11307_v51 = vld [vmem:[#allocation16_spill] sm:$0xff]  ;;  %v11308_v19 = vld [vmem:[#allocation89_spill] sm:$0xff] }
 0x36c   :  { %v3938_v30 = vadd.f32 %v11303_v33, %v3858_v2  ;;  %v4133_v60 = vmul.f32 %v9706_v20, %v4101_v5  ;;  %v3859_v44 = vadd.f32 %v3827_v22, %v3778_v50  ;;  %v3779_v56 = vadd.f32 %v11304_v0, %v3695_v18  ;;  %v11310_v0 = vld [vmem:[#allocation14_spill] sm:$0xff]  ;;  %v11312_v33 = vld [vmem:[#allocation44_spill] sm:$0xff] }
 0x36d   :  { %v4196_v43 = vmax.f32 %v4164_v17, 0.0  ;;  %v3696_v37 = vadd.f32 %v11305_v25, %v3618_v1  ;;  %v4102_v16 = vadd.f32 %v4070_v10, %v4019_v7  ;;  %v3619_v52 = vadd.f32 %v3587_v61, %v11306_v49  ;;  %v3536_v7 = vpop.permute.xlu1 %3535  ;;  %v11311_v10 = vld [vmem:[#allocation43_spill] sm:$0xff] }
 0x36e   :  { %v4165_v9 = vadd.f32 %v9718_v63, %v4133_v60  ;;  %v3939_v28 = vadd.f32 %v11307_v51, %v3859_v44  ;;  %v4020_v45 = vadd.f32 %v11308_v19, %v3938_v30  ;;  %v3828_v53 = vmul.f32 %v11212_v39, %v3532_v34  ;;  %v11315_v19 = vld [vmem:[#allocation82_spill] sm:$0xff] }
 0x36f   :  { %v11309_v2 = vmax.f32 %v9978_v27, 0.0  ;;  %v4134_v50 = vmul.f32 %v9706_v20, %v4102_v16  ;;  %v3697_v18 = vadd.f32 %v11310_v0, %v3619_v52  ;;  %v4071_v22 = vmul.f32 %v11216_v47, %v3532_v34  ;;  %v11314_v34 = vld [vmem:[#allocation11_spill] sm:$0xff] }
 0x370   :  { %v4197_v17 = vmax.f32 %v4165_v9, 0.0  ;;  %v3860_v1 = vadd.f32 %v3828_v53, %v3779_v56  ;;  %v3780_v61 = vadd.f32 %v11311_v10, %v3696_v37  ;;  %v4021_v60 = vadd.f32 %v11312_v33, %v3939_v28 }
 0x371   :  { %v4218_v5 = vmax.f32 %v11309_v2, %v4196_v43  ;;  %v10055_v25 = vadd.f32 %v9718_v63, %v4134_v50  ;;  %v4103_v27 = vadd.f32 %v4071_v22, %v4020_v45  ;;  %v10059_v43 = vsel %vm2164_vm2, %v10026_v21, %v4800_v4  ;;  %v3540_v4 = vpop.permute.xlu0 %3539  ;;  %v3544_v3 = vpop.permute.xlu1 %3543 }
 0x372   :  { %11313 = vst [vmem:[#allocation56_spill] sm:$0xff] %v10059_v43  ;;  %v4219_v16 = vmax.f32 %v4195_v62, %v4197_v17  ;;  %v3940_v49 = vadd.f32 %v11314_v34, %v3860_v1  ;;  %v3588_v53 = vmul.f32 %v8900_v8, %v3536_v7  ;;  %v3829_v9 = vmul.f32 %v11212_v39, %v3536_v7  ;;  %v11316_v34 = vld [vmem:[#allocation4_spill] sm:$0xff] }
 0x373   :  { %v4378_v44 = vcombine.high %v4218_v5, %v4218_v5  ;;  %v4385_v30 = vrot.slane %v4218_v5, %v11234_v15  ;;  %v4135_v45 = vmul.f32 %v9706_v20, %v4103_v27  ;;  %v4198_v0 = vmax.f32 %v10055_v25, 0.0 }
 0x374   :  { %v4395_v51 = vcombine.high %v4219_v16, %v4219_v16  ;;  %v4402_v28 = vrot.slane %v4219_v16, %v11234_v15  ;;  %v3620_v2 = vadd.f32 %v3588_v53, %v11315_v19  ;;  %v3861_v31 = vadd.f32 %v3829_v9, %v3780_v61  ;;  %v11320_v61 = vld [vmem:[#allocation92_spill] sm:$0xff] }
 0x375   :  { %v4392_v56 = vrot.slane %v4378_v44, %v11234_v15  ;;  %v4393_v37 = vcombine.high %v4385_v30, %v4385_v30  ;;  %v5667_v52 = vrot.slane %v4385_v30, 9  ;;  %v10071_v10 = vadd.f32 %v9718_v63, %v4135_v45 }
 0x376   :  { %v4409_v22 = vrot.slane %v4395_v51, %v11234_v15  ;;  %v4410_v17 = vcombine.high %v4402_v28, %v4402_v28  ;;  %v5671_v1 = vrot.slane %v4402_v28, 9  ;;  %v3698_v27 = vadd.f32 %v11316_v34, %v3620_v2 }
 0x377   :  { %v4394_v5 = vcombine.high %v4392_v56, %v4392_v56  ;;  %v5668_v62 = vrot.slane %v4393_v37, 9  ;;  %v5669_v50 = vrot.slane %v4392_v56, 9  ;;  %v4802_v44 = vmax.f32 %v4385_v30, %v5667_v52  ;;  %v3548_v30 = vpop.permute.xlu0 %3547 }
 0x378   :  { %v4411_v53 = vcombine.high %v4409_v22, %v4409_v22  ;;  %v5672_v19 = vrot.slane %v4410_v17, 9  ;;  %v5673_v43 = vrot.slane %v4409_v22, 9  ;;  %v4806_v25 = vmax.f32 %v4402_v28, %v5671_v1 }
 0x379   :  { %v5670_v33 = vrot.slane %v4394_v5, 9  ;;  %v4803_v16 = vmax.f32 %v4393_v37, %v5668_v62  ;;  %v4804_v21 = vmax.f32 %v4392_v56, %v5669_v50  ;;  %v4199_v48 = vmax.f32 %v10071_v10, 0.0  ;;  %v11318_v56 = vld [vmem:[#allocation19_spill] sm:$0xff] }
 0x37a   :  { %v5674_v51 = vrot.slane %v4411_v53, 9  ;;  %v4807_v6 = vmax.f32 %v4410_v17, %v5672_v19  ;;  %v4072_v45 = vmul.f32 %v11216_v47, %v3536_v7  ;;  %v4808_v52 = vmax.f32 %v4409_v22, %v5673_v43  ;;  %v11319_v62 = vld [vmem:[#allocation91_spill] sm:$0xff]  ;;  %v11323_v22 = vld [vmem:[#allocation84_spill] sm:$0xff] }
 0x37b   :  { %v4805_v42 = vmax.f32 %v4394_v5, %v5670_v33  ;;  %v10074_v32 = vrot.slane %v4803_v16, 7  ;;  %v3941_v2 = vadd.f32 %v11318_v56, %v3861_v31  ;;  %v3781_v50 = vadd.f32 %v11319_v62, %v3697_v18  ;;  %v11324_v16 = vld [vmem:[#allocation46_spill] sm:$0xff]  ;;  %v11327_v56 = vld [vmem:[#allocation75_spill] sm:$0xff] }
 0x37c   :  { %v4809_v5 = vmax.f32 %v4411_v53, %v5674_v51  ;;  %v10082_v33 = vrot.slane %v4807_v6, 7  ;;  %v4104_v28 = vadd.f32 %v4072_v45, %v4021_v60  ;;  %v4022_v9 = vadd.f32 %v11320_v61, %v3940_v49  ;;  %v11322_v60 = vld [vmem:[#allocation45_spill] sm:$0xff]  ;;  %v10111_v51 = vpop.permute.xlu0 %3555 }
 0x37d   :  { %v10078_v37 = vrot.slane %v4805_v42, 7  ;;  %v10087_v17 = vsel %vm2164_vm2, %v10074_v32, %v4802_v44  ;;  %v3589_v7 = vmul.f32 %v8900_v8, %v3540_v4  ;;  %v3830_v42 = vmul.f32 %v11212_v39, %v3540_v4  ;;  %v11326_v45 = vld [vmem:[#allocation21_spill] sm:$0xff] }
 0x37e   :  { %v4073_v43 = vmul.f32 %v11216_v47, %v3540_v4  ;;  %v10098_v6 = vsel %vm2164_vm2, %v10082_v33, %v4806_v25  ;;  %v4136_v18 = vmul.f32 %v9706_v20, %v4104_v28  ;;  %v3782_v49 = vadd.f32 %v11322_v60, %v3698_v27  ;;  %v10109_v25 = vpop.permute.xlu1 %3551  ;;  %v11328_v28 = vld [vmem:[#allocation31_spill] sm:$0xff] }
 0x37f   :  { %11317 = vst [vmem:[#allocation29_spill] sm:$0xff] %v10078_v37  ;;  %v10094_v31 = vsel %vm2164_vm2, %v10078_v37, %v4804_v21  ;;  %v3621_v1 = vadd.f32 %v3589_v7, %v11323_v22  ;;  %v3862_v10 = vadd.f32 %v3830_v42, %v3781_v50  ;;  %v4023_v34 = vadd.f32 %v11324_v16, %v3941_v2  ;;  %v11330_v22 = vld [vmem:[#allocation47_spill] sm:$0xff] }
 0x380   :  { %11321 = vst [vmem:[#allocation57_spill] sm:$0xff] %v10094_v31  ;;  %v4105_v44 = vadd.f32 %v4073_v43, %v4022_v9  ;;  %v10104_v53 = vrot.slane %v4809_v5, 7  ;;  %v4168_v4 = vadd.f32 %v9718_v63, %v4136_v18  ;;  %v3590_v21 = vmul.f32 %v8900_v8, %v3544_v3  ;;  %v11329_v18 = vld [vmem:[#allocation90_spill] sm:$0xff]  ;;  %v11333_v37 = vld [vmem:[#allocation83_spill] sm:$0xff] }
 0x381   :  { %v3831_v19 = vmul.f32 %v11212_v39, %v3544_v3  ;;  %v3699_v27 = vadd.f32 %v11326_v45, %v3621_v1  ;;  %v3942_v62 = vadd.f32 %v11327_v56, %v3862_v10  ;;  %v4074_v2 = vmul.f32 %v11216_v47, %v3544_v3  ;;  %v11331_v45 = vld [vmem:[#allocation22_spill] sm:$0xff]  ;;  %v11332_v56 = vld [vmem:[#allocation24_spill] sm:$0xff]  ;;  %v11339_v31 = vld [vmem:[#allocation87_spill] sm:$0xff] }
 0x382   :  { %11325 = vst [vmem:[#allocation101_spill] sm:$0xff] %v10104_v53  ;;  %v4137_v50 = vmul.f32 %v9706_v20, %v4105_v44  ;;  %v4200_v5 = vmax.f32 %v4168_v4, 0.0  ;;  %v3622_v61 = vadd.f32 %v3590_v21, %v11328_v28  ;;  %v3591_v7 = vmul.f32 %v8900_v8, %v3548_v30  ;;  %v10133_v28 = vpop.permute.xlu0 %3633 }
 0x383   :  { %v3863_v9 = vadd.f32 %v3831_v19, %v3782_v49  ;;  %v4106_v43 = vadd.f32 %v4074_v2, %v4023_v34  ;;  %v3783_v60 = vadd.f32 %v11329_v18, %v3699_v27  ;;  %v4024_v16 = vadd.f32 %v11330_v22, %v3942_v62  ;;  %v11334_v27 = vld [vmem:[#allocation23_spill] sm:$0xff]  ;;  %v11335_v62 = vld [vmem:[#allocation93_spill] sm:$0xff] }
 0x384   :  { %v4169_v42 = vadd.f32 %v9718_v63, %v4137_v50  ;;  %v4220_v1 = vmax.f32 %v4198_v0, %v4200_v5  ;;  %v3700_v10 = vadd.f32 %v11331_v45, %v3622_v61  ;;  %v3623_v3 = vadd.f32 %v3591_v7, %v11333_v37  ;;  %v10131_v5 = vpop.permute.xlu1 %3628 }
 0x385   :  { %v3943_v44 = vadd.f32 %v11332_v56, %v3863_v9  ;;  %v4138_v21 = vmul.f32 %v9706_v20, %v4106_v43  ;;  %v3832_v49 = vmul.f32 %v11212_v39, %v3548_v30  ;;  %v4075_v19 = vmul.f32 %v11216_v47, %v3548_v30  ;;  %v11336_v43 = vld [vmem:[#allocation3_spill] sm:$0xff] }
 0x386   :  { %v4201_v4 = vmax.f32 %v4169_v42, 0.0  ;;  %v4412_v50 = vcombine.high %v4220_v1, %v4220_v1  ;;  %v4419_v34 = vrot.slane %v4220_v1, %v11234_v15  ;;  %v3701_v2 = vadd.f32 %v11334_v27, %v3623_v3 }
 0x387   :  { %v3784_v0 = vadd.f32 %v11335_v62, %v3700_v10  ;;  %v10136_v37 = vadd.f32 %v9718_v63, %v4138_v21  ;;  %v3864_v20 = vadd.f32 %v3832_v49, %v3783_v60  ;;  %v4107_v9 = vadd.f32 %v4075_v19, %v4024_v16  ;;  %v11338_v10 = vld [vmem:[#allocation25_spill] sm:$0xff] }
 0x388   :  { %v4221_v61 = vmax.f32 %v4199_v48, %v4201_v4  ;;  %v4426_v7 = vrot.slane %v4412_v50, %v11234_v15  ;;  %v4427_v30 = vcombine.high %v4419_v34, %v4419_v34  ;;  %v5675_v42 = vrot.slane %v4419_v34, 9  ;;  %v3714_v62 = vpop.permute.xlu1 %3713 }
 0x389   :  { %v4025_v18 = vadd.f32 %v11336_v43, %v3943_v44  ;;  %v10142_v22 = vsel %vm2164_vm2, %v10104_v53, %v4808_v52  ;;  %v3944_v48 = vadd.f32 %v11338_v10, %v3864_v20  ;;  %v10151_v44 = vld [vmem:[%s10600_s2] ss:$0 sm:$0xff]  ;;  %v3592_v27 = vmul.f32 %v8900_v8, %v10109_v25 }
 0x38a   :  { %11337 = vst [vmem:[#allocation59_spill] sm:$0xff] %v10142_v22  ;;  %v4429_v1 = vcombine.high %v4221_v61, %v4221_v61  ;;  %v4436_v45 = vrot.slane %v4221_v61, %v11234_v15  ;;  %v4428_v56 = vcombine.high %v4426_v7, %v4426_v7  ;;  %v5676_v63 = vrot.slane %v4427_v30, 9  ;;  %v3718_v61 = vpop.permute.xlu0 %3717 }
 0x38b   :  { %v5677_v3 = vrot.slane %v4426_v7, 9  ;;  %v4139_v52 = vmul.f32 %v10151_v44, %v4107_v9  ;;  %v4810_v19 = vmax.f32 %v4419_v34, %v5675_v42  ;;  %v10161_v9 = vld [vmem:[%s10601_s3] ss:$0 sm:$0xff]  ;;  %v3624_v58 = vadd.f32 %v3592_v27, %v11339_v31 }
 0x38c   :  { %v4443_v16 = vrot.slane %v4429_v1, %v11234_v15  ;;  %v4444_v4 = vcombine.high %v4436_v45, %v4436_v45  ;;  %v5679_v21 = vrot.slane %v4436_v45, 9  ;;  %v5678_v49 = vrot.slane %v4428_v56, 9 }
 0x38d   :  { %v4811_v50 = vmax.f32 %v4427_v30, %v5676_v63  ;;  %v4812_v20 = vmax.f32 %v4426_v7, %v5677_v3  ;;  %v4171_v34 = vadd.f32 %v10161_v9, %v4139_v52  ;;  %v4076_v3 = vmul.f32 %v11216_v47, %v10109_v25 }
 0x38e   :  { %v4445_v43 = vcombine.high %v4443_v16, %v4443_v16  ;;  %v5680_v1 = vrot.slane %v4444_v4, 9  ;;  %v5681_v10 = vrot.slane %v4443_v16, 9  ;;  %v4813_v60 = vmax.f32 %v4428_v56, %v5678_v49 }
 0x38f   :  { %v10156_v53 = vrot.slane %v4811_v50, 7  ;;  %v4814_v22 = vmax.f32 %v4436_v45, %v5679_v21  ;;  %v3833_v45 = vmul.f32 %v11212_v39, %v10109_v25  ;;  %v4203_v52 = vmax.f32 %v4171_v34, 0.0  ;;  %v11346_v34 = vld [vmem:[#allocation88_spill] sm:$0xff] }
 0x390   :  { %v5682_v30 = vrot.slane %v4445_v43, 9  ;;  %v4815_v42 = vmax.f32 %v4444_v4, %v5680_v1  ;;  %v4816_v63 = vmax.f32 %v4443_v16, %v5681_v10  ;;  %v10169_v56 = vrot.slane %v4813_v60, 7  ;;  %v11341_v4 = vld [vmem:[#allocation5_spill] sm:$0xff]  ;;  %v3799_v1 = vpop.permute.xlu0 %3798 }
 0x391   :  { %v10167_v7 = vsel %vm2164_vm2, %v10156_v53, %v4810_v19  ;;  %v3785_v16 = vadd.f32 %v11341_v4, %v3701_v2  ;;  %v3865_v50 = vadd.f32 %v3833_v45, %v3784_v0  ;;  %v4108_v31 = vadd.f32 %v4076_v3, %v4025_v18  ;;  %v3795_v19 = vpop.permute.xlu1 %3794  ;;  %v11344_v0 = vld [vmem:[#allocation94_spill] sm:$0xff] }
 0x392   :  { %11340 = vst [vmem:[#allocation102_spill] sm:$0xff] %v10169_v56  ;;  %v4817_v21 = vmax.f32 %v4445_v43, %v5682_v30  ;;  %v10175_v49 = vrot.slane %v4815_v42, 7  ;;  %v4026_v27 = vadd.f32 %v9748_v26, %v3944_v48  ;;  %v3593_v60 = vmul.f32 %v8900_v8, %v10111_v51  ;;  %v11345_v48 = vld [vmem:[#allocation49_spill] sm:$0xff] }
 0x393   :  { %v10183_v10 = vsel %vm2164_vm2, %v10169_v56, %v4812_v20  ;;  %v3834_v43 = vmul.f32 %v11212_v39, %v10111_v51  ;;  %v4077_v2 = vmul.f32 %v11216_v47, %v10111_v51  ;;  %v4140_v8 = vmul.f32 %v10151_v44, %v4108_v31  ;;  %v11348_v56 = vld [vmem:[#allocation95_spill] sm:$0xff] }
 0x394   :  { %11342 = vst [vmem:[#allocation81_spill] sm:$0xff] %v10183_v10  ;;  %v10185_v25 = vrot.slane %v4817_v21, 7  ;;  %v10193_v26 = vsel %vm2164_vm2, %v10175_v49, %v4814_v22  ;;  %v3670_v18 = vmul.f32 %v11344_v0, %v10131_v5  ;;  %v3913_v20 = vmul.f32 %v11345_v48, %v10131_v5 }
 0x395   :  { %v3625_v30 = vadd.f32 %v3593_v60, %v11346_v34  ;;  %v3866_v42 = vadd.f32 %v3834_v43, %v3785_v16  ;;  %v4109_v45 = vadd.f32 %v4077_v2, %v4026_v27  ;;  %v3671_v3 = vmul.f32 %v11344_v0, %v10133_v28  ;;  %v3874_v0 = vpop.permute.xlu1 %3873  ;;  %v3879_v34 = vpop.permute.xlu0 %3878 }
 0x396   :  { %11343 = vst [vmem:[#allocation60_spill] sm:$0xff] %v10185_v25  ;;  %v10205_v51 = vsel %vm2164_vm2, %v10185_v25, %v4816_v63  ;;  %v4172_v22 = vadd.f32 %v10161_v9, %v4140_v8  ;;  %v3702_v21 = vadd.f32 %v3670_v18, %v3624_v58  ;;  %v3914_v4 = vmul.f32 %v11345_v48, %v10133_v28 }
 0x397   :  { %11347 = vst [vmem:[#allocation32_spill] sm:$0xff] %v10205_v51  ;;  %v4141_v31 = vmul.f32 %v10151_v44, %v4109_v45  ;;  %v3945_v5 = vadd.f32 %v3913_v20, %v3865_v50  ;;  %v3754_v60 = vmul.f32 %v11348_v56, %v3714_v62  ;;  %v3995_v16 = vmul.f32 %v8889_v11, %v3714_v62 }
 0x398   :  { %v4204_v27 = vmax.f32 %v4172_v22, 0.0  ;;  %v3703_v43 = vadd.f32 %v3671_v3, %v3625_v30  ;;  %v3755_v2 = vmul.f32 %v11348_v56, %v3718_v61  ;;  %v3996_v63 = vmul.f32 %v8889_v11, %v3718_v61 }
 0x399   :  { %v4173_v58 = vadd.f32 %v10161_v9, %v4141_v31  ;;  %v3946_v8 = vadd.f32 %v3914_v4, %v3866_v42  ;;  %v3786_v18 = vadd.f32 %v3754_v60, %v3702_v21  ;;  %v3835_v28 = vmul.f32 %v11212_v39, %v3795_v19 }
 0x39a   :  { %v11349_v50 = vmax.f32 %v10136_v37, 0.0  ;;  %v4027_v45 = vadd.f32 %v3995_v16, %v3945_v5  ;;  %v3787_v25 = vadd.f32 %v3755_v2, %v3703_v43  ;;  %v4078_v62 = vmul.f32 %v11216_v47, %v3795_v19  ;;  %v3957_v2 = vpop.permute.xlu1 %3956 }
 0x39b   :  { %v4205_v30 = vmax.f32 %v4173_v58, 0.0  ;;  %v4028_v3 = vadd.f32 %v3996_v63, %v3946_v8  ;;  %v3836_v56 = vmul.f32 %v11212_v39, %v3799_v1  ;;  %v4079_v61 = vmul.f32 %v11216_v47, %v3799_v1  ;;  %v3961_v39 = vpop.permute.xlu0 %3960 }
 0x39c   :  { %v4222_v20 = vmax.f32 %v11349_v50, %v4204_v27  ;;  %v4110_v42 = vadd.f32 %v4078_v62, %v4027_v45  ;;  %v3915_v21 = vmul.f32 %v11345_v48, %v3874_v0  ;;  %v3867_v60 = vadd.f32 %v3835_v28, %v3786_v18 }
 0x39d   :  { %v4223_v4 = vmax.f32 %v4203_v52, %v4205_v30  ;;  %v3868_v37 = vadd.f32 %v3836_v56, %v3787_v25  ;;  %v4111_v27 = vadd.f32 %v4079_v61, %v4028_v3  ;;  %v3916_v8 = vmul.f32 %v11345_v48, %v3879_v34 }
 0x39e   :  { %v4446_v22 = vcombine.high %v4222_v20, %v4222_v20  ;;  %v4453_v31 = vrot.slane %v4222_v20, %v11234_v15  ;;  %v4142_v43 = vmul.f32 %v10151_v44, %v4110_v42  ;;  %v3947_v25 = vadd.f32 %v3915_v21, %v3867_v60 }
 0x39f   :  { %v4463_v63 = vcombine.high %v4223_v4, %v4223_v4  ;;  %v4470_v1 = vrot.slane %v4223_v4, %v11234_v15  ;;  %v4143_v58 = vmul.f32 %v10151_v44, %v4111_v27  ;;  %v4040_v27 = vpop.permute.xlu1 %4039 }
 0x3a0   :  { %v4460_v5 = vrot.slane %v4446_v22, %v11234_v15  ;;  %v4461_v16 = vcombine.high %v4453_v31, %v4453_v31  ;;  %v5683_v19 = vrot.slane %v4453_v31, 9  ;;  %v10231_v45 = vadd.f32 %v10161_v9, %v4142_v43 }
 0x3a1   :  { %v4477_v28 = vrot.slane %v4463_v63, %v11234_v15  ;;  %v4478_v50 = vcombine.high %v4470_v1, %v4470_v1  ;;  %v5687_v20 = vrot.slane %v4470_v1, 9  ;;  %v10234_v56 = vadd.f32 %v10161_v9, %v4143_v58  ;;  %v4044_v63 = vpop.permute.xlu0 %4043 }
 0x3a2   :  { %v4462_v0 = vcombine.high %v4460_v5, %v4460_v5  ;;  %v5684_v52 = vrot.slane %v4461_v16, 9  ;;  %v5685_v18 = vrot.slane %v4460_v5, 9  ;;  %v4818_v30 = vmax.f32 %v4453_v31, %v5683_v19 }
 0x3a3   :  { %v4479_v22 = vcombine.high %v4477_v28, %v4477_v28  ;;  %v5688_v48 = vrot.slane %v4478_v50, 9  ;;  %v5689_v34 = vrot.slane %v4477_v28, 9  ;;  %v4822_v21 = vmax.f32 %v4470_v1, %v5687_v20 }
 0x3a4   :  { %v5686_v62 = vrot.slane %v4462_v0, 9  ;;  %v4819_v3 = vmax.f32 %v4461_v16, %v5684_v52  ;;  %v4820_v61 = vmax.f32 %v4460_v5, %v5685_v18  ;;  %v4206_v60 = vmax.f32 %v10231_v45, 0.0 }
 0x3a5   :  { %v5690_v43 = vrot.slane %v4479_v22, 9  ;;  %v4823_v51 = vmax.f32 %v4478_v50, %v5688_v48  ;;  %v4824_v10 = vmax.f32 %v4477_v28, %v5689_v34  ;;  %v4207_v31 = vmax.f32 %v10234_v56, 0.0 }
 0x3a6   :  { %v4821_v42 = vmax.f32 %v4462_v0, %v5686_v62  ;;  %v10236_v4 = vrot.slane %v4819_v3, 7  ;;  %v3948_v19 = vadd.f32 %v3916_v8, %v3868_v37  ;;  %v3997_v5 = vmul.f32 %v8889_v11, %v3957_v2 }
 0x3a7   :  { %v3998_v58 = vmul.f32 %v8889_v11, %v3961_v39  ;;  %v4825_v0 = vmax.f32 %v4479_v22, %v5690_v43  ;;  %v10244_v52 = vrot.slane %v4823_v51, 7  ;;  %v4080_v1 = vmul.f32 %v11216_v47, %v4040_v27 }
 0x3a8   :  { %v10240_v16 = vrot.slane %v4821_v42, 7  ;;  %v4081_v18 = vmul.f32 %v11216_v47, %v4044_v63  ;;  %v5069_v50 = vsel %vm2164_vm2, %v10236_v4, %v4818_v30  ;;  %v4029_v28 = vadd.f32 %v3997_v5, %v3947_v25 }
 0x3a9   :  { %v4030_v20 = vadd.f32 %v3998_v58, %v3948_v19  ;;  %v4902_v37 = vsel %vm2166_vm3, %v9770_v46, %v9783_v24  ;;  %v10257_v11 = vrot.slane %v4825_v0, 7  ;;  %v4916_v47 = vsel %vm2166_vm3, %v9777_v38, %v9794_v57 }
 0x3aa   :  { %v10255_v2 = vsel %vm2164_vm2, %v10240_v16, %v4820_v61  ;;  %v4903_v51 = vsel %vm2168_vm4, %v9770_v46, %v4902_v37  ;;  %v5083_v39 = vsel %vm2164_vm2, %v10244_v52, %v4822_v21  ;;  %v4112_v8 = vadd.f32 %v4080_v1, %v4029_v28 }
 0x3ab   :  { %v4113_v25 = vadd.f32 %v4081_v18, %v4030_v20  ;;  %v4917_v24 = vsel %vm2168_vm4, %v9777_v38, %v4916_v47  ;;  %v10270_v45 = vsel %vm2164_vm2, %v10257_v11, %v4824_v10  ;;  %v10274_v62 = vsel %vm2170_vm5, %v9770_v46, %v4903_v51 }
 0x3ac   :  { %v4930_v57 = vsel %vm2166_vm3, %v9842_v59, %v9848_v12  ;;  %v4944_v30 = vsel %vm2166_vm3, %v9857_v55, %v9870_v54  ;;  %v4144_v3 = vmul.f32 %v10151_v44, %v4112_v8  ;;  %v10290_v46 = vsel %vm2170_vm5, %v9777_v38, %v4917_v24 }
 0x3ad   :  { %v4145_v56 = vmul.f32 %v10151_v44, %v4113_v25  ;;  %v4931_v10 = vsel %vm2168_vm4, %v9842_v59, %v4930_v57  ;;  %v4945_v61 = vsel %vm2168_vm4, %v9857_v55, %v4944_v30  ;;  %v4958_v54 = vsel %vm2166_vm3, %v9922_v41, %v9935_v29 }
 0x3ae   :  { %v10294_v12 = vsel %vm2170_vm5, %v9842_v59, %v4931_v10  ;;  %v4972_v44 = vsel %vm2166_vm3, %v9930_v36, %v9946_v40  ;;  %v4176_v22 = vadd.f32 %v10161_v9, %v4144_v3  ;;  %v4959_v38 = vsel %vm2168_vm4, %v9922_v41, %v4958_v54 }
 0x3af   :  { %v4177_v48 = vadd.f32 %v10161_v9, %v4145_v56  ;;  %v4973_v34 = vsel %vm2168_vm4, %v9930_v36, %v4972_v44  ;;  %v10310_v59 = vsel %vm2170_vm5, %v9857_v55, %v4945_v61  ;;  %v10314_v29 = vsel %vm2170_vm5, %v9922_v41, %v4959_v38 }
 0x3b0   :  { %v4986_v40 = vsel %vm2166_vm3, %v9992_v35, %v10001_v23  ;;  %v5000_v9 = vsel %vm2166_vm3, %v10006_v14, %v10019_v13  ;;  %v4208_v42 = vmax.f32 %v4176_v22, 0.0  ;;  %v10328_v41 = vsel %vm2170_vm5, %v9930_v36, %v4973_v34 }
 0x3b1   :  { %v4209_v21 = vmax.f32 %v4177_v48, 0.0  ;;  %v4987_v27 = vsel %vm2168_vm4, %v9992_v35, %v4986_v40  ;;  %v5001_v55 = vsel %vm2168_vm4, %v10006_v14, %v5000_v9  ;;  %v5014_v23 = vsel %vm2166_vm3, %v10074_v32, %v10087_v17 }
 0x3b2   :  { %v4988_v63 = vsel %vm2170_vm5, %v9992_v35, %v4987_v27  ;;  %v5028_v13 = vsel %vm2166_vm3, %v10082_v33, %v10098_v6  ;;  %v4224_v43 = vmax.f32 %v4206_v60, %v4208_v42  ;;  %v5015_v5 = vsel %vm2168_vm4, %v10074_v32, %v5014_v23 }
 0x3b3   :  { %v4225_v19 = vmax.f32 %v4207_v31, %v4209_v21  ;;  %v5029_v36 = vsel %vm2168_vm4, %v10082_v33, %v5028_v13  ;;  %v10344_v58 = vsel %vm2170_vm5, %v10006_v14, %v5001_v55  ;;  %v5016_v35 = vsel %vm2170_vm5, %v10074_v32, %v5015_v5 }
 0x3b4   :  { %v5042_v17 = vsel %vm2166_vm3, %v10156_v53, %v10167_v7  ;;  %v5056_v6 = vsel %vm2166_vm3, %v10175_v49, %v10193_v26  ;;  %v4480_v60 = vcombine.high %v4224_v43, %v4224_v43  ;;  %v4487_v31 = vrot.slane %v4224_v43, %v11234_v15 }
 0x3b5   :  { %v4497_v0 = vcombine.high %v4225_v19, %v4225_v19  ;;  %v4504_v1 = vrot.slane %v4225_v19, %v11234_v15  ;;  %v10358_v14 = vsel %vm2170_vm5, %v10082_v33, %v5029_v36  ;;  %v5043_v32 = vsel %vm2168_vm4, %v10156_v53, %v5042_v17 }
 0x3b6   :  { %v5057_v7 = vsel %vm2168_vm4, %v10175_v49, %v5056_v6  ;;  %v5070_v18 = vsel %vm2166_vm3, %v10236_v4, %v5069_v50  ;;  %v4494_v26 = vrot.slane %v4480_v60, %v11234_v15  ;;  %v4495_v28 = vcombine.high %v4487_v31, %v4487_v31 }
 0x3b7   :  { %v5691_v20 = vrot.slane %v4487_v31, 9  ;;  %v4511_v37 = vrot.slane %v4497_v0, %v11234_v15  ;;  %v4512_v51 = vcombine.high %v4504_v1, %v4504_v1  ;;  %v5695_v47 = vrot.slane %v4504_v1, 9 }
 0x3b8   :  { %v5044_v33 = vsel %vm2170_vm5, %v10156_v53, %v5043_v32  ;;  %v5084_v8 = vsel %vm2166_vm3, %v10244_v52, %v5083_v39  ;;  %v4496_v25 = vcombine.high %v4494_v26, %v4494_v26  ;;  %v5692_v24 = vrot.slane %v4495_v28, 9 }
 0x3b9   :  { %v5693_v57 = vrot.slane %v4494_v26, 9  ;;  %v5058_v50 = vsel %vm2170_vm5, %v10175_v49, %v5057_v7  ;;  %v4826_v30 = vmax.f32 %v4487_v31, %v5691_v20  ;;  %v4513_v3 = vcombine.high %v4511_v37, %v4511_v37  ;;  %v11351_v20 = vld [vmem:[#allocation50_spill] sm:$0xff] }
 0x3ba   :  { %v5696_v56 = vrot.slane %v4512_v51, 9  ;;  %v5697_v10 = vrot.slane %v4511_v37, 9  ;;  %v5694_v61 = vrot.slane %v4496_v25, 9  ;;  %v4827_v54 = vmax.f32 %v4495_v28, %v5692_v24 }
 0x3bb   :  { %v4830_v44 = vmax.f32 %v4504_v1, %v5695_v47  ;;  %v5071_v22 = vsel %vm2168_vm4, %v10236_v4, %v5070_v18  ;;  %v4828_v53 = vmax.f32 %v4494_v26, %v5693_v57  ;;  %v5698_v48 = vrot.slane %v4513_v3, 9 }
 0x3bc   :  { %v4831_v38 = vmax.f32 %v4512_v51, %v5696_v56  ;;  %v4832_v39 = vmax.f32 %v4511_v37, %v5697_v10  ;;  %v4829_v34 = vmax.f32 %v4496_v25, %v5694_v61  ;;  %v5096_v40 = vrot.slane %v4827_v54, 7  ;;  %v11352_v37 = vld [vmem:[#allocation48_spill] sm:$0xff]  ;;  %v11356_v56 = vld [vmem:[#allocation97_spill] sm:$0xff] }
 0x3bd   :  { %v5085_v9 = vsel %vm2168_vm4, %v10244_v52, %v5084_v8  ;;  %v5154_v49 = vcombine.low %v10274_v62, %v10294_v12  ;;  %v4833_v42 = vmax.f32 %v4513_v3, %v5698_v48  ;;  %v5072_v27 = vsel %vm2170_vm5, %v10236_v4, %v5071_v22  ;;  %v11350_v12 = vld [vmem:[#allocation30_spill] sm:$0xff]  ;;  %v11354_v25 = vld [vmem:[#allocation96_spill] sm:$0xff]  ;;  %v11357_v22 = vld [vmem:[#allocation51_spill] sm:$0xff] }
 0x3be   :  { %v5110_v21 = vrot.slane %v4831_v38, 7  ;;  %v5163_v55 = vcombine.low %v10314_v29, %v4988_v63  ;;  %v5097_v23 = vsel %vm2164_vm2, %v5096_v40, %v4826_v30  ;;  %v10384_v13 = vrot.slane %v4829_v34, 7  ;;  %v11353_v8 = vld [vmem:[#allocation98_spill] sm:$0xff]  ;;  %v11355_v3 = vld [vmem:[#allocation52_spill] sm:$0xff] }
 0x3bf   :  { %v5086_v43 = vsel %vm2170_vm5, %v10244_v52, %v5085_v9  ;;  %v5172_v19 = vcombine.low %v5016_v35, %v5044_v33  ;;  %v5098_v5 = vsel %vm2166_vm3, %v5096_v40, %v5097_v23  ;;  %v10390_v62 = vrot.slane %v4833_v42, 7  ;;  %v11359_v42 = vld [vmem:[#allocation99_spill] sm:$0xff]  ;;  %v11362_v23 = vld [vmem:[#allocation100_spill] sm:$0xff] }
 0x3c0   :  { %v5111_v36 = vsel %vm2164_vm2, %v5110_v21, %v4830_v44  ;;  %v10393_v17 = vrot.slane %v5163_v55, %v11350_v12  ;;  %v10397_v4 = vsel %vm2164_vm2, %v10384_v13, %v4828_v53  ;;  %v5099_v63 = vsel %vm2168_vm4, %v5096_v40, %v5098_v5  ;;  %v11358_v53 = vld [vmem:[#allocation58_spill] sm:$0xff] }
 0x3c1   :  { %v5112_v29 = vsel %vm2166_vm3, %v5110_v21, %v5111_v36  ;;  %v10402_v52 = vrot.slane %v5154_v49, %v11350_v12  ;;  %v5100_v35 = vsel %vm2170_vm5, %v5096_v40, %v5099_v63  ;;  %v10407_v60 = vrot.slane %v5172_v19, %v11350_v12  ;;  %v11361_v55 = vld [vmem:[#allocation54_spill] sm:$0xff]  ;;  %v11364_v63 = vld [vmem:[#allocation55_spill] sm:$0xff] }
 0x3c2   :  { %v5113_v6 = vsel %vm2168_vm4, %v5110_v21, %v5112_v29  ;;  %v5226_v31 = vcombine.low %v10290_v46, %v10310_v59  ;;  %v5181_v1 = vcombine.low %v5072_v27, %v5100_v35  ;;  %v5235_v32 = vcombine.low %v10328_v41, %v10344_v58  ;;  %v11363_v29 = vld [vmem:[#allocation78_spill] sm:$0xff] }
 0x3c3   :  { %v5114_v0 = vsel %vm2170_vm5, %v5110_v21, %v5113_v6  ;;  %v5244_v7 = vcombine.low %v10358_v14, %v5058_v50  ;;  %v10417_v18 = vsel %vm2164_vm2, %v10390_v62, %v4832_v39  ;;  %v5699_v28 = vcombine.high %v10402_v52, %v10393_v17  ;;  %v11360_v21 = vld [vmem:[#allocation53_spill] sm:$0xff] }
 0x3c4   :  { %v5253_v26 = vcombine.low %v5086_v43, %v5114_v0  ;;  %v4909_v46 = vsel %vm2166_vm3, %v11352_v37, %v11351_v20  ;;  %v10425_v59 = vrot.slane %v5181_v1, %v11350_v12  ;;  %v10428_v51 = vrot.slane %v5226_v31, %v11350_v12  ;;  %v11367_v20 = vld [vmem:[#allocation57_spill] sm:$0xff] }
 0x3c5   :  { %v10431_v41 = vrot.slane %v5235_v32, %v11350_v12  ;;  %v4910_v58 = vsel %vm2168_vm4, %v11352_v37, %v4909_v46  ;;  %v10436_v14 = vrot.slane %v5244_v7, %v11350_v12  ;;  %v5332_v33 = vrot.slane %v5699_v28, %v11234_v15  ;;  %v11365_v7 = vld [vmem:[#allocation56_spill] sm:$0xff] }
 0x3c6   :  { %v10439_v47 = vrot.slane %v5253_v26, %v11350_v12  ;;  %v4923_v24 = vsel %vm2166_vm3, %v11354_v25, %v11353_v8  ;;  %v5700_v57 = vcombine.high %v10407_v60, %v10425_v59  ;;  %v4937_v10 = vsel %vm2166_vm3, %v11356_v56, %v11355_v3  ;;  %v11366_v26 = vld [vmem:[#allocation27_spill] sm:$0xff] }
 0x3c7   :  { %v5703_v50 = vcombine.high %v10428_v51, %v10431_v41  ;;  %v4924_v30 = vsel %vm2168_vm4, %v11354_v25, %v4923_v24  ;;  %v4911_v54 = vsel %vm2170_vm5, %v11352_v37, %v4910_v58  ;;  %v4938_v44 = vsel %vm2168_vm4, %v11356_v56, %v4937_v10  ;;  %v11368_v37 = vld [vmem:[#allocation29_spill] sm:$0xff]  ;;  %v11369_v58 = vld [vmem:[#allocation59_spill] sm:$0xff] }
 0x3c8   :  { %v5704_v61 = vcombine.high %v10436_v14, %v10439_v47  ;;  %v4951_v48 = vsel %vm2166_vm3, %v11358_v53, %v11357_v22  ;;  %v5339_v38 = vrot.slane %v5700_v57, %v11234_v15  ;;  %v4925_v34 = vsel %vm2170_vm5, %v11354_v25, %v4924_v30  ;;  %v11371_v10 = vld [vmem:[#allocation81_spill] sm:$0xff] }
 0x3c9   :  { %v5426_v39 = vrot.slane %v5703_v50, %v11234_v15  ;;  %v4952_v40 = vsel %vm2168_vm4, %v11358_v53, %v4951_v48  ;;  %v4939_v49 = vsel %vm2170_vm5, %v11356_v56, %v4938_v44  ;;  %v4965_v27 = vsel %vm2166_vm3, %v11360_v21, %v11359_v42  ;;  %v11374_v48 = vld [vmem:[#allocation60_spill] sm:$0xff] }
 0x3ca   :  { %v5433_v9 = vrot.slane %v5704_v61, %v11234_v15  ;;  %v4979_v43 = vsel %vm2166_vm3, %v11362_v23, %v11361_v55  ;;  %v5340_v19 = vcombine.low %v5332_v33, %v5339_v38  ;;  %v4966_v5 = vsel %vm2168_vm4, %v11360_v21, %v4965_v27  ;;  %v11370_v33 = vld [vmem:[#allocation101_spill] sm:$0xff]  ;;  %v11372_v61 = vld [vmem:[#allocation102_spill] sm:$0xff] }
 0x3cb   :  { %v4980_v36 = vsel %vm2168_vm4, %v11362_v23, %v4979_v43  ;;  %v4993_v35 = vsel %vm2166_vm3, %v11364_v63, %v11363_v29  ;;  %v4953_v31 = vsel %vm2170_vm5, %v11358_v53, %v4952_v40  ;;  %v4967_v0 = vsel %vm2170_vm5, %v11360_v21, %v4966_v5  ;;  %v11373_v53 = vld [vmem:[#allocation32_spill] sm:$0xff] }
 0x3cc   :  { %v5434_v6 = vcombine.low %v5426_v39, %v5433_v9  ;;  %v4994_v1 = vsel %vm2168_vm4, %v11364_v63, %v4993_v35  ;;  %v4981_v32 = vsel %vm2170_vm5, %v11362_v23, %v4980_v36  ;;  %v5007_v28 = vsel %vm2166_vm3, %v11366_v26, %v11365_v7 }
 0x3cd   :  { %v5021_v46 = vsel %vm2166_vm3, %v11368_v37, %v11367_v20  ;;  %v5035_v8 = vsel %vm2166_vm3, %v11370_v33, %v11369_v58  ;;  %v5008_v24 = vsel %vm2168_vm4, %v11366_v26, %v5007_v28  ;;  %v4995_v30 = vsel %vm2170_vm5, %v11364_v63, %v4994_v1 }
 0x3ce   :  { %v5734_v25 = vpack.i.bf16 %v5434_v6, %v5340_v19  ;;  %v5022_v57 = vsel %vm2168_vm4, %v11368_v37, %v5021_v46  ;;  %v5036_v50 = vsel %vm2168_vm4, %v11370_v33, %v5035_v8  ;;  %v5009_v3 = vsel %vm2170_vm5, %v11366_v26, %v5008_v24 }
 0x3cf   :  { %v5023_v56 = vsel %vm2170_vm5, %v11368_v37, %v5022_v57  ;;  %v5049_v44 = vsel %vm2166_vm3, %v11372_v61, %v11371_v10  ;;  %v5063_v38 = vsel %vm2166_vm3, %v11374_v48, %v11373_v53  ;;  %v5077_v39 = vsel %vm2166_vm3, %v10240_v16, %v10255_v2 }
 0x3d0   :  { %5735 = vrot.lane.b32.xlu1 %v5734_v25, %s5758_s11  ;;  %v5050_v22 = vsel %vm2168_vm4, %v11372_v61, %v5049_v44  ;;  %v5091_v40 = vsel %vm2166_vm3, %v10257_v11, %v10270_v45  ;;  %v5037_v9 = vsel %vm2170_vm5, %v11370_v33, %v5036_v50  ;;  %v5064_v21 = vsel %vm2168_vm4, %v11374_v48, %v5063_v38 }
 0x3d1   :  { %v5051_v42 = vsel %vm2170_vm5, %v11372_v61, %v5050_v22  ;;  %v5078_v27 = vsel %vm2168_vm4, %v10240_v16, %v5077_v39  ;;  %v5065_v55 = vsel %vm2170_vm5, %v11374_v48, %v5064_v21  ;;  %v5092_v45 = vsel %vm2168_vm4, %v10257_v11, %v5091_v40 }
 0x3d2   :  { %v5079_v2 = vsel %vm2170_vm5, %v10240_v16, %v5078_v27  ;;  %v5105_v23 = vsel %vm2166_vm3, %v10384_v13, %v10397_v4  ;;  %v5119_v19 = vsel %vm2166_vm3, %v10390_v62, %v10417_v18  ;;  %v5190_v5 = vcombine.low %v4911_v54, %v4939_v49 }
 0x3d3   :  { %v5106_v43 = vsel %vm2168_vm4, %v10384_v13, %v5105_v23  ;;  %v5199_v36 = vcombine.low %v4967_v0, %v4995_v30  ;;  %v5120_v16 = vsel %vm2168_vm4, %v10390_v62, %v5119_v19  ;;  %v5208_v63 = vcombine.low %v5023_v56, %v5051_v42 }
 0x3d4   :  { %v5107_v29 = vsel %vm2170_vm5, %v10384_v13, %v5106_v43  ;;  %v5262_v35 = vcombine.low %v4925_v34, %v4953_v31  ;;  %v5121_v4 = vsel %vm2170_vm5, %v10390_v62, %v5120_v16  ;;  %v5197_v6 = vrot.slane %v5190_v5, %v11350_v12 }
 0x3d5   :  { %v5206_v1 = vrot.slane %v5199_v36, %v11350_v12  ;;  %v5217_v7 = vcombine.low %v5079_v2, %v5107_v29  ;;  %v5093_v18 = vsel %vm2170_vm5, %v10257_v11, %v5092_v45  ;;  %v5215_v54 = vrot.slane %v5208_v63, %v11350_v12 }
 0x3d6   :  { %v5271_v49 = vcombine.low %v4981_v32, %v5009_v3  ;;  %v5280_v13 = vcombine.low %v5037_v9, %v5065_v55  ;;  %v5289_v26 = vcombine.low %v5093_v18, %v5121_v4  ;;  %v5269_v31 = vrot.slane %v5262_v35, %v11350_v12 }
 0x3d7   :  { %v5224_v0 = vrot.slane %v5217_v7, %v11350_v12  ;;  %v5348_v28 = vcombine.low %v5197_v6, %v5206_v1  ;;  %v5701_v34 = vcombine.high %v5197_v6, %v5206_v1  ;;  %v5302_v20 = vcombine.low %v10402_v52, %v10393_v17 }
 0x3d8   :  { %v5278_v62 = vrot.slane %v5271_v49, %v11350_v12  ;;  %v5396_v37 = vcombine.low %v10428_v51, %v10431_v41  ;;  %v5287_v11 = vrot.slane %v5280_v13, %v11350_v12  ;;  %v5296_v32 = vrot.slane %v5289_v26, %v11350_v12 }
 0x3d9   :  { %v5349_v46 = vcombine.low %v5215_v54, %v5224_v0  ;;  %v5702_v58 = vcombine.high %v5215_v54, %v5224_v0  ;;  %v5356_v33 = vrot.slane %v5348_v28, %v11234_v15  ;;  %v5380_v25 = vrot.slane %v5701_v34, %v11234_v15 }
 0x3da   :  { %v5442_v8 = vcombine.low %v5269_v31, %v5278_v62  ;;  %v5705_v24 = vcombine.high %v5269_v31, %v5278_v62  ;;  %v5443_v50 = vcombine.low %v5287_v11, %v5296_v32  ;;  %v5706_v52 = vcombine.high %v5287_v11, %v5296_v32 }
 0x3db   :  { %v5363_v57 = vrot.slane %v5349_v46, %v11234_v15  ;;  %v5387_v17 = vrot.slane %v5702_v58, %v11234_v15  ;;  %v5397_v12 = vcombine.low %v10436_v14, %v10439_v47  ;;  %v5404_v61 = vrot.slane %v5396_v37, %v11234_v15 }
 0x3dc   :  { %v5450_v51 = vrot.slane %v5442_v8, %v11234_v15  ;;  %v5474_v41 = vrot.slane %v5705_v24, %v11234_v15  ;;  %v5457_v3 = vrot.slane %v5443_v50, %v11234_v15  ;;  %v5481_v10 = vrot.slane %v5706_v52, %v11234_v15 }
 0x3dd   :  { %v5364_v30 = vcombine.low %v5356_v33, %v5363_v57  ;;  %v5388_v56 = vcombine.low %v5380_v25, %v5387_v17  ;;  %v5411_v44 = vrot.slane %v5397_v12, %v11234_v15  ;;  %v5303_v22 = vcombine.low %v10407_v60, %v10425_v59 }
 0x3de   :  { %v5458_v53 = vcombine.low %v5450_v51, %v5457_v3  ;;  %v5482_v48 = vcombine.low %v5474_v41, %v5481_v10  ;;  %v5310_v38 = vrot.slane %v5302_v20, %v11234_v15 }
 0x3df   :  { %v5412_v39 = vcombine.low %v5404_v61, %v5411_v44  ;;  %v5317_v14 = vrot.slane %v5303_v22, %v11234_v15 }
 0x3e0   :  { %v5739_v47 = vpack.i.bf16 %v5458_v53, %v5364_v30  ;;  %v5744_v40 = vpack.i.bf16 %v5482_v48, %v5388_v56 }
 0x3e1   :  { %v5318_v9 = vcombine.low %v5310_v38, %v5317_v14 }
 0x3e2   :  { %5740 = vrot.lane.b32.xlu0 %v5739_v47, %s5759_s12  ;;  %5745 = vrot.lane.b32.xlu1 %v5744_v40, %s5760_s13 }
 0x442   :  { %v5736_v42 = vpop.permute.xlu1 %5735 }
 0x443   :  { %v5738_v21 = vunpack.i.h.bf16 %v5736_v42  ;;  %v5737_v27 = vunpack.i.l.bf16 %v5736_v42 }
 0x445   :  { %v5489_v55 = vsel %vm2753_vm6, %v5412_v39, %v5738_v21  ;;  %v5486_v60 = vsel %vm2753_vm6, %v5318_v9, %v5737_v27 }
 0x454   :  { %v5741_v59 = vpop.permute.xlu0 %5740  ;;  %v5746_v2 = vpop.permute.xlu1 %5745 }
 0x455   :  { %v5743_v45 = vunpack.i.h.bf16 %v5741_v59  ;;  %v5742_v23 = vunpack.i.l.bf16 %v5741_v59  ;;  %v5748_v43 = vunpack.i.h.bf16 %v5746_v2  ;;  %v5747_v15 = vunpack.i.l.bf16 %v5746_v2 }
 0x457   :  { %v5490_v19 = vsel %vm2755_vm7, %v5489_v55, %v5743_v45  ;;  %v5487_v5 = vsel %vm2755_vm7, %v5486_v60, %v5742_v23 }
 0x458   :  { %v5488_v36 = vsel %vm2757_vm8, %v5487_v5, %v5747_v15  ;;  %v5491_v29 = vsel %vm2757_vm8, %v5490_v19, %v5748_v43 }
 0x459   :  { %v5710_v16 = vpack.c.bf16 %v5491_v29, %v5488_v36 }
 0x45b   :  { %5708 = vst [vmem:[%s10602_s4 + $0x8] sm:$0xff] %v5710_v16 }

// kernel: crnn_forward.12
= control target key start
LH: loop header
LB: loop body
LE: loop exit
PB: predicated region body
PF: predicated region fallthrough
CT: control target
= control target key end

     0   :  { %v2320_v1 = vmov 0   ;;  %s2315_s1 = inlined_call_operand.vmem [shape: bf16[256,768], index: 1, kind: input, shape index: {}]   ;;  %s2316_s2 = inlined_call_operand.vmem [shape: f32[1,768], index: 2, kind: input, shape index: {}]   ;;  %s2317_s0 = inlined_call_operand.vmem [shape: f32[2,2,768], index: 0, kind: input, shape index: {}]   ;;  %s2318_s3 = inlined_call_operand.vmem [shape: bf16[2,2,256], index: 3, kind: output, shape index: {}]  }
   0x1   :  { %v1545_v0 = vld [vmem:[%s2315_s1 + $0x4] ss:$24 sps:$4 sm:$0xff]   ;;  %829 = vmatprep.mubr.bf16.mxu0 %v2320_v1  ;;  %870 = vmatprep.mubr.bf16.mxu1 %v2320_v1  ;;  %v1552_v2 = vld [vmem:[%s2315_s1] ss:$24 sps:$4 sm:$0xff]   ;;  %v1558_v3 = vld [vmem:[%s2315_s1 + $0x34] ss:$24 sps:$4 sm:$0xff]  }
   0x2   :  { %797 = vmatprep.subr.bf16.mxu0 %v1545_v0  ;;  %v1564_v4 = vld [vmem:[%s2315_s1 + $0x30] ss:$24 sps:$4 sm:$0xff]   ;;  %v1570_v5 = vld [vmem:[%s2315_s1 + $0x64] ss:$24 sps:$4 sm:$0xff]   ;;  %v1576_v6 = vld [vmem:[%s2315_s1 + $0x60] ss:$24 sps:$4 sm:$0xff]  }
   0x3   :  { %798 = vmatpush1.bf16.msra.mxu0 %v1552_v2  ;;  %v1582_v7 = vld [vmem:[%s2315_s1 + $0x94] ss:$24 sps:$4 sm:$0xff]   ;;  %v1588_v8 = vld [vmem:[%s2315_s1 + $0x90] ss:$24 sps:$4 sm:$0xff]   ;;  %v1594_v9 = vld [vmem:[%s2315_s1 + $0xc4] ss:$24 sps:$4 sm:$0xff]  }
   0x4   :  { %799 = vmatprep.subr.bf16.mxu0 %v1558_v3  ;;  %v1600_v10 = vld [vmem:[%s2315_s1 + $0xc0] ss:$24 sps:$4 sm:$0xff]   ;;  %v1605_v11 = vld [vmem:[%s2315_s1 + $0xf4] ss:$24 sps:$4 sm:$0xff]   ;;  %v1621_v14 = vld [vmem:[%s2315_s1 + $0xf0] ss:$24 sps:$4 sm:$0xff]  }
   0x5   :  { %v1611_v12 = vld [vmem:[%s2315_s1 + $0xc] ss:$24 sps:$4 sm:$0xff]   ;;  %v1616_v13 = vld [vmem:[%s2315_s1 + $0x8] ss:$24 sps:$4 sm:$0xff]   ;;  %v1629_v15 = vld [vmem:[%s2315_s1 + $0x3c] ss:$24 sps:$4 sm:$0xff]  }
   0x6   :  { %838 = vmatprep.subr.bf16.mxu1 %v1611_v12  ;;  %v1634_v16 = vld [vmem:[%s2315_s1 + $0x38] ss:$24 sps:$4 sm:$0xff]   ;;  %v1640_v17 = vld [vmem:[%s2315_s1 + $0x124] ss:$24 sps:$4 sm:$0xff]   ;;  %v1657_v20 = vld [vmem:[%s2315_s1 + $0x154] ss:$24 sps:$4 sm:$0xff]  }
   0x7   :  { %800 = vmatpush1.bf16.msra.mxu0 %v1564_v4  ;;  %839 = vmatpush1.bf16.msra.mxu1 %v1616_v13  ;;  %v1646_v18 = vld [vmem:[%s2315_s1 + $0x120] ss:$24 sps:$4 sm:$0xff]   ;;  %v1651_v19 = vld [vmem:[%s2315_s1 + $0x6c] ss:$24 sps:$4 sm:$0xff]   ;;  %v1670_v22 = vld [vmem:[%s2315_s1 + $0x9c] ss:$24 sps:$4 sm:$0xff]  }
   0x8   :  { %801 = vmatprep.subr.bf16.mxu0 %v1570_v5  ;;  %840 = vmatprep.subr.bf16.mxu1 %v1629_v15  ;;  %v1663_v21 = vld [vmem:[%s2315_s1 + $0x68] ss:$24 sps:$4 sm:$0xff]   ;;  %v1681_v24 = vld [vmem:[%s2315_s1 + $0x184] ss:$24 sps:$4 sm:$0xff]   ;;  %v1687_v25 = vld [vmem:[%s2315_s1 + $0x98] ss:$24 sps:$4 sm:$0xff]  }
   0x9   :  { %v1675_v23 = vld [vmem:[%s2315_s1 + $0x150] ss:$24 sps:$4 sm:$0xff]   ;;  %v1694_v26 = vld [vmem:[%s2315_s1 + $0xcc] ss:$24 sps:$4 sm:$0xff]   ;;  %v1699_v27 = vld [vmem:[%s2315_s1 + $0x180] ss:$24 sps:$4 sm:$0xff]  }
   0xa   :  { %v1705_v28 = vld [vmem:[%s2315_s1 + $0x1b4] ss:$24 sps:$4 sm:$0xff]   ;;  %v1711_v29 = vld [vmem:[%s2315_s1 + $0xc8] ss:$24 sps:$4 sm:$0xff]   ;;  %v1729_v32 = vld [vmem:[%s2315_s1 + $0x1e4] ss:$24 sps:$4 sm:$0xff]  }
   0xb   :  { %802 = vmatpush1.bf16.msra.mxu0 %v1576_v6  ;;  %841 = vmatpush1.bf16.msra.mxu1 %v1634_v16  ;;  %v1718_v30 = vld [vmem:[%s2315_s1 + $0xfc] ss:$24 sps:$4 sm:$0xff]   ;;  %v1723_v31 = vld [vmem:[%s2315_s1 + $0x1b0] ss:$24 sps:$4 sm:$0xff]   ;;  %v1742_v34 = vld [vmem:[%s2315_s1 + $0x12c] ss:$24 sps:$4 sm:$0xff]  }
   0xc   :  { %803 = vmatprep.subr.bf16.mxu0 %v1582_v7  ;;  %842 = vmatprep.subr.bf16.mxu1 %v1651_v19  ;;  %v1735_v33 = vld [vmem:[%s2315_s1 + $0xf8] ss:$24 sps:$4 sm:$0xff]   ;;  %v1753_v36 = vld [vmem:[%s2315_s1 + $0x214] ss:$24 sps:$4 sm:$0xff]   ;;  %v1759_v37 = vld [vmem:[%s2315_s1 + $0x128] ss:$24 sps:$4 sm:$0xff]  }
   0xd   :  { %v1747_v35 = vld [vmem:[%s2315_s1 + $0x1e0] ss:$24 sps:$4 sm:$0xff]   ;;  %v1766_v38 = vld [vmem:[%s2315_s1 + $0x15c] ss:$24 sps:$4 sm:$0xff]   ;;  %v1771_v39 = vld [vmem:[%s2315_s1 + $0x210] ss:$24 sps:$4 sm:$0xff]  }
   0xe   :  { %v1777_v40 = vld [vmem:[%s2315_s1 + $0x244] ss:$24 sps:$4 sm:$0xff]   ;;  %v1783_v41 = vld [vmem:[%s2315_s1 + $0x158] ss:$24 sps:$4 sm:$0xff]   ;;  %v1801_v44 = vld [vmem:[%s2315_s1 + $0x274] ss:$24 sps:$4 sm:$0xff]  }
   0xf   :  { %804 = vmatpush1.bf16.msra.mxu0 %v1588_v8  ;;  %843 = vmatpush1.bf16.msra.mxu1 %v1663_v21  ;;  %v1790_v42 = vld [vmem:[%s2315_s1 + $0x18c] ss:$24 sps:$4 sm:$0xff]   ;;  %v1795_v43 = vld [vmem:[%s2315_s1 + $0x240] ss:$24 sps:$4 sm:$0xff]   ;;  %v1814_v46 = vld [vmem:[%s2315_s1 + $0x1bc] ss:$24 sps:$4 sm:$0xff]  }
  0x10   :  { %805 = vmatprep.subr.bf16.mxu0 %v1594_v9  ;;  %844 = vmatprep.subr.bf16.mxu1 %v1670_v22  ;;  %v1807_v45 = vld [vmem:[%s2315_s1 + $0x188] ss:$24 sps:$4 sm:$0xff]   ;;  %v1825_v48 = vld [vmem:[%s2315_s1 + $0x2a4] ss:$24 sps:$4 sm:$0xff]   ;;  %v1831_v49 = vld [vmem:[%s2315_s1 + $0x1b8] ss:$24 sps:$4 sm:$0xff]  }
  0x11   :  { %v1819_v47 = vld [vmem:[%s2315_s1 + $0x270] ss:$24 sps:$4 sm:$0xff]   ;;  %v1838_v50 = vld [vmem:[%s2315_s1 + $0x1ec] ss:$24 sps:$4 sm:$0xff]   ;;  %v1843_v51 = vld [vmem:[%s2315_s1 + $0x2a0] ss:$24 sps:$4 sm:$0xff]  }
  0x12   :  { %v1849_v52 = vld [vmem:[%s2315_s1 + $0x2d4] ss:$24 sps:$4 sm:$0xff]   ;;  %v1855_v53 = vld [vmem:[%s2315_s1 + $0x1e8] ss:$24 sps:$4 sm:$0xff]   ;;  %v1879_v57 = vld [vmem:[%s2315_s1 + $0x218] ss:$24 sps:$4 sm:$0xff]  }
  0x13   :  { %806 = vmatpush1.bf16.msra.mxu0 %v1600_v10  ;;  %845 = vmatpush1.bf16.msra.mxu1 %v1687_v25  ;;  %v1862_v54 = vld [vmem:[%s2315_s1 + $0x21c] ss:$24 sps:$4 sm:$0xff]   ;;  %v1867_v55 = vld [vmem:[%s2315_s1 + $0x2d0] ss:$24 sps:$4 sm:$0xff]   ;;  %2335 = vst [vmem:[#allocation2_spill] sm:$0xff] %v1879_v57 }
  0x14   :  { %807 = vmatprep.subr.bf16.mxu0 %v1605_v11  ;;  %846 = vmatprep.subr.bf16.mxu1 %v1694_v26  ;;  %v1873_v56 = vld [vmem:[%s2315_s1 + $0x14] ss:$24 sps:$4 sm:$0xff]   ;;  %v1892_v59 = vld [vmem:[%s2315_s1 + $0x10] ss:$24 sps:$4 sm:$0xff]   ;;  %v1904_v61 = vld [vmem:[%s2315_s1 + $0x44] ss:$24 sps:$4 sm:$0xff]  }
  0x15   :  { %v1886_v58 = vld [vmem:[%s2315_s1 + $0x24c] ss:$24 sps:$4 sm:$0xff]   ;;  %2337 = vst [vmem:[#allocation4_spill] sm:$0xff] %v1892_v59  ;;  %v1898_v60 = vld [vmem:[%s2315_s1 + $0x248] ss:$24 sps:$4 sm:$0xff]   ;;  %2339 = vst [vmem:[#allocation6_spill] sm:$0xff] %v1904_v61 }
  0x16   :  { %2336 = vst [vmem:[#allocation3_spill] sm:$0xff] %v1886_v58  ;;  %2338 = vst [vmem:[#allocation5_spill] sm:$0xff] %v1898_v60  ;;  %v1910_v62 = vld [vmem:[%s2315_s1 + $0x27c] ss:$24 sps:$4 sm:$0xff]   ;;  %v1917_v63 = vld [vmem:[%s2315_s1 + $0x40] ss:$24 sps:$4 sm:$0xff]  }
  0x17   :  { %808 = vmatpush1.bf16.msra.mxu0 %v1621_v14  ;;  %847 = vmatpush1.bf16.msra.mxu1 %v1711_v29  ;;  %2340 = vst [vmem:[#allocation7_spill] sm:$0xff] %v1910_v62  ;;  %2341 = vst [vmem:[#allocation8_spill] sm:$0xff] %v1917_v63 }
  0x18   :  { %809 = vmatprep.subr.bf16.mxu0 %v1640_v17  ;;  %848 = vmatprep.subr.bf16.mxu1 %v1718_v30 }
  0x1b   :  { %810 = vmatpush1.bf16.msra.mxu0 %v1646_v18  ;;  %849 = vmatpush1.bf16.msra.mxu1 %v1735_v33 }
  0x1c   :  { %811 = vmatprep.subr.bf16.mxu0 %v1657_v20  ;;  %850 = vmatprep.subr.bf16.mxu1 %v1742_v34 }
  0x1f   :  { %812 = vmatpush1.bf16.msra.mxu0 %v1675_v23  ;;  %851 = vmatpush1.bf16.msra.mxu1 %v1759_v37 }
  0x20   :  { %813 = vmatprep.subr.bf16.mxu0 %v1681_v24  ;;  %852 = vmatprep.subr.bf16.mxu1 %v1766_v38 }
  0x23   :  { %814 = vmatpush1.bf16.msra.mxu0 %v1699_v27  ;;  %853 = vmatpush1.bf16.msra.mxu1 %v1783_v41 }
  0x24   :  { %815 = vmatprep.subr.bf16.mxu0 %v1705_v28  ;;  %854 = vmatprep.subr.bf16.mxu1 %v1790_v42 }
  0x27   :  { %816 = vmatpush1.bf16.msra.mxu0 %v1723_v31  ;;  %855 = vmatpush1.bf16.msra.mxu1 %v1807_v45 }
  0x28   :  { %817 = vmatprep.subr.bf16.mxu0 %v1729_v32  ;;  %856 = vmatprep.subr.bf16.mxu1 %v1814_v46 }
  0x2b   :  { %818 = vmatpush1.bf16.msra.mxu0 %v1747_v35  ;;  %857 = vmatpush1.bf16.msra.mxu1 %v1831_v49 }
  0x2c   :  { %819 = vmatprep.subr.bf16.mxu0 %v1753_v36  ;;  %858 = vmatprep.subr.bf16.mxu1 %v1838_v50 }
  0x2f   :  { %820 = vmatpush1.bf16.msra.mxu0 %v1771_v39  ;;  %859 = vmatpush1.bf16.msra.mxu1 %v1855_v53 }
  0x30   :  { %821 = vmatprep.subr.bf16.mxu0 %v1777_v40  ;;  %860 = vmatprep.subr.bf16.mxu1 %v1862_v54 }
  0x33   :  { %822 = vmatpush1.bf16.msra.mxu0 %v1795_v43  ;;  %861 = vmatpush1.bf16.msra.mxu1 %v1879_v57  ;;  %v1954_v57 = vld [vmem:[%s2315_s1 + $0xa4] ss:$24 sps:$4 sm:$0xff]  }
  0x34   :  { %823 = vmatprep.subr.bf16.mxu0 %v1801_v44  ;;  %862 = vmatprep.subr.bf16.mxu1 %v1886_v58  ;;  %v1923_v58 = vld [vmem:[%s2315_s1 + $0x278] ss:$24 sps:$4 sm:$0xff]   ;;  %2347 = vst [vmem:[#allocation13_spill] sm:$0xff] %v1954_v57 }
  0x35   :  { %2342 = vst [vmem:[#allocation9_spill] sm:$0xff] %v1923_v58 }
  0x37   :  { %824 = vmatpush1.bf16.msra.mxu0 %v1819_v47  ;;  %863 = vmatpush1.bf16.msra.mxu1 %v1898_v60  ;;  %v2345_v60 = vmov 0  }
  0x38   :  { %825 = vmatprep.subr.bf16.mxu0 %v1825_v48  ;;  %864 = vmatprep.subr.bf16.mxu1 %v1910_v62  ;;  %v1948_v62 = vld [vmem:[%s2315_s1 + $0x2a8] ss:$24 sps:$4 sm:$0xff]  }
  0x3b   :  { %826 = vmatpush1.bf16.msra.mxu0 %v1843_v51  ;;  %865 = vmatpush1.bf16.msra.mxu1 %v1923_v58  ;;  %v1966_v58 = vld [vmem:[%s2315_s1 + $0xa0] ss:$24 sps:$4 sm:$0xff]  }
  0x3c   :  { %827 = vmatprep.subr.bf16.mxu0 %v1849_v52  ;;  %2348 = vst [vmem:[#allocation14_spill] sm:$0xff] %v1966_v58 }
  0x3f   :  { %828 = vmatpush1.bf16.msra.mxu0 %v1867_v55 }
  0x40   :  { %879 = vmatprep.subr.bf16.mxu0 %v1873_v56 }
  0x42   :  { %830 = vmatmul.mubr.bf16.vlgmr.msra.gmra.mrb[0].mxu0 %v2320_v1  ;;  %v1929_v1 = vld [vmem:[%s2315_s1 + $0x74] ss:$24 sps:$4 sm:$0xff]  }
  0x43   :  { %880 = vmatpush1.bf16.msra.mxu0 %v1892_v59  ;;  %2343 = vst [vmem:[#allocation10_spill] sm:$0xff] %v1929_v1  ;;  %v1935_v59 = vld [vmem:[%s2315_s1 + $0x2ac] ss:$24 sps:$4 sm:$0xff]   ;;  %911 = vmatprep.mubr.bf16.mxu0 %v2345_v60 }
  0x44   :  { %881 = vmatprep.subr.bf16.mxu0 %v1904_v61  ;;  %2344 = vst [vmem:[#allocation11_spill] sm:$0xff] %v1935_v59  ;;  %v1942_v61 = vld [vmem:[%s2315_s1 + $0x70] ss:$24 sps:$4 sm:$0xff]   ;;  %866 = vmatprep.subr.bf16.mxu1 %v1935_v59  ;;  %v1978_v59 = vld [vmem:[%s2315_s1 + $0xd4] ss:$24 sps:$4 sm:$0xff]  }
  0x45   :  { %2346 = vst [vmem:[#allocation12_spill] sm:$0xff] %v1942_v61  ;;  %867 = vmatpush1.bf16.msra.mxu1 %v1948_v62  ;;  %2349 = vst [vmem:[#allocation15_spill] sm:$0xff] %v1978_v59 }
  0x47   :  { %882 = vmatpush1.bf16.msra.mxu0 %v1917_v63  ;;  %v1960_v63 = vld [vmem:[%s2315_s1 + $0x2dc] ss:$24 sps:$4 sm:$0xff]  }
  0x48   :  { %883 = vmatprep.subr.bf16.mxu0 %v1929_v1  ;;  %v1972_v1 = vld [vmem:[%s2315_s1 + $0x2d8] ss:$24 sps:$4 sm:$0xff]   ;;  %868 = vmatprep.subr.bf16.mxu1 %v1960_v63 }
  0x49   :  { %869 = vmatpush1.bf16.msra.mxu1 %v1972_v1 }
  0x4a   :  { %1043 = vmatprep.subr.bf16.mxu1 %v1545_v0  ;;  %v2014_v0 = vld [vmem:[%s2315_s1 + $0x130] ss:$24 sps:$4 sm:$0xff]  }
  0x4b   :  { %884 = vmatpush1.bf16.msra.mxu0 %v1942_v61  ;;  %v1985_v61 = vld [vmem:[%s2315_s1 + $0xd0] ss:$24 sps:$4 sm:$0xff]  }
  0x4c   :  { %885 = vmatprep.subr.bf16.mxu0 %v1954_v57  ;;  %v1992_v57 = vld [vmem:[%s2315_s1 + $0x104] ss:$24 sps:$4 sm:$0xff]   ;;  %871 = vmatmul.mubr.bf16.vlgmr.msra.gmra.mrb[0].mxu1 %v2345_v60 }
  0x4d   :  { %1044 = vmatpush1.bf16.msra.mxu1 %v1552_v2  ;;  %v2021_v2 = vld [vmem:[%s2315_s1 + $0x164] ss:$24 sps:$4 sm:$0xff]  }
  0x4e   :  { %1045 = vmatprep.subr.bf16.mxu1 %v1558_v3  ;;  %v2028_v3 = vld [vmem:[%s2315_s1 + $0x160] ss:$24 sps:$4 sm:$0xff]  }
  0x4f   :  { %886 = vmatpush1.bf16.msra.mxu0 %v1966_v58  ;;  %v2000_v58 = vld [vmem:[%s2315_s1 + $0x100] ss:$24 sps:$4 sm:$0xff]  }
  0x50   :  { %887 = vmatprep.subr.bf16.mxu0 %v1978_v59  ;;  %v2007_v59 = vld [vmem:[%s2315_s1 + $0x134] ss:$24 sps:$4 sm:$0xff]  }
  0x51   :  { %1046 = vmatpush1.bf16.msra.mxu1 %v1564_v4  ;;  %v2035_v4 = vld [vmem:[%s2315_s1 + $0x194] ss:$24 sps:$4 sm:$0xff]  }
  0x52   :  { %1047 = vmatprep.subr.bf16.mxu1 %v1570_v5  ;;  %v2042_v5 = vld [vmem:[%s2315_s1 + $0x190] ss:$24 sps:$4 sm:$0xff]  }
  0x53   :  { %888 = vmatpush1.bf16.msra.mxu0 %v1985_v61 }
  0x54   :  { %889 = vmatprep.subr.bf16.mxu0 %v1992_v57 }
  0x55   :  { %1048 = vmatpush1.bf16.msra.mxu1 %v1576_v6  ;;  %v2049_v6 = vld [vmem:[%s2315_s1 + $0x1c4] ss:$24 sps:$4 sm:$0xff]  }
  0x56   :  { %1049 = vmatprep.subr.bf16.mxu1 %v1582_v7  ;;  %v2056_v7 = vld [vmem:[%s2315_s1 + $0x1c0] ss:$24 sps:$4 sm:$0xff]  }
  0x57   :  { %890 = vmatpush1.bf16.msra.mxu0 %v2000_v58 }
  0x58   :  { %891 = vmatprep.subr.bf16.mxu0 %v2007_v59 }
  0x59   :  { %1050 = vmatpush1.bf16.msra.mxu1 %v1588_v8  ;;  %v2063_v8 = vld [vmem:[%s2315_s1 + $0x1f4] ss:$24 sps:$4 sm:$0xff]  }
  0x5a   :  { %1051 = vmatprep.subr.bf16.mxu1 %v1594_v9  ;;  %v2070_v9 = vld [vmem:[%s2315_s1 + $0x1f0] ss:$24 sps:$4 sm:$0xff]  }
  0x5b   :  { %892 = vmatpush1.bf16.msra.mxu0 %v2014_v0 }
  0x5c   :  { %893 = vmatprep.subr.bf16.mxu0 %v2021_v2 }
  0x5d   :  { %1052 = vmatpush1.bf16.msra.mxu1 %v1600_v10  ;;  %v2077_v10 = vld [vmem:[%s2315_s1 + $0x224] ss:$24 sps:$4 sm:$0xff]  }
  0x5e   :  { %1053 = vmatprep.subr.bf16.mxu1 %v1605_v11  ;;  %v2084_v11 = vld [vmem:[%s2315_s1 + $0x220] ss:$24 sps:$4 sm:$0xff]  }
  0x5f   :  { %894 = vmatpush1.bf16.msra.mxu0 %v2028_v3 }
  0x60   :  { %895 = vmatprep.subr.bf16.mxu0 %v2035_v4 }
  0x61   :  { %1054 = vmatpush1.bf16.msra.mxu1 %v1621_v14  ;;  %v2091_v14 = vld [vmem:[%s2315_s1 + $0x254] ss:$24 sps:$4 sm:$0xff]  }
  0x62   :  { %1055 = vmatprep.subr.bf16.mxu1 %v1640_v17  ;;  %v2098_v17 = vld [vmem:[%s2315_s1 + $0x250] ss:$24 sps:$4 sm:$0xff]  }
  0x63   :  { %896 = vmatpush1.bf16.msra.mxu0 %v2042_v5 }
  0x64   :  { %897 = vmatprep.subr.bf16.mxu0 %v2049_v6 }
  0x65   :  { %1056 = vmatpush1.bf16.msra.mxu1 %v1646_v18  ;;  %v2105_v18 = vld [vmem:[%s2315_s1 + $0x284] ss:$24 sps:$4 sm:$0xff]  }
  0x66   :  { %1057 = vmatprep.subr.bf16.mxu1 %v1657_v20  ;;  %v2112_v20 = vld [vmem:[%s2315_s1 + $0x280] ss:$24 sps:$4 sm:$0xff]  }
  0x67   :  { %898 = vmatpush1.bf16.msra.mxu0 %v2056_v7 }
  0x68   :  { %899 = vmatprep.subr.bf16.mxu0 %v2063_v8 }
  0x69   :  { %1058 = vmatpush1.bf16.msra.mxu1 %v1675_v23  ;;  %v2119_v23 = vld [vmem:[%s2315_s1 + $0x2b4] ss:$24 sps:$4 sm:$0xff]  }
  0x6a   :  { %1059 = vmatprep.subr.bf16.mxu1 %v1681_v24  ;;  %v2126_v24 = vld [vmem:[%s2315_s1 + $0x2b0] ss:$24 sps:$4 sm:$0xff]  }
  0x6b   :  { %900 = vmatpush1.bf16.msra.mxu0 %v2070_v9 }
  0x6c   :  { %901 = vmatprep.subr.bf16.mxu0 %v2077_v10 }
  0x6d   :  { %1060 = vmatpush1.bf16.msra.mxu1 %v1699_v27  ;;  %v2133_v27 = vld [vmem:[%s2315_s1 + $0x2e4] ss:$24 sps:$4 sm:$0xff]  }
  0x6e   :  { %1061 = vmatprep.subr.bf16.mxu1 %v1705_v28  ;;  %v2140_v28 = vld [vmem:[%s2315_s1 + $0x2e0] ss:$24 sps:$4 sm:$0xff]  }
  0x6f   :  { %902 = vmatpush1.bf16.msra.mxu0 %v2084_v11 }
  0x70   :  { %903 = vmatprep.subr.bf16.mxu0 %v2091_v14 }
  0x71   :  { %1062 = vmatpush1.bf16.msra.mxu1 %v1723_v31  ;;  %v1521_v31 = vmov 1983009808  }
  0x72   :  { %1063 = vmatprep.subr.bf16.mxu1 %v1729_v32  ;;  %v218_v32 = vunpack.c.l.s4 %v1521_v31 }
  0x73   :  { %904 = vmatpush1.bf16.msra.mxu0 %v2098_v17 }
  0x74   :  { %905 = vmatprep.subr.bf16.mxu0 %v2105_v18 }
  0x75   :  { %1064 = vmatpush1.bf16.msra.mxu1 %v1747_v35 }
  0x76   :  { %1065 = vmatprep.subr.bf16.mxu1 %v1753_v36 }
  0x77   :  { %906 = vmatpush1.bf16.msra.mxu0 %v2112_v20 }
  0x78   :  { %907 = vmatprep.subr.bf16.mxu0 %v2119_v23 }
  0x79   :  { %1066 = vmatpush1.bf16.msra.mxu1 %v1771_v39 }
  0x7a   :  { %1067 = vmatprep.subr.bf16.mxu1 %v1777_v40  ;;  %v196_v40 = vld [vmem:[%s2316_s2] sm:$0x3f] }
  0x7b   :  { %908 = vmatpush1.bf16.msra.mxu0 %v2126_v24 }
  0x7c   :  { %909 = vmatprep.subr.bf16.mxu0 %v2133_v27 }
  0x7d   :  { %1068 = vmatpush1.bf16.msra.mxu1 %v1795_v43 }
  0x7e   :  { %1069 = vmatprep.subr.bf16.mxu1 %v1801_v44  ;;  %v197_v44 = vld [vmem:[%s2317_s0] sm:$0xff] }
  0x7f   :  { %910 = vmatpush1.bf16.msra.mxu0 %v2140_v28 }
  0x80   :  { %1084 = vmatprep.subr.bf16.mxu0 %v1611_v12  ;;  %v2350_v12 = vld [vmem:[#allocation2_spill] sm:$0xff] }
  0x81   :  { %1070 = vmatpush1.bf16.msra.mxu1 %v1819_v47 }
  0x82   :  { %912 = vmatmul.mubr.bf16.vlgmr.msra.gmra.mrb[4].mxu0 %v2345_v60  ;;  %1071 = vmatprep.subr.bf16.mxu1 %v1825_v48 }
  0x83   :  { %1085 = vmatpush1.bf16.msra.mxu0 %v1616_v13  ;;  %v2351_v13 = vld [vmem:[#allocation3_spill] sm:$0xff] }
  0x84   :  { %1086 = vmatprep.subr.bf16.mxu0 %v1629_v15  ;;  %v2352_v15 = vld [vmem:[#allocation5_spill] sm:$0xff] }
  0x85   :  { %1072 = vmatpush1.bf16.msra.mxu1 %v1843_v51 }
  0x86   :  { %1073 = vmatprep.subr.bf16.mxu1 %v1849_v52 }
  0x87   :  { %1087 = vmatpush1.bf16.msra.mxu0 %v1634_v16  ;;  %v2353_v16 = vld [vmem:[#allocation7_spill] sm:$0xff] }
  0x88   :  { %1088 = vmatprep.subr.bf16.mxu0 %v1651_v19  ;;  %v2354_v19 = vld [vmem:[#allocation9_spill] sm:$0xff] }
  0x89   :  { %1074 = vmatpush1.bf16.msra.mxu1 %v1867_v55 }
  0x8a   :  { %1125 = vmatprep.subr.bf16.mxu1 %v1873_v56  ;;  %v216_v56 = vcombine.high %v197_v44, %v197_v44 }
  0x8b   :  { %1089 = vmatpush1.bf16.msra.mxu0 %v1663_v21  ;;  %v2355_v21 = vld [vmem:[#allocation11_spill] sm:$0xff] }
  0x8c   :  { %1090 = vmatprep.subr.bf16.mxu0 %v1670_v22 }
  0x8f   :  { %1091 = vmatpush1.bf16.msra.mxu0 %v1687_v25 }
  0x90   :  { %1092 = vmatprep.subr.bf16.mxu0 %v1694_v26 }
  0x93   :  { %1093 = vmatpush1.bf16.msra.mxu0 %v1711_v29 }
  0x94   :  { %1094 = vmatprep.subr.bf16.mxu0 %v1718_v30  ;;  %v220_v30 = vlaneseq }
  0x97   :  { %1095 = vmatpush1.bf16.msra.mxu0 %v1735_v33  ;;  %v221_v33 = vshrl.u32 %v220_v30, 7 }
  0x98   :  { %1096 = vmatprep.subr.bf16.mxu0 %v1742_v34  ;;  %v219_v34 = vunpack.c.0.s8 %v218_v32 }
  0x99   :  { %v297_v51 = vsub.s32 2, %v221_v33 }
  0x9b   :  { %1097 = vmatpush1.bf16.msra.mxu0 %v1759_v37  ;;  %v2211_v60 = vrot.slane %v196_v40, %v297_v51 }
  0x9c   :  { %1098 = vmatprep.subr.bf16.mxu0 %v1766_v38  ;;  %v289_v38 = vsub.s32 0, %v221_v33 }
  0x9e   :  { %v2195_v43 = vrot.slane %v196_v40, %v289_v38  ;;  %v309_v38 = vsub.s32 5, %v221_v33 }
  0x9f   :  { %1099 = vmatpush1.bf16.msra.mxu0 %v1783_v41  ;;  %v222_v41 = vsub.s32 %v219_v34, %v221_v33 }
  0xa0   :  { %1100 = vmatprep.subr.bf16.mxu0 %v1790_v42  ;;  %v1218_v42 = vld [vmem:[%s2317_s0 + $0xc] sm:$0xff] }
  0xa1   :  { %v2204_v47 = vrot.slane %v197_v44, %v222_v41  ;;  %v249_v52 = vcombine.high %v1218_v42, %v1218_v42  ;;  %v2231_v44 = vld.sshfl [vmem:[%s2317_s0 + $0x14] sm:$0x33 pattern:$0x76325410] }
  0xa3   :  { %1101 = vmatpush1.bf16.msra.mxu0 %v1807_v45  ;;  %v2200_v45 = vrot.slane %v1218_v42, %v222_v41  ;;  %v2226_v42 = vrot.slane %v196_v40, %v309_v38 }
  0xa4   :  { %1102 = vmatprep.subr.bf16.mxu0 %v1814_v46 }
  0xa7   :  { %1103 = vmatpush1.bf16.msra.mxu0 %v1831_v49  ;;  %v264_v49 = vcombine.high %v2200_v45, %v2200_v45 }
  0xa8   :  { %1104 = vmatprep.subr.bf16.mxu0 %v1838_v50 }
  0xab   :  { %1105 = vmatpush1.bf16.msra.mxu0 %v1855_v53  ;;  %v301_v53 = vsub.s32 3, %v221_v33 }
  0xac   :  { %1106 = vmatprep.subr.bf16.mxu0 %v1862_v54 }
  0xaf   :  { %1107 = vmatpush1.bf16.msra.mxu0 %v2350_v12 }
  0xb0   :  { %1108 = vmatprep.subr.bf16.mxu0 %v2351_v13 }
  0xb3   :  { %1109 = vmatpush1.bf16.msra.mxu0 %v2352_v15  ;;  %v2217_v15 = vrot.slane %v216_v56, %v222_v41 }
  0xb4   :  { %1110 = vmatprep.subr.bf16.mxu0 %v2353_v16 }
  0xb7   :  { %1111 = vmatpush1.bf16.msra.mxu0 %v2354_v19 }
  0xb8   :  { %1112 = vmatprep.subr.bf16.mxu0 %v2355_v21 }
  0xbb   :  { %1113 = vmatpush1.bf16.msra.mxu0 %v1948_v62  ;;  %v2213_v62 = vrot.slane %v249_v52, %v222_v41 }
  0xbc   :  { %1114 = vmatprep.subr.bf16.mxu0 %v1960_v63  ;;  %v2215_v63 = vrot.slane %v196_v40, %v301_v53 }
  0xbd   :  { %v265_v19 = vcombine.high %v2213_v62, %v2213_v62 }
  0xbf   :  { %1115 = vmatpush1.bf16.msra.mxu0 %v1972_v1  ;;  %v293_v1 = vsub.s32 1, %v221_v33 }
  0xc1   :  { %v2202_v46 = vrot.slane %v196_v40, %v293_v1 }
 0x115   :  { %v831_v22 = vpop.f32.mrb[0].mxu0 }
 0x116   :  { %v833_v25 = vpop.f32.mrb[1].mxu0  ;;  %v832_v48 = vadd.f32 %v831_v22, %v2195_v43 }
 0x117   :  { %v835_v26 = vpop.f32.mrb[2].mxu0  ;;  %v834_v50 = vadd.f32 %v833_v25, %v2202_v46 }
 0x118   :  { %v836_v29 = vpop.f32.mrb[3].mxu0  ;;  %v920_v54 = vadd.f32 %v832_v48, %v2204_v47 }
 0x119   :  { %v921_v55 = vadd.f32 %v834_v50, %v264_v49 }
 0x11a   :  { %v1318_v12 = vmul.f32 -1.442695, %v920_v54 }
 0x11b   :  { %v1319_v13 = vmul.f32 -1.442695, %v921_v55 }
 0x11c   :  { %1480 = vpow2.f32 %v1318_v12 }
 0x11d   :  { %1482 = vpow2.f32 %v1319_v13 }
 0x11f   :  { %v872_v35 = vpop.f32.mrb[0].mxu1 }
 0x120   :  { %v874_v36 = vpop.f32.mrb[1].mxu1  ;;  %v873_v16 = vadd.f32 %v872_v35, %v2211_v60  ;;  %v305_v35 = vsub.s32 4, %v221_v33  ;;  %v2237_v33 = vld.sshfl [vmem:[%s2317_s0 + $0x8] sm:$0x33 pattern:$0x76325410] }
 0x121   :  { %v876_v37 = vpop.f32.mrb[2].mxu1  ;;  %v875_v21 = vadd.f32 %v874_v36, %v2215_v63 }
 0x122   :  { %v877_v39 = vpop.f32.mrb[3].mxu1  ;;  %v922_v22 = vadd.f32 %v873_v16, %v2217_v15  ;;  %v2224_v41 = vrot.slane %v196_v40, %v305_v35  ;;  %v273_v40 = vcombine.high %v2231_v44, %v2231_v44 }
 0x123   :  { %v923_v25 = vadd.f32 %v875_v21, %v265_v19 }
 0x124   :  { %v1320_v26 = vmul.f32 -1.442695, %v922_v22 }
 0x125   :  { %v1321_v29 = vmul.f32 -1.442695, %v923_v25 }
 0x126   :  { %1484 = vpow2.f32 %v1320_v26  ;;  %v1481_v30 = vpop.eup %1480 }
 0x127   :  { %1486 = vpow2.f32 %v1321_v29  ;;  %v1483_v31 = vpop.eup %1482  ;;  %v936_v32 = vadd.f32 1.0, %v1481_v30 }
 0x128   :  { %v937_v34 = vadd.f32 1.0, %v1483_v31 }
 0x129   :  { %1488 = vrcp.f32 %v936_v32 }
 0x12a   :  { %1490 = vrcp.f32 %v937_v34 }
 0x130   :  { %v1485_v37 = vpop.eup %1484 }
 0x131   :  { %v1487_v39 = vpop.eup %1486  ;;  %v938_v36 = vadd.f32 1.0, %v1485_v37 }
 0x132   :  { %v939_v1 = vadd.f32 1.0, %v1487_v39 }
 0x133   :  { %1492 = vrcp.f32 %v938_v36  ;;  %v1489_v51 = vpop.eup %1488  ;;  %v2356_v36 = vld [vmem:[#allocation4_spill] sm:$0xff] }
 0x134   :  { %1494 = vrcp.f32 %v939_v1  ;;  %v1491_v54 = vpop.eup %1490  ;;  %v2357_v1 = vld [vmem:[#allocation6_spill] sm:$0xff] }
 0x13d   :  { %v1493_v19 = vpop.eup %1492 }
 0x13e   :  { %v1495_v21 = vpop.eup %1494  ;;  %v954_v22 = vsub.f32 1.0, %v1493_v19  ;;  %v958_v31 = vmul.f32 0.0, %v1493_v19 }
 0x13f   :  { %v955_v25 = vsub.f32 1.0, %v1495_v21  ;;  %v959_v34 = vmul.f32 0.0, %v1495_v21 }
 0x155   :  { %v913_v48 = vpop.f32.mrb[4].mxu0 }
 0x156   :  { %v914_v49 = vadd.f32 %v913_v48, %v2224_v41  ;;  %v915_v50 = vpop.f32.mrb[5].mxu0  ;;  %v2358_v48 = vld [vmem:[#allocation8_spill] sm:$0xff] }
 0x157   :  { %v916_v52 = vadd.f32 %v915_v50, %v2226_v42  ;;  %v917_v53 = vpop.f32.mrb[6].mxu0  ;;  %v2360_v50 = vld [vmem:[#allocation12_spill] sm:$0xff] }
 0x158   :  { %v948_v55 = vmul.f32 %v1489_v51, %v914_v49  ;;  %v918_v56 = vpop.f32.mrb[7].mxu0  ;;  %v2359_v49 = vld [vmem:[#allocation10_spill] sm:$0xff]  ;;  %v2361_v51 = vld [vmem:[#allocation13_spill] sm:$0xff] }
 0x159   :  { %v949_v12 = vmul.f32 %v1491_v54, %v916_v52  ;;  %v2363_v52 = vld [vmem:[#allocation15_spill] sm:$0xff] }
 0x15a   :  { %v950_v13 = vadd.f32 %v2237_v33, %v948_v55 }
 0x15b   :  { %v951_v16 = vadd.f32 %v949_v12, %v273_v40  ;;  %v2362_v40 = vld [vmem:[#allocation14_spill] sm:$0xff] }
 0x15c   :  { %1496 = vtanh.f32 %v950_v13 }
 0x15d   :  { %1498 = vtanh.f32 %v951_v16 }
 0x166   :  { %v1497_v26 = vpop.eup %1496 }
 0x167   :  { %v1499_v29 = vpop.eup %1498  ;;  %v956_v30 = vmul.f32 %v1497_v26, %v954_v22 }
 0x168   :  { %v957_v32 = vmul.f32 %v1499_v29, %v955_v25 }
 0x169   :  { %v960_v35 = vadd.f32 %v958_v31, %v956_v30 }
 0x16a   :  { %v961_v37 = vadd.f32 %v959_v34, %v957_v32 }
 0x16b   :  { %v2243_v38 = vpack.c.bf16 %v960_v35, %v960_v35 }
 0x16c   :  { %v2245_v39 = vpack.c.bf16 %v961_v37, %v961_v37 }
 0x16d   :  { %964 = vst [vmem:[%s2318_s3] sm:$0x1] %v2243_v38  ;;  %v1204_v34 = vunpack.c.l.bf16 %v2243_v38 }
 0x16e   :  { %1322 = vst [vmem:[%s2318_s3 + $0x3] sm:$0x1] %v2245_v39  ;;  %1075 = vmatprep.mubr.bf16.mxu1 %v2245_v39  ;;  %1116 = vmatprep.mubr.bf16.mxu0 %v2245_v39 }
 0x16f   :  { %1076 = vmatmul.mubr.bf16.vlgmr.msra.gmra.mrb[4].mxu1 %v2243_v38  ;;  %1117 = vmatmul.mubr.bf16.vlgmr.msra.gmra.mrb[8].mxu0 %v2243_v38 }
 0x170   :  { %1126 = vmatpush1.bf16.msra.mxu1 %v2356_v36  ;;  %1157 = vmatprep.mubr.bf16.mxu1 %v2245_v39 }
 0x171   :  { %1127 = vmatprep.subr.bf16.mxu1 %v2357_v1 }
 0x174   :  { %1128 = vmatpush1.bf16.msra.mxu1 %v2358_v48 }
 0x175   :  { %1129 = vmatprep.subr.bf16.mxu1 %v2359_v49 }
 0x178   :  { %1130 = vmatpush1.bf16.msra.mxu1 %v2360_v50 }
 0x179   :  { %1131 = vmatprep.subr.bf16.mxu1 %v2361_v51 }
 0x17c   :  { %1132 = vmatpush1.bf16.msra.mxu1 %v2362_v40 }
 0x17d   :  { %1133 = vmatprep.subr.bf16.mxu1 %v2363_v52 }
 0x180   :  { %1134 = vmatpush1.bf16.msra.mxu1 %v1985_v61 }
 0x181   :  { %1135 = vmatprep.subr.bf16.mxu1 %v1992_v57 }
 0x184   :  { %1136 = vmatpush1.bf16.msra.mxu1 %v2000_v58 }
 0x185   :  { %1137 = vmatprep.subr.bf16.mxu1 %v2007_v59  ;;  %v1022_v59 = vcombine.high %v2217_v15, %v2217_v15 }
 0x188   :  { %1138 = vmatpush1.bf16.msra.mxu1 %v2014_v0 }
 0x189   :  { %1139 = vmatprep.subr.bf16.mxu1 %v2021_v2 }
 0x18c   :  { %1140 = vmatpush1.bf16.msra.mxu1 %v2028_v3 }
 0x18d   :  { %1141 = vmatprep.subr.bf16.mxu1 %v2035_v4 }
 0x190   :  { %1142 = vmatpush1.bf16.msra.mxu1 %v2042_v5 }
 0x191   :  { %1143 = vmatprep.subr.bf16.mxu1 %v2049_v6 }
 0x194   :  { %1144 = vmatpush1.bf16.msra.mxu1 %v2056_v7 }
 0x195   :  { %1145 = vmatprep.subr.bf16.mxu1 %v2063_v8 }
 0x198   :  { %1146 = vmatpush1.bf16.msra.mxu1 %v2070_v9 }
 0x199   :  { %1147 = vmatprep.subr.bf16.mxu1 %v2077_v10 }
 0x19c   :  { %1148 = vmatpush1.bf16.msra.mxu1 %v2084_v11 }
 0x19d   :  { %1149 = vmatprep.subr.bf16.mxu1 %v2091_v14  ;;  %v1021_v14 = vcombine.high %v2204_v47, %v2204_v47 }
 0x1a0   :  { %1150 = vmatpush1.bf16.msra.mxu1 %v2098_v17 }
 0x1a1   :  { %1151 = vmatprep.subr.bf16.mxu1 %v2105_v18 }
 0x1a4   :  { %1152 = vmatpush1.bf16.msra.mxu1 %v2112_v20 }
 0x1a5   :  { %1153 = vmatprep.subr.bf16.mxu1 %v2119_v23  ;;  %v1205_v23 = vunpack.c.l.bf16 %v2245_v39 }
 0x1a8   :  { %1154 = vmatpush1.bf16.msra.mxu1 %v2126_v24 }
 0x1a9   :  { %1155 = vmatprep.subr.bf16.mxu1 %v2133_v27 }
 0x1ac   :  { %1156 = vmatpush1.bf16.msra.mxu1 %v2140_v28 }
 0x1af   :  { %1158 = vmatmul.mubr.bf16.vlgmr.msra.gmra.mrb[8].mxu1 %v2243_v38 }
 0x242   :  { %v1077_v57 = vpop.f32.mrb[4].mxu1  ;;  %v1118_v58 = vpop.f32.mrb[8].mxu0 }
 0x243   :  { %v1079_v61 = vpop.f32.mrb[5].mxu1  ;;  %v1120_v0 = vpop.f32.mrb[9].mxu0  ;;  %v1078_v11 = vadd.f32 %v1077_v57, %v2195_v43  ;;  %v1119_v15 = vadd.f32 %v1118_v58, %v2211_v60  ;;  %v1030_v60 = vcombine.high %v2237_v33, %v2237_v33 }
 0x244   :  { %v1121_v2 = vadd.f32 %v1120_v0, %v2215_v63  ;;  %v1081_v3 = vpop.f32.mrb[6].mxu1  ;;  %v1122_v4 = vpop.f32.mrb[10].mxu0  ;;  %v1080_v17 = vadd.f32 %v1079_v61, %v2202_v46 }
 0x245   :  { %v1082_v5 = vpop.f32.mrb[7].mxu1  ;;  %v1123_v6 = vpop.f32.mrb[11].mxu0  ;;  %v1166_v18 = vadd.f32 %v1078_v11, %v2200_v45  ;;  %v1168_v43 = vadd.f32 %v1119_v15, %v2213_v62 }
 0x246   :  { %v1169_v7 = vadd.f32 %v1121_v2, %v1022_v59  ;;  %v1167_v20 = vadd.f32 %v1080_v17, %v1021_v14 }
 0x247   :  { %v1327_v28 = vmul.f32 -1.442695, %v1166_v18  ;;  %v1329_v53 = vmul.f32 -1.442695, %v1168_v43 }
 0x248   :  { %v1330_v8 = vmul.f32 -1.442695, %v1169_v7  ;;  %v1328_v63 = vmul.f32 -1.442695, %v1167_v20 }
 0x24a   :  { %1500 = vpow2.f32 %v1330_v8 }
 0x254   :  { %v1501_v9 = vpop.eup %1500 }
 0x255   :  { %v1185_v10 = vadd.f32 1.0, %v1501_v9 }
 0x257   :  { %1502 = vrcp.f32 %v1185_v10 }
 0x258   :  { %1504 = vpow2.f32 %v1327_v28 }
 0x259   :  { %1506 = vpow2.f32 %v1328_v63 }
 0x25a   :  { %1508 = vpow2.f32 %v1329_v53 }
 0x261   :  { %v1503_v24 = vpop.eup %1502 }
 0x262   :  { %v1207_v27 = vmul.f32 %v1503_v24, %v1205_v23  ;;  %v1505_v54 = vpop.eup %1504  ;;  %v1201_v37 = vsub.f32 1.0, %v1503_v24 }
 0x263   :  { %v1507_v47 = vpop.eup %1506  ;;  %v1182_v46 = vadd.f32 1.0, %v1505_v54 }
 0x264   :  { %v1183_v55 = vadd.f32 1.0, %v1507_v47  ;;  %v1509_v45 = vpop.eup %1508 }
 0x265   :  { %1510 = vrcp.f32 %v1182_v46  ;;  %v1184_v56 = vadd.f32 1.0, %v1509_v45 }
 0x266   :  { %1512 = vrcp.f32 %v1183_v55 }
 0x267   :  { %1514 = vrcp.f32 %v1184_v56 }
 0x26f   :  { %v1511_v19 = vpop.eup %1510 }
 0x270   :  { %v1513_v22 = vpop.eup %1512 }
 0x271   :  { %v1515_v32 = vpop.eup %1514 }
 0x272   :  { %v1206_v39 = vmul.f32 %v1515_v32, %v1204_v34 }
 0x282   :  { %v1159_v12 = vpop.f32.mrb[8].mxu1 }
 0x283   :  { %v1160_v13 = vadd.f32 %v1159_v12, %v2224_v41  ;;  %v1161_v16 = vpop.f32.mrb[9].mxu1  ;;  %v1200_v41 = vsub.f32 1.0, %v1515_v32 }
 0x284   :  { %v1162_v62 = vadd.f32 %v1161_v16, %v2226_v42  ;;  %v1163_v21 = vpop.f32.mrb[10].mxu1 }
 0x285   :  { %v1194_v25 = vmul.f32 %v1511_v19, %v1160_v13  ;;  %v1164_v26 = vpop.f32.mrb[11].mxu1 }
 0x286   :  { %v1195_v29 = vmul.f32 %v1513_v22, %v1162_v62 }
 0x287   :  { %v1196_v30 = vadd.f32 %v2231_v44, %v1194_v25 }
 0x288   :  { %v1197_v31 = vadd.f32 %v1195_v29, %v1030_v60 }
 0x289   :  { %1516 = vtanh.f32 %v1196_v30 }
 0x28a   :  { %1518 = vtanh.f32 %v1197_v31 }
 0x293   :  { %v1517_v35 = vpop.eup %1516 }
 0x294   :  { %v1519_v33 = vpop.eup %1518  ;;  %v1202_v42 = vmul.f32 %v1517_v35, %v1200_v41 }
 0x295   :  { %v1203_v36 = vmul.f32 %v1519_v33, %v1201_v37 }
 0x296   :  { %v1208_v1 = vadd.f32 %v1206_v39, %v1202_v42 }
 0x297   :  { %v1209_v48 = vadd.f32 %v1207_v27, %v1203_v36 }
 0x298   :  { %v1210_v49 = vpack.c.bf16 %v1208_v1, %v1208_v1 }
 0x299   :  { %v1211_v50 = vpack.c.bf16 %v1209_v48, %v1209_v48 }
 0x29a   :  { %1331 = vst [vmem:[%s2318_s3 + $0x2] sm:$0x1] %v1210_v49 }
 0x29b   :  { %1213 = vst [vmem:[%s2318_s3 + $0x1] sm:$0x1] %v1211_v50 }

// kernel: crnn_forward.15
= control target key start
LH: loop header
LB: loop body
LE: loop exit
PB: predicated region body
PF: predicated region fallthrough
CT: control target
= control target key end

     0   :  { %v434_v2 = vmov 0.0   ;;  %v74_v10 = vlaneseq  ;;  %v435_v15 = vmov 1966171168   ;;  %s549_s0 = inlined_call_operand.vmem [shape: bf16[2,256], index: 0, kind: input, shape index: {}]   ;;  %s550_s1 = inlined_call_operand.vmem [shape: bf16[256,64], index: 1, kind: input, shape index: {}]   ;;  %s551_s2 = inlined_call_operand.vmem [shape: f32[1,64], index: 2, kind: input, shape index: {}]   ;;  %s552_s3 = inlined_call_operand.vmem [shape: bf16[64,10], index: 3, kind: input, shape index: {}]   ;;  %s553_s4 = inlined_call_operand.vmem [shape: f32[1,10], index: 4, kind: input, shape index: {}]   ;;  %s554_s5 = inlined_call_operand.hbm [shape: f32[2,10], index: 5, kind: output, shape index: {}]  }
   0x1   :  { %v390_v0 = vld [vmem:[%s550_s1 + $0x40] sm:$0xff]   ;;  %374 = vmatprep.subr.bf16.mxu1 %v434_v2  ;;  %v392_v3 = vld [vmem:[%s550_s1 + $0x48] sm:$0xff]   ;;  %v394_v5 = vld [vmem:[%s550_s1 + $0x50] sm:$0xff]   ;;  %v72_v16 = vunpack.c.l.s4 %v435_v15 }
   0x2   :  { %v391_v1 = vld [vmem:[%s550_s1] sm:$0xff]   ;;  %347 = vmatprep.subr.bf16.mxu0 %v390_v0  ;;  %v393_v4 = vld [vmem:[%s550_s1 + $0x8] sm:$0xff]   ;;  %v395_v6 = vld [vmem:[%s550_s1 + $0x10] sm:$0xff]   ;;  %v75_v17 = vshrl.u32 %v74_v10, 7 }
   0x3   :  { %348 = vmatpush3.bf16.msra.mxu0 %v391_v1  ;;  %v396_v7 = vld [vmem:[%s550_s1 + $0x58] sm:$0xff]   ;;  %v398_v9 = vld [vmem:[%s550_s1 + $0x60] sm:$0xff]   ;;  %v400_v12 = vld [vmem:[%s550_s1 + $0x68] sm:$0xff]   ;;  %v73_v21 = vunpack.c.0.s8 %v72_v16 }
   0x4   :  { %349 = vmatprep.subr.bf16.mxu0 %v392_v3  ;;  %v397_v8 = vld [vmem:[%s550_s1 + $0x18] sm:$0xff]   ;;  %v399_v11 = vld [vmem:[%s550_s1 + $0x20] sm:$0xff]   ;;  %v401_v14 = vld [vmem:[%s550_s1 + $0x28] sm:$0xff]  }
   0x5   :  { %v324_v13 = vld.sshfl [vmem:[%s549_s0] sm:$0x11 pattern:$0x75316420]  ;;  %v407_v19 = vld [vmem:[%s552_s3 + $0x8] sm:$0xff]   ;;  %v402_v22 = vld [vmem:[%s550_s1 + $0x70] sm:$0xff]  }
   0x6   :  { %v406_v18 = vld [vmem:[%s552_s3] sm:$0xff]   ;;  %v70_v20 = vcombine.high %v324_v13, %v324_v13 }
   0x7   :  { %350 = vmatpush3.bf16.msra.mxu0 %v393_v4  ;;  %375 = vmatpush3.bf16.msra.mxu1 %v406_v18 }
   0x8   :  { %351 = vmatprep.subr.bf16.mxu0 %v394_v5  ;;  %376 = vmatprep.subr.bf16.mxu1 %v434_v2 }
   0xb   :  { %352 = vmatpush3.bf16.msra.mxu0 %v395_v6 }
   0xc   :  { %353 = vmatprep.subr.bf16.mxu0 %v396_v7 }
   0xf   :  { %354 = vmatpush3.bf16.msra.mxu0 %v397_v8 }
  0x10   :  { %355 = vmatprep.subr.bf16.mxu0 %v398_v9 }
  0x13   :  { %356 = vmatpush3.bf16.msra.mxu0 %v399_v11 }
  0x14   :  { %357 = vmatprep.subr.bf16.mxu0 %v400_v12 }
  0x15   :  { %10 = vsyncpa [#allocation3], 0  ;;  %v76_v23 = vsub.s32 %v73_v21, %v75_v17  ;;  %v403_v24 = vld [vmem:[%s550_s1 + $0x30] sm:$0xff]   ;;  %377 = vmatpush3.bf16.msra.mxu1 %v407_v19  ;;  %v404_v26 = vld [vmem:[%s550_s1 + $0x78] sm:$0xff]   ;;  %vm436_vm0 = vmmov 0   ;;  %vm263_vm1 = vcmask 523264  }
  0x16   :  { %378 = vmatprep.subr.bf16.mxu1 %v434_v2  ;;  %v405_v27 = vld [vmem:[%s550_s1 + $0x38] sm:$0xff]   ;;  %v408_v29 = vld [vmem:[%s552_s3 + $0x10] sm:$0xff]   ;;  %382 = vmatprep.mubr.msk.bf16.mxu1 %vm436_vm0, %v434_v2  ;;  %v323_v32 = vld [vmem:[%s551_s2] ss:$0 sm:$0xff]  ;;  %vm307_vm2 = vcmask 74752  }
  0x17   :  { %358 = vmatpush3.bf16.msra.mxu0 %v401_v14  ;;  %v84_v25 = vrot.slane %v70_v20, %v76_v23  ;;  %v77_v28 = vrot.slane %v324_v13, %v76_v23  ;;  %v409_v30 = vld [vmem:[%s552_s3 + $0x18] sm:$0xff]   ;;  %v341_v39 = vld [vmem:[%s553_s4] ss:$0 sm:$0xff]  ;;  %s437_s3 = smov [#allocation2]  }
  0x18   :  { %359 = vmatprep.subr.bf16.mxu0 %v402_v22  ;;  %s315_s12 = sshll.u32 %s437_s3, 4  ;;  %s316_s12 = int_to_ptr.vmem [resolvable:$true] %s315_s12 }
  0x19   :  { %215 = vmatprep.mubr.bf16.mxu0 %v84_v25  ;;  %379 = vmatpush3.bf16.msra.mxu1 %v408_v29  ;;  %s410_s2 = scalar_lea.vmem %s316_s12, 32  ;;  %p415_p1 = scmp.lt.s32.totalorder %s316_s12, %s316_s12 }
  0x1a   :  { %380 = vmatprep.subr.bf16.mxu1 %v434_v2  ;;  %p411_p0 = scmp.ne.s32.totalorder %s316_s12, %s410_s2  ;;  %p416_p2 = scmp.lt.s32.totalorder %s410_s2, %s410_s2 }
  0x1b   :  { %360 = vmatpush3.bf16.msra.mxu0 %v403_v24 }
  0x1c   :  { %361 = vmatprep.subr.bf16.mxu0 %v404_v26  ;;  %p417_p3 = por %p416_p2, %p415_p1 }
  0x1d   :  { %381 = vmatpush3.bf16.msra.mxu1 %v409_v30 }
  0x1e   :  { %p418_p4 = pnand %p417_p3, %p411_p0 }
  0x1f   :  { %362 = vmatpush3.bf16.msra.mxu0 %v405_v27 }
  0x22   :  { %216 = vmatmul.mubr.bf16.vlgmr.msra.gmra.mrb[0].mxu0 %v77_v28 }
  0xf5   :  { %v363_v31 = vpop.f32.mrb[0].mxu0 }
  0xf6   :  { %v364_v33 = vpop.f32.mrb[1].mxu0 }
  0xf7   :  { %v365_v34 = vadd.f32 %v364_v33, %v363_v31  ;;  %v366_v35 = vpop.f32.mrb[2].mxu0 }
  0xf8   :  { %v367_v36 = vpop.f32.mrb[3].mxu0 }
  0xf9   :  { %v218_v37 = vadd.f32 %v365_v34, %v323_v32 }
  0xfb   :  { %v223_v38 = vpack.c.bf16 %v218_v37, %v218_v37 }
  0xfd   :  { %383 = vmatmul.mubr.msk.bf16.vlgmr.msra.gmra.mrb[0].mxu1 %vm263_vm1, %v223_v38 }
 0x1d0   :  { %v301_v40 = vpop.f32.mrb[0].mxu1 }
 0x1d1   :  { %v302_v41 = vadd.f32 %v341_v39, %v301_v40  ;;  %v384_v42 = vpop.f32.mrb[1].mxu1 }
 0x1d2   :  { %v304_v43 = vpop.f32.mrb[2].mxu1 }
 0x1d3   :  { %v385_v44 = vpop.f32.mrb[3].mxu1  ;;  %308 = vst.msk [vmem:[#allocation2] sm:$0x3] %vm307_vm2, %v302_v41 }
 0x1d4   :  { %421 = shalt.err (!%p418_p4)
}
 0x1d5   :  { %s422_s4 = scalar_lea.hbm %s554_s5, 32 }
 0x1d6   :  { %p423_p5 = scmp.ne.s32.totalorder %s554_s5, %s422_s4  ;;  %p426_p6 = scmp.lt.u32.totalorder %s422_s4, %s554_s5 }
 0x1d8   :  { %p428_p7 = pnand %p426_p6, %p423_p5 }
 0x1da   :  { %431 = shalt.err (!%p428_p7)
}
 0x1db   :  { %318 = dma.vmem_to_hbm [thread:$0]  %s316_s12, 32, %s554_s5, [#allocation3]  }
 0x1dc   :  { %432 = dma.done.wait [#allocation3], 32  }
 0x1dd   :  { %433 = vsyncadd [#allocation3], 4294967264 }
 0x1de   :  { %322 = vsyncpa [#allocation3], 1 }

</bundles_post_ra>
